<compile_context>
chip_gen: v6e
topology: v6e:2x2x1
jax: 0.10.0
libtpu: 0.0.40
codegen_flags: <defaults>
</compile_context>

<pallas_src>
import functools
import math

import jax
import jax.numpy as jnp
from jax import lax
from jax.experimental import pallas as pl
from jax.experimental.pallas import tpu as pltpu

LN_EPS = 1e-5
GN_EPS = 1e-5
VMEM_SPEC = pl.BlockSpec(memory_space=pltpu.MemorySpace.VMEM)


# ----------------------------------------------------------------------------
# In-kernel math helpers
# ----------------------------------------------------------------------------
def _gelu(x):
    # tanh-form GELU: the transcendental lands on the EUP slot.
    c = 0.7978845608028654  # sqrt(2/pi)
    return 0.5 * x * (1.0 + jnp.tanh(c * (x + 0.044715 * x * x * x)))


def _ln_lanes(x, gamma, beta):
    mu = jnp.mean(x, axis=-1, keepdims=True)
    d = x - mu
    var = jnp.mean(d * d, axis=-1, keepdims=True)
    return d * lax.rsqrt(var + LN_EPS) * gamma + beta


def _bf16(x):
    # cast immediately at the dot operand; surrounding math stays f32 (v5e).
    return x.astype(jnp.bfloat16)


def _vmem_limit(nbytes):
    # derived from actual operand bytes + headroom, capped at v7x physical VMEM
    return int(min(max(4 * nbytes + (8 << 20), 16 << 20), 64 << 20))


# ----------------------------------------------------------------------------
# Kernel A: fused token path
#   pos-emb + n_blocks x (mixer_block1 + mixer_block2) + backbone_linear
#   + clip projector + blin1 + GroupNorm(1, 64)
# ----------------------------------------------------------------------------
def _token_path_kernel(x_ref, pe_ref,
                       g1_ref, be1_ref, w1a_ref, b1a_ref, w1b_ref, b1b_ref,
                       g2_ref, be2_ref, w2a_ref, b2a_ref, w2b_ref, b2b_ref,
                       bbw_ref, bbb_ref,
                       cg_ref, cbe_ref, cw_ref, cb_ref,
                       blw_ref, blb_ref, bng_ref, bnb_ref,
                       backbone_ref, c_ref, bmap_ref):
    n_blocks = w1a_ref.shape[0]
    S = bbw_ref.shape[0]
    H = x_ref.shape[1]
    BS = x_ref.shape[0]
    B = BS // S
    out_dim = bbw_ref.shape[2]
    clip = cw_ref.shape[1]
    nb = out_dim // clip

    x = x_ref[...] + pe_ref[...]        # (B*S, H), row b*S+s <-> token (b, s)
    r1 = x                              # residual1 (post-block1 layout)
    r2 = x                              # residual2 (the torch permute is only a view)

    for blk in range(n_blocks):
        # -- mixer_block1: LN(H) -> Linear(H,H) -> GELU -> Linear(H,H); +res1
        #    bf16 operands, f32 accumulation on the MXU.
        xn = _ln_lanes(x, g1_ref[blk], be1_ref[blk])
        h = _gelu(jnp.dot(_bf16(xn), w1a_ref[blk],
                          preferred_element_type=jnp.float32) + b1a_ref[blk])
        h = jnp.dot(_bf16(h), w1b_ref[blk],
                    preferred_element_type=jnp.float32) + b1b_ref[blk]
        x = h + r1
        r1 = x

        # -- mixer_block2 (permute -> LN(S) -> MLP(S) -> permute): per-sample
        #    (S, H) tile, LN as a sublane reduction, dense (S,S) dots.
        w2a = w2a_ref[blk]
        b2a = b2a_ref[blk]
        w2b = w2b_ref[blk]
        b2b = b2b_ref[blk]
        g2 = g2_ref[blk]
        be2 = be2_ref[blk]
        pieces = []
        for b in range(B):
            t = x[b * S:(b + 1) * S, :]                      # (S, H)
            mu = jnp.mean(t, axis=0, keepdims=True)          # per-column stats over S
            d = t - mu
            var = jnp.mean(d * d, axis=0, keepdims=True)
            tn = d * lax.rsqrt(var + LN_EPS) * g2 + be2      # gamma/beta along S
            hh = _gelu(jnp.dot(w2a, tn, preferred_element_type=jnp.float32) + b2a)
            hh = jnp.dot(w2b, hh, preferred_element_type=jnp.float32) + b2b
            pieces.append(hh + r2[b * S:(b + 1) * S, :])
        x = jnp.concatenate(pieces, axis=0)
        r2 = x

    # -- heads without flatten: xf @ W == sum_s x[:, s, :] @ W[s]
    #    (weights stored (S, H, out); (B,H) slabs built from static row slices)
    backbone = bbb_ref[...]
    blin = blb_ref[...]
    for s in range(S):
        xs = jnp.concatenate([x[b * S + s:b * S + s + 1, :] for b in range(B)],
                             axis=0)                         # (B, H)
        xs16 = _bf16(xs)
        backbone = backbone + jnp.dot(xs16, bbw_ref[s],
                                      preferred_element_type=jnp.float32)
        blin = blin + jnp.dot(xs16, blw_ref[s],
                              preferred_element_type=jnp.float32)
    backbone_ref[...] = backbone

    # -- clip projector: 3 x (LayerNorm -> GELU -> Linear(clip,clip)) applied
    #    per clip_size segment of the backbone (no kron operators).
    for seg in range(nb):
        hseg = backbone[:, seg * clip:(seg + 1) * clip]
        for i in range(3):
            hn = _ln_lanes(hseg, cg_ref[i], cbe_ref[i])
            hseg = jnp.dot(_bf16(_gelu(hn)), cw_ref[i],
                           preferred_element_type=jnp.float32) + cb_ref[i]
        c_ref[:, seg * clip:(seg + 1) * clip] = hseg

    # -- blurry head: blin1 output (HW-major columns) + GroupNorm(1, 64).
    #    GroupNorm(1) stats are over all C*H*W elements per sample == per row.
    mu = jnp.mean(blin, axis=-1, keepdims=True)
    d = blin - mu
    var = jnp.mean(d * d, axis=-1, keepdims=True)
    bmap_ref[...] = d * lax.rsqrt(var + GN_EPS) * bng_ref[...] + bnb_ref[...]


def _token_path(x2d, p):
    BS, H = x2d.shape
    S = p['backbone_w'].shape[0]
    B = BS // S
    out_dim = p['backbone_w'].shape[2]
    n_blurry = p['blin_w'].shape[2]
    n_blocks = p['w1a'].shape[0]
    clip = p['cp_w'].shape[1]
    nb = out_dim // clip

    args = (x2d, p['pos_emb'],
            p['g1'], p['be1'], p['w1a'], p['b1a'], p['w1b'], p['b1b'],
            p['g2'], p['be2'], p['w2a'], p['b2a'], p['w2b'], p['b2b'],
            p['backbone_w'], p['backbone_b'],
            p['cp_g'], p['cp_be'], p['cp_w'], p['cp_b'],
            p['blin_w'], p['blin_b'], p['bn_g'], p['bn_b'])
    out_shapes = (jax.ShapeDtypeStruct((B, out_dim), jnp.float32),
                  jax.ShapeDtypeStruct((B, out_dim), jnp.float32),
                  jax.ShapeDtypeStruct((B, n_blurry), jnp.float32))

    in_bytes = sum(int(a.size) * a.dtype.itemsize for a in args)
    out_bytes = sum(int(math.prod(o.shape)) * 4 for o in out_shapes)
    flops = int(n_blocks * 2 * 2 * BS * H * H                 # block1 MLPs
                + n_blocks * B * 2 * 2 * S * S * H            # block2 MLPs
                + S * 2 * B * H * (out_dim + n_blurry)        # backbone + blin heads
                + nb * 3 * 2 * B * clip * clip)               # clip projector
    transc = int(n_blocks * 2 * BS * H + nb * 3 * B * clip)

    return pl.pallas_call(
        _token_path_kernel,
        out_shape=out_shapes,
        in_specs=[VMEM_SPEC] * len(args),
        out_specs=(VMEM_SPEC, VMEM_SPEC, VMEM_SPEC),
        compiler_params=pltpu.CompilerParams(
            vmem_limit_bytes=_vmem_limit(in_bytes + out_bytes)),
        cost_estimate=pl.CostEstimate(flops=flops, transcendentals=transc,
                                      bytes_accessed=in_bytes + out_bytes),
    )(*args)


# ----------------------------------------------------------------------------
# Kernel B: fused b_maps_projector on the concatenated (B*49, C) row slab
#   (1x1 conv -> GroupNorm(1) -> ReLU) x2 -> 1x1 conv + bias
# ----------------------------------------------------------------------------
def _bmaps_kernel(x_ref, mrow_ref, w1_ref, g1_ref, be1_ref,
                  w2_ref, g2_ref, be2_ref, w3_ref, b3_ref, o_ref):
    mrow = mrow_ref[...]              # (B*49, B*49) per-sample row-mean operator

    def group_norm1(v, g, be):
        # GroupNorm(num_groups=1): reduce over channels first (lane reduction),
        # then broadcast the per-sample mean via a cheap (rows, 1) matvec.
        rm = jnp.mean(v, axis=-1, keepdims=True)                       # (rows, 1)
        mu = jnp.dot(mrow, rm, preferred_element_type=jnp.float32)     # (rows, 1)
        d = v - mu
        rv = jnp.mean(d * d, axis=-1, keepdims=True)
        var = jnp.dot(mrow, rv, preferred_element_type=jnp.float32)
        return d * lax.rsqrt(var + GN_EPS) * g + be

    # 1x1 convs == row-wise matmuls; bf16 operands / f32 accumulation.
    h = jnp.dot(_bf16(x_ref[...]), w1_ref[...], preferred_element_type=jnp.float32)
    h = jnp.maximum(group_norm1(h, g1_ref[...], be1_ref[...]), 0.0)
    h = jnp.dot(_bf16(h), w2_ref[...], preferred_element_type=jnp.float32)
    h = jnp.maximum(group_norm1(h, g2_ref[...], be2_ref[...]), 0.0)
    h = jnp.dot(_bf16(h), w3_ref[...], preferred_element_type=jnp.float32)
    o_ref[...] = h + b3_ref[...]


def _bmaps_proj(x_rows, p):
    n_rows, c_in = x_rows.shape
    c_mid = p['bm_w2'].shape[0]
    c_out = p['bm_w3'].shape[1]
    args = (x_rows, p['mrow'],
            p['bm_w1'], p['bm_g1'], p['bm_be1'],
            p['bm_w2'], p['bm_g2'], p['bm_be2'],
            p['bm_w3'], p['bm_b3'])
    in_bytes = sum(int(a.size) * a.dtype.itemsize for a in args)
    out_bytes = n_rows * c_out * 4
    flops = int(2 * n_rows * (c_in * c_mid + c_mid * c_mid + c_mid * c_out)
                + 4 * 2 * n_rows * n_rows)

    return pl.pallas_call(
        _bmaps_kernel,
        out_shape=jax.ShapeDtypeStruct((n_rows, c_out), jnp.float32),
        in_specs=[VMEM_SPEC] * len(args),
        out_specs=VMEM_SPEC,
        compiler_params=pltpu.CompilerParams(
            vmem_limit_bytes=_vmem_limit(in_bytes + out_bytes)),
        cost_estimate=pl.CostEstimate(flops=flops, transcendentals=2 * n_rows,
                                      bytes_accessed=in_bytes + out_bytes),
    )(*args)


# ----------------------------------------------------------------------------
# Full forward (wrapper glue is free reshapes + one tiny NCHW transpose)
# ----------------------------------------------------------------------------
def brain_network2_forward(x, p, *, clip_size):
    B, S, H = x.shape
    x2d = x.reshape(B * S, H)                       # free: row b*S+s = token (b, s)
    backbone2d, c2d, bmap = _token_path(x2d, p)

    out_dim = backbone2d.shape[1]
    nb = out_dim // clip_size
    backbone = backbone2d.reshape(B, nb, clip_size)
    c = c2d.reshape(B, nb, clip_size)

    # blurry branch (bdropout is eval-mode identity)
    b_rows = bmap.reshape(B * 49, 64)               # HW-major cols -> channel-last, free in HBM
    b_aux = _bmaps_proj(b_rows, p).reshape(B, 49, 512)
    b_feat = jnp.transpose(bmap.reshape(B, 49, 64), (0, 2, 1)).reshape(B, 64, 7, 7)
    # TODO(synk): self.bupsampler (diffusers Decoder / VAE upsampler) has no clean
    # Pallas equivalent; the GroupNorm'd 64x7x7 feature map is returned in its slot.
    return backbone, c, (b_feat, b_aux)


# ----------------------------------------------------------------------------
# Deterministic, kernel-ready parameter construction
# ----------------------------------------------------------------------------
def init_params(key, B, S, H, n_blocks, out_dim, clip_size):
    assert out_dim % clip_size == 0
    keys = iter(jax.random.split(key, 64))

    def unif(shape, fan_in, dtype=jnp.float32):
        bound = 1.0 / math.sqrt(fan_in)
        w = jax.random.uniform(next(keys), shape, jnp.float32, -bound, bound)
        return w.astype(dtype)

    # sinusoidal positional embedding (same construction as the torch __init__),
    # tiled over batch to (B*S, H)
    pos = jnp.arange(S, dtype=jnp.float32)[:, None]
    two_i = jnp.arange(0, H, 2, dtype=jnp.float32)
    ang = pos / (10000.0 ** (two_i / H))
    pe = jnp.zeros((S, H), jnp.float32)
    pe = pe.at[:, 0::2].set(jnp.sin(ang)).at[:, 1::2].set(jnp.cos(ang))
    pos_emb = jnp.tile(pe, (B, 1))

    # ---- mixer_block1 (h-dim MLP); bf16 weights for the MXU ----
    g1 = jnp.ones((n_blocks, 1, H), jnp.float32)
    be1 = jnp.zeros((n_blocks, 1, H), jnp.float32)
    w1a = unif((n_blocks, H, H), H, jnp.bfloat16)
    b1a = unif((n_blocks, 1, H), H)
    w1b = unif((n_blocks, H, H), H, jnp.bfloat16)
    b1b = unif((n_blocks, 1, H), H)

    # ---- mixer_block2 (seq-dim MLP): dense (S,S), applied per-sample ----
    g2 = jnp.ones((n_blocks, S, 1), jnp.float32)
    be2 = jnp.zeros((n_blocks, S, 1), jnp.float32)
    w2a = unif((n_blocks, S, S), S)
    b2a = unif((n_blocks, S, 1), S)
    w2b = unif((n_blocks, S, S), S)
    b2b = unif((n_blocks, S, 1), S)

    # ---- heads: weights stored (S, H, out) so xf @ W == sum_s x[:,s,:] @ W[s] ----
    backbone_w = unif((S, H, out_dim), S * H, jnp.bfloat16)
    backbone_b = unif((1, out_dim), S * H)

    # ---- clip projector: 3 x (LN -> GELU -> Linear(clip, clip)) ----
    cp_g = jnp.ones((3, 1, clip_size), jnp.float32)
    cp_be = jnp.zeros((3, 1, clip_size), jnp.float32)
    cp_w = unif((3, clip_size, clip_size), clip_size, jnp.bfloat16)
    cp_b = unif((3, 1, clip_size), clip_size)

    # ---- blurry branch ----
    # blin1 columns stored HW-major (col = hw*64 + c) so the kernel's (B, 3136)
    # output reshapes straight to channel-last (B, 49, 64) with no transpose.
    n_blurry = 4 * 28 * 28
    blin_w = unif((S, H, n_blurry), S * H, jnp.bfloat16)
    blin_b = unif((1, n_blurry), S * H)
    bn_g = jnp.ones((1, n_blurry), jnp.float32)   # per-channel gamma tiled over HW (init=1)
    bn_b = jnp.zeros((1, n_blurry), jnp.float32)

    mrow = jnp.kron(jnp.eye(B, dtype=jnp.float32),
                    jnp.full((49, 49), 1.0 / 49.0, jnp.float32))     # (B*49, B*49)
    bm_w1 = unif((64, 512), 64, jnp.bfloat16)
    bm_g1 = jnp.ones((1, 512), jnp.float32)
    bm_be1 = jnp.zeros((1, 512), jnp.float32)
    bm_w2 = unif((512, 512), 512, jnp.bfloat16)
    bm_g2 = jnp.ones((1, 512), jnp.float32)
    bm_be2 = jnp.zeros((1, 512), jnp.float32)
    bm_w3 = unif((512, 512), 512, jnp.bfloat16)
    bm_b3 = unif((1, 512), 512)

    return dict(pos_emb=pos_emb,
                g1=g1, be1=be1, w1a=w1a, b1a=b1a, w1b=w1b, b1b=b1b,
                g2=g2, be2=be2, w2a=w2a, b2a=b2a, w2b=w2b, b2b=b2b,
                backbone_w=backbone_w, backbone_b=backbone_b,
                cp_g=cp_g, cp_be=cp_be, cp_w=cp_w, cp_b=cp_b,
                blin_w=blin_w, blin_b=blin_b, bn_g=bn_g, bn_b=bn_b,
                mrow=mrow,
                bm_w1=bm_w1, bm_g1=bm_g1, bm_be1=bm_be1,
                bm_w2=bm_w2, bm_g2=bm_g2, bm_be2=bm_be2,
                bm_w3=bm_w3, bm_b3=bm_b3)


if __name__ == "__main__":
    # Small shapes consistent with the module's forward: x is (batch, seq_len, h)
    B, S, H = 2, 2, 128
    N_BLOCKS = 4
    OUT_DIM = 128
    CLIP_SIZE = 128      # out_dim must be a multiple of clip_size

    key = jax.random.PRNGKey(0)
    k_x, k_p = jax.random.split(key)
    params = init_params(k_p, B, S, H, N_BLOCKS, OUT_DIM, CLIP_SIZE)
    x = jax.random.normal(k_x, (B, S, H), jnp.float32)

    fwd = jax.jit(functools.partial(brain_network2_forward, clip_size=CLIP_SIZE))
    backbone, c, (b_feat, b_aux) = fwd(x, params)
    jax.block_until_ready((backbone, c, b_feat, b_aux))

    assert backbone.shape == (B, OUT_DIM // CLIP_SIZE, CLIP_SIZE)
    assert c.shape == (B, OUT_DIM // CLIP_SIZE, CLIP_SIZE)
    assert b_feat.shape == (B, 64, 7, 7)
    assert b_aux.shape == (B, 49, 512)
    assert all(bool(jnp.all(jnp.isfinite(t))) for t in (backbone, c, b_feat, b_aux))
    print("KERNEL_OK")
</pallas_src>

<mosaic_0001>
module attributes {stable_mosaic.version = 11 : i64} {
  func.func @_token_path_kernel(%arg0: memref<4x128xf32, #tpu.memory_space<vmem>>, %arg1: memref<4x128xf32, #tpu.memory_space<vmem>>, %arg2: memref<4x1x128xf32, #tpu.memory_space<vmem>>, %arg3: memref<4x1x128xf32, #tpu.memory_space<vmem>>, %arg4: memref<4x128x128xbf16, #tpu.memory_space<vmem>>, %arg5: memref<4x1x128xf32, #tpu.memory_space<vmem>>, %arg6: memref<4x128x128xbf16, #tpu.memory_space<vmem>>, %arg7: memref<4x1x128xf32, #tpu.memory_space<vmem>>, %arg8: memref<4x2x1xf32, #tpu.memory_space<vmem>>, %arg9: memref<4x2x1xf32, #tpu.memory_space<vmem>>, %arg10: memref<4x2x2xf32, #tpu.memory_space<vmem>>, %arg11: memref<4x2x1xf32, #tpu.memory_space<vmem>>, %arg12: memref<4x2x2xf32, #tpu.memory_space<vmem>>, %arg13: memref<4x2x1xf32, #tpu.memory_space<vmem>>, %arg14: memref<2x128x128xbf16, #tpu.memory_space<vmem>>, %arg15: memref<1x128xf32, #tpu.memory_space<vmem>>, %arg16: memref<3x1x128xf32, #tpu.memory_space<vmem>>, %arg17: memref<3x1x128xf32, #tpu.memory_space<vmem>>, %arg18: memref<3x128x128xbf16, #tpu.memory_space<vmem>>, %arg19: memref<3x1x128xf32, #tpu.memory_space<vmem>>, %arg20: memref<2x128x3136xbf16, #tpu.memory_space<vmem>>, %arg21: memref<1x3136xf32, #tpu.memory_space<vmem>>, %arg22: memref<1x3136xf32, #tpu.memory_space<vmem>>, %arg23: memref<1x3136xf32, #tpu.memory_space<vmem>>, %arg24: memref<2x128xf32, #tpu.memory_space<vmem>>, %arg25: memref<2x128xf32, #tpu.memory_space<vmem>>, %arg26: memref<2x3136xf32, #tpu.memory_space<vmem>>) attributes {dimension_semantics = [], scalar_prefetch = 0 : i64, scratch_operands = 0 : i64, tpu.core_type = #tpu.core_type<tc>} {
    %c0 = arith.constant 0 : index
    %c0_0 = arith.constant 0 : index
    %0 = vector.load %arg0[%c0, %c0_0] : memref<4x128xf32, #tpu.memory_space<vmem>>, vector<4x128xf32>
    %c0_1 = arith.constant 0 : index
    %c0_2 = arith.constant 0 : index
    %1 = vector.load %arg1[%c0_1, %c0_2] : memref<4x128xf32, #tpu.memory_space<vmem>>, vector<4x128xf32>
    %2 = arith.addf %0, %1 : vector<4x128xf32>
    %c0_3 = arith.constant 0 : index
    %c0_4 = arith.constant 0 : index
    %c0_5 = arith.constant 0 : index
    %3 = vector.load %arg2[%c0_3, %c0_4, %c0_5] : memref<4x1x128xf32, #tpu.memory_space<vmem>>, vector<1x1x128xf32>
    %4 = vector.shape_cast %3 : vector<1x1x128xf32> to vector<1x128xf32>
    %c0_6 = arith.constant 0 : index
    %c0_7 = arith.constant 0 : index
    %c0_8 = arith.constant 0 : index
    %5 = vector.load %arg3[%c0_6, %c0_7, %c0_8] : memref<4x1x128xf32, #tpu.memory_space<vmem>>, vector<1x1x128xf32>
    %6 = vector.shape_cast %5 : vector<1x1x128xf32> to vector<1x128xf32>
    %cst = arith.constant dense<0.000000e+00> : vector<4xf32>
    %7 = vector.multi_reduction <add>, %2, %cst [1] : vector<4x128xf32> to vector<4xf32>
    %8 = vector.shape_cast %7 : vector<4xf32> to vector<4x1xf32>
    %cst_9 = arith.constant 1.280000e+02 : f32
    %9 = vector.broadcast %cst_9 : f32 to vector<4x1xf32>
    %10 = arith.divf %8, %9 : vector<4x1xf32>
    %11 = vector.broadcast %10 : vector<4x1xf32> to vector<4x128xf32>
    %12 = arith.subf %2, %11 : vector<4x128xf32>
    %13 = arith.mulf %12, %12 : vector<4x128xf32>
    %cst_10 = arith.constant dense<0.000000e+00> : vector<4xf32>
    %14 = vector.multi_reduction <add>, %13, %cst_10 [1] : vector<4x128xf32> to vector<4xf32>
    %15 = vector.shape_cast %14 : vector<4xf32> to vector<4x1xf32>
    %cst_11 = arith.constant 1.280000e+02 : f32
    %16 = vector.broadcast %cst_11 : f32 to vector<4x1xf32>
    %17 = arith.divf %15, %16 : vector<4x1xf32>
    %cst_12 = arith.constant 9.99999974E-6 : f32
    %18 = vector.broadcast %cst_12 : f32 to vector<4x1xf32>
    %19 = arith.addf %17, %18 : vector<4x1xf32>
    %20 = math.rsqrt %19 : vector<4x1xf32>
    %21 = vector.broadcast %20 : vector<4x1xf32> to vector<4x128xf32>
    %22 = arith.mulf %12, %21 : vector<4x128xf32>
    %23 = vector.broadcast %4 : vector<1x128xf32> to vector<4x128xf32>
    %24 = arith.mulf %22, %23 : vector<4x128xf32>
    %25 = vector.broadcast %6 : vector<1x128xf32> to vector<4x128xf32>
    %26 = arith.addf %24, %25 : vector<4x128xf32>
    %27 = arith.truncf %26 : vector<4x128xf32> to vector<4x128xbf16>
    %c0_13 = arith.constant 0 : index
    %c0_14 = arith.constant 0 : index
    %c0_15 = arith.constant 0 : index
    %28 = vector.load %arg4[%c0_13, %c0_14, %c0_15] : memref<4x128x128xbf16, #tpu.memory_space<vmem>>, vector<1x128x128xbf16>
    %29 = vector.shape_cast %28 : vector<1x128x128xbf16> to vector<128x128xbf16>
    %cst_16 = arith.constant dense<0.000000e+00> : vector<4x128xf32>
    %30 = tpu.matmul %27, %29, %cst_16 {dimension_numbers = #tpu.dot_dimension_numbers<[1], [0], [0], [1], [0, 0, 1, 1], [], []>} : vector<4x128xbf16>, vector<128x128xbf16>, vector<4x128xf32> -> vector<4x128xf32>
    %c0_17 = arith.constant 0 : index
    %c0_18 = arith.constant 0 : index
    %c0_19 = arith.constant 0 : index
    %31 = vector.load %arg5[%c0_17, %c0_18, %c0_19] : memref<4x1x128xf32, #tpu.memory_space<vmem>>, vector<1x1x128xf32>
    %32 = vector.shape_cast %31 : vector<1x1x128xf32> to vector<1x128xf32>
    %33 = vector.broadcast %32 : vector<1x128xf32> to vector<4x128xf32>
    %34 = arith.addf %30, %33 : vector<4x128xf32>
    %cst_20 = arith.constant 5.000000e-01 : f32
    %35 = vector.broadcast %cst_20 : f32 to vector<4x128xf32>
    %36 = arith.mulf %35, %34 : vector<4x128xf32>
    %cst_21 = arith.constant 4.471500e-02 : f32
    %37 = vector.broadcast %cst_21 : f32 to vector<4x128xf32>
    %38 = arith.mulf %37, %34 : vector<4x128xf32>
    %39 = arith.mulf %38, %34 : vector<4x128xf32>
    %40 = arith.mulf %39, %34 : vector<4x128xf32>
    %41 = arith.addf %34, %40 : vector<4x128xf32>
    %cst_22 = arith.constant 0.797884583 : f32
    %42 = vector.broadcast %cst_22 : f32 to vector<4x128xf32>
    %43 = arith.mulf %42, %41 : vector<4x128xf32>
    %44 = math.tanh %43 : vector<4x128xf32>
    %cst_23 = arith.constant 1.000000e+00 : f32
    %45 = vector.broadcast %cst_23 : f32 to vector<4x128xf32>
    %46 = arith.addf %45, %44 : vector<4x128xf32>
    %47 = arith.mulf %36, %46 : vector<4x128xf32>
    %48 = arith.truncf %47 : vector<4x128xf32> to vector<4x128xbf16>
    %c0_24 = arith.constant 0 : index
    %c0_25 = arith.constant 0 : index
    %c0_26 = arith.constant 0 : index
    %49 = vector.load %arg6[%c0_24, %c0_25, %c0_26] : memref<4x128x128xbf16, #tpu.memory_space<vmem>>, vector<1x128x128xbf16>
    %50 = vector.shape_cast %49 : vector<1x128x128xbf16> to vector<128x128xbf16>
    %cst_27 = arith.constant dense<0.000000e+00> : vector<4x128xf32>
    %51 = tpu.matmul %48, %50, %cst_27 {dimension_numbers = #tpu.dot_dimension_numbers<[1], [0], [0], [1], [0, 0, 1, 1], [], []>} : vector<4x128xbf16>, vector<128x128xbf16>, vector<4x128xf32> -> vector<4x128xf32>
    %c0_28 = arith.constant 0 : index
    %c0_29 = arith.constant 0 : index
    %c0_30 = arith.constant 0 : index
    %52 = vector.load %arg7[%c0_28, %c0_29, %c0_30] : memref<4x1x128xf32, #tpu.memory_space<vmem>>, vector<1x1x128xf32>
    %53 = vector.shape_cast %52 : vector<1x1x128xf32> to vector<1x128xf32>
    %54 = vector.broadcast %53 : vector<1x128xf32> to vector<4x128xf32>
    %55 = arith.addf %51, %54 : vector<4x128xf32>
    %56 = arith.addf %55, %2 : vector<4x128xf32>
    %c0_31 = arith.constant 0 : index
    %c0_32 = arith.constant 0 : index
    %c0_33 = arith.constant 0 : index
    %57 = vector.load %arg10[%c0_31, %c0_32, %c0_33] : memref<4x2x2xf32, #tpu.memory_space<vmem>>, vector<1x2x2xf32>
    %58 = vector.shape_cast %57 : vector<1x2x2xf32> to vector<2x2xf32>
    %c0_34 = arith.constant 0 : index
    %c0_35 = arith.constant 0 : index
    %c0_36 = arith.constant 0 : index
    %59 = vector.load %arg11[%c0_34, %c0_35, %c0_36] : memref<4x2x1xf32, #tpu.memory_space<vmem>>, vector<1x2x1xf32>
    %60 = vector.shape_cast %59 : vector<1x2x1xf32> to vector<2x1xf32>
    %c0_37 = arith.constant 0 : index
    %c0_38 = arith.constant 0 : index
    %c0_39 = arith.constant 0 : index
    %61 = vector.load %arg12[%c0_37, %c0_38, %c0_39] : memref<4x2x2xf32, #tpu.memory_space<vmem>>, vector<1x2x2xf32>
    %62 = vector.shape_cast %61 : vector<1x2x2xf32> to vector<2x2xf32>
    %c0_40 = arith.constant 0 : index
    %c0_41 = arith.constant 0 : index
    %c0_42 = arith.constant 0 : index
    %63 = vector.load %arg13[%c0_40, %c0_41, %c0_42] : memref<4x2x1xf32, #tpu.memory_space<vmem>>, vector<1x2x1xf32>
    %64 = vector.shape_cast %63 : vector<1x2x1xf32> to vector<2x1xf32>
    %c0_43 = arith.constant 0 : index
    %c0_44 = arith.constant 0 : index
    %c0_45 = arith.constant 0 : index
    %65 = vector.load %arg8[%c0_43, %c0_44, %c0_45] : memref<4x2x1xf32, #tpu.memory_space<vmem>>, vector<1x2x1xf32>
    %66 = vector.shape_cast %65 : vector<1x2x1xf32> to vector<2x1xf32>
    %c0_46 = arith.constant 0 : index
    %c0_47 = arith.constant 0 : index
    %c0_48 = arith.constant 0 : index
    %67 = vector.load %arg9[%c0_46, %c0_47, %c0_48] : memref<4x2x1xf32, #tpu.memory_space<vmem>>, vector<1x2x1xf32>
    %68 = vector.shape_cast %67 : vector<1x2x1xf32> to vector<2x1xf32>
    %69 = vector.extract_strided_slice %56 {offsets = [0, 0], sizes = [2, 128], strides = [1, 1]} : vector<4x128xf32> to vector<2x128xf32>
    %cst_49 = arith.constant dense<0.000000e+00> : vector<128xf32>
    %70 = vector.multi_reduction <add>, %69, %cst_49 [0] : vector<2x128xf32> to vector<128xf32>
    %71 = vector.shape_cast %70 : vector<128xf32> to vector<1x128xf32>
    %cst_50 = arith.constant 2.000000e+00 : f32
    %72 = vector.broadcast %cst_50 : f32 to vector<1x128xf32>
    %73 = arith.divf %71, %72 : vector<1x128xf32>
    %74 = vector.broadcast %73 : vector<1x128xf32> to vector<2x128xf32>
    %75 = arith.subf %69, %74 : vector<2x128xf32>
    %76 = arith.mulf %75, %75 : vector<2x128xf32>
    %cst_51 = arith.constant dense<0.000000e+00> : vector<128xf32>
    %77 = vector.multi_reduction <add>, %76, %cst_51 [0] : vector<2x128xf32> to vector<128xf32>
    %78 = vector.shape_cast %77 : vector<128xf32> to vector<1x128xf32>
    %cst_52 = arith.constant 2.000000e+00 : f32
    %79 = vector.broadcast %cst_52 : f32 to vector<1x128xf32>
    %80 = arith.divf %78, %79 : vector<1x128xf32>
    %cst_53 = arith.constant 9.99999974E-6 : f32
    %81 = vector.broadcast %cst_53 : f32 to vector<1x128xf32>
    %82 = arith.addf %80, %81 : vector<1x128xf32>
    %83 = math.rsqrt %82 : vector<1x128xf32>
    %84 = vector.broadcast %83 : vector<1x128xf32> to vector<2x128xf32>
    %85 = arith.mulf %75, %84 : vector<2x128xf32>
    %86 = vector.broadcast %66 : vector<2x1xf32> to vector<2x128xf32>
    %87 = arith.mulf %85, %86 : vector<2x128xf32>
    %88 = vector.broadcast %68 : vector<2x1xf32> to vector<2x128xf32>
    %89 = arith.addf %87, %88 : vector<2x128xf32>
    %cst_54 = arith.constant dense<0.000000e+00> : vector<2x128xf32>
    %90 = tpu.matmul %58, %89, %cst_54 {dimension_numbers = #tpu.dot_dimension_numbers<[1], [0], [0], [1], [0, 0, 1, 1], [], []>} : vector<2x2xf32>, vector<2x128xf32>, vector<2x128xf32> -> vector<2x128xf32>
    %91 = vector.broadcast %60 : vector<2x1xf32> to vector<2x128xf32>
    %92 = arith.addf %90, %91 : vector<2x128xf32>
    %cst_55 = arith.constant 5.000000e-01 : f32
    %93 = vector.broadcast %cst_55 : f32 to vector<2x128xf32>
    %94 = arith.mulf %93, %92 : vector<2x128xf32>
    %cst_56 = arith.constant 4.471500e-02 : f32
    %95 = vector.broadcast %cst_56 : f32 to vector<2x128xf32>
    %96 = arith.mulf %95, %92 : vector<2x128xf32>
    %97 = arith.mulf %96, %92 : vector<2x128xf32>
    %98 = arith.mulf %97, %92 : vector<2x128xf32>
    %99 = arith.addf %92, %98 : vector<2x128xf32>
    %cst_57 = arith.constant 0.797884583 : f32
    %100 = vector.broadcast %cst_57 : f32 to vector<2x128xf32>
    %101 = arith.mulf %100, %99 : vector<2x128xf32>
    %102 = math.tanh %101 : vector<2x128xf32>
    %cst_58 = arith.constant 1.000000e+00 : f32
    %103 = vector.broadcast %cst_58 : f32 to vector<2x128xf32>
    %104 = arith.addf %103, %102 : vector<2x128xf32>
    %105 = arith.mulf %94, %104 : vector<2x128xf32>
    %cst_59 = arith.constant dense<0.000000e+00> : vector<2x128xf32>
    %106 = tpu.matmul %62, %105, %cst_59 {dimension_numbers = #tpu.dot_dimension_numbers<[1], [0], [0], [1], [0, 0, 1, 1], [], []>} : vector<2x2xf32>, vector<2x128xf32>, vector<2x128xf32> -> vector<2x128xf32>
    %107 = vector.broadcast %64 : vector<2x1xf32> to vector<2x128xf32>
    %108 = arith.addf %106, %107 : vector<2x128xf32>
    %109 = vector.extract_strided_slice %2 {offsets = [0, 0], sizes = [2, 128], strides = [1, 1]} : vector<4x128xf32> to vector<2x128xf32>
    %110 = arith.addf %108, %109 : vector<2x128xf32>
    %111 = vector.extract_strided_slice %56 {offsets = [2, 0], sizes = [2, 128], strides = [1, 1]} : vector<4x128xf32> to vector<2x128xf32>
    %cst_60 = arith.constant dense<0.000000e+00> : vector<128xf32>
    %112 = vector.multi_reduction <add>, %111, %cst_60 [0] : vector<2x128xf32> to vector<128xf32>
    %113 = vector.shape_cast %112 : vector<128xf32> to vector<1x128xf32>
    %cst_61 = arith.constant 2.000000e+00 : f32
    %114 = vector.broadcast %cst_61 : f32 to vector<1x128xf32>
    %115 = arith.divf %113, %114 : vector<1x128xf32>
    %116 = vector.broadcast %115 : vector<1x128xf32> to vector<2x128xf32>
    %117 = arith.subf %111, %116 : vector<2x128xf32>
    %118 = arith.mulf %117, %117 : vector<2x128xf32>
    %cst_62 = arith.constant dense<0.000000e+00> : vector<128xf32>
    %119 = vector.multi_reduction <add>, %118, %cst_62 [0] : vector<2x128xf32> to vector<128xf32>
    %120 = vector.shape_cast %119 : vector<128xf32> to vector<1x128xf32>
    %cst_63 = arith.constant 2.000000e+00 : f32
    %121 = vector.broadcast %cst_63 : f32 to vector<1x128xf32>
    %122 = arith.divf %120, %121 : vector<1x128xf32>
    %cst_64 = arith.constant 9.99999974E-6 : f32
    %123 = vector.broadcast %cst_64 : f32 to vector<1x128xf32>
    %124 = arith.addf %122, %123 : vector<1x128xf32>
    %125 = math.rsqrt %124 : vector<1x128xf32>
    %126 = vector.broadcast %125 : vector<1x128xf32> to vector<2x128xf32>
    %127 = arith.mulf %117, %126 : vector<2x128xf32>
    %128 = vector.broadcast %66 : vector<2x1xf32> to vector<2x128xf32>
    %129 = arith.mulf %127, %128 : vector<2x128xf32>
    %130 = vector.broadcast %68 : vector<2x1xf32> to vector<2x128xf32>
    %131 = arith.addf %129, %130 : vector<2x128xf32>
    %cst_65 = arith.constant dense<0.000000e+00> : vector<2x128xf32>
    %132 = tpu.matmul %58, %131, %cst_65 {dimension_numbers = #tpu.dot_dimension_numbers<[1], [0], [0], [1], [0, 0, 1, 1], [], []>} : vector<2x2xf32>, vector<2x128xf32>, vector<2x128xf32> -> vector<2x128xf32>
    %133 = vector.broadcast %60 : vector<2x1xf32> to vector<2x128xf32>
    %134 = arith.addf %132, %133 : vector<2x128xf32>
    %cst_66 = arith.constant 5.000000e-01 : f32
    %135 = vector.broadcast %cst_66 : f32 to vector<2x128xf32>
    %136 = arith.mulf %135, %134 : vector<2x128xf32>
    %cst_67 = arith.constant 4.471500e-02 : f32
    %137 = vector.broadcast %cst_67 : f32 to vector<2x128xf32>
    %138 = arith.mulf %137, %134 : vector<2x128xf32>
    %139 = arith.mulf %138, %134 : vector<2x128xf32>
    %140 = arith.mulf %139, %134 : vector<2x128xf32>
    %141 = arith.addf %134, %140 : vector<2x128xf32>
    %cst_68 = arith.constant 0.797884583 : f32
    %142 = vector.broadcast %cst_68 : f32 to vector<2x128xf32>
    %143 = arith.mulf %142, %141 : vector<2x128xf32>
    %144 = math.tanh %143 : vector<2x128xf32>
    %cst_69 = arith.constant 1.000000e+00 : f32
    %145 = vector.broadcast %cst_69 : f32 to vector<2x128xf32>
    %146 = arith.addf %145, %144 : vector<2x128xf32>
    %147 = arith.mulf %136, %146 : vector<2x128xf32>
    %cst_70 = arith.constant dense<0.000000e+00> : vector<2x128xf32>
    %148 = tpu.matmul %62, %147, %cst_70 {dimension_numbers = #tpu.dot_dimension_numbers<[1], [0], [0], [1], [0, 0, 1, 1], [], []>} : vector<2x2xf32>, vector<2x128xf32>, vector<2x128xf32> -> vector<2x128xf32>
    %149 = vector.broadcast %64 : vector<2x1xf32> to vector<2x128xf32>
    %150 = arith.addf %148, %149 : vector<2x128xf32>
    %151 = vector.extract_strided_slice %2 {offsets = [2, 0], sizes = [2, 128], strides = [1, 1]} : vector<4x128xf32> to vector<2x128xf32>
    %152 = arith.addf %150, %151 : vector<2x128xf32>
    %153 = tpu.concatenate %110, %152 in 0 : vector<2x128xf32>, vector<2x128xf32> -> vector<4x128xf32>
    %c1 = arith.constant 1 : index
    %c0_71 = arith.constant 0 : index
    %c0_72 = arith.constant 0 : index
    %154 = vector.load %arg2[%c1, %c0_71, %c0_72] : memref<4x1x128xf32, #tpu.memory_space<vmem>>, vector<1x1x128xf32>
    %155 = vector.shape_cast %154 : vector<1x1x128xf32> to vector<1x128xf32>
    %c1_73 = arith.constant 1 : index
    %c0_74 = arith.constant 0 : index
    %c0_75 = arith.constant 0 : index
    %156 = vector.load %arg3[%c1_73, %c0_74, %c0_75] : memref<4x1x128xf32, #tpu.memory_space<vmem>>, vector<1x1x128xf32>
    %157 = vector.shape_cast %156 : vector<1x1x128xf32> to vector<1x128xf32>
    %cst_76 = arith.constant dense<0.000000e+00> : vector<4xf32>
    %158 = vector.multi_reduction <add>, %153, %cst_76 [1] : vector<4x128xf32> to vector<4xf32>
    %159 = vector.shape_cast %158 : vector<4xf32> to vector<4x1xf32>
    %cst_77 = arith.constant 1.280000e+02 : f32
    %160 = vector.broadcast %cst_77 : f32 to vector<4x1xf32>
    %161 = arith.divf %159, %160 : vector<4x1xf32>
    %162 = vector.broadcast %161 : vector<4x1xf32> to vector<4x128xf32>
    %163 = arith.subf %153, %162 : vector<4x128xf32>
    %164 = arith.mulf %163, %163 : vector<4x128xf32>
    %cst_78 = arith.constant dense<0.000000e+00> : vector<4xf32>
    %165 = vector.multi_reduction <add>, %164, %cst_78 [1] : vector<4x128xf32> to vector<4xf32>
    %166 = vector.shape_cast %165 : vector<4xf32> to vector<4x1xf32>
    %cst_79 = arith.constant 1.280000e+02 : f32
    %167 = vector.broadcast %cst_79 : f32 to vector<4x1xf32>
    %168 = arith.divf %166, %167 : vector<4x1xf32>
    %cst_80 = arith.constant 9.99999974E-6 : f32
    %169 = vector.broadcast %cst_80 : f32 to vector<4x1xf32>
    %170 = arith.addf %168, %169 : vector<4x1xf32>
    %171 = math.rsqrt %170 : vector<4x1xf32>
    %172 = vector.broadcast %171 : vector<4x1xf32> to vector<4x128xf32>
    %173 = arith.mulf %163, %172 : vector<4x128xf32>
    %174 = vector.broadcast %155 : vector<1x128xf32> to vector<4x128xf32>
    %175 = arith.mulf %173, %174 : vector<4x128xf32>
    %176 = vector.broadcast %157 : vector<1x128xf32> to vector<4x128xf32>
    %177 = arith.addf %175, %176 : vector<4x128xf32>
    %178 = arith.truncf %177 : vector<4x128xf32> to vector<4x128xbf16>
    %c1_81 = arith.constant 1 : index
    %c0_82 = arith.constant 0 : index
    %c0_83 = arith.constant 0 : index
    %179 = vector.load %arg4[%c1_81, %c0_82, %c0_83] : memref<4x128x128xbf16, #tpu.memory_space<vmem>>, vector<1x128x128xbf16>
    %180 = vector.shape_cast %179 : vector<1x128x128xbf16> to vector<128x128xbf16>
    %cst_84 = arith.constant dense<0.000000e+00> : vector<4x128xf32>
    %181 = tpu.matmul %178, %180, %cst_84 {dimension_numbers = #tpu.dot_dimension_numbers<[1], [0], [0], [1], [0, 0, 1, 1], [], []>} : vector<4x128xbf16>, vector<128x128xbf16>, vector<4x128xf32> -> vector<4x128xf32>
    %c1_85 = arith.constant 1 : index
    %c0_86 = arith.constant 0 : index
    %c0_87 = arith.constant 0 : index
    %182 = vector.load %arg5[%c1_85, %c0_86, %c0_87] : memref<4x1x128xf32, #tpu.memory_space<vmem>>, vector<1x1x128xf32>
    %183 = vector.shape_cast %182 : vector<1x1x128xf32> to vector<1x128xf32>
    %184 = vector.broadcast %183 : vector<1x128xf32> to vector<4x128xf32>
    %185 = arith.addf %181, %184 : vector<4x128xf32>
    %cst_88 = arith.constant 5.000000e-01 : f32
    %186 = vector.broadcast %cst_88 : f32 to vector<4x128xf32>
    %187 = arith.mulf %186, %185 : vector<4x128xf32>
    %cst_89 = arith.constant 4.471500e-02 : f32
    %188 = vector.broadcast %cst_89 : f32 to vector<4x128xf32>
    %189 = arith.mulf %188, %185 : vector<4x128xf32>
    %190 = arith.mulf %189, %185 : vector<4x128xf32>
    %191 = arith.mulf %190, %185 : vector<4x128xf32>
    %192 = arith.addf %185, %191 : vector<4x128xf32>
    %cst_90 = arith.constant 0.797884583 : f32
    %193 = vector.broadcast %cst_90 : f32 to vector<4x128xf32>
    %194 = arith.mulf %193, %192 : vector<4x128xf32>
    %195 = math.tanh %194 : vector<4x128xf32>
    %cst_91 = arith.constant 1.000000e+00 : f32
    %196 = vector.broadcast %cst_91 : f32 to vector<4x128xf32>
    %197 = arith.addf %196, %195 : vector<4x128xf32>
    %198 = arith.mulf %187, %197 : vector<4x128xf32>
    %199 = arith.truncf %198 : vector<4x128xf32> to vector<4x128xbf16>
    %c1_92 = arith.constant 1 : index
    %c0_93 = arith.constant 0 : index
    %c0_94 = arith.constant 0 : index
    %200 = vector.load %arg6[%c1_92, %c0_93, %c0_94] : memref<4x128x128xbf16, #tpu.memory_space<vmem>>, vector<1x128x128xbf16>
    %201 = vector.shape_cast %200 : vector<1x128x128xbf16> to vector<128x128xbf16>
    %cst_95 = arith.constant dense<0.000000e+00> : vector<4x128xf32>
    %202 = tpu.matmul %199, %201, %cst_95 {dimension_numbers = #tpu.dot_dimension_numbers<[1], [0], [0], [1], [0, 0, 1, 1], [], []>} : vector<4x128xbf16>, vector<128x128xbf16>, vector<4x128xf32> -> vector<4x128xf32>
    %c1_96 = arith.constant 1 : index
    %c0_97 = arith.constant 0 : index
    %c0_98 = arith.constant 0 : index
    %203 = vector.load %arg7[%c1_96, %c0_97, %c0_98] : memref<4x1x128xf32, #tpu.memory_space<vmem>>, vector<1x1x128xf32>
    %204 = vector.shape_cast %203 : vector<1x1x128xf32> to vector<1x128xf32>
    %205 = vector.broadcast %204 : vector<1x128xf32> to vector<4x128xf32>
    %206 = arith.addf %202, %205 : vector<4x128xf32>
    %207 = arith.addf %206, %56 : vector<4x128xf32>
    %c1_99 = arith.constant 1 : index
    %c0_100 = arith.constant 0 : index
    %c0_101 = arith.constant 0 : index
    %208 = vector.load %arg10[%c1_99, %c0_100, %c0_101] : memref<4x2x2xf32, #tpu.memory_space<vmem>>, vector<1x2x2xf32>
    %209 = vector.shape_cast %208 : vector<1x2x2xf32> to vector<2x2xf32>
    %c1_102 = arith.constant 1 : index
    %c0_103 = arith.constant 0 : index
    %c0_104 = arith.constant 0 : index
    %210 = vector.load %arg11[%c1_102, %c0_103, %c0_104] : memref<4x2x1xf32, #tpu.memory_space<vmem>>, vector<1x2x1xf32>
    %211 = vector.shape_cast %210 : vector<1x2x1xf32> to vector<2x1xf32>
    %c1_105 = arith.constant 1 : index
    %c0_106 = arith.constant 0 : index
    %c0_107 = arith.constant 0 : index
    %212 = vector.load %arg12[%c1_105, %c0_106, %c0_107] : memref<4x2x2xf32, #tpu.memory_space<vmem>>, vector<1x2x2xf32>
    %213 = vector.shape_cast %212 : vector<1x2x2xf32> to vector<2x2xf32>
    %c1_108 = arith.constant 1 : index
    %c0_109 = arith.constant 0 : index
    %c0_110 = arith.constant 0 : index
    %214 = vector.load %arg13[%c1_108, %c0_109, %c0_110] : memref<4x2x1xf32, #tpu.memory_space<vmem>>, vector<1x2x1xf32>
    %215 = vector.shape_cast %214 : vector<1x2x1xf32> to vector<2x1xf32>
    %c1_111 = arith.constant 1 : index
    %c0_112 = arith.constant 0 : index
    %c0_113 = arith.constant 0 : index
    %216 = vector.load %arg8[%c1_111, %c0_112, %c0_113] : memref<4x2x1xf32, #tpu.memory_space<vmem>>, vector<1x2x1xf32>
    %217 = vector.shape_cast %216 : vector<1x2x1xf32> to vector<2x1xf32>
    %c1_114 = arith.constant 1 : index
    %c0_115 = arith.constant 0 : index
    %c0_116 = arith.constant 0 : index
    %218 = vector.load %arg9[%c1_114, %c0_115, %c0_116] : memref<4x2x1xf32, #tpu.memory_space<vmem>>, vector<1x2x1xf32>
    %219 = vector.shape_cast %218 : vector<1x2x1xf32> to vector<2x1xf32>
    %220 = vector.extract_strided_slice %207 {offsets = [0, 0], sizes = [2, 128], strides = [1, 1]} : vector<4x128xf32> to vector<2x128xf32>
    %cst_117 = arith.constant dense<0.000000e+00> : vector<128xf32>
    %221 = vector.multi_reduction <add>, %220, %cst_117 [0] : vector<2x128xf32> to vector<128xf32>
    %222 = vector.shape_cast %221 : vector<128xf32> to vector<1x128xf32>
    %cst_118 = arith.constant 2.000000e+00 : f32
    %223 = vector.broadcast %cst_118 : f32 to vector<1x128xf32>
    %224 = arith.divf %222, %223 : vector<1x128xf32>
    %225 = vector.broadcast %224 : vector<1x128xf32> to vector<2x128xf32>
    %226 = arith.subf %220, %225 : vector<2x128xf32>
    %227 = arith.mulf %226, %226 : vector<2x128xf32>
    %cst_119 = arith.constant dense<0.000000e+00> : vector<128xf32>
    %228 = vector.multi_reduction <add>, %227, %cst_119 [0] : vector<2x128xf32> to vector<128xf32>
    %229 = vector.shape_cast %228 : vector<128xf32> to vector<1x128xf32>
    %cst_120 = arith.constant 2.000000e+00 : f32
    %230 = vector.broadcast %cst_120 : f32 to vector<1x128xf32>
    %231 = arith.divf %229, %230 : vector<1x128xf32>
    %cst_121 = arith.constant 9.99999974E-6 : f32
    %232 = vector.broadcast %cst_121 : f32 to vector<1x128xf32>
    %233 = arith.addf %231, %232 : vector<1x128xf32>
    %234 = math.rsqrt %233 : vector<1x128xf32>
    %235 = vector.broadcast %234 : vector<1x128xf32> to vector<2x128xf32>
    %236 = arith.mulf %226, %235 : vector<2x128xf32>
    %237 = vector.broadcast %217 : vector<2x1xf32> to vector<2x128xf32>
    %238 = arith.mulf %236, %237 : vector<2x128xf32>
    %239 = vector.broadcast %219 : vector<2x1xf32> to vector<2x128xf32>
    %240 = arith.addf %238, %239 : vector<2x128xf32>
    %cst_122 = arith.constant dense<0.000000e+00> : vector<2x128xf32>
    %241 = tpu.matmul %209, %240, %cst_122 {dimension_numbers = #tpu.dot_dimension_numbers<[1], [0], [0], [1], [0, 0, 1, 1], [], []>} : vector<2x2xf32>, vector<2x128xf32>, vector<2x128xf32> -> vector<2x128xf32>
    %242 = vector.broadcast %211 : vector<2x1xf32> to vector<2x128xf32>
    %243 = arith.addf %241, %242 : vector<2x128xf32>
    %cst_123 = arith.constant 5.000000e-01 : f32
    %244 = vector.broadcast %cst_123 : f32 to vector<2x128xf32>
    %245 = arith.mulf %244, %243 : vector<2x128xf32>
    %cst_124 = arith.constant 4.471500e-02 : f32
    %246 = vector.broadcast %cst_124 : f32 to vector<2x128xf32>
    %247 = arith.mulf %246, %243 : vector<2x128xf32>
    %248 = arith.mulf %247, %243 : vector<2x128xf32>
    %249 = arith.mulf %248, %243 : vector<2x128xf32>
    %250 = arith.addf %243, %249 : vector<2x128xf32>
    %cst_125 = arith.constant 0.797884583 : f32
    %251 = vector.broadcast %cst_125 : f32 to vector<2x128xf32>
    %252 = arith.mulf %251, %250 : vector<2x128xf32>
    %253 = math.tanh %252 : vector<2x128xf32>
    %cst_126 = arith.constant 1.000000e+00 : f32
    %254 = vector.broadcast %cst_126 : f32 to vector<2x128xf32>
    %255 = arith.addf %254, %253 : vector<2x128xf32>
    %256 = arith.mulf %245, %255 : vector<2x128xf32>
    %cst_127 = arith.constant dense<0.000000e+00> : vector<2x128xf32>
    %257 = tpu.matmul %213, %256, %cst_127 {dimension_numbers = #tpu.dot_dimension_numbers<[1], [0], [0], [1], [0, 0, 1, 1], [], []>} : vector<2x2xf32>, vector<2x128xf32>, vector<2x128xf32> -> vector<2x128xf32>
    %258 = vector.broadcast %215 : vector<2x1xf32> to vector<2x128xf32>
    %259 = arith.addf %257, %258 : vector<2x128xf32>
    %260 = vector.extract_strided_slice %153 {offsets = [0, 0], sizes = [2, 128], strides = [1, 1]} : vector<4x128xf32> to vector<2x128xf32>
    %261 = arith.addf %259, %260 : vector<2x128xf32>
    %262 = vector.extract_strided_slice %207 {offsets = [2, 0], sizes = [2, 128], strides = [1, 1]} : vector<4x128xf32> to vector<2x128xf32>
    %cst_128 = arith.constant dense<0.000000e+00> : vector<128xf32>
    %263 = vector.multi_reduction <add>, %262, %cst_128 [0] : vector<2x128xf32> to vector<128xf32>
    %264 = vector.shape_cast %263 : vector<128xf32> to vector<1x128xf32>
    %cst_129 = arith.constant 2.000000e+00 : f32
    %265 = vector.broadcast %cst_129 : f32 to vector<1x128xf32>
    %266 = arith.divf %264, %265 : vector<1x128xf32>
    %267 = vector.broadcast %266 : vector<1x128xf32> to vector<2x128xf32>
    %268 = arith.subf %262, %267 : vector<2x128xf32>
    %269 = arith.mulf %268, %268 : vector<2x128xf32>
    %cst_130 = arith.constant dense<0.000000e+00> : vector<128xf32>
    %270 = vector.multi_reduction <add>, %269, %cst_130 [0] : vector<2x128xf32> to vector<128xf32>
    %271 = vector.shape_cast %270 : vector<128xf32> to vector<1x128xf32>
    %cst_131 = arith.constant 2.000000e+00 : f32
    %272 = vector.broadcast %cst_131 : f32 to vector<1x128xf32>
    %273 = arith.divf %271, %272 : vector<1x128xf32>
    %cst_132 = arith.constant 9.99999974E-6 : f32
    %274 = vector.broadcast %cst_132 : f32 to vector<1x128xf32>
    %275 = arith.addf %273, %274 : vector<1x128xf32>
    %276 = math.rsqrt %275 : vector<1x128xf32>
    %277 = vector.broadcast %276 : vector<1x128xf32> to vector<2x128xf32>
    %278 = arith.mulf %268, %277 : vector<2x128xf32>
    %279 = vector.broadcast %217 : vector<2x1xf32> to vector<2x128xf32>
    %280 = arith.mulf %278, %279 : vector<2x128xf32>
    %281 = vector.broadcast %219 : vector<2x1xf32> to vector<2x128xf32>
    %282 = arith.addf %280, %281 : vector<2x128xf32>
    %cst_133 = arith.constant dense<0.000000e+00> : vector<2x128xf32>
    %283 = tpu.matmul %209, %282, %cst_133 {dimension_numbers = #tpu.dot_dimension_numbers<[1], [0], [0], [1], [0, 0, 1, 1], [], []>} : vector<2x2xf32>, vector<2x128xf32>, vector<2x128xf32> -> vector<2x128xf32>
    %284 = vector.broadcast %211 : vector<2x1xf32> to vector<2x128xf32>
    %285 = arith.addf %283, %284 : vector<2x128xf32>
    %cst_134 = arith.constant 5.000000e-01 : f32
    %286 = vector.broadcast %cst_134 : f32 to vector<2x128xf32>
    %287 = arith.mulf %286, %285 : vector<2x128xf32>
    %cst_135 = arith.constant 4.471500e-02 : f32
    %288 = vector.broadcast %cst_135 : f32 to vector<2x128xf32>
    %289 = arith.mulf %288, %285 : vector<2x128xf32>
    %290 = arith.mulf %289, %285 : vector<2x128xf32>
    %291 = arith.mulf %290, %285 : vector<2x128xf32>
    %292 = arith.addf %285, %291 : vector<2x128xf32>
    %cst_136 = arith.constant 0.797884583 : f32
    %293 = vector.broadcast %cst_136 : f32 to vector<2x128xf32>
    %294 = arith.mulf %293, %292 : vector<2x128xf32>
    %295 = math.tanh %294 : vector<2x128xf32>
    %cst_137 = arith.constant 1.000000e+00 : f32
    %296 = vector.broadcast %cst_137 : f32 to vector<2x128xf32>
    %297 = arith.addf %296, %295 : vector<2x128xf32>
    %298 = arith.mulf %287, %297 : vector<2x128xf32>
    %cst_138 = arith.constant dense<0.000000e+00> : vector<2x128xf32>
    %299 = tpu.matmul %213, %298, %cst_138 {dimension_numbers = #tpu.dot_dimension_numbers<[1], [0], [0], [1], [0, 0, 1, 1], [], []>} : vector<2x2xf32>, vector<2x128xf32>, vector<2x128xf32> -> vector<2x128xf32>
    %300 = vector.broadcast %215 : vector<2x1xf32> to vector<2x128xf32>
    %301 = arith.addf %299, %300 : vector<2x128xf32>
    %302 = vector.extract_strided_slice %153 {offsets = [2, 0], sizes = [2, 128], strides = [1, 1]} : vector<4x128xf32> to vector<2x128xf32>
    %303 = arith.addf %301, %302 : vector<2x128xf32>
    %304 = tpu.concatenate %261, %303 in 0 : vector<2x128xf32>, vector<2x128xf32> -> vector<4x128xf32>
    %c2 = arith.constant 2 : index
    %c0_139 = arith.constant 0 : index
    %c0_140 = arith.constant 0 : index
    %305 = vector.load %arg2[%c2, %c0_139, %c0_140] : memref<4x1x128xf32, #tpu.memory_space<vmem>>, vector<1x1x128xf32>
    %306 = vector.shape_cast %305 : vector<1x1x128xf32> to vector<1x128xf32>
    %c2_141 = arith.constant 2 : index
    %c0_142 = arith.constant 0 : index
    %c0_143 = arith.constant 0 : index
    %307 = vector.load %arg3[%c2_141, %c0_142, %c0_143] : memref<4x1x128xf32, #tpu.memory_space<vmem>>, vector<1x1x128xf32>
    %308 = vector.shape_cast %307 : vector<1x1x128xf32> to vector<1x128xf32>
    %cst_144 = arith.constant dense<0.000000e+00> : vector<4xf32>
    %309 = vector.multi_reduction <add>, %304, %cst_144 [1] : vector<4x128xf32> to vector<4xf32>
    %310 = vector.shape_cast %309 : vector<4xf32> to vector<4x1xf32>
    %cst_145 = arith.constant 1.280000e+02 : f32
    %311 = vector.broadcast %cst_145 : f32 to vector<4x1xf32>
    %312 = arith.divf %310, %311 : vector<4x1xf32>
    %313 = vector.broadcast %312 : vector<4x1xf32> to vector<4x128xf32>
    %314 = arith.subf %304, %313 : vector<4x128xf32>
    %315 = arith.mulf %314, %314 : vector<4x128xf32>
    %cst_146 = arith.constant dense<0.000000e+00> : vector<4xf32>
    %316 = vector.multi_reduction <add>, %315, %cst_146 [1] : vector<4x128xf32> to vector<4xf32>
    %317 = vector.shape_cast %316 : vector<4xf32> to vector<4x1xf32>
    %cst_147 = arith.constant 1.280000e+02 : f32
    %318 = vector.broadcast %cst_147 : f32 to vector<4x1xf32>
    %319 = arith.divf %317, %318 : vector<4x1xf32>
    %cst_148 = arith.constant 9.99999974E-6 : f32
    %320 = vector.broadcast %cst_148 : f32 to vector<4x1xf32>
    %321 = arith.addf %319, %320 : vector<4x1xf32>
    %322 = math.rsqrt %321 : vector<4x1xf32>
    %323 = vector.broadcast %322 : vector<4x1xf32> to vector<4x128xf32>
    %324 = arith.mulf %314, %323 : vector<4x128xf32>
    %325 = vector.broadcast %306 : vector<1x128xf32> to vector<4x128xf32>
    %326 = arith.mulf %324, %325 : vector<4x128xf32>
    %327 = vector.broadcast %308 : vector<1x128xf32> to vector<4x128xf32>
    %328 = arith.addf %326, %327 : vector<4x128xf32>
    %329 = arith.truncf %328 : vector<4x128xf32> to vector<4x128xbf16>
    %c2_149 = arith.constant 2 : index
    %c0_150 = arith.constant 0 : index
    %c0_151 = arith.constant 0 : index
    %330 = vector.load %arg4[%c2_149, %c0_150, %c0_151] : memref<4x128x128xbf16, #tpu.memory_space<vmem>>, vector<1x128x128xbf16>
    %331 = vector.shape_cast %330 : vector<1x128x128xbf16> to vector<128x128xbf16>
    %cst_152 = arith.constant dense<0.000000e+00> : vector<4x128xf32>
    %332 = tpu.matmul %329, %331, %cst_152 {dimension_numbers = #tpu.dot_dimension_numbers<[1], [0], [0], [1], [0, 0, 1, 1], [], []>} : vector<4x128xbf16>, vector<128x128xbf16>, vector<4x128xf32> -> vector<4x128xf32>
    %c2_153 = arith.constant 2 : index
    %c0_154 = arith.constant 0 : index
    %c0_155 = arith.constant 0 : index
    %333 = vector.load %arg5[%c2_153, %c0_154, %c0_155] : memref<4x1x128xf32, #tpu.memory_space<vmem>>, vector<1x1x128xf32>
    %334 = vector.shape_cast %333 : vector<1x1x128xf32> to vector<1x128xf32>
    %335 = vector.broadcast %334 : vector<1x128xf32> to vector<4x128xf32>
    %336 = arith.addf %332, %335 : vector<4x128xf32>
    %cst_156 = arith.constant 5.000000e-01 : f32
    %337 = vector.broadcast %cst_156 : f32 to vector<4x128xf32>
    %338 = arith.mulf %337, %336 : vector<4x128xf32>
    %cst_157 = arith.constant 4.471500e-02 : f32
    %339 = vector.broadcast %cst_157 : f32 to vector<4x128xf32>
    %340 = arith.mulf %339, %336 : vector<4x128xf32>
    %341 = arith.mulf %340, %336 : vector<4x128xf32>
    %342 = arith.mulf %341, %336 : vector<4x128xf32>
    %343 = arith.addf %336, %342 : vector<4x128xf32>
    %cst_158 = arith.constant 0.797884583 : f32
    %344 = vector.broadcast %cst_158 : f32 to vector<4x128xf32>
    %345 = arith.mulf %344, %343 : vector<4x128xf32>
    %346 = math.tanh %345 : vector<4x128xf32>
    %cst_159 = arith.constant 1.000000e+00 : f32
    %347 = vector.broadcast %cst_159 : f32 to vector<4x128xf32>
    %348 = arith.addf %347, %346 : vector<4x128xf32>
    %349 = arith.mulf %338, %348 : vector<4x128xf32>
    %350 = arith.truncf %349 : vector<4x128xf32> to vector<4x128xbf16>
    %c2_160 = arith.constant 2 : index
    %c0_161 = arith.constant 0 : index
    %c0_162 = arith.constant 0 : index
    %351 = vector.load %arg6[%c2_160, %c0_161, %c0_162] : memref<4x128x128xbf16, #tpu.memory_space<vmem>>, vector<1x128x128xbf16>
    %352 = vector.shape_cast %351 : vector<1x128x128xbf16> to vector<128x128xbf16>
    %cst_163 = arith.constant dense<0.000000e+00> : vector<4x128xf32>
    %353 = tpu.matmul %350, %352, %cst_163 {dimension_numbers = #tpu.dot_dimension_numbers<[1], [0], [0], [1], [0, 0, 1, 1], [], []>} : vector<4x128xbf16>, vector<128x128xbf16>, vector<4x128xf32> -> vector<4x128xf32>
    %c2_164 = arith.constant 2 : index
    %c0_165 = arith.constant 0 : index
    %c0_166 = arith.constant 0 : index
    %354 = vector.load %arg7[%c2_164, %c0_165, %c0_166] : memref<4x1x128xf32, #tpu.memory_space<vmem>>, vector<1x1x128xf32>
    %355 = vector.shape_cast %354 : vector<1x1x128xf32> to vector<1x128xf32>
    %356 = vector.broadcast %355 : vector<1x128xf32> to vector<4x128xf32>
    %357 = arith.addf %353, %356 : vector<4x128xf32>
    %358 = arith.addf %357, %207 : vector<4x128xf32>
    %c2_167 = arith.constant 2 : index
    %c0_168 = arith.constant 0 : index
    %c0_169 = arith.constant 0 : index
    %359 = vector.load %arg10[%c2_167, %c0_168, %c0_169] : memref<4x2x2xf32, #tpu.memory_space<vmem>>, vector<1x2x2xf32>
    %360 = vector.shape_cast %359 : vector<1x2x2xf32> to vector<2x2xf32>
    %c2_170 = arith.constant 2 : index
    %c0_171 = arith.constant 0 : index
    %c0_172 = arith.constant 0 : index
    %361 = vector.load %arg11[%c2_170, %c0_171, %c0_172] : memref<4x2x1xf32, #tpu.memory_space<vmem>>, vector<1x2x1xf32>
    %362 = vector.shape_cast %361 : vector<1x2x1xf32> to vector<2x1xf32>
    %c2_173 = arith.constant 2 : index
    %c0_174 = arith.constant 0 : index
    %c0_175 = arith.constant 0 : index
    %363 = vector.load %arg12[%c2_173, %c0_174, %c0_175] : memref<4x2x2xf32, #tpu.memory_space<vmem>>, vector<1x2x2xf32>
    %364 = vector.shape_cast %363 : vector<1x2x2xf32> to vector<2x2xf32>
    %c2_176 = arith.constant 2 : index
    %c0_177 = arith.constant 0 : index
    %c0_178 = arith.constant 0 : index
    %365 = vector.load %arg13[%c2_176, %c0_177, %c0_178] : memref<4x2x1xf32, #tpu.memory_space<vmem>>, vector<1x2x1xf32>
    %366 = vector.shape_cast %365 : vector<1x2x1xf32> to vector<2x1xf32>
    %c2_179 = arith.constant 2 : index
    %c0_180 = arith.constant 0 : index
    %c0_181 = arith.constant 0 : index
    %367 = vector.load %arg8[%c2_179, %c0_180, %c0_181] : memref<4x2x1xf32, #tpu.memory_space<vmem>>, vector<1x2x1xf32>
    %368 = vector.shape_cast %367 : vector<1x2x1xf32> to vector<2x1xf32>
    %c2_182 = arith.constant 2 : index
    %c0_183 = arith.constant 0 : index
    %c0_184 = arith.constant 0 : index
    %369 = vector.load %arg9[%c2_182, %c0_183, %c0_184] : memref<4x2x1xf32, #tpu.memory_space<vmem>>, vector<1x2x1xf32>
    %370 = vector.shape_cast %369 : vector<1x2x1xf32> to vector<2x1xf32>
    %371 = vector.extract_strided_slice %358 {offsets = [0, 0], sizes = [2, 128], strides = [1, 1]} : vector<4x128xf32> to vector<2x128xf32>
    %cst_185 = arith.constant dense<0.000000e+00> : vector<128xf32>
    %372 = vector.multi_reduction <add>, %371, %cst_185 [0] : vector<2x128xf32> to vector<128xf32>
    %373 = vector.shape_cast %372 : vector<128xf32> to vector<1x128xf32>
    %cst_186 = arith.constant 2.000000e+00 : f32
    %374 = vector.broadcast %cst_186 : f32 to vector<1x128xf32>
    %375 = arith.divf %373, %374 : vector<1x128xf32>
    %376 = vector.broadcast %375 : vector<1x128xf32> to vector<2x128xf32>
    %377 = arith.subf %371, %376 : vector<2x128xf32>
    %378 = arith.mulf %377, %377 : vector<2x128xf32>
    %cst_187 = arith.constant dense<0.000000e+00> : vector<128xf32>
    %379 = vector.multi_reduction <add>, %378, %cst_187 [0] : vector<2x128xf32> to vector<128xf32>
    %380 = vector.shape_cast %379 : vector<128xf32> to vector<1x128xf32>
    %cst_188 = arith.constant 2.000000e+00 : f32
    %381 = vector.broadcast %cst_188 : f32 to vector<1x128xf32>
    %382 = arith.divf %380, %381 : vector<1x128xf32>
    %cst_189 = arith.constant 9.99999974E-6 : f32
    %383 = vector.broadcast %cst_189 : f32 to vector<1x128xf32>
    %384 = arith.addf %382, %383 : vector<1x128xf32>
    %385 = math.rsqrt %384 : vector<1x128xf32>
    %386 = vector.broadcast %385 : vector<1x128xf32> to vector<2x128xf32>
    %387 = arith.mulf %377, %386 : vector<2x128xf32>
    %388 = vector.broadcast %368 : vector<2x1xf32> to vector<2x128xf32>
    %389 = arith.mulf %387, %388 : vector<2x128xf32>
    %390 = vector.broadcast %370 : vector<2x1xf32> to vector<2x128xf32>
    %391 = arith.addf %389, %390 : vector<2x128xf32>
    %cst_190 = arith.constant dense<0.000000e+00> : vector<2x128xf32>
    %392 = tpu.matmul %360, %391, %cst_190 {dimension_numbers = #tpu.dot_dimension_numbers<[1], [0], [0], [1], [0, 0, 1, 1], [], []>} : vector<2x2xf32>, vector<2x128xf32>, vector<2x128xf32> -> vector<2x128xf32>
    %393 = vector.broadcast %362 : vector<2x1xf32> to vector<2x128xf32>
    %394 = arith.addf %392, %393 : vector<2x128xf32>
    %cst_191 = arith.constant 5.000000e-01 : f32
    %395 = vector.broadcast %cst_191 : f32 to vector<2x128xf32>
    %396 = arith.mulf %395, %394 : vector<2x128xf32>
    %cst_192 = arith.constant 4.471500e-02 : f32
    %397 = vector.broadcast %cst_192 : f32 to vector<2x128xf32>
    %398 = arith.mulf %397, %394 : vector<2x128xf32>
    %399 = arith.mulf %398, %394 : vector<2x128xf32>
    %400 = arith.mulf %399, %394 : vector<2x128xf32>
    %401 = arith.addf %394, %400 : vector<2x128xf32>
    %cst_193 = arith.constant 0.797884583 : f32
    %402 = vector.broadcast %cst_193 : f32 to vector<2x128xf32>
    %403 = arith.mulf %402, %401 : vector<2x128xf32>
    %404 = math.tanh %403 : vector<2x128xf32>
    %cst_194 = arith.constant 1.000000e+00 : f32
    %405 = vector.broadcast %cst_194 : f32 to vector<2x128xf32>
    %406 = arith.addf %405, %404 : vector<2x128xf32>
    %407 = arith.mulf %396, %406 : vector<2x128xf32>
    %cst_195 = arith.constant dense<0.000000e+00> : vector<2x128xf32>
    %408 = tpu.matmul %364, %407, %cst_195 {dimension_numbers = #tpu.dot_dimension_numbers<[1], [0], [0], [1], [0, 0, 1, 1], [], []>} : vector<2x2xf32>, vector<2x128xf32>, vector<2x128xf32> -> vector<2x128xf32>
    %409 = vector.broadcast %366 : vector<2x1xf32> to vector<2x128xf32>
    %410 = arith.addf %408, %409 : vector<2x128xf32>
    %411 = vector.extract_strided_slice %304 {offsets = [0, 0], sizes = [2, 128], strides = [1, 1]} : vector<4x128xf32> to vector<2x128xf32>
    %412 = arith.addf %410, %411 : vector<2x128xf32>
    %413 = vector.extract_strided_slice %358 {offsets = [2, 0], sizes = [2, 128], strides = [1, 1]} : vector<4x128xf32> to vector<2x128xf32>
    %cst_196 = arith.constant dense<0.000000e+00> : vector<128xf32>
    %414 = vector.multi_reduction <add>, %413, %cst_196 [0] : vector<2x128xf32> to vector<128xf32>
    %415 = vector.shape_cast %414 : vector<128xf32> to vector<1x128xf32>
    %cst_197 = arith.constant 2.000000e+00 : f32
    %416 = vector.broadcast %cst_197 : f32 to vector<1x128xf32>
    %417 = arith.divf %415, %416 : vector<1x128xf32>
    %418 = vector.broadcast %417 : vector<1x128xf32> to vector<2x128xf32>
    %419 = arith.subf %413, %418 : vector<2x128xf32>
    %420 = arith.mulf %419, %419 : vector<2x128xf32>
    %cst_198 = arith.constant dense<0.000000e+00> : vector<128xf32>
    %421 = vector.multi_reduction <add>, %420, %cst_198 [0] : vector<2x128xf32> to vector<128xf32>
    %422 = vector.shape_cast %421 : vector<128xf32> to vector<1x128xf32>
    %cst_199 = arith.constant 2.000000e+00 : f32
    %423 = vector.broadcast %cst_199 : f32 to vector<1x128xf32>
    %424 = arith.divf %422, %423 : vector<1x128xf32>
    %cst_200 = arith.constant 9.99999974E-6 : f32
    %425 = vector.broadcast %cst_200 : f32 to vector<1x128xf32>
    %426 = arith.addf %424, %425 : vector<1x128xf32>
    %427 = math.rsqrt %426 : vector<1x128xf32>
    %428 = vector.broadcast %427 : vector<1x128xf32> to vector<2x128xf32>
    %429 = arith.mulf %419, %428 : vector<2x128xf32>
    %430 = vector.broadcast %368 : vector<2x1xf32> to vector<2x128xf32>
    %431 = arith.mulf %429, %430 : vector<2x128xf32>
    %432 = vector.broadcast %370 : vector<2x1xf32> to vector<2x128xf32>
    %433 = arith.addf %431, %432 : vector<2x128xf32>
    %cst_201 = arith.constant dense<0.000000e+00> : vector<2x128xf32>
    %434 = tpu.matmul %360, %433, %cst_201 {dimension_numbers = #tpu.dot_dimension_numbers<[1], [0], [0], [1], [0, 0, 1, 1], [], []>} : vector<2x2xf32>, vector<2x128xf32>, vector<2x128xf32> -> vector<2x128xf32>
    %435 = vector.broadcast %362 : vector<2x1xf32> to vector<2x128xf32>
    %436 = arith.addf %434, %435 : vector<2x128xf32>
    %cst_202 = arith.constant 5.000000e-01 : f32
    %437 = vector.broadcast %cst_202 : f32 to vector<2x128xf32>
    %438 = arith.mulf %437, %436 : vector<2x128xf32>
    %cst_203 = arith.constant 4.471500e-02 : f32
    %439 = vector.broadcast %cst_203 : f32 to vector<2x128xf32>
    %440 = arith.mulf %439, %436 : vector<2x128xf32>
    %441 = arith.mulf %440, %436 : vector<2x128xf32>
    %442 = arith.mulf %441, %436 : vector<2x128xf32>
    %443 = arith.addf %436, %442 : vector<2x128xf32>
    %cst_204 = arith.constant 0.797884583 : f32
    %444 = vector.broadcast %cst_204 : f32 to vector<2x128xf32>
    %445 = arith.mulf %444, %443 : vector<2x128xf32>
    %446 = math.tanh %445 : vector<2x128xf32>
    %cst_205 = arith.constant 1.000000e+00 : f32
    %447 = vector.broadcast %cst_205 : f32 to vector<2x128xf32>
    %448 = arith.addf %447, %446 : vector<2x128xf32>
    %449 = arith.mulf %438, %448 : vector<2x128xf32>
    %cst_206 = arith.constant dense<0.000000e+00> : vector<2x128xf32>
    %450 = tpu.matmul %364, %449, %cst_206 {dimension_numbers = #tpu.dot_dimension_numbers<[1], [0], [0], [1], [0, 0, 1, 1], [], []>} : vector<2x2xf32>, vector<2x128xf32>, vector<2x128xf32> -> vector<2x128xf32>
    %451 = vector.broadcast %366 : vector<2x1xf32> to vector<2x128xf32>
    %452 = arith.addf %450, %451 : vector<2x128xf32>
    %453 = vector.extract_strided_slice %304 {offsets = [2, 0], sizes = [2, 128], strides = [1, 1]} : vector<4x128xf32> to vector<2x128xf32>
    %454 = arith.addf %452, %453 : vector<2x128xf32>
    %455 = tpu.concatenate %412, %454 in 0 : vector<2x128xf32>, vector<2x128xf32> -> vector<4x128xf32>
    %c3 = arith.constant 3 : index
    %c0_207 = arith.constant 0 : index
    %c0_208 = arith.constant 0 : index
    %456 = vector.load %arg2[%c3, %c0_207, %c0_208] : memref<4x1x128xf32, #tpu.memory_space<vmem>>, vector<1x1x128xf32>
    %457 = vector.shape_cast %456 : vector<1x1x128xf32> to vector<1x128xf32>
    %c3_209 = arith.constant 3 : index
    %c0_210 = arith.constant 0 : index
    %c0_211 = arith.constant 0 : index
    %458 = vector.load %arg3[%c3_209, %c0_210, %c0_211] : memref<4x1x128xf32, #tpu.memory_space<vmem>>, vector<1x1x128xf32>
    %459 = vector.shape_cast %458 : vector<1x1x128xf32> to vector<1x128xf32>
    %cst_212 = arith.constant dense<0.000000e+00> : vector<4xf32>
    %460 = vector.multi_reduction <add>, %455, %cst_212 [1] : vector<4x128xf32> to vector<4xf32>
    %461 = vector.shape_cast %460 : vector<4xf32> to vector<4x1xf32>
    %cst_213 = arith.constant 1.280000e+02 : f32
    %462 = vector.broadcast %cst_213 : f32 to vector<4x1xf32>
    %463 = arith.divf %461, %462 : vector<4x1xf32>
    %464 = vector.broadcast %463 : vector<4x1xf32> to vector<4x128xf32>
    %465 = arith.subf %455, %464 : vector<4x128xf32>
    %466 = arith.mulf %465, %465 : vector<4x128xf32>
    %cst_214 = arith.constant dense<0.000000e+00> : vector<4xf32>
    %467 = vector.multi_reduction <add>, %466, %cst_214 [1] : vector<4x128xf32> to vector<4xf32>
    %468 = vector.shape_cast %467 : vector<4xf32> to vector<4x1xf32>
    %cst_215 = arith.constant 1.280000e+02 : f32
    %469 = vector.broadcast %cst_215 : f32 to vector<4x1xf32>
    %470 = arith.divf %468, %469 : vector<4x1xf32>
    %cst_216 = arith.constant 9.99999974E-6 : f32
    %471 = vector.broadcast %cst_216 : f32 to vector<4x1xf32>
    %472 = arith.addf %470, %471 : vector<4x1xf32>
    %473 = math.rsqrt %472 : vector<4x1xf32>
    %474 = vector.broadcast %473 : vector<4x1xf32> to vector<4x128xf32>
    %475 = arith.mulf %465, %474 : vector<4x128xf32>
    %476 = vector.broadcast %457 : vector<1x128xf32> to vector<4x128xf32>
    %477 = arith.mulf %475, %476 : vector<4x128xf32>
    %478 = vector.broadcast %459 : vector<1x128xf32> to vector<4x128xf32>
    %479 = arith.addf %477, %478 : vector<4x128xf32>
    %480 = arith.truncf %479 : vector<4x128xf32> to vector<4x128xbf16>
    %c3_217 = arith.constant 3 : index
    %c0_218 = arith.constant 0 : index
    %c0_219 = arith.constant 0 : index
    %481 = vector.load %arg4[%c3_217, %c0_218, %c0_219] : memref<4x128x128xbf16, #tpu.memory_space<vmem>>, vector<1x128x128xbf16>
    %482 = vector.shape_cast %481 : vector<1x128x128xbf16> to vector<128x128xbf16>
    %cst_220 = arith.constant dense<0.000000e+00> : vector<4x128xf32>
    %483 = tpu.matmul %480, %482, %cst_220 {dimension_numbers = #tpu.dot_dimension_numbers<[1], [0], [0], [1], [0, 0, 1, 1], [], []>} : vector<4x128xbf16>, vector<128x128xbf16>, vector<4x128xf32> -> vector<4x128xf32>
    %c3_221 = arith.constant 3 : index
    %c0_222 = arith.constant 0 : index
    %c0_223 = arith.constant 0 : index
    %484 = vector.load %arg5[%c3_221, %c0_222, %c0_223] : memref<4x1x128xf32, #tpu.memory_space<vmem>>, vector<1x1x128xf32>
    %485 = vector.shape_cast %484 : vector<1x1x128xf32> to vector<1x128xf32>
    %486 = vector.broadcast %485 : vector<1x128xf32> to vector<4x128xf32>
    %487 = arith.addf %483, %486 : vector<4x128xf32>
    %cst_224 = arith.constant 5.000000e-01 : f32
    %488 = vector.broadcast %cst_224 : f32 to vector<4x128xf32>
    %489 = arith.mulf %488, %487 : vector<4x128xf32>
    %cst_225 = arith.constant 4.471500e-02 : f32
    %490 = vector.broadcast %cst_225 : f32 to vector<4x128xf32>
    %491 = arith.mulf %490, %487 : vector<4x128xf32>
    %492 = arith.mulf %491, %487 : vector<4x128xf32>
    %493 = arith.mulf %492, %487 : vector<4x128xf32>
    %494 = arith.addf %487, %493 : vector<4x128xf32>
    %cst_226 = arith.constant 0.797884583 : f32
    %495 = vector.broadcast %cst_226 : f32 to vector<4x128xf32>
    %496 = arith.mulf %495, %494 : vector<4x128xf32>
    %497 = math.tanh %496 : vector<4x128xf32>
    %cst_227 = arith.constant 1.000000e+00 : f32
    %498 = vector.broadcast %cst_227 : f32 to vector<4x128xf32>
    %499 = arith.addf %498, %497 : vector<4x128xf32>
    %500 = arith.mulf %489, %499 : vector<4x128xf32>
    %501 = arith.truncf %500 : vector<4x128xf32> to vector<4x128xbf16>
    %c3_228 = arith.constant 3 : index
    %c0_229 = arith.constant 0 : index
    %c0_230 = arith.constant 0 : index
    %502 = vector.load %arg6[%c3_228, %c0_229, %c0_230] : memref<4x128x128xbf16, #tpu.memory_space<vmem>>, vector<1x128x128xbf16>
    %503 = vector.shape_cast %502 : vector<1x128x128xbf16> to vector<128x128xbf16>
    %cst_231 = arith.constant dense<0.000000e+00> : vector<4x128xf32>
    %504 = tpu.matmul %501, %503, %cst_231 {dimension_numbers = #tpu.dot_dimension_numbers<[1], [0], [0], [1], [0, 0, 1, 1], [], []>} : vector<4x128xbf16>, vector<128x128xbf16>, vector<4x128xf32> -> vector<4x128xf32>
    %c3_232 = arith.constant 3 : index
    %c0_233 = arith.constant 0 : index
    %c0_234 = arith.constant 0 : index
    %505 = vector.load %arg7[%c3_232, %c0_233, %c0_234] : memref<4x1x128xf32, #tpu.memory_space<vmem>>, vector<1x1x128xf32>
    %506 = vector.shape_cast %505 : vector<1x1x128xf32> to vector<1x128xf32>
    %507 = vector.broadcast %506 : vector<1x128xf32> to vector<4x128xf32>
    %508 = arith.addf %504, %507 : vector<4x128xf32>
    %509 = arith.addf %508, %358 : vector<4x128xf32>
    %c3_235 = arith.constant 3 : index
    %c0_236 = arith.constant 0 : index
    %c0_237 = arith.constant 0 : index
    %510 = vector.load %arg10[%c3_235, %c0_236, %c0_237] : memref<4x2x2xf32, #tpu.memory_space<vmem>>, vector<1x2x2xf32>
    %511 = vector.shape_cast %510 : vector<1x2x2xf32> to vector<2x2xf32>
    %c3_238 = arith.constant 3 : index
    %c0_239 = arith.constant 0 : index
    %c0_240 = arith.constant 0 : index
    %512 = vector.load %arg11[%c3_238, %c0_239, %c0_240] : memref<4x2x1xf32, #tpu.memory_space<vmem>>, vector<1x2x1xf32>
    %513 = vector.shape_cast %512 : vector<1x2x1xf32> to vector<2x1xf32>
    %c3_241 = arith.constant 3 : index
    %c0_242 = arith.constant 0 : index
    %c0_243 = arith.constant 0 : index
    %514 = vector.load %arg12[%c3_241, %c0_242, %c0_243] : memref<4x2x2xf32, #tpu.memory_space<vmem>>, vector<1x2x2xf32>
    %515 = vector.shape_cast %514 : vector<1x2x2xf32> to vector<2x2xf32>
    %c3_244 = arith.constant 3 : index
    %c0_245 = arith.constant 0 : index
    %c0_246 = arith.constant 0 : index
    %516 = vector.load %arg13[%c3_244, %c0_245, %c0_246] : memref<4x2x1xf32, #tpu.memory_space<vmem>>, vector<1x2x1xf32>
    %517 = vector.shape_cast %516 : vector<1x2x1xf32> to vector<2x1xf32>
    %c3_247 = arith.constant 3 : index
    %c0_248 = arith.constant 0 : index
    %c0_249 = arith.constant 0 : index
    %518 = vector.load %arg8[%c3_247, %c0_248, %c0_249] : memref<4x2x1xf32, #tpu.memory_space<vmem>>, vector<1x2x1xf32>
    %519 = vector.shape_cast %518 : vector<1x2x1xf32> to vector<2x1xf32>
    %c3_250 = arith.constant 3 : index
    %c0_251 = arith.constant 0 : index
    %c0_252 = arith.constant 0 : index
    %520 = vector.load %arg9[%c3_250, %c0_251, %c0_252] : memref<4x2x1xf32, #tpu.memory_space<vmem>>, vector<1x2x1xf32>
    %521 = vector.shape_cast %520 : vector<1x2x1xf32> to vector<2x1xf32>
    %522 = vector.extract_strided_slice %509 {offsets = [0, 0], sizes = [2, 128], strides = [1, 1]} : vector<4x128xf32> to vector<2x128xf32>
    %cst_253 = arith.constant dense<0.000000e+00> : vector<128xf32>
    %523 = vector.multi_reduction <add>, %522, %cst_253 [0] : vector<2x128xf32> to vector<128xf32>
    %524 = vector.shape_cast %523 : vector<128xf32> to vector<1x128xf32>
    %cst_254 = arith.constant 2.000000e+00 : f32
    %525 = vector.broadcast %cst_254 : f32 to vector<1x128xf32>
    %526 = arith.divf %524, %525 : vector<1x128xf32>
    %527 = vector.broadcast %526 : vector<1x128xf32> to vector<2x128xf32>
    %528 = arith.subf %522, %527 : vector<2x128xf32>
    %529 = arith.mulf %528, %528 : vector<2x128xf32>
    %cst_255 = arith.constant dense<0.000000e+00> : vector<128xf32>
    %530 = vector.multi_reduction <add>, %529, %cst_255 [0] : vector<2x128xf32> to vector<128xf32>
    %531 = vector.shape_cast %530 : vector<128xf32> to vector<1x128xf32>
    %cst_256 = arith.constant 2.000000e+00 : f32
    %532 = vector.broadcast %cst_256 : f32 to vector<1x128xf32>
    %533 = arith.divf %531, %532 : vector<1x128xf32>
    %cst_257 = arith.constant 9.99999974E-6 : f32
    %534 = vector.broadcast %cst_257 : f32 to vector<1x128xf32>
    %535 = arith.addf %533, %534 : vector<1x128xf32>
    %536 = math.rsqrt %535 : vector<1x128xf32>
    %537 = vector.broadcast %536 : vector<1x128xf32> to vector<2x128xf32>
    %538 = arith.mulf %528, %537 : vector<2x128xf32>
    %539 = vector.broadcast %519 : vector<2x1xf32> to vector<2x128xf32>
    %540 = arith.mulf %538, %539 : vector<2x128xf32>
    %541 = vector.broadcast %521 : vector<2x1xf32> to vector<2x128xf32>
    %542 = arith.addf %540, %541 : vector<2x128xf32>
    %cst_258 = arith.constant dense<0.000000e+00> : vector<2x128xf32>
    %543 = tpu.matmul %511, %542, %cst_258 {dimension_numbers = #tpu.dot_dimension_numbers<[1], [0], [0], [1], [0, 0, 1, 1], [], []>} : vector<2x2xf32>, vector<2x128xf32>, vector<2x128xf32> -> vector<2x128xf32>
    %544 = vector.broadcast %513 : vector<2x1xf32> to vector<2x128xf32>
    %545 = arith.addf %543, %544 : vector<2x128xf32>
    %cst_259 = arith.constant 5.000000e-01 : f32
    %546 = vector.broadcast %cst_259 : f32 to vector<2x128xf32>
    %547 = arith.mulf %546, %545 : vector<2x128xf32>
    %cst_260 = arith.constant 4.471500e-02 : f32
    %548 = vector.broadcast %cst_260 : f32 to vector<2x128xf32>
    %549 = arith.mulf %548, %545 : vector<2x128xf32>
    %550 = arith.mulf %549, %545 : vector<2x128xf32>
    %551 = arith.mulf %550, %545 : vector<2x128xf32>
    %552 = arith.addf %545, %551 : vector<2x128xf32>
    %cst_261 = arith.constant 0.797884583 : f32
    %553 = vector.broadcast %cst_261 : f32 to vector<2x128xf32>
    %554 = arith.mulf %553, %552 : vector<2x128xf32>
    %555 = math.tanh %554 : vector<2x128xf32>
    %cst_262 = arith.constant 1.000000e+00 : f32
    %556 = vector.broadcast %cst_262 : f32 to vector<2x128xf32>
    %557 = arith.addf %556, %555 : vector<2x128xf32>
    %558 = arith.mulf %547, %557 : vector<2x128xf32>
    %cst_263 = arith.constant dense<0.000000e+00> : vector<2x128xf32>
    %559 = tpu.matmul %515, %558, %cst_263 {dimension_numbers = #tpu.dot_dimension_numbers<[1], [0], [0], [1], [0, 0, 1, 1], [], []>} : vector<2x2xf32>, vector<2x128xf32>, vector<2x128xf32> -> vector<2x128xf32>
    %560 = vector.broadcast %517 : vector<2x1xf32> to vector<2x128xf32>
    %561 = arith.addf %559, %560 : vector<2x128xf32>
    %562 = vector.extract_strided_slice %455 {offsets = [0, 0], sizes = [2, 128], strides = [1, 1]} : vector<4x128xf32> to vector<2x128xf32>
    %563 = arith.addf %561, %562 : vector<2x128xf32>
    %564 = vector.extract_strided_slice %509 {offsets = [2, 0], sizes = [2, 128], strides = [1, 1]} : vector<4x128xf32> to vector<2x128xf32>
    %cst_264 = arith.constant dense<0.000000e+00> : vector<128xf32>
    %565 = vector.multi_reduction <add>, %564, %cst_264 [0] : vector<2x128xf32> to vector<128xf32>
    %566 = vector.shape_cast %565 : vector<128xf32> to vector<1x128xf32>
    %cst_265 = arith.constant 2.000000e+00 : f32
    %567 = vector.broadcast %cst_265 : f32 to vector<1x128xf32>
    %568 = arith.divf %566, %567 : vector<1x128xf32>
    %569 = vector.broadcast %568 : vector<1x128xf32> to vector<2x128xf32>
    %570 = arith.subf %564, %569 : vector<2x128xf32>
    %571 = arith.mulf %570, %570 : vector<2x128xf32>
    %cst_266 = arith.constant dense<0.000000e+00> : vector<128xf32>
    %572 = vector.multi_reduction <add>, %571, %cst_266 [0] : vector<2x128xf32> to vector<128xf32>
    %573 = vector.shape_cast %572 : vector<128xf32> to vector<1x128xf32>
    %cst_267 = arith.constant 2.000000e+00 : f32
    %574 = vector.broadcast %cst_267 : f32 to vector<1x128xf32>
    %575 = arith.divf %573, %574 : vector<1x128xf32>
    %cst_268 = arith.constant 9.99999974E-6 : f32
    %576 = vector.broadcast %cst_268 : f32 to vector<1x128xf32>
    %577 = arith.addf %575, %576 : vector<1x128xf32>
    %578 = math.rsqrt %577 : vector<1x128xf32>
    %579 = vector.broadcast %578 : vector<1x128xf32> to vector<2x128xf32>
    %580 = arith.mulf %570, %579 : vector<2x128xf32>
    %581 = vector.broadcast %519 : vector<2x1xf32> to vector<2x128xf32>
    %582 = arith.mulf %580, %581 : vector<2x128xf32>
    %583 = vector.broadcast %521 : vector<2x1xf32> to vector<2x128xf32>
    %584 = arith.addf %582, %583 : vector<2x128xf32>
    %cst_269 = arith.constant dense<0.000000e+00> : vector<2x128xf32>
    %585 = tpu.matmul %511, %584, %cst_269 {dimension_numbers = #tpu.dot_dimension_numbers<[1], [0], [0], [1], [0, 0, 1, 1], [], []>} : vector<2x2xf32>, vector<2x128xf32>, vector<2x128xf32> -> vector<2x128xf32>
    %586 = vector.broadcast %513 : vector<2x1xf32> to vector<2x128xf32>
    %587 = arith.addf %585, %586 : vector<2x128xf32>
    %cst_270 = arith.constant 5.000000e-01 : f32
    %588 = vector.broadcast %cst_270 : f32 to vector<2x128xf32>
    %589 = arith.mulf %588, %587 : vector<2x128xf32>
    %cst_271 = arith.constant 4.471500e-02 : f32
    %590 = vector.broadcast %cst_271 : f32 to vector<2x128xf32>
    %591 = arith.mulf %590, %587 : vector<2x128xf32>
    %592 = arith.mulf %591, %587 : vector<2x128xf32>
    %593 = arith.mulf %592, %587 : vector<2x128xf32>
    %594 = arith.addf %587, %593 : vector<2x128xf32>
    %cst_272 = arith.constant 0.797884583 : f32
    %595 = vector.broadcast %cst_272 : f32 to vector<2x128xf32>
    %596 = arith.mulf %595, %594 : vector<2x128xf32>
    %597 = math.tanh %596 : vector<2x128xf32>
    %cst_273 = arith.constant 1.000000e+00 : f32
    %598 = vector.broadcast %cst_273 : f32 to vector<2x128xf32>
    %599 = arith.addf %598, %597 : vector<2x128xf32>
    %600 = arith.mulf %589, %599 : vector<2x128xf32>
    %cst_274 = arith.constant dense<0.000000e+00> : vector<2x128xf32>
    %601 = tpu.matmul %515, %600, %cst_274 {dimension_numbers = #tpu.dot_dimension_numbers<[1], [0], [0], [1], [0, 0, 1, 1], [], []>} : vector<2x2xf32>, vector<2x128xf32>, vector<2x128xf32> -> vector<2x128xf32>
    %602 = vector.broadcast %517 : vector<2x1xf32> to vector<2x128xf32>
    %603 = arith.addf %601, %602 : vector<2x128xf32>
    %604 = vector.extract_strided_slice %455 {offsets = [2, 0], sizes = [2, 128], strides = [1, 1]} : vector<4x128xf32> to vector<2x128xf32>
    %605 = arith.addf %603, %604 : vector<2x128xf32>
    %606 = tpu.concatenate %563, %605 in 0 : vector<2x128xf32>, vector<2x128xf32> -> vector<4x128xf32>
    %c0_275 = arith.constant 0 : index
    %c0_276 = arith.constant 0 : index
    %607 = vector.load %arg15[%c0_275, %c0_276] : memref<1x128xf32, #tpu.memory_space<vmem>>, vector<1x128xf32>
    %c0_277 = arith.constant 0 : index
    %c0_278 = arith.constant 0 : index
    %608 = vector.load %arg21[%c0_277, %c0_278] : memref<1x3136xf32, #tpu.memory_space<vmem>>, vector<1x3136xf32>
    %609 = vector.extract_strided_slice %606 {offsets = [0, 0], sizes = [1, 128], strides = [1, 1]} : vector<4x128xf32> to vector<1x128xf32>
    %610 = vector.extract_strided_slice %606 {offsets = [2, 0], sizes = [1, 128], strides = [1, 1]} : vector<4x128xf32> to vector<1x128xf32>
    %611 = tpu.concatenate %609, %610 in 0 : vector<1x128xf32>, vector<1x128xf32> -> vector<2x128xf32>
    %612 = arith.truncf %611 : vector<2x128xf32> to vector<2x128xbf16>
    %c0_279 = arith.constant 0 : index
    %c0_280 = arith.constant 0 : index
    %c0_281 = arith.constant 0 : index
    %613 = vector.load %arg14[%c0_279, %c0_280, %c0_281] : memref<2x128x128xbf16, #tpu.memory_space<vmem>>, vector<1x128x128xbf16>
    %614 = vector.shape_cast %613 : vector<1x128x128xbf16> to vector<128x128xbf16>
    %cst_282 = arith.constant dense<0.000000e+00> : vector<2x128xf32>
    %615 = tpu.matmul %612, %614, %cst_282 {dimension_numbers = #tpu.dot_dimension_numbers<[1], [0], [0], [1], [0, 0, 1, 1], [], []>} : vector<2x128xbf16>, vector<128x128xbf16>, vector<2x128xf32> -> vector<2x128xf32>
    %616 = vector.broadcast %607 : vector<1x128xf32> to vector<2x128xf32>
    %617 = arith.addf %616, %615 : vector<2x128xf32>
    %c0_283 = arith.constant 0 : index
    %c0_284 = arith.constant 0 : index
    %c0_285 = arith.constant 0 : index
    %618 = vector.load %arg20[%c0_283, %c0_284, %c0_285] : memref<2x128x3136xbf16, #tpu.memory_space<vmem>>, vector<1x128x3136xbf16>
    %619 = vector.shape_cast %618 : vector<1x128x3136xbf16> to vector<128x3136xbf16>
    %cst_286 = arith.constant dense<0.000000e+00> : vector<2x3136xf32>
    %620 = tpu.matmul %612, %619, %cst_286 {dimension_numbers = #tpu.dot_dimension_numbers<[1], [0], [0], [1], [0, 0, 1, 1], [], []>} : vector<2x128xbf16>, vector<128x3136xbf16>, vector<2x3136xf32> -> vector<2x3136xf32>
    %621 = vector.broadcast %608 : vector<1x3136xf32> to vector<2x3136xf32>
    %622 = arith.addf %621, %620 : vector<2x3136xf32>
    %623 = vector.extract_strided_slice %606 {offsets = [1, 0], sizes = [1, 128], strides = [1, 1]} : vector<4x128xf32> to vector<1x128xf32>
    %624 = vector.extract_strided_slice %606 {offsets = [3, 0], sizes = [1, 128], strides = [1, 1]} : vector<4x128xf32> to vector<1x128xf32>
    %625 = tpu.concatenate %623, %624 in 0 : vector<1x128xf32>, vector<1x128xf32> -> vector<2x128xf32>
    %626 = arith.truncf %625 : vector<2x128xf32> to vector<2x128xbf16>
    %c1_287 = arith.constant 1 : index
    %c0_288 = arith.constant 0 : index
    %c0_289 = arith.constant 0 : index
    %627 = vector.load %arg14[%c1_287, %c0_288, %c0_289] : memref<2x128x128xbf16, #tpu.memory_space<vmem>>, vector<1x128x128xbf16>
    %628 = vector.shape_cast %627 : vector<1x128x128xbf16> to vector<128x128xbf16>
    %cst_290 = arith.constant dense<0.000000e+00> : vector<2x128xf32>
    %629 = tpu.matmul %626, %628, %cst_290 {dimension_numbers = #tpu.dot_dimension_numbers<[1], [0], [0], [1], [0, 0, 1, 1], [], []>} : vector<2x128xbf16>, vector<128x128xbf16>, vector<2x128xf32> -> vector<2x128xf32>
    %630 = arith.addf %617, %629 : vector<2x128xf32>
    %c1_291 = arith.constant 1 : index
    %c0_292 = arith.constant 0 : index
    %c0_293 = arith.constant 0 : index
    %631 = vector.load %arg20[%c1_291, %c0_292, %c0_293] : memref<2x128x3136xbf16, #tpu.memory_space<vmem>>, vector<1x128x3136xbf16>
    %632 = vector.shape_cast %631 : vector<1x128x3136xbf16> to vector<128x3136xbf16>
    %cst_294 = arith.constant dense<0.000000e+00> : vector<2x3136xf32>
    %633 = tpu.matmul %626, %632, %cst_294 {dimension_numbers = #tpu.dot_dimension_numbers<[1], [0], [0], [1], [0, 0, 1, 1], [], []>} : vector<2x128xbf16>, vector<128x3136xbf16>, vector<2x3136xf32> -> vector<2x3136xf32>
    %634 = arith.addf %622, %633 : vector<2x3136xf32>
    %c0_295 = arith.constant 0 : index
    %c0_296 = arith.constant 0 : index
    %635 = vector.load %arg24[%c0_295, %c0_296] : memref<2x128xf32, #tpu.memory_space<vmem>>, vector<2x128xf32>
    tpu.vector_store %arg24[%c0_295, %c0_296], %630 {strides = array<i32>} : memref<2x128xf32, #tpu.memory_space<vmem>>, vector<2x128xf32>,
    %c0_297 = arith.constant 0 : index
    %c0_298 = arith.constant 0 : index
    %c0_299 = arith.constant 0 : index
    %636 = vector.load %arg16[%c0_297, %c0_298, %c0_299] : memref<3x1x128xf32, #tpu.memory_space<vmem>>, vector<1x1x128xf32>
    %637 = vector.shape_cast %636 : vector<1x1x128xf32> to vector<1x128xf32>
    %c0_300 = arith.constant 0 : index
    %c0_301 = arith.constant 0 : index
    %c0_302 = arith.constant 0 : index
    %638 = vector.load %arg17[%c0_300, %c0_301, %c0_302] : memref<3x1x128xf32, #tpu.memory_space<vmem>>, vector<1x1x128xf32>
    %639 = vector.shape_cast %638 : vector<1x1x128xf32> to vector<1x128xf32>
    %cst_303 = arith.constant dense<0.000000e+00> : vector<2xf32>
    %640 = vector.multi_reduction <add>, %630, %cst_303 [1] : vector<2x128xf32> to vector<2xf32>
    %641 = vector.shape_cast %640 : vector<2xf32> to vector<2x1xf32>
    %cst_304 = arith.constant 1.280000e+02 : f32
    %642 = vector.broadcast %cst_304 : f32 to vector<2x1xf32>
    %643 = arith.divf %641, %642 : vector<2x1xf32>
    %644 = vector.broadcast %643 : vector<2x1xf32> to vector<2x128xf32>
    %645 = arith.subf %630, %644 : vector<2x128xf32>
    %646 = arith.mulf %645, %645 : vector<2x128xf32>
    %cst_305 = arith.constant dense<0.000000e+00> : vector<2xf32>
    %647 = vector.multi_reduction <add>, %646, %cst_305 [1] : vector<2x128xf32> to vector<2xf32>
    %648 = vector.shape_cast %647 : vector<2xf32> to vector<2x1xf32>
    %cst_306 = arith.constant 1.280000e+02 : f32
    %649 = vector.broadcast %cst_306 : f32 to vector<2x1xf32>
    %650 = arith.divf %648, %649 : vector<2x1xf32>
    %cst_307 = arith.constant 9.99999974E-6 : f32
    %651 = vector.broadcast %cst_307 : f32 to vector<2x1xf32>
    %652 = arith.addf %650, %651 : vector<2x1xf32>
    %653 = math.rsqrt %652 : vector<2x1xf32>
    %654 = vector.broadcast %653 : vector<2x1xf32> to vector<2x128xf32>
    %655 = arith.mulf %645, %654 : vector<2x128xf32>
    %656 = vector.broadcast %637 : vector<1x128xf32> to vector<2x128xf32>
    %657 = arith.mulf %655, %656 : vector<2x128xf32>
    %658 = vector.broadcast %639 : vector<1x128xf32> to vector<2x128xf32>
    %659 = arith.addf %657, %658 : vector<2x128xf32>
    %cst_308 = arith.constant 5.000000e-01 : f32
    %660 = vector.broadcast %cst_308 : f32 to vector<2x128xf32>
    %661 = arith.mulf %660, %659 : vector<2x128xf32>
    %cst_309 = arith.constant 4.471500e-02 : f32
    %662 = vector.broadcast %cst_309 : f32 to vector<2x128xf32>
    %663 = arith.mulf %662, %659 : vector<2x128xf32>
    %664 = arith.mulf %663, %659 : vector<2x128xf32>
    %665 = arith.mulf %664, %659 : vector<2x128xf32>
    %666 = arith.addf %659, %665 : vector<2x128xf32>
    %cst_310 = arith.constant 0.797884583 : f32
    %667 = vector.broadcast %cst_310 : f32 to vector<2x128xf32>
    %668 = arith.mulf %667, %666 : vector<2x128xf32>
    %669 = math.tanh %668 : vector<2x128xf32>
    %cst_311 = arith.constant 1.000000e+00 : f32
    %670 = vector.broadcast %cst_311 : f32 to vector<2x128xf32>
    %671 = arith.addf %670, %669 : vector<2x128xf32>
    %672 = arith.mulf %661, %671 : vector<2x128xf32>
    %673 = arith.truncf %672 : vector<2x128xf32> to vector<2x128xbf16>
    %c0_312 = arith.constant 0 : index
    %c0_313 = arith.constant 0 : index
    %c0_314 = arith.constant 0 : index
    %674 = vector.load %arg18[%c0_312, %c0_313, %c0_314] : memref<3x128x128xbf16, #tpu.memory_space<vmem>>, vector<1x128x128xbf16>
    %675 = vector.shape_cast %674 : vector<1x128x128xbf16> to vector<128x128xbf16>
    %cst_315 = arith.constant dense<0.000000e+00> : vector<2x128xf32>
    %676 = tpu.matmul %673, %675, %cst_315 {dimension_numbers = #tpu.dot_dimension_numbers<[1], [0], [0], [1], [0, 0, 1, 1], [], []>} : vector<2x128xbf16>, vector<128x128xbf16>, vector<2x128xf32> -> vector<2x128xf32>
    %c0_316 = arith.constant 0 : index
    %c0_317 = arith.constant 0 : index
    %c0_318 = arith.constant 0 : index
    %677 = vector.load %arg19[%c0_316, %c0_317, %c0_318] : memref<3x1x128xf32, #tpu.memory_space<vmem>>, vector<1x1x128xf32>
    %678 = vector.shape_cast %677 : vector<1x1x128xf32> to vector<1x128xf32>
    %679 = vector.broadcast %678 : vector<1x128xf32> to vector<2x128xf32>
    %680 = arith.addf %676, %679 : vector<2x128xf32>
    %c1_319 = arith.constant 1 : index
    %c0_320 = arith.constant 0 : index
    %c0_321 = arith.constant 0 : index
    %681 = vector.load %arg16[%c1_319, %c0_320, %c0_321] : memref<3x1x128xf32, #tpu.memory_space<vmem>>, vector<1x1x128xf32>
    %682 = vector.shape_cast %681 : vector<1x1x128xf32> to vector<1x128xf32>
    %c1_322 = arith.constant 1 : index
    %c0_323 = arith.constant 0 : index
    %c0_324 = arith.constant 0 : index
    %683 = vector.load %arg17[%c1_322, %c0_323, %c0_324] : memref<3x1x128xf32, #tpu.memory_space<vmem>>, vector<1x1x128xf32>
    %684 = vector.shape_cast %683 : vector<1x1x128xf32> to vector<1x128xf32>
    %cst_325 = arith.constant dense<0.000000e+00> : vector<2xf32>
    %685 = vector.multi_reduction <add>, %680, %cst_325 [1] : vector<2x128xf32> to vector<2xf32>
    %686 = vector.shape_cast %685 : vector<2xf32> to vector<2x1xf32>
    %cst_326 = arith.constant 1.280000e+02 : f32
    %687 = vector.broadcast %cst_326 : f32 to vector<2x1xf32>
    %688 = arith.divf %686, %687 : vector<2x1xf32>
    %689 = vector.broadcast %688 : vector<2x1xf32> to vector<2x128xf32>
    %690 = arith.subf %680, %689 : vector<2x128xf32>
    %691 = arith.mulf %690, %690 : vector<2x128xf32>
    %cst_327 = arith.constant dense<0.000000e+00> : vector<2xf32>
    %692 = vector.multi_reduction <add>, %691, %cst_327 [1] : vector<2x128xf32> to vector<2xf32>
    %693 = vector.shape_cast %692 : vector<2xf32> to vector<2x1xf32>
    %cst_328 = arith.constant 1.280000e+02 : f32
    %694 = vector.broadcast %cst_328 : f32 to vector<2x1xf32>
    %695 = arith.divf %693, %694 : vector<2x1xf32>
    %cst_329 = arith.constant 9.99999974E-6 : f32
    %696 = vector.broadcast %cst_329 : f32 to vector<2x1xf32>
    %697 = arith.addf %695, %696 : vector<2x1xf32>
    %698 = math.rsqrt %697 : vector<2x1xf32>
    %699 = vector.broadcast %698 : vector<2x1xf32> to vector<2x128xf32>
    %700 = arith.mulf %690, %699 : vector<2x128xf32>
    %701 = vector.broadcast %682 : vector<1x128xf32> to vector<2x128xf32>
    %702 = arith.mulf %700, %701 : vector<2x128xf32>
    %703 = vector.broadcast %684 : vector<1x128xf32> to vector<2x128xf32>
    %704 = arith.addf %702, %703 : vector<2x128xf32>
    %cst_330 = arith.constant 5.000000e-01 : f32
    %705 = vector.broadcast %cst_330 : f32 to vector<2x128xf32>
    %706 = arith.mulf %705, %704 : vector<2x128xf32>
    %cst_331 = arith.constant 4.471500e-02 : f32
    %707 = vector.broadcast %cst_331 : f32 to vector<2x128xf32>
    %708 = arith.mulf %707, %704 : vector<2x128xf32>
    %709 = arith.mulf %708, %704 : vector<2x128xf32>
    %710 = arith.mulf %709, %704 : vector<2x128xf32>
    %711 = arith.addf %704, %710 : vector<2x128xf32>
    %cst_332 = arith.constant 0.797884583 : f32
    %712 = vector.broadcast %cst_332 : f32 to vector<2x128xf32>
    %713 = arith.mulf %712, %711 : vector<2x128xf32>
    %714 = math.tanh %713 : vector<2x128xf32>
    %cst_333 = arith.constant 1.000000e+00 : f32
    %715 = vector.broadcast %cst_333 : f32 to vector<2x128xf32>
    %716 = arith.addf %715, %714 : vector<2x128xf32>
    %717 = arith.mulf %706, %716 : vector<2x128xf32>
    %718 = arith.truncf %717 : vector<2x128xf32> to vector<2x128xbf16>
    %c1_334 = arith.constant 1 : index
    %c0_335 = arith.constant 0 : index
    %c0_336 = arith.constant 0 : index
    %719 = vector.load %arg18[%c1_334, %c0_335, %c0_336] : memref<3x128x128xbf16, #tpu.memory_space<vmem>>, vector<1x128x128xbf16>
    %720 = vector.shape_cast %719 : vector<1x128x128xbf16> to vector<128x128xbf16>
    %cst_337 = arith.constant dense<0.000000e+00> : vector<2x128xf32>
    %721 = tpu.matmul %718, %720, %cst_337 {dimension_numbers = #tpu.dot_dimension_numbers<[1], [0], [0], [1], [0, 0, 1, 1], [], []>} : vector<2x128xbf16>, vector<128x128xbf16>, vector<2x128xf32> -> vector<2x128xf32>
    %c1_338 = arith.constant 1 : index
    %c0_339 = arith.constant 0 : index
    %c0_340 = arith.constant 0 : index
    %722 = vector.load %arg19[%c1_338, %c0_339, %c0_340] : memref<3x1x128xf32, #tpu.memory_space<vmem>>, vector<1x1x128xf32>
    %723 = vector.shape_cast %722 : vector<1x1x128xf32> to vector<1x128xf32>
    %724 = vector.broadcast %723 : vector<1x128xf32> to vector<2x128xf32>
    %725 = arith.addf %721, %724 : vector<2x128xf32>
    %c2_341 = arith.constant 2 : index
    %c0_342 = arith.constant 0 : index
    %c0_343 = arith.constant 0 : index
    %726 = vector.load %arg16[%c2_341, %c0_342, %c0_343] : memref<3x1x128xf32, #tpu.memory_space<vmem>>, vector<1x1x128xf32>
    %727 = vector.shape_cast %726 : vector<1x1x128xf32> to vector<1x128xf32>
    %c2_344 = arith.constant 2 : index
    %c0_345 = arith.constant 0 : index
    %c0_346 = arith.constant 0 : index
    %728 = vector.load %arg17[%c2_344, %c0_345, %c0_346] : memref<3x1x128xf32, #tpu.memory_space<vmem>>, vector<1x1x128xf32>
    %729 = vector.shape_cast %728 : vector<1x1x128xf32> to vector<1x128xf32>
    %cst_347 = arith.constant dense<0.000000e+00> : vector<2xf32>
    %730 = vector.multi_reduction <add>, %725, %cst_347 [1] : vector<2x128xf32> to vector<2xf32>
    %731 = vector.shape_cast %730 : vector<2xf32> to vector<2x1xf32>
    %cst_348 = arith.constant 1.280000e+02 : f32
    %732 = vector.broadcast %cst_348 : f32 to vector<2x1xf32>
    %733 = arith.divf %731, %732 : vector<2x1xf32>
    %734 = vector.broadcast %733 : vector<2x1xf32> to vector<2x128xf32>
    %735 = arith.subf %725, %734 : vector<2x128xf32>
    %736 = arith.mulf %735, %735 : vector<2x128xf32>
    %cst_349 = arith.constant dense<0.000000e+00> : vector<2xf32>
    %737 = vector.multi_reduction <add>, %736, %cst_349 [1] : vector<2x128xf32> to vector<2xf32>
    %738 = vector.shape_cast %737 : vector<2xf32> to vector<2x1xf32>
    %cst_350 = arith.constant 1.280000e+02 : f32
    %739 = vector.broadcast %cst_350 : f32 to vector<2x1xf32>
    %740 = arith.divf %738, %739 : vector<2x1xf32>
    %cst_351 = arith.constant 9.99999974E-6 : f32
    %741 = vector.broadcast %cst_351 : f32 to vector<2x1xf32>
    %742 = arith.addf %740, %741 : vector<2x1xf32>
    %743 = math.rsqrt %742 : vector<2x1xf32>
    %744 = vector.broadcast %743 : vector<2x1xf32> to vector<2x128xf32>
    %745 = arith.mulf %735, %744 : vector<2x128xf32>
    %746 = vector.broadcast %727 : vector<1x128xf32> to vector<2x128xf32>
    %747 = arith.mulf %745, %746 : vector<2x128xf32>
    %748 = vector.broadcast %729 : vector<1x128xf32> to vector<2x128xf32>
    %749 = arith.addf %747, %748 : vector<2x128xf32>
    %cst_352 = arith.constant 5.000000e-01 : f32
    %750 = vector.broadcast %cst_352 : f32 to vector<2x128xf32>
    %751 = arith.mulf %750, %749 : vector<2x128xf32>
    %cst_353 = arith.constant 4.471500e-02 : f32
    %752 = vector.broadcast %cst_353 : f32 to vector<2x128xf32>
    %753 = arith.mulf %752, %749 : vector<2x128xf32>
    %754 = arith.mulf %753, %749 : vector<2x128xf32>
    %755 = arith.mulf %754, %749 : vector<2x128xf32>
    %756 = arith.addf %749, %755 : vector<2x128xf32>
    %cst_354 = arith.constant 0.797884583 : f32
    %757 = vector.broadcast %cst_354 : f32 to vector<2x128xf32>
    %758 = arith.mulf %757, %756 : vector<2x128xf32>
    %759 = math.tanh %758 : vector<2x128xf32>
    %cst_355 = arith.constant 1.000000e+00 : f32
    %760 = vector.broadcast %cst_355 : f32 to vector<2x128xf32>
    %761 = arith.addf %760, %759 : vector<2x128xf32>
    %762 = arith.mulf %751, %761 : vector<2x128xf32>
    %763 = arith.truncf %762 : vector<2x128xf32> to vector<2x128xbf16>
    %c2_356 = arith.constant 2 : index
    %c0_357 = arith.constant 0 : index
    %c0_358 = arith.constant 0 : index
    %764 = vector.load %arg18[%c2_356, %c0_357, %c0_358] : memref<3x128x128xbf16, #tpu.memory_space<vmem>>, vector<1x128x128xbf16>
    %765 = vector.shape_cast %764 : vector<1x128x128xbf16> to vector<128x128xbf16>
    %cst_359 = arith.constant dense<0.000000e+00> : vector<2x128xf32>
    %766 = tpu.matmul %763, %765, %cst_359 {dimension_numbers = #tpu.dot_dimension_numbers<[1], [0], [0], [1], [0, 0, 1, 1], [], []>} : vector<2x128xbf16>, vector<128x128xbf16>, vector<2x128xf32> -> vector<2x128xf32>
    %c2_360 = arith.constant 2 : index
    %c0_361 = arith.constant 0 : index
    %c0_362 = arith.constant 0 : index
    %767 = vector.load %arg19[%c2_360, %c0_361, %c0_362] : memref<3x1x128xf32, #tpu.memory_space<vmem>>, vector<1x1x128xf32>
    %768 = vector.shape_cast %767 : vector<1x1x128xf32> to vector<1x128xf32>
    %769 = vector.broadcast %768 : vector<1x128xf32> to vector<2x128xf32>
    %770 = arith.addf %766, %769 : vector<2x128xf32>
    %c0_363 = arith.constant 0 : index
    %c0_364 = arith.constant 0 : index
    %771 = vector.load %arg25[%c0_363, %c0_364] : memref<2x128xf32, #tpu.memory_space<vmem>>, vector<2x128xf32>
    tpu.vector_store %arg25[%c0_363, %c0_364], %770 {strides = array<i32>} : memref<2x128xf32, #tpu.memory_space<vmem>>, vector<2x128xf32>,
    %cst_365 = arith.constant dense<0.000000e+00> : vector<2xf32>
    %772 = vector.multi_reduction <add>, %634, %cst_365 [1] : vector<2x3136xf32> to vector<2xf32>
    %773 = vector.shape_cast %772 : vector<2xf32> to vector<2x1xf32>
    %cst_366 = arith.constant 3.136000e+03 : f32
    %774 = vector.broadcast %cst_366 : f32 to vector<2x1xf32>
    %775 = arith.divf %773, %774 : vector<2x1xf32>
    %776 = vector.broadcast %775 : vector<2x1xf32> to vector<2x3136xf32>
    %777 = arith.subf %634, %776 : vector<2x3136xf32>
    %778 = arith.mulf %777, %777 : vector<2x3136xf32>
    %cst_367 = arith.constant dense<0.000000e+00> : vector<2xf32>
    %779 = vector.multi_reduction <add>, %778, %cst_367 [1] : vector<2x3136xf32> to vector<2xf32>
    %780 = vector.shape_cast %779 : vector<2xf32> to vector<2x1xf32>
    %cst_368 = arith.constant 3.136000e+03 : f32
    %781 = vector.broadcast %cst_368 : f32 to vector<2x1xf32>
    %782 = arith.divf %780, %781 : vector<2x1xf32>
    %cst_369 = arith.constant 9.99999974E-6 : f32
    %783 = vector.broadcast %cst_369 : f32 to vector<2x1xf32>
    %784 = arith.addf %782, %783 : vector<2x1xf32>
    %785 = math.rsqrt %784 : vector<2x1xf32>
    %786 = vector.broadcast %785 : vector<2x1xf32> to vector<2x3136xf32>
    %787 = arith.mulf %777, %786 : vector<2x3136xf32>
    %c0_370 = arith.constant 0 : index
    %c0_371 = arith.constant 0 : index
    %788 = vector.load %arg22[%c0_370, %c0_371] : memref<1x3136xf32, #tpu.memory_space<vmem>>, vector<1x3136xf32>
    %789 = vector.broadcast %788 : vector<1x3136xf32> to vector<2x3136xf32>
    %790 = arith.mulf %787, %789 : vector<2x3136xf32>
    %c0_372 = arith.constant 0 : index
    %c0_373 = arith.constant 0 : index
    %791 = vector.load %arg23[%c0_372, %c0_373] : memref<1x3136xf32, #tpu.memory_space<vmem>>, vector<1x3136xf32>
    %792 = vector.broadcast %791 : vector<1x3136xf32> to vector<2x3136xf32>
    %793 = arith.addf %790, %792 : vector<2x3136xf32>
    %c0_374 = arith.constant 0 : index
    %c0_375 = arith.constant 0 : index
    %794 = vector.load %arg26[%c0_374, %c0_375] : memref<2x3136xf32, #tpu.memory_space<vmem>>, vector<2x3136xf32>
    tpu.vector_store %arg26[%c0_374, %c0_375], %793 {strides = array<i32>} : memref<2x3136xf32, #tpu.memory_space<vmem>>, vector<2x3136xf32>,
    return
  }
}

module attributes {stable_mosaic.version = 11 : i64} {
  func.func @_bmaps_kernel(%arg0: memref<98x64xf32, #tpu.memory_space<vmem>>, %arg1: memref<98x98xf32, #tpu.memory_space<vmem>>, %arg2: memref<64x512xbf16, #tpu.memory_space<vmem>>, %arg3: memref<1x512xf32, #tpu.memory_space<vmem>>, %arg4: memref<1x512xf32, #tpu.memory_space<vmem>>, %arg5: memref<512x512xbf16, #tpu.memory_space<vmem>>, %arg6: memref<1x512xf32, #tpu.memory_space<vmem>>, %arg7: memref<1x512xf32, #tpu.memory_space<vmem>>, %arg8: memref<512x512xbf16, #tpu.memory_space<vmem>>, %arg9: memref<1x512xf32, #tpu.memory_space<vmem>>, %arg10: memref<98x512xf32, #tpu.memory_space<vmem>>) attributes {dimension_semantics = [], scalar_prefetch = 0 : i64, scratch_operands = 0 : i64, tpu.core_type = #tpu.core_type<tc>} {
    %c0 = arith.constant 0 : index
    %c0_0 = arith.constant 0 : index
    %0 = vector.load %arg1[%c0, %c0_0] : memref<98x98xf32, #tpu.memory_space<vmem>>, vector<98x98xf32>
    %c0_1 = arith.constant 0 : index
    %c0_2 = arith.constant 0 : index
    %1 = vector.load %arg0[%c0_1, %c0_2] : memref<98x64xf32, #tpu.memory_space<vmem>>, vector<98x64xf32>
    %2 = arith.truncf %1 : vector<98x64xf32> to vector<98x64xbf16>
    %c0_3 = arith.constant 0 : index
    %c0_4 = arith.constant 0 : index
    %3 = vector.load %arg2[%c0_3, %c0_4] : memref<64x512xbf16, #tpu.memory_space<vmem>>, vector<64x512xbf16>
    %cst = arith.constant dense<0.000000e+00> : vector<98x512xf32>
    %4 = tpu.matmul %2, %3, %cst {dimension_numbers = #tpu.dot_dimension_numbers<[1], [0], [0], [1], [0, 0, 1, 1], [], []>} : vector<98x64xbf16>, vector<64x512xbf16>, vector<98x512xf32> -> vector<98x512xf32>
    %c0_5 = arith.constant 0 : index
    %c0_6 = arith.constant 0 : index
    %5 = vector.load %arg3[%c0_5, %c0_6] : memref<1x512xf32, #tpu.memory_space<vmem>>, vector<1x512xf32>
    %c0_7 = arith.constant 0 : index
    %c0_8 = arith.constant 0 : index
    %6 = vector.load %arg4[%c0_7, %c0_8] : memref<1x512xf32, #tpu.memory_space<vmem>>, vector<1x512xf32>
    %cst_9 = arith.constant dense<0.000000e+00> : vector<98xf32>
    %7 = vector.multi_reduction <add>, %4, %cst_9 [1] : vector<98x512xf32> to vector<98xf32>
    %8 = vector.shape_cast %7 : vector<98xf32> to vector<98x1xf32>
    %cst_10 = arith.constant 5.120000e+02 : f32
    %9 = vector.broadcast %cst_10 : f32 to vector<98x1xf32>
    %10 = arith.divf %8, %9 : vector<98x1xf32>
    %cst_11 = arith.constant dense<0.000000e+00> : vector<98x1xf32>
    %11 = tpu.matmul %0, %10, %cst_11 {dimension_numbers = #tpu.dot_dimension_numbers<[1], [0], [0], [1], [0, 0, 1, 1], [], []>} : vector<98x98xf32>, vector<98x1xf32>, vector<98x1xf32> -> vector<98x1xf32>
    %12 = vector.broadcast %11 : vector<98x1xf32> to vector<98x512xf32>
    %13 = arith.subf %4, %12 : vector<98x512xf32>
    %14 = arith.mulf %13, %13 : vector<98x512xf32>
    %cst_12 = arith.constant dense<0.000000e+00> : vector<98xf32>
    %15 = vector.multi_reduction <add>, %14, %cst_12 [1] : vector<98x512xf32> to vector<98xf32>
    %16 = vector.shape_cast %15 : vector<98xf32> to vector<98x1xf32>
    %cst_13 = arith.constant 5.120000e+02 : f32
    %17 = vector.broadcast %cst_13 : f32 to vector<98x1xf32>
    %18 = arith.divf %16, %17 : vector<98x1xf32>
    %cst_14 = arith.constant dense<0.000000e+00> : vector<98x1xf32>
    %19 = tpu.matmul %0, %18, %cst_14 {dimension_numbers = #tpu.dot_dimension_numbers<[1], [0], [0], [1], [0, 0, 1, 1], [], []>} : vector<98x98xf32>, vector<98x1xf32>, vector<98x1xf32> -> vector<98x1xf32>
    %cst_15 = arith.constant 9.99999974E-6 : f32
    %20 = vector.broadcast %cst_15 : f32 to vector<98x1xf32>
    %21 = arith.addf %19, %20 : vector<98x1xf32>
    %22 = math.rsqrt %21 : vector<98x1xf32>
    %23 = vector.broadcast %22 : vector<98x1xf32> to vector<98x512xf32>
    %24 = arith.mulf %13, %23 : vector<98x512xf32>
    %25 = vector.broadcast %5 : vector<1x512xf32> to vector<98x512xf32>
    %26 = arith.mulf %24, %25 : vector<98x512xf32>
    %27 = vector.broadcast %6 : vector<1x512xf32> to vector<98x512xf32>
    %28 = arith.addf %26, %27 : vector<98x512xf32>
    %cst_16 = arith.constant 0.000000e+00 : f32
    %29 = vector.broadcast %cst_16 : f32 to vector<98x512xf32>
    %30 = arith.maximumf %28, %29 : vector<98x512xf32>
    %31 = arith.truncf %30 : vector<98x512xf32> to vector<98x512xbf16>
    %c0_17 = arith.constant 0 : index
    %c0_18 = arith.constant 0 : index
    %32 = vector.load %arg5[%c0_17, %c0_18] : memref<512x512xbf16, #tpu.memory_space<vmem>>, vector<512x512xbf16>
    %cst_19 = arith.constant dense<0.000000e+00> : vector<98x512xf32>
    %33 = tpu.matmul %31, %32, %cst_19 {dimension_numbers = #tpu.dot_dimension_numbers<[1], [0], [0], [1], [0, 0, 1, 1], [], []>} : vector<98x512xbf16>, vector<512x512xbf16>, vector<98x512xf32> -> vector<98x512xf32>
    %c0_20 = arith.constant 0 : index
    %c0_21 = arith.constant 0 : index
    %34 = vector.load %arg6[%c0_20, %c0_21] : memref<1x512xf32, #tpu.memory_space<vmem>>, vector<1x512xf32>
    %c0_22 = arith.constant 0 : index
    %c0_23 = arith.constant 0 : index
    %35 = vector.load %arg7[%c0_22, %c0_23] : memref<1x512xf32, #tpu.memory_space<vmem>>, vector<1x512xf32>
    %cst_24 = arith.constant dense<0.000000e+00> : vector<98xf32>
    %36 = vector.multi_reduction <add>, %33, %cst_24 [1] : vector<98x512xf32> to vector<98xf32>
    %37 = vector.shape_cast %36 : vector<98xf32> to vector<98x1xf32>
    %cst_25 = arith.constant 5.120000e+02 : f32
    %38 = vector.broadcast %cst_25 : f32 to vector<98x1xf32>
    %39 = arith.divf %37, %38 : vector<98x1xf32>
    %cst_26 = arith.constant dense<0.000000e+00> : vector<98x1xf32>
    %40 = tpu.matmul %0, %39, %cst_26 {dimension_numbers = #tpu.dot_dimension_numbers<[1], [0], [0], [1], [0, 0, 1, 1], [], []>} : vector<98x98xf32>, vector<98x1xf32>, vector<98x1xf32> -> vector<98x1xf32>
    %41 = vector.broadcast %40 : vector<98x1xf32> to vector<98x512xf32>
    %42 = arith.subf %33, %41 : vector<98x512xf32>
    %43 = arith.mulf %42, %42 : vector<98x512xf32>
    %cst_27 = arith.constant dense<0.000000e+00> : vector<98xf32>
    %44 = vector.multi_reduction <add>, %43, %cst_27 [1] : vector<98x512xf32> to vector<98xf32>
    %45 = vector.shape_cast %44 : vector<98xf32> to vector<98x1xf32>
    %cst_28 = arith.constant 5.120000e+02 : f32
    %46 = vector.broadcast %cst_28 : f32 to vector<98x1xf32>
    %47 = arith.divf %45, %46 : vector<98x1xf32>
    %cst_29 = arith.constant dense<0.000000e+00> : vector<98x1xf32>
    %48 = tpu.matmul %0, %47, %cst_29 {dimension_numbers = #tpu.dot_dimension_numbers<[1], [0], [0], [1], [0, 0, 1, 1], [], []>} : vector<98x98xf32>, vector<98x1xf32>, vector<98x1xf32> -> vector<98x1xf32>
    %cst_30 = arith.constant 9.99999974E-6 : f32
    %49 = vector.broadcast %cst_30 : f32 to vector<98x1xf32>
    %50 = arith.addf %48, %49 : vector<98x1xf32>
    %51 = math.rsqrt %50 : vector<98x1xf32>
    %52 = vector.broadcast %51 : vector<98x1xf32> to vector<98x512xf32>
    %53 = arith.mulf %42, %52 : vector<98x512xf32>
    %54 = vector.broadcast %34 : vector<1x512xf32> to vector<98x512xf32>
    %55 = arith.mulf %53, %54 : vector<98x512xf32>
    %56 = vector.broadcast %35 : vector<1x512xf32> to vector<98x512xf32>
    %57 = arith.addf %55, %56 : vector<98x512xf32>
    %cst_31 = arith.constant 0.000000e+00 : f32
    %58 = vector.broadcast %cst_31 : f32 to vector<98x512xf32>
    %59 = arith.maximumf %57, %58 : vector<98x512xf32>
    %60 = arith.truncf %59 : vector<98x512xf32> to vector<98x512xbf16>
    %c0_32 = arith.constant 0 : index
    %c0_33 = arith.constant 0 : index
    %61 = vector.load %arg8[%c0_32, %c0_33] : memref<512x512xbf16, #tpu.memory_space<vmem>>, vector<512x512xbf16>
    %cst_34 = arith.constant dense<0.000000e+00> : vector<98x512xf32>
    %62 = tpu.matmul %60, %61, %cst_34 {dimension_numbers = #tpu.dot_dimension_numbers<[1], [0], [0], [1], [0, 0, 1, 1], [], []>} : vector<98x512xbf16>, vector<512x512xbf16>, vector<98x512xf32> -> vector<98x512xf32>
    %c0_35 = arith.constant 0 : index
    %c0_36 = arith.constant 0 : index
    %63 = vector.load %arg9[%c0_35, %c0_36] : memref<1x512xf32, #tpu.memory_space<vmem>>, vector<1x512xf32>
    %64 = vector.broadcast %63 : vector<1x512xf32> to vector<98x512xf32>
    %65 = arith.addf %62, %64 : vector<98x512xf32>
    %c0_37 = arith.constant 0 : index
    %c0_38 = arith.constant 0 : index
    %66 = vector.load %arg10[%c0_37, %c0_38] : memref<98x512xf32, #tpu.memory_space<vmem>>, vector<98x512xf32>
    tpu.vector_store %arg10[%c0_37, %c0_38], %65 {strides = array<i32>} : memref<98x512xf32, #tpu.memory_space<vmem>>, vector<98x512xf32>,
    return
  }
}

</mosaic_0001>

<bundles_post_ra>
// kernel: brain_network2_forward.3
= control target key start
LH: loop header
LB: loop body
LE: loop exit
PB: predicated region body
PF: predicated region fallthrough
CT: control target
= control target key end

     0   :  { %v5951_v1 = vmov 0   ;;  %vm165_vm0 = vcmask 523264   ;;  %vm451_vm1 = vcmask 1041408   ;;  %vm5953_vm2 = vmmov 0   ;;  %s9181_s2 = inlined_call_operand.vmem [shape: bf16[64,512], index: 2, kind: input, shape index: {}]   ;;  %s9182_s0 = inlined_call_operand.vmem [shape: f32[98,64], index: 0, kind: input, shape index: {}]   ;;  %s9183_s1 = inlined_call_operand.vmem [shape: f32[98,98], index: 1, kind: input, shape index: {}]   ;;  %s9184_s5 = inlined_call_operand.vmem [shape: bf16[512,512], index: 5, kind: input, shape index: {}]   ;;  %s9185_s3 = inlined_call_operand.vmem [shape: f32[1,512], index: 3, kind: input, shape index: {}]   ;;  %s9186_s4 = inlined_call_operand.vmem [shape: f32[1,512], index: 4, kind: input, shape index: {}]   ;;  %s9187_s8 = inlined_call_operand.vmem [shape: bf16[512,512], index: 8, kind: input, shape index: {}]   ;;  %s9188_s6 = inlined_call_operand.vmem [shape: f32[1,512], index: 6, kind: input, shape index: {}]   ;;  %s9189_s7 = inlined_call_operand.vmem [shape: f32[1,512], index: 7, kind: input, shape index: {}]   ;;  %s9190_s9 = inlined_call_operand.vmem [shape: f32[1,512], index: 9, kind: input, shape index: {}]   ;;  %s9191_s10 = inlined_call_operand.vmem [shape: f32[98,512], index: 10, kind: output, shape index: {}]  }
   0x1   :  { %v5478_v0 = vld [vmem:[%s9181_s2 + $0x64] ss:$16 sps:$4 sm:$0xff]   ;;  %219 = vmatprep.mubr.bf16.mxu0 %v5951_v1  ;;  %320 = vmatprep.mubr.bf16.mxu1 %v5951_v1  ;;  %v5480_v2 = vld [vmem:[%s9181_s2 + $0x6c] ss:$16 sps:$4 sm:$0xff]   ;;  %v5482_v3 = vld [vmem:[%s9181_s2 + $0x60] ss:$16 sps:$4 sm:$0xff]  }
   0x2   :  { %5477 = vset.pattern.permute.xlu1 %v5951_v1  ;;  %5476 = vset.pattern.permute.xlu0 %v5951_v1  ;;  %v5483_v4 = vld [vmem:[%s9181_s2 + $0x68] ss:$16 sps:$4 sm:$0xff]   ;;  %v5484_v5 = vld [vmem:[%s9181_s2 + $0x44] ss:$16 sps:$4 sm:$0xff]   ;;  %v5486_v6 = vld [vmem:[%s9181_s2 + $0x4c] ss:$16 sps:$4 sm:$0xff]  }
   0x3   :  { %195 = vmatprep.subr.bf16.mxu0 %v5478_v0  ;;  %296 = vmatprep.subr.bf16.mxu1 %v5480_v2  ;;  %v5488_v7 = vld [vmem:[%s9181_s2 + $0x40] ss:$16 sps:$4 sm:$0xff]   ;;  %v5489_v8 = vld [vmem:[%s9181_s2 + $0x48] ss:$16 sps:$4 sm:$0xff]   ;;  %v5490_v9 = vld [vmem:[%s9181_s2 + $0x24] ss:$16 sps:$4 sm:$0xff]  }
   0x4   :  { %196 = vmatpush1.bf16.msra.mxu0 %v5482_v3  ;;  %297 = vmatpush1.bf16.msra.mxu1 %v5483_v4  ;;  %v5492_v10 = vld [vmem:[%s9181_s2 + $0x2c] ss:$16 sps:$4 sm:$0xff]   ;;  %v5494_v11 = vld [vmem:[%s9181_s2 + $0x20] ss:$16 sps:$4 sm:$0xff]   ;;  %v5495_v12 = vld [vmem:[%s9181_s2 + $0x28] ss:$16 sps:$4 sm:$0xff]  }
   0x5   :  { %197 = vmatprep.subr.bf16.mxu0 %v5484_v5  ;;  %298 = vmatprep.subr.bf16.mxu1 %v5486_v6  ;;  %v5496_v13 = vld [vmem:[%s9181_s2 + $0x4] ss:$16 sps:$4 sm:$0xff]   ;;  %v5498_v14 = vld [vmem:[%s9181_s2 + $0xc] ss:$16 sps:$4 sm:$0xff]   ;;  %v5500_v15 = vld [vmem:[%s9181_s2] ss:$16 sps:$4 sm:$0xff]  }
   0x6   :  { %v5501_v16 = vld [vmem:[%s9181_s2 + $0x8] ss:$16 sps:$4 sm:$0xff]   ;;  %v49_v17 = vld [vmem:[%s9182_s0] sm:$0xff]  ;;  %v51_v20 = vld [vmem:[%s9182_s0 + $0x10] sm:$0xff]  ;;  %vm475_vm3 = vcmask 801792  }
   0x7   :  { %v50_v18 = vld [vmem:[%s9182_s0 + $0x8] sm:$0xff]  ;;  %v52_v21 = vld [vmem:[%s9182_s0 + $0x18] sm:$0xff]  ;;  %v53_v23 = vld [vmem:[%s9182_s0 + $0x20] sm:$0xff] }
   0x8   :  { %198 = vmatpush1.bf16.msra.mxu0 %v5488_v7  ;;  %299 = vmatpush1.bf16.msra.mxu1 %v5489_v8  ;;  %v62_v19 = vpack.c.bf16 %v50_v18, %v49_v17  ;;  %v63_v22 = vpack.c.bf16 %v52_v21, %v51_v20  ;;  %v54_v24 = vld [vmem:[%s9182_s0 + $0x28] sm:$0xff]  ;;  %v55_v26 = vld [vmem:[%s9182_s0 + $0x30] sm:$0xff]  ;;  %v56_v27 = vld [vmem:[%s9182_s0 + $0x38] sm:$0xff] }
   0x9   :  { %199 = vmatprep.subr.bf16.mxu0 %v5490_v9  ;;  %300 = vmatprep.subr.bf16.mxu1 %v5492_v10  ;;  %v64_v25 = vpack.c.bf16 %v54_v24, %v53_v23  ;;  %v65_v28 = vpack.c.bf16 %v56_v27, %v55_v26  ;;  %v57_v29 = vld [vmem:[%s9182_s0 + $0x40] sm:$0xff]  ;;  %v58_v30 = vld [vmem:[%s9182_s0 + $0x48] sm:$0xff]  ;;  %v59_v32 = vld [vmem:[%s9182_s0 + $0x50] sm:$0xff] }
   0xa   :  { %v66_v31 = vpack.c.bf16 %v58_v30, %v57_v29  ;;  %v60_v33 = vld [vmem:[%s9182_s0 + $0x58] sm:$0xff]  ;;  %v61_v35 = vld [vmem:[%s9182_s0 + $0x60] sm:$0x3] }
   0xb   :  { %v67_v34 = vpack.c.bf16 %v60_v33, %v59_v32  ;;  %v68_v36 = vpack.c.bf16 %v61_v35, %v61_v35 }
   0xc   :  { %200 = vmatpush1.bf16.msra.mxu0 %v5494_v11  ;;  %301 = vmatpush1.bf16.msra.mxu1 %v5495_v12 }
   0xd   :  { %201 = vmatprep.subr.bf16.mxu0 %v5496_v13  ;;  %302 = vmatprep.subr.bf16.mxu1 %v5498_v14 }
  0x10   :  { %202 = vmatpush1.bf16.msra.mxu0 %v5500_v15  ;;  %303 = vmatpush1.bf16.msra.mxu1 %v5501_v16 }
  0x13   :  { %4783 = vmatmul.mubr.msk.bf16.vlgmr.msra.gmra.mxu0 %vm165_vm0, %v62_v19  ;;  %4790 = vmatmul.mubr.msk.bf16.vlgmr.msra.gmra.mxu1 %vm165_vm0, %v62_v19 }
  0x14   :  { %229 = vmatprep.mubr.bf16.mxu0 %v5951_v1  ;;  %330 = vmatprep.mubr.bf16.mxu1 %v5951_v1 }
  0x1b   :  { %4784 = vmatmul.mubr.msk.bf16.gmra.mxu0 %vm165_vm0, %v63_v22  ;;  %4791 = vmatmul.mubr.msk.bf16.gmra.mxu1 %vm165_vm0, %v63_v22 }
  0x1c   :  { %239 = vmatprep.mubr.bf16.mxu0 %v5951_v1  ;;  %340 = vmatprep.mubr.bf16.mxu1 %v5951_v1 }
  0x23   :  { %4785 = vmatmul.mubr.msk.bf16.gmra.mxu0 %vm165_vm0, %v64_v25  ;;  %4792 = vmatmul.mubr.msk.bf16.gmra.mxu1 %vm165_vm0, %v64_v25 }
  0x24   :  { %249 = vmatprep.mubr.bf16.mxu0 %v5951_v1  ;;  %350 = vmatprep.mubr.bf16.mxu1 %v5951_v1 }
  0x2b   :  { %4786 = vmatmul.mubr.msk.bf16.gmra.mxu0 %vm165_vm0, %v65_v28  ;;  %4793 = vmatmul.mubr.msk.bf16.gmra.mxu1 %vm165_vm0, %v65_v28 }
  0x2c   :  { %259 = vmatprep.mubr.bf16.mxu0 %v5951_v1  ;;  %360 = vmatprep.mubr.bf16.mxu1 %v5951_v1 }
  0x33   :  { %4787 = vmatmul.mubr.msk.bf16.gmra.mxu0 %vm165_vm0, %v66_v31  ;;  %4794 = vmatmul.mubr.msk.bf16.gmra.mxu1 %vm165_vm0, %v66_v31 }
  0x34   :  { %269 = vmatprep.mubr.bf16.mxu0 %v5951_v1  ;;  %370 = vmatprep.mubr.bf16.mxu1 %v5951_v1 }
  0x3b   :  { %4788 = vmatmul.mubr.msk.bf16.gmra.mxu0 %vm165_vm0, %v67_v34  ;;  %4795 = vmatmul.mubr.msk.bf16.gmra.mxu1 %vm165_vm0, %v67_v34 }
  0x3c   :  { %279 = vmatprep.mubr.bf16.mxu0 %v5951_v1  ;;  %380 = vmatprep.mubr.bf16.mxu1 %v5951_v1 }
  0x43   :  { %4789 = vmatmul.mubr.msk.bf16.gmra.mxu0 %vm165_vm0, %v68_v36  ;;  %4796 = vmatmul.mubr.msk.bf16.gmra.mxu1 %vm165_vm0, %v68_v36 }
  0xd3   :  { %v6126_v37 = vpop.f32.mrf.mxu0  ;;  %v6128_v38 = vpop.f32.mrf.mxu1 }
  0xd5   :  { %v6130_v39 = vpop.f32.mrf.mxu0  ;;  %v6132_v40 = vpop.f32.mrf.mxu1 }
  0xd6   :  { %9279 = vst [vmem:[#allocation2_spill] sm:$0xff] %v6132_v40 }
  0xd7   :  { %v6134_v41 = vpop.f32.mrf.mxu0  ;;  %v6136_v42 = vpop.f32.mrf.mxu1 }
  0xd8   :  { %9280 = vst [vmem:[#allocation3_spill] sm:$0xff] %v6136_v42 }
  0xd9   :  { %v6138_v43 = vpop.f32.mrf.mxu0  ;;  %v6140_v44 = vpop.f32.mrf.mxu1 }
  0xda   :  { %9281 = vst [vmem:[#allocation4_spill] sm:$0xff] %v6140_v44 }
  0xdb   :  { %v6142_v45 = vpop.f32.mrf.mxu0  ;;  %v6144_v46 = vpop.f32.mrf.mxu1 }
  0xdd   :  { %v6146_v47 = vpop.f32.mrf.mxu0  ;;  %v6148_v48 = vpop.f32.mrf.mxu1 }
  0xdf   :  { %v6150_v49 = vpop.f32.mrf.mxu0  ;;  %v6152_v50 = vpop.f32.mrf.mxu1 }
  0xe1   :  { %v6154_v51 = vpop.f32.mrf.mxu0  ;;  %v6156_v52 = vpop.f32.mrf.mxu1 }
  0xe3   :  { %v6158_v53 = vpop.f32.mrf.mxu0  ;;  %v6160_v54 = vpop.f32.mrf.mxu1 }
  0xe5   :  { %v6162_v55 = vpop.f32.mrf.mxu0  ;;  %v6164_v56 = vpop.f32.mrf.mxu1 }
  0xe7   :  { %v6166_v57 = vpop.f32.mrf.mxu0  ;;  %v6168_v58 = vpop.f32.mrf.mxu1 }
  0xe8   :  { %9282 = vst [vmem:[#allocation5_spill] sm:$0xff] %v6166_v57 }
  0xe9   :  { %v6170_v59 = vpop.f32.mrf.mxu0  ;;  %v6172_v60 = vpop.f32.mrf.mxu1 }
  0xea   :  { %9283 = vst [vmem:[#allocation6_spill] sm:$0xff] %v6170_v59  ;;  %v416_v29 = vadd.f32 %v6170_v59, %v6166_v57 }
  0xeb   :  { %v6174_v61 = vpop.f32.mrf.mxu0  ;;  %v6176_v62 = vpop.f32.mrf.mxu1 }
  0xed   :  { %v6178_v63 = vpop.f32.mrf.mxu0  ;;  %v6180_v0 = vpop.f32.mrf.mxu1 }
  0xef   :  { %v6182_v1 = vpop.f32.mrf.mxu0  ;;  %v6184_v2 = vpop.f32.mrf.mxu1 }
  0xf0   :  { %9284 = vst [vmem:[#allocation7_spill] sm:$0xff] %v6182_v1  ;;  %9285 = vst [vmem:[#allocation8_spill] sm:$0xff] %v6184_v2 }
  0xf1   :  { %v6186_v3 = vpop.f32.mrf.mxu0  ;;  %v6188_v4 = vpop.f32.mrf.mxu1 }
  0xf2   :  { %9286 = vst [vmem:[#allocation9_spill] sm:$0xff] %v6186_v3  ;;  %v426_v22 = vadd.f32 %v6186_v3, %v6182_v1 }
  0xf3   :  { %v6190_v5 = vpop.f32.mrf.mxu0  ;;  %v6192_v6 = vpop.f32.mrf.mxu1 }
  0xf4   :  { %v427_v32 = vadd.f32 %v426_v22, %v6184_v2  ;;  %v406_v2 = vadd.f32 %v6154_v51, %v6150_v49 }
  0xf5   :  { %v6194_v7 = vpop.f32.mrf.mxu0  ;;  %v6196_v8 = vpop.f32.mrf.mxu1 }
  0xf6   :  { %v428_v3 = vadd.f32 %v427_v32, %v6188_v4  ;;  %v407_v32 = vadd.f32 %v406_v2, %v6152_v50 }
  0xf7   :  { %v6198_v9 = vpop.f32.mrf.mxu0  ;;  %v6200_v10 = vpop.f32.mrf.mxu1 }
  0xf9   :  { %v6202_v11 = vpop.f32.mrf.mxu0  ;;  %v6204_v12 = vpop.f32.mrf.mxu1 }
  0xfa   :  { %v436_v17 = vadd.f32 %v6202_v11, %v6198_v9 }
  0xfb   :  { %v6206_v13 = vpop.f32.mrf.mxu0  ;;  %v6208_v14 = vpop.f32.mrf.mxu1 }
  0xfc   :  { %v437_v26 = vadd.f32 %v436_v17, %v6200_v10 }
  0xfd   :  { %v6210_v15 = vpop.f32.mrf.mxu0  ;;  %v6212_v16 = vpop.f32.mrf.mxu1 }
  0xfe   :  { %v441_v18 = vadd.f32 %v6210_v15, %v6206_v13  ;;  %v438_v36 = vadd.f32 %v437_v26, %v6204_v12  ;;  %v417_v26 = vadd.f32 %v416_v29, %v6168_v58 }
  0xff   :  { %v6218_v19 = vpop.f32.mrf.mxu0  ;;  %v6220_v20 = vpop.f32.mrf.mxu1 }
 0x100   :  { %v442_v21 = vadd.f32 %v441_v18, %v6208_v14 }
 0x101   :  { %v6225_v23 = vpop.f32.mrf.mxu0  ;;  %v6227_v24 = vpop.f32.mrf.mxu1 }
 0x102   :  { %v443_v25 = vadd.f32 %v442_v21, %v6212_v16  ;;  %v446_v17 = vadd.f32 %v6225_v23, %v6218_v19 }
 0x103   :  { %v6231_v27 = vpop.f32.mrf.mxu0  ;;  %v6233_v28 = vpop.f32.mrf.mxu1 }
 0x104   :  { %9287 = vst [vmem:[#allocation10_spill] sm:$0xff] %v6233_v28  ;;  %444 = vadd.xlane.f32.xlu1 %v443_v25  ;;  %v452_v33 = vsel %vm451_vm1, %v6231_v27, 0.0  ;;  %v455_v34 = vsel %vm451_vm1, %v6233_v28, 0.0  ;;  %v431_v28 = vadd.f32 %v6194_v7, %v6190_v5 }
 0x105   :  { %v6237_v30 = vpop.f32.mrf.mxu0  ;;  %v6239_v31 = vpop.f32.mrf.mxu1 }
 0x106   :  { %v453_v35 = vsel %vm451_vm1, %v6237_v30, 0.0  ;;  %v457_v1 = vsel %vm451_vm1, %v6239_v31, 0.0 }
 0x107   :  { %v454_v18 = vadd.f32 %v453_v35, %v452_v33  ;;  %v285_v21 = vpop.f32.mrf.mxu0  ;;  %v386_v25 = vpop.f32.mrf.mxu1  ;;  %v447_v35 = vadd.f32 %v446_v17, %v6220_v20 }
 0x108   :  { %439 = vadd.xlane.f32.xlu1 %v438_v36  ;;  %v421_v36 = vadd.f32 %v6178_v63, %v6174_v61 }
 0x109   :  { %v286_v59 = vpop.f32.mrf.mxu0  ;;  %v387_v22 = vpop.f32.mrf.mxu1  ;;  %v456_v57 = vadd.f32 %v455_v34, %v454_v18  ;;  %v418_v34 = vadd.f32 %v417_v26, %v6172_v60  ;;  %v448_v29 = vadd.f32 %v447_v35, %v6227_v24  ;;  %v432_v18 = vadd.f32 %v431_v28, %v6192_v6 }
 0x10a   :  { %v396_v59 = vadd.f32 %v6138_v43, %v6134_v41  ;;  %v422_v2 = vadd.f32 %v421_v36, %v6176_v62  ;;  %v401_v28 = vadd.f32 %v6146_v47, %v6142_v45  ;;  %v9205_v26 = vmov 0.0  }
 0x10b   :  { %v458_v33 = vadd.f32 %v457_v1, %v456_v57  ;;  %v408_v57 = vadd.f32 %v407_v32, %v6156_v52  ;;  %v433_v17 = vadd.f32 %v432_v18, %v6196_v8  ;;  %5213 = vmatprep.subr.mxu0 %v9205_v26  ;;  %5278 = vmatprep.subr.mxu1 %v9205_v26 }
 0x10c   :  { %429 = vadd.xlane.f32.xlu1 %v428_v3  ;;  %v397_v1 = vadd.f32 %v396_v59, %v6136_v42  ;;  %v411_v3 = vadd.f32 %v6162_v55, %v6158_v53  ;;  %v423_v25 = vadd.f32 %v422_v2, %v6180_v0  ;;  %v402_v59 = vadd.f32 %v401_v28, %v6144_v46 }
 0x10d   :  { %459 = vadd.xlane.f32.xlu0 %v458_v33  ;;  %v391_v33 = vadd.f32 %v6130_v39, %v6126_v37  ;;  %5239 = vmatprep.mubr.msk.f32.mxu0 %vm5953_vm2, %v9205_v26 }
 0x10e   :  { %v398_v21 = vadd.f32 %v397_v1, %v6140_v44  ;;  %v412_v22 = vadd.f32 %v411_v3, %v6160_v54  ;;  %5304 = vmatprep.mubr.msk.f32.mxu1 %vm5953_vm2, %v9205_v26 }
 0x10f   :  { %v392_v32 = vadd.f32 %v391_v33, %v6128_v38 }
 0x110   :  { %419 = vadd.xlane.f32.xlu1 %v418_v34  ;;  %v413_v35 = vadd.f32 %v412_v22, %v6164_v56  ;;  %v403_v34 = vadd.f32 %v402_v59, %v6148_v48 }
 0x111   :  { %449 = vadd.xlane.f32.xlu0 %v448_v29  ;;  %v393_v36 = vadd.f32 %v392_v32, %v6132_v40 }
 0x114   :  { %409 = vadd.xlane.f32.xlu1 %v408_v57 }
 0x115   :  { %434 = vadd.xlane.f32.xlu0 %v433_v17 }
 0x118   :  { %399 = vadd.xlane.f32.xlu1 %v398_v21 }
 0x119   :  { %424 = vadd.xlane.f32.xlu0 %v423_v25 }
 0x11d   :  { %414 = vadd.xlane.f32.xlu0 %v413_v35 }
 0x121   :  { %404 = vadd.xlane.f32.xlu0 %v403_v34 }
 0x125   :  { %394 = vadd.xlane.f32.xlu0 %v393_v36 }
 0x18d   :  { %v445_v29 = vpop.xlane.xlu1 %444 }
 0x18e   :  { %v472_v21 = vmul.f32 0.001953125, %v445_v29 }
 0x191   :  { %v440_v18 = vpop.xlane.xlu1 %439 }
 0x192   :  { %v471_v25 = vmul.f32 0.001953125, %v440_v18 }
 0x195   :  { %v430_v3 = vpop.xlane.xlu1 %429 }
 0x196   :  { %v460_v57 = vpop.xlane.xlu0 %459  ;;  %v469_v59 = vmul.f32 0.001953125, %v430_v3 }
 0x197   :  { %v474_v1 = vmul.f32 0.001953125, %v460_v57 }
 0x199   :  { %5214 = vmatpush3.msk.msra.mxu0 %vm451_vm1, %v474_v1  ;;  %v420_v22 = vpop.xlane.xlu1 %419 }
 0x19a   :  { %v450_v17 = vpop.xlane.xlu0 %449  ;;  %5215 = vmatprep.subr.mxu0 %v9205_v26  ;;  %v467_v29 = vmul.f32 0.001953125, %v420_v22  ;;  %v6317_v22 = vld [vmem:[%s9183_s1 + $0x8] sm:$0xff] }
 0x19b   :  { %v473_v2 = vmul.f32 0.001953125, %v450_v17  ;;  %9289 = vst [vmem:[#allocation12_spill] sm:$0xff] %v6317_v22 }
 0x19d   :  { %5216 = vmatpush3.msra.mxu0 %v473_v2  ;;  %v410_v32 = vpop.xlane.xlu1 %409 }
 0x19e   :  { %5217 = vmatprep.subr.mxu0 %v9205_v26  ;;  %v435_v28 = vpop.xlane.xlu0 %434  ;;  %v465_v1 = vmul.f32 0.001953125, %v410_v32  ;;  %v6362_v32 = vld [vmem:[%s9183_s1 + $0x30] sm:$0xff] }
 0x19f   :  { %5218 = vmatpush3.msra.mxu0 %v472_v21  ;;  %v470_v33 = vmul.f32 0.001953125, %v435_v28  ;;  %9294 = vst [vmem:[#allocation17_spill] sm:$0xff] %v6362_v32 }
 0x1a0   :  { %5219 = vmatprep.subr.mxu0 %v9205_v26 }
 0x1a1   :  { %5220 = vmatpush3.msra.mxu0 %v471_v25  ;;  %v400_v3 = vpop.xlane.xlu1 %399  ;;  %v6307_v25 = vld [vmem:[%s9183_s1] sm:$0xff] }
 0x1a2   :  { %5221 = vmatprep.subr.mxu0 %v9205_v26  ;;  %v425_v35 = vpop.xlane.xlu0 %424  ;;  %v463_v21 = vmul.f32 0.001953125, %v400_v3  ;;  %9288 = vst [vmem:[#allocation11_spill] sm:$0xff] %v6307_v25  ;;  %v6416_v3 = vld [vmem:[%s9183_s1 + $0x60] sm:$0x3] }
 0x1a3   :  { %5222 = vmatpush3.msra.mxu0 %v470_v33  ;;  %v468_v34 = vmul.f32 0.001953125, %v425_v35  ;;  %v6326_v33 = vld [vmem:[%s9183_s1 + $0x10] sm:$0xff]  ;;  %v6335_v35 = vld [vmem:[%s9183_s1 + $0x18] sm:$0xff]  ;;  %9300 = vst [vmem:[#allocation23_spill] sm:$0xff] %v6416_v3 }
 0x1a4   :  { %5223 = vmatprep.subr.mxu0 %v9205_v26  ;;  %9290 = vst [vmem:[#allocation13_spill] sm:$0xff] %v6326_v33  ;;  %9291 = vst [vmem:[#allocation14_spill] sm:$0xff] %v6335_v35 }
 0x1a5   :  { %5224 = vmatpush3.msra.mxu0 %v469_v59  ;;  %v6344_v59 = vld [vmem:[%s9183_s1 + $0x20] sm:$0xff] }
 0x1a6   :  { %5225 = vmatprep.subr.mxu0 %v9205_v26  ;;  %v415_v36 = vpop.xlane.xlu0 %414  ;;  %9292 = vst [vmem:[#allocation15_spill] sm:$0xff] %v6344_v59 }
 0x1a7   :  { %5226 = vmatpush3.msra.mxu0 %v468_v34  ;;  %v466_v18 = vmul.f32 0.001953125, %v415_v36  ;;  %v6353_v34 = vld [vmem:[%s9183_s1 + $0x28] sm:$0xff]  ;;  %v6371_v36 = vld [vmem:[%s9183_s1 + $0x38] sm:$0xff] }
 0x1a8   :  { %5227 = vmatprep.subr.mxu0 %v9205_v26  ;;  %9293 = vst [vmem:[#allocation16_spill] sm:$0xff] %v6353_v34  ;;  %9295 = vst [vmem:[#allocation18_spill] sm:$0xff] %v6371_v36 }
 0x1a9   :  { %5228 = vmatpush3.msra.mxu0 %v467_v29  ;;  %v6380_v29 = vld [vmem:[%s9183_s1 + $0x40] sm:$0xff] }
 0x1aa   :  { %5229 = vmatprep.subr.mxu0 %v9205_v26  ;;  %v405_v57 = vpop.xlane.xlu0 %404  ;;  %9296 = vst [vmem:[#allocation19_spill] sm:$0xff] %v6380_v29 }
 0x1ab   :  { %5230 = vmatpush3.msra.mxu0 %v466_v18  ;;  %v464_v17 = vmul.f32 0.001953125, %v405_v57  ;;  %v6389_v18 = vld [vmem:[%s9183_s1 + $0x48] sm:$0xff]  ;;  %v6398_v57 = vld [vmem:[%s9183_s1 + $0x50] sm:$0xff] }
 0x1ac   :  { %5231 = vmatprep.subr.mxu0 %v9205_v26  ;;  %9297 = vst [vmem:[#allocation20_spill] sm:$0xff] %v6389_v18  ;;  %9298 = vst [vmem:[#allocation21_spill] sm:$0xff] %v6398_v57 }
 0x1ad   :  { %5232 = vmatpush3.msra.mxu0 %v465_v1  ;;  %v6407_v1 = vld [vmem:[%s9183_s1 + $0x58] sm:$0xff] }
 0x1ae   :  { %5233 = vmatprep.subr.mxu0 %v9205_v26  ;;  %v395_v2 = vpop.xlane.xlu0 %394  ;;  %9299 = vst [vmem:[#allocation22_spill] sm:$0xff] %v6407_v1 }
 0x1af   :  { %5234 = vmatpush3.msra.mxu0 %v464_v17  ;;  %v462_v28 = vmul.f32 0.001953125, %v395_v2 }
 0x1b0   :  { %5235 = vmatprep.subr.mxu0 %v9205_v26 }
 0x1b1   :  { %5236 = vmatpush3.msra.mxu0 %v463_v21 }
 0x1b2   :  { %5237 = vmatprep.subr.mxu0 %v9205_v26 }
 0x1b3   :  { %5238 = vmatpush3.msra.mxu0 %v462_v28 }
 0x1b4   :  { %5240 = vmatmul.mubr.msk.f32.vlgmr.msra.gmra.mxu0 %vm475_vm3, %v6307_v25 }
 0x1b5   :  { %5242 = vmatprep.mubr.msk.f32.mxu0 %vm5953_vm2, %v9205_v26 }
 0x1b8   :  { %5243 = vmatmul.mubr.msk.f32.gmra.mxu0 %vm475_vm3, %v6317_v22 }
 0x1b9   :  { %5245 = vmatprep.mubr.msk.f32.mxu0 %vm5953_vm2, %v9205_v26 }
 0x1bc   :  { %5246 = vmatmul.mubr.msk.f32.gmra.mxu0 %vm475_vm3, %v6326_v33 }
 0x1bd   :  { %5248 = vmatprep.mubr.msk.f32.mxu0 %vm5953_vm2, %v9205_v26 }
 0x1c0   :  { %5249 = vmatmul.mubr.msk.f32.gmra.mxu0 %vm475_vm3, %v6335_v35 }
 0x1c1   :  { %5251 = vmatprep.mubr.msk.f32.mxu0 %vm5953_vm2, %v9205_v26 }
 0x1c4   :  { %5252 = vmatmul.mubr.msk.f32.gmra.mxu0 %vm475_vm3, %v6344_v59 }
 0x1c5   :  { %5254 = vmatprep.mubr.msk.f32.mxu0 %vm5953_vm2, %v9205_v26 }
 0x1c8   :  { %5255 = vmatmul.mubr.msk.f32.gmra.mxu0 %vm475_vm3, %v6353_v34 }
 0x1c9   :  { %5257 = vmatprep.mubr.msk.f32.mxu0 %vm5953_vm2, %v9205_v26 }
 0x1cc   :  { %5258 = vmatmul.mubr.msk.f32.gmra.mxu0 %vm475_vm3, %v6362_v32 }
 0x1cd   :  { %5260 = vmatprep.mubr.msk.f32.mxu0 %vm5953_vm2, %v9205_v26 }
 0x1d0   :  { %5261 = vmatmul.mubr.msk.f32.gmra.mxu0 %vm475_vm3, %v6371_v36 }
 0x1d1   :  { %5263 = vmatprep.mubr.msk.f32.mxu0 %vm5953_vm2, %v9205_v26 }
 0x1d4   :  { %5264 = vmatmul.mubr.msk.f32.gmra.mxu0 %vm475_vm3, %v6380_v29 }
 0x1d5   :  { %5266 = vmatprep.mubr.msk.f32.mxu0 %vm5953_vm2, %v9205_v26 }
 0x1d8   :  { %5267 = vmatmul.mubr.msk.f32.gmra.mxu0 %vm475_vm3, %v6389_v18 }
 0x1d9   :  { %5269 = vmatprep.mubr.msk.f32.mxu0 %vm5953_vm2, %v9205_v26 }
 0x1dc   :  { %5270 = vmatmul.mubr.msk.f32.gmra.mxu0 %vm475_vm3, %v6398_v57 }
 0x1dd   :  { %5272 = vmatprep.mubr.msk.f32.mxu0 %vm5953_vm2, %v9205_v26 }
 0x1e0   :  { %5273 = vmatmul.mubr.msk.f32.gmra.mxu0 %vm475_vm3, %v6407_v1 }
 0x1e1   :  { %5275 = vmatprep.mubr.msk.f32.mxu0 %vm5953_vm2, %v9205_v26 }
 0x1e4   :  { %5276 = vmatmul.mubr.msk.f32.gmra.mxu0 %vm475_vm3, %v6416_v3 }
 0x274   :  { %v584_v17 = vpop.f32.mrf.mxu0 }
 0x276   :  { %v5241_v2 = vpop.f32.mrf.mxu0 }
 0x278   :  { %v589_v21 = vpop.f32.mrf.mxu0 }
 0x27a   :  { %v5244_v28 = vpop.f32.mrf.mxu0 }
 0x27c   :  { %v594_v57 = vpop.f32.mrf.mxu0 }
 0x27e   :  { %v5247_v18 = vpop.f32.mrf.mxu0 }
 0x280   :  { %v599_v29 = vpop.f32.mrf.mxu0 }
 0x282   :  { %v5250_v36 = vpop.f32.mrf.mxu0 }
 0x284   :  { %v604_v1 = vpop.f32.mrf.mxu0 }
 0x286   :  { %v5253_v32 = vpop.f32.mrf.mxu0 }
 0x288   :  { %v609_v34 = vpop.f32.mrf.mxu0 }
 0x28a   :  { %v5256_v26 = vpop.f32.mrf.mxu0 }
 0x28c   :  { %v614_v59 = vpop.f32.mrf.mxu0 }
 0x28e   :  { %v5259_v35 = vpop.f32.mrf.mxu0 }
 0x290   :  { %v619_v33 = vpop.f32.mrf.mxu0 }
 0x292   :  { %v5262_v22 = vpop.f32.mrf.mxu0 }
 0x294   :  { %v624_v25 = vpop.f32.mrf.mxu0 }
 0x296   :  { %v5265_v44 = vpop.f32.mrf.mxu0 }
 0x298   :  { %v629_v40 = vpop.f32.mrf.mxu0 }
 0x29a   :  { %v5268_v3 = vpop.f32.mrf.mxu0 }
 0x29c   :  { %v634_v42 = vpop.f32.mrf.mxu0 }
 0x29d   :  { %700 = vperm.xlu1 %5477, %v634_v42  }
 0x29e   :  { %v5271_v2 = vpop.f32.mrf.mxu0 }
 0x2a0   :  { %v639_v28 = vpop.f32.mrf.mxu0 }
 0x2a1   :  { %695 = vperm.xlu1 %5477, %v629_v40   ;;  %705 = vperm.xlu0 %5476, %v639_v28  }
 0x2a2   :  { %v5274_v18 = vpop.f32.mrf.mxu0 }
 0x2a4   :  { %v644_v36 = vpop.f32.mrf.mxu0 }
 0x2a5   :  { %690 = vperm.xlu1 %5477, %v624_v25   ;;  %660 = vperm.xlu0 %5476, %v594_v57  }
 0x2a6   :  { %v5277_v32 = vpop.f32.mrf.mxu0 }
 0x2a9   :  { %650 = vperm.xlu0 %5476, %v584_v17   ;;  %710 = vperm.xlu1 %5477, %v644_v36  }
 0x2ad   :  { %685 = vperm.xlu1 %5477, %v619_v33  }
 0x2b1   :  { %680 = vperm.xlu1 %5477, %v614_v59  }
 0x2b5   :  { %675 = vperm.xlu1 %5477, %v609_v34  }
 0x2b9   :  { %670 = vperm.xlu1 %5477, %v604_v1  }
 0x2bd   :  { %665 = vperm.xlu1 %5477, %v599_v29  }
 0x2c1   :  { %655 = vperm.xlu1 %5477, %v589_v21  }
 0x318   :  { %v701_v44 = vpop.permute.xlu1 %700 }
 0x319   :  { %v6421_v42 = vsub.f32 %v6206_v13, %v701_v44  ;;  %v6424_v40 = vsub.f32 %v6210_v15, %v701_v44  ;;  %v6434_v59 = vsub.f32 %v6208_v14, %v701_v44 }
 0x31b   :  { %v805_v33 = vmul.f32 %v6421_v42, %v6421_v42  ;;  %v806_v35 = vmul.f32 %v6424_v40, %v6424_v40  ;;  %9302 = vst [vmem:[#allocation25_spill] sm:$0xff] %v6434_v59 }
 0x31c   :  { %v696_v26 = vpop.permute.xlu1 %695  ;;  %v706_v22 = vpop.permute.xlu0 %705 }
 0x31d   :  { %v6427_v25 = vsub.f32 %v6218_v19, %v706_v22  ;;  %v6437_v13 = vsub.f32 %v6225_v23, %v706_v22  ;;  %v6440_v15 = vsub.f32 %v6220_v20, %v706_v22  ;;  %v6443_v34 = vsub.f32 %v6198_v9, %v696_v26 }
 0x31e   :  { %v6446_v19 = vsub.f32 %v6202_v11, %v696_v26  ;;  %v6451_v1 = vsub.f32 %v6227_v24, %v706_v22  ;;  %v6456_v23 = vsub.f32 %v6212_v16, %v701_v44  ;;  %v867_v11 = vadd.f32 %v806_v35, %v805_v33 }
 0x31f   :  { %9301 = vst [vmem:[#allocation24_spill] sm:$0xff] %v6427_v25  ;;  %9303 = vst [vmem:[#allocation26_spill] sm:$0xff] %v6437_v13  ;;  %v809_v29 = vmul.f32 %v6427_v25, %v6427_v25  ;;  %v810_v14 = vmul.f32 %v6437_v13, %v6437_v13  ;;  %v811_v3 = vmul.f32 %v6440_v15, %v6440_v15 }
 0x320   :  { %9304 = vst [vmem:[#allocation27_spill] sm:$0xff] %v6440_v15  ;;  %v691_v57 = vpop.permute.xlu1 %690  ;;  %9305 = vst [vmem:[#allocation28_spill] sm:$0xff] %v6451_v1  ;;  %v807_v24 = vmul.f32 %v6434_v59, %v6434_v59  ;;  %v812_v18 = vmul.f32 %v6451_v1, %v6451_v1  ;;  %v808_v32 = vmul.f32 %v6456_v23, %v6456_v23  ;;  %v6486_v22 = vpop.permute.xlu0 %660 }
 0x321   :  { %9306 = vst [vmem:[#allocation29_spill] sm:$0xff] %v6456_v23  ;;  %v6459_v20 = vsub.f32 %v6190_v5, %v691_v57  ;;  %v6462_v9 = vsub.f32 %v6194_v7, %v691_v57  ;;  %v872_v17 = vadd.f32 %v810_v14, %v809_v29  ;;  %v801_v5 = vmul.f32 %v6443_v34, %v6443_v34  ;;  %v9309_v14 = vld [vmem:[#allocation10_spill] sm:$0xff] }
 0x322   :  { %v802_v7 = vmul.f32 %v6446_v19, %v6446_v19  ;;  %v6477_v2 = vsub.f32 %v6192_v6, %v691_v57  ;;  %v6484_v44 = vsub.f32 %v6200_v10, %v696_v26  ;;  %v868_v35 = vadd.f32 %v867_v11, %v807_v24 }
 0x323   :  { %v797_v21 = vmul.f32 %v6459_v20, %v6459_v20  ;;  %v798_v16 = vmul.f32 %v6462_v9, %v6462_v9  ;;  %v873_v36 = vadd.f32 %v872_v17, %v811_v3  ;;  %v6492_v6 = vsub.f32 %v6204_v12, %v696_v26 }
 0x324   :  { %v711_v28 = vpop.permute.xlu1 %710  ;;  %v862_v24 = vadd.f32 %v802_v7, %v801_v5  ;;  %v6510_v12 = vsub.f32 %v6142_v45, %v6486_v22  ;;  %v803_v45 = vmul.f32 %v6484_v44, %v6484_v44 }
 0x325   :  { %v6489_v33 = vsub.f32 %v6231_v27, %v711_v28  ;;  %v6495_v29 = vsub.f32 %v6237_v30, %v711_v28  ;;  %v6498_v3 = vsub.f32 %v9309_v14, %v711_v28  ;;  %v6501_v17 = vsub.f32 %v6239_v31, %v711_v28 }
 0x326   :  { %v874_v10 = vadd.f32 %v873_v36, %v812_v18  ;;  %v6506_v27 = vsub.f32 %v6196_v8, %v691_v57  ;;  %v857_v11 = vadd.f32 %v798_v16, %v797_v21  ;;  %v799_v31 = vmul.f32 %v6477_v2, %v6477_v2  ;;  %v9312_v18 = vld [vmem:[#allocation7_spill] sm:$0xff]  ;;  %v9313_v57 = vld [vmem:[#allocation9_spill] sm:$0xff] }
 0x327   :  { %9307 = vst [vmem:[#allocation30_spill] sm:$0xff] %v6489_v33  ;;  %9308 = vst [vmem:[#allocation31_spill] sm:$0xff] %v6495_v29  ;;  %v813_v1 = vmul.f32 %v6489_v33, %v6489_v33  ;;  %v814_v30 = vmul.f32 %v6495_v29, %v6495_v29  ;;  %v815_v28 = vmul.f32 %v6498_v3, %v6498_v3 }
 0x328   :  { %9310 = vst [vmem:[#allocation10_spill] sm:$0xff] %v6498_v3  ;;  %9311 = vst [vmem:[#allocation32_spill] sm:$0xff] %v6501_v17  ;;  %875 = vadd.xlane.f32.xlu0 %v874_v10  ;;  %v686_v26 = vpop.permute.xlu1 %685  ;;  %v869_v16 = vadd.f32 %v868_v35, %v808_v32  ;;  %v858_v5 = vadd.f32 %v857_v11, %v799_v31  ;;  %v816_v7 = vmul.f32 %v6501_v17, %v6501_v17  ;;  %v9314_v35 = vld [vmem:[#allocation8_spill] sm:$0xff] }
 0x329   :  { %v6519_v8 = vsub.f32 %v9312_v18, %v686_v26  ;;  %v6522_v21 = vsub.f32 %v9313_v57, %v686_v26  ;;  %v877_v36 = vsel %vm451_vm1, %v813_v1, 0.0  ;;  %v878_v14 = vsel %vm451_vm1, %v814_v30, 0.0 }
 0x32a   :  { %v6532_v10 = vsub.f32 %v6146_v47, %v6486_v22  ;;  %v800_v18 = vmul.f32 %v6506_v27, %v6506_v27  ;;  %v879_v57 = vadd.f32 %v878_v14, %v877_v36  ;;  %v863_v32 = vadd.f32 %v862_v24, %v803_v45 }
 0x32b   :  { %v6537_v3 = vsub.f32 %v9314_v35, %v686_v26  ;;  %v880_v31 = vsel %vm451_vm1, %v815_v28, 0.0  ;;  %v793_v1 = vmul.f32 %v6519_v8, %v6519_v8  ;;  %v794_v30 = vmul.f32 %v6522_v21, %v6522_v21 }
 0x32c   :  { %870 = vadd.xlane.f32.xlu0 %v869_v16  ;;  %v681_v11 = vpop.permute.xlu1 %680  ;;  %v881_v45 = vadd.f32 %v880_v31, %v879_v57  ;;  %v859_v16 = vadd.f32 %v858_v5, %v800_v18  ;;  %v882_v36 = vsel %vm451_vm1, %v816_v7, 0.0  ;;  %v804_v28 = vmul.f32 %v6492_v6, %v6492_v6  ;;  %v6572_v57 = vpop.permute.xlu0 %650 }
 0x32d   :  { %v6545_v47 = vsub.f32 %v6174_v61, %v681_v11  ;;  %v6548_v17 = vsub.f32 %v6178_v63, %v681_v11  ;;  %v6551_v24 = vsub.f32 %v6176_v62, %v681_v11  ;;  %v852_v14 = vadd.f32 %v794_v30, %v793_v1  ;;  %v9316_v1 = vld [vmem:[#allocation6_spill] sm:$0xff] }
 0x32e   :  { %v883_v35 = vadd.f32 %v882_v36, %v881_v45  ;;  %v6557_v29 = vsub.f32 %v6180_v0, %v681_v11  ;;  %v6565_v62 = vsub.f32 %v6144_v46, %v6486_v22  ;;  %v864_v7 = vadd.f32 %v863_v32, %v804_v28  ;;  %v9315_v11 = vld [vmem:[#allocation5_spill] sm:$0xff] }
 0x32f   :  { %v789_v61 = vmul.f32 %v6545_v47, %v6545_v47  ;;  %v790_v63 = vmul.f32 %v6548_v17, %v6548_v17  ;;  %v6568_v18 = vsub.f32 %v6188_v4, %v686_v26  ;;  %v795_v0 = vmul.f32 %v6537_v3, %v6537_v3 }
 0x330   :  { %860 = vadd.xlane.f32.xlu0 %v859_v16  ;;  %v676_v5 = vpop.permute.xlu1 %675  ;;  %884 = vadd.xlane.f32.xlu1 %v883_v35  ;;  %v791_v46 = vmul.f32 %v6551_v24, %v6551_v24  ;;  %v773_v26 = vmul.f32 %v6510_v12, %v6510_v12  ;;  %v774_v16 = vmul.f32 %v6532_v10, %v6532_v10 }
 0x331   :  { %v6575_v31 = vsub.f32 %v9315_v11, %v676_v5  ;;  %v6578_v30 = vsub.f32 %v9316_v1, %v676_v5  ;;  %v847_v45 = vadd.f32 %v790_v63, %v789_v61  ;;  %v6583_v32 = vsub.f32 %v6168_v58, %v676_v5 }
 0x332   :  { %v853_v4 = vadd.f32 %v852_v14, %v795_v0  ;;  %v792_v36 = vmul.f32 %v6557_v29, %v6557_v29  ;;  %v6597_v58 = vsub.f32 %v6126_v37, %v6572_v57  ;;  %v6601_v14 = vsub.f32 %v6130_v39, %v6572_v57 }
 0x333   :  { %v848_v28 = vadd.f32 %v847_v45, %v791_v46  ;;  %v785_v35 = vmul.f32 %v6575_v31, %v6575_v31  ;;  %v786_v61 = vmul.f32 %v6578_v30, %v6578_v30  ;;  %v796_v0 = vmul.f32 %v6568_v18, %v6568_v18 }
 0x334   :  { %v671_v63 = vpop.permute.xlu1 %670  ;;  %v6606_v11 = vsub.f32 %v6172_v60, %v676_v5  ;;  %865 = vadd.xlane.f32.xlu1 %v864_v7  ;;  %v6619_v39 = vsub.f32 %v6128_v38, %v6572_v57  ;;  %v787_v60 = vmul.f32 %v6583_v32, %v6583_v32  ;;  %v827_v7 = vadd.f32 %v774_v16, %v773_v26 }
 0x335   :  { %v6609_v1 = vsub.f32 %v6158_v53, %v671_v63  ;;  %v6612_v46 = vsub.f32 %v6162_v55, %v671_v63  ;;  %v6615_v37 = vsub.f32 %v6160_v54, %v671_v63  ;;  %v849_v45 = vadd.f32 %v848_v28, %v792_v36 }
 0x336   :  { %v854_v33 = vadd.f32 %v853_v4, %v796_v0  ;;  %v842_v5 = vadd.f32 %v786_v61, %v785_v35  ;;  %v6624_v53 = vsub.f32 %v6164_v56, %v671_v63  ;;  %v788_v38 = vmul.f32 %v6606_v11, %v6606_v11 }
 0x337   :  { %850 = vadd.xlane.f32.xlu0 %v849_v45  ;;  %v781_v55 = vmul.f32 %v6609_v1, %v6609_v1  ;;  %v782_v54 = vmul.f32 %v6612_v46, %v6612_v46  ;;  %v765_v28 = vmul.f32 %v6597_v58, %v6597_v58  ;;  %v766_v35 = vmul.f32 %v6601_v14, %v6601_v14 }
 0x338   :  { %v666_v36 = vpop.permute.xlu1 %665  ;;  %v843_v4 = vadd.f32 %v842_v5, %v787_v60  ;;  %855 = vadd.xlane.f32.xlu1 %v854_v33  ;;  %v783_v26 = vmul.f32 %v6615_v37, %v6615_v37  ;;  %v6649_v45 = vsub.f32 %v6148_v48, %v6486_v22  ;;  %v775_v33 = vmul.f32 %v6565_v62, %v6565_v62 }
 0x339   :  { %v6637_v56 = vsub.f32 %v6150_v49, %v666_v36  ;;  %v6640_v61 = vsub.f32 %v6154_v51, %v666_v36  ;;  %v837_v16 = vadd.f32 %v782_v54, %v781_v55  ;;  %v6645_v63 = vsub.f32 %v6152_v50, %v666_v36 }
 0x33a   :  { %v844_v0 = vadd.f32 %v843_v4, %v788_v38  ;;  %v784_v49 = vmul.f32 %v6624_v53, %v6624_v53  ;;  %v828_v55 = vadd.f32 %v827_v7, %v775_v33  ;;  %v6660_v54 = vsub.f32 %v6156_v52, %v666_v36  ;;  %v9317_v4 = vld [vmem:[#allocation3_spill] sm:$0xff]  ;;  %v9318_v36 = vld [vmem:[#allocation2_spill] sm:$0xff] }
 0x33b   :  { %v838_v51 = vadd.f32 %v837_v16, %v783_v26  ;;  %v777_v60 = vmul.f32 %v6637_v56, %v6637_v56  ;;  %v778_v5 = vmul.f32 %v6640_v61, %v6640_v61  ;;  %v817_v48 = vadd.f32 %v766_v35, %v765_v28 }
 0x33c   :  { %v656_v50 = vpop.permute.xlu1 %655  ;;  %845 = vadd.xlane.f32.xlu1 %v844_v0  ;;  %v776_v15 = vmul.f32 %v6649_v45, %v6649_v45  ;;  %v779_v7 = vmul.f32 %v6645_v63, %v6645_v63  ;;  %v6677_v28 = vsub.f32 %v9318_v36, %v6572_v57 }
 0x33d   :  { %v6663_v22 = vsub.f32 %v6134_v41, %v656_v50  ;;  %v6666_v38 = vsub.f32 %v6138_v43, %v656_v50  ;;  %v6669_v26 = vsub.f32 %v9317_v4, %v656_v50  ;;  %v839_v16 = vadd.f32 %v838_v51, %v784_v49  ;;  %v9319_v43 = vld [vmem:[#allocation4_spill] sm:$0xff] }
 0x33e   :  { %v832_v52 = vadd.f32 %v778_v5, %v777_v60  ;;  %v767_v41 = vmul.f32 %v6619_v39, %v6619_v39  ;;  %v6682_v35 = vsub.f32 %v9319_v43, %v656_v50  ;;  %v780_v49 = vmul.f32 %v6660_v54, %v6660_v54 }
 0x33f   :  { %840 = vadd.xlane.f32.xlu0 %v839_v16  ;;  %v769_v0 = vmul.f32 %v6663_v22, %v6663_v22  ;;  %v770_v33 = vmul.f32 %v6666_v38, %v6666_v38  ;;  %v829_v60 = vadd.f32 %v828_v55, %v776_v15  ;;  %v771_v5 = vmul.f32 %v6669_v26, %v6669_v26 }
 0x340   :  { %v833_v51 = vadd.f32 %v832_v52, %v779_v7  ;;  %v818_v57 = vadd.f32 %v817_v48, %v767_v41  ;;  %v768_v50 = vmul.f32 %v6677_v28, %v6677_v28  ;;  %v772_v36 = vmul.f32 %v6682_v35, %v6682_v35 }
 0x341   :  { %v822_v4 = vadd.f32 %v770_v33, %v769_v0  ;;  %v9320_v41 = vmov 0.0  }
 0x342   :  { %v834_v16 = vadd.f32 %v833_v51, %v780_v49  ;;  %v819_v13 = vadd.f32 %v818_v57, %v768_v50 }
 0x343   :  { %830 = vadd.xlane.f32.xlu0 %v829_v60  ;;  %v823_v43 = vadd.f32 %v822_v4, %v771_v5 }
 0x344   :  { %835 = vadd.xlane.f32.xlu1 %v834_v16 }
 0x345   :  { %v824_v25 = vadd.f32 %v823_v43, %v772_v36 }
 0x347   :  { %820 = vadd.xlane.f32.xlu0 %v819_v13 }
 0x348   :  { %825 = vadd.xlane.f32.xlu1 %v824_v25 }
 0x3b1   :  { %v876_v15 = vpop.xlane.xlu0 %875 }
 0x3b2   :  { %v897_v52 = vmul.f32 0.001953125, %v876_v15 }
 0x3b5   :  { %v871_v55 = vpop.xlane.xlu0 %870 }
 0x3b6   :  { %v896_v33 = vmul.f32 0.001953125, %v871_v55 }
 0x3b9   :  { %v885_v48 = vpop.xlane.xlu1 %884  ;;  %v861_v49 = vpop.xlane.xlu0 %860 }
 0x3ba   :  { %v898_v7 = vmul.f32 0.001953125, %v885_v48  ;;  %v894_v13 = vmul.f32 0.001953125, %v861_v49  ;;  %v9321_v49 = vld [vmem:[#allocation11_spill] sm:$0xff] }
 0x3bc   :  { %5279 = vmatpush3.msk.msra.mxu1 %vm451_vm1, %v898_v7 }
 0x3bd   :  { %5280 = vmatprep.subr.mxu1 %v9320_v41  ;;  %v866_v0 = vpop.xlane.xlu1 %865 }
 0x3be   :  { %5281 = vmatpush3.msra.mxu1 %v897_v52  ;;  %v895_v51 = vmul.f32 0.001953125, %v866_v0 }
 0x3bf   :  { %5282 = vmatprep.subr.mxu1 %v9320_v41 }
 0x3c0   :  { %5283 = vmatpush3.msra.mxu1 %v896_v33  ;;  %v851_v60 = vpop.xlane.xlu0 %850 }
 0x3c1   :  { %5284 = vmatprep.subr.mxu1 %v9320_v41  ;;  %v856_v25 = vpop.xlane.xlu1 %855  ;;  %v892_v4 = vmul.f32 0.001953125, %v851_v60  ;;  %v9325_v60 = vld [vmem:[#allocation15_spill] sm:$0xff] }
 0x3c2   :  { %5285 = vmatpush3.msra.mxu1 %v895_v51  ;;  %v893_v57 = vmul.f32 0.001953125, %v856_v25  ;;  %v9322_v51 = vld [vmem:[#allocation12_spill] sm:$0xff]  ;;  %v9323_v25 = vld [vmem:[#allocation13_spill] sm:$0xff] }
 0x3c3   :  { %5286 = vmatprep.subr.mxu1 %v9320_v41 }
 0x3c4   :  { %5287 = vmatpush3.msra.mxu1 %v894_v13  ;;  %v9324_v13 = vld [vmem:[#allocation14_spill] sm:$0xff] }
 0x3c5   :  { %5288 = vmatprep.subr.mxu1 %v9320_v41  ;;  %v846_v5 = vpop.xlane.xlu1 %845 }
 0x3c6   :  { %5289 = vmatpush3.msra.mxu1 %v893_v57  ;;  %v891_v50 = vmul.f32 0.001953125, %v846_v5  ;;  %v9326_v57 = vld [vmem:[#allocation16_spill] sm:$0xff]  ;;  %v9327_v5 = vld [vmem:[#allocation17_spill] sm:$0xff] }
 0x3c7   :  { %5290 = vmatprep.subr.mxu1 %v9320_v41 }
 0x3c8   :  { %v841_v16 = vpop.xlane.xlu0 %840  ;;  %5291 = vmatpush3.msra.mxu1 %v892_v4  ;;  %v9328_v4 = vld [vmem:[#allocation18_spill] sm:$0xff] }
 0x3c9   :  { %v890_v36 = vmul.f32 0.001953125, %v841_v16  ;;  %5292 = vmatprep.subr.mxu1 %v9320_v41  ;;  %v9329_v16 = vld [vmem:[#allocation19_spill] sm:$0xff] }
 0x3ca   :  { %5293 = vmatpush3.msra.mxu1 %v891_v50  ;;  %v9330_v50 = vld [vmem:[#allocation20_spill] sm:$0xff] }
 0x3cb   :  { %5294 = vmatprep.subr.mxu1 %v9320_v41 }
 0x3cc   :  { %v831_v43 = vpop.xlane.xlu0 %830  ;;  %5295 = vmatpush3.msra.mxu1 %v890_v36  ;;  %v9331_v36 = vld [vmem:[#allocation21_spill] sm:$0xff] }
 0x3cd   :  { %v836_v15 = vpop.xlane.xlu1 %835  ;;  %5296 = vmatprep.subr.mxu1 %v9320_v41  ;;  %v888_v48 = vmul.f32 0.001953125, %v831_v43  ;;  %v9332_v43 = vld [vmem:[#allocation22_spill] sm:$0xff] }
 0x3ce   :  { %v889_v55 = vmul.f32 0.001953125, %v836_v15  ;;  %v9333_v15 = vld [vmem:[#allocation23_spill] sm:$0xff] }
 0x3d0   :  { %5297 = vmatpush3.msra.mxu1 %v889_v55  ;;  %v821_v7 = vpop.xlane.xlu0 %820  ;;  %v5502_v55 = vld [vmem:[%s9184_s5 + $0xe0] ss:$16 sps:$4 sm:$0xff]  }
 0x3d1   :  { %5298 = vmatprep.subr.mxu1 %v9320_v41  ;;  %v826_v52 = vpop.xlane.xlu1 %825  ;;  %v886_v33 = vmul.f32 0.001953125, %v821_v7  ;;  %v5505_v7 = vld [vmem:[%s9184_s5 + $0x2e0] ss:$16 sps:$4 sm:$0xff]  }
 0x3d2   :  { %v887_v0 = vmul.f32 0.001953125, %v826_v52  ;;  %5299 = vmatpush3.msra.mxu1 %v888_v48  ;;  %v5504_v48 = vld [vmem:[%s9184_s5 + $0xe4] ss:$16 sps:$4 sm:$0xff]  }
 0x3d3   :  { %5300 = vmatprep.subr.mxu1 %v9320_v41  ;;  %v5507_v52 = vld [vmem:[%s9184_s5 + $0x2e4] ss:$16 sps:$4 sm:$0xff]   ;;  %2156 = vmatprep.subr.bf16.mxu0 %v5504_v48 }
 0x3d4   :  { %5301 = vmatpush3.msra.mxu1 %v887_v0  ;;  %v5508_v0 = vld [vmem:[%s9184_s5 + $0xc0] ss:$16 sps:$4 sm:$0xff]   ;;  %2157 = vmatpush1.bf16.msra.mxu0 %v5502_v55  ;;  %v5534_v48 = vld [vmem:[%s9184_s5 + $0x44] ss:$16 sps:$4 sm:$0xff]  }
 0x3d5   :  { %5302 = vmatprep.subr.mxu1 %v9320_v41  ;;  %v5529_v55 = vld [vmem:[%s9184_s5 + $0x260] ss:$16 sps:$4 sm:$0xff]  }
 0x3d6   :  { %5303 = vmatpush3.msra.mxu1 %v886_v33  ;;  %v5510_v33 = vld [vmem:[%s9184_s5 + $0xc4] ss:$16 sps:$4 sm:$0xff]  }
 0x3d7   :  { %5305 = vmatmul.mubr.msk.f32.vlgmr.msra.gmra.mxu1 %vm475_vm3, %v9321_v49  ;;  %2257 = vmatprep.subr.bf16.mxu1 %v5507_v52  ;;  %v5511_v49 = vld [vmem:[%s9184_s5 + $0x2c0] ss:$16 sps:$4 sm:$0xff]  }
 0x3d8   :  { %5307 = vmatprep.mubr.msk.f32.mxu1 %vm5953_vm2, %v9320_v41  ;;  %2258 = vmatpush1.bf16.msra.mxu1 %v5505_v7  ;;  %v5537_v7 = vld [vmem:[%s9184_s5 + $0x244] ss:$16 sps:$4 sm:$0xff]   ;;  %v5532_v52 = vld [vmem:[%s9184_s5 + $0x40] ss:$16 sps:$4 sm:$0xff]  }
 0x3d9   :  { %2158 = vmatprep.subr.bf16.mxu0 %v5510_v33  ;;  %v5540_v33 = vld [vmem:[%s9184_s5 + $0x24] ss:$16 sps:$4 sm:$0xff]  }
 0x3da   :  { %2159 = vmatpush1.bf16.msra.mxu0 %v5508_v0  ;;  %v5535_v0 = vld [vmem:[%s9184_s5 + $0x240] ss:$16 sps:$4 sm:$0xff]  }
 0x3db   :  { %5308 = vmatmul.mubr.msk.f32.gmra.mxu1 %vm475_vm3, %v9322_v51  ;;  %v5513_v51 = vld [vmem:[%s9184_s5 + $0x2c4] ss:$16 sps:$4 sm:$0xff]  }
 0x3dc   :  { %5310 = vmatprep.mubr.msk.f32.mxu1 %vm5953_vm2, %v9320_v41  ;;  %2259 = vmatprep.subr.bf16.mxu1 %v5513_v51  ;;  %v5538_v51 = vld [vmem:[%s9184_s5 + $0x20] ss:$16 sps:$4 sm:$0xff]  }
 0x3dd   :  { %2260 = vmatpush1.bf16.msra.mxu1 %v5511_v49  ;;  %v5543_v49 = vld [vmem:[%s9184_s5 + $0x224] ss:$16 sps:$4 sm:$0xff]  }
 0x3df   :  { %5311 = vmatmul.mubr.msk.f32.gmra.mxu1 %vm475_vm3, %v9323_v25  ;;  %v5516_v25 = vld [vmem:[%s9184_s5 + $0xa4] ss:$16 sps:$4 sm:$0xff]  }
 0x3e0   :  { %5313 = vmatprep.mubr.msk.f32.mxu1 %vm5953_vm2, %v9320_v41  ;;  %2160 = vmatprep.subr.bf16.mxu0 %v5516_v25  ;;  %v5541_v25 = vld [vmem:[%s9184_s5 + $0x220] ss:$16 sps:$4 sm:$0xff]  }
 0x3e3   :  { %5314 = vmatmul.mubr.msk.f32.gmra.mxu1 %vm475_vm3, %v9324_v13  ;;  %v5514_v13 = vld [vmem:[%s9184_s5 + $0xa0] ss:$16 sps:$4 sm:$0xff]  }
 0x3e4   :  { %5316 = vmatprep.mubr.msk.f32.mxu1 %vm5953_vm2, %v9320_v41  ;;  %2161 = vmatpush1.bf16.msra.mxu0 %v5514_v13  ;;  %v5546_v13 = vld [vmem:[%s9184_s5 + $0x4] ss:$16 sps:$4 sm:$0xff]  }
 0x3e7   :  { %5317 = vmatmul.mubr.msk.f32.gmra.mxu1 %vm475_vm3, %v9325_v60  ;;  %v5519_v60 = vld [vmem:[%s9184_s5 + $0x2a4] ss:$16 sps:$4 sm:$0xff]  }
 0x3e8   :  { %5319 = vmatprep.mubr.msk.f32.mxu1 %vm5953_vm2, %v9320_v41  ;;  %2261 = vmatprep.subr.bf16.mxu1 %v5519_v60  ;;  %v5549_v60 = vld [vmem:[%s9184_s5 + $0x204] ss:$16 sps:$4 sm:$0xff]  }
 0x3eb   :  { %5320 = vmatmul.mubr.msk.f32.gmra.mxu1 %vm475_vm3, %v9326_v57  ;;  %v5517_v57 = vld [vmem:[%s9184_s5 + $0x2a0] ss:$16 sps:$4 sm:$0xff]  }
 0x3ec   :  { %5322 = vmatprep.mubr.msk.f32.mxu1 %vm5953_vm2, %v9320_v41  ;;  %2262 = vmatpush1.bf16.msra.mxu1 %v5517_v57  ;;  %v5544_v57 = vld [vmem:[%s9184_s5] ss:$16 sps:$4 sm:$0xff]  }
 0x3ef   :  { %5323 = vmatmul.mubr.msk.f32.gmra.mxu1 %vm475_vm3, %v9327_v5  ;;  %v5522_v5 = vld [vmem:[%s9184_s5 + $0x84] ss:$16 sps:$4 sm:$0xff]  }
 0x3f0   :  { %5325 = vmatprep.mubr.msk.f32.mxu1 %vm5953_vm2, %v9320_v41  ;;  %2162 = vmatprep.subr.bf16.mxu0 %v5522_v5  ;;  %v5547_v5 = vld [vmem:[%s9184_s5 + $0x200] ss:$16 sps:$4 sm:$0xff]  }
 0x3f3   :  { %5326 = vmatmul.mubr.msk.f32.gmra.mxu1 %vm475_vm3, %v9328_v4  ;;  %v5525_v4 = vld [vmem:[%s9184_s5 + $0x284] ss:$16 sps:$4 sm:$0xff]  }
 0x3f4   :  { %5328 = vmatprep.mubr.msk.f32.mxu1 %vm5953_vm2, %v9320_v41  ;;  %2263 = vmatprep.subr.bf16.mxu1 %v5525_v4  ;;  %v5552_v4 = vld [vmem:[%s9184_s5 + $0x1e4] ss:$16 sps:$4 sm:$0xff]  }
 0x3f7   :  { %5329 = vmatmul.mubr.msk.f32.gmra.mxu1 %vm475_vm3, %v9329_v16  ;;  %v5520_v16 = vld [vmem:[%s9184_s5 + $0x80] ss:$16 sps:$4 sm:$0xff]  }
 0x3f8   :  { %5331 = vmatprep.mubr.msk.f32.mxu1 %vm5953_vm2, %v9320_v41  ;;  %2163 = vmatpush1.bf16.msra.mxu0 %v5520_v16  ;;  %v5555_v16 = vld [vmem:[%s9184_s5 + $0x3e4] ss:$16 sps:$4 sm:$0xff]  }
 0x3fb   :  { %5332 = vmatmul.mubr.msk.f32.gmra.mxu1 %vm475_vm3, %v9330_v50  ;;  %v5523_v50 = vld [vmem:[%s9184_s5 + $0x280] ss:$16 sps:$4 sm:$0xff]  }
 0x3fc   :  { %5334 = vmatprep.mubr.msk.f32.mxu1 %vm5953_vm2, %v9320_v41  ;;  %2264 = vmatpush1.bf16.msra.mxu1 %v5523_v50  ;;  %v5550_v50 = vld [vmem:[%s9184_s5 + $0x1e0] ss:$16 sps:$4 sm:$0xff]  }
 0x3ff   :  { %5335 = vmatmul.mubr.msk.f32.gmra.mxu1 %vm475_vm3, %v9331_v36  ;;  %v5528_v36 = vld [vmem:[%s9184_s5 + $0x64] ss:$16 sps:$4 sm:$0xff]  }
 0x400   :  { %5337 = vmatprep.mubr.msk.f32.mxu1 %vm5953_vm2, %v9320_v41  ;;  %2164 = vmatprep.subr.bf16.mxu0 %v5528_v36  ;;  %v5553_v36 = vld [vmem:[%s9184_s5 + $0x3e0] ss:$16 sps:$4 sm:$0xff]  }
 0x403   :  { %5338 = vmatmul.mubr.msk.f32.gmra.mxu1 %vm475_vm3, %v9332_v43  ;;  %v5531_v43 = vld [vmem:[%s9184_s5 + $0x264] ss:$16 sps:$4 sm:$0xff]  }
 0x404   :  { %5340 = vmatprep.mubr.msk.f32.mxu1 %vm5953_vm2, %v9320_v41  ;;  %2265 = vmatprep.subr.bf16.mxu1 %v5531_v43  ;;  %v5558_v43 = vld [vmem:[%s9184_s5 + $0x1c4] ss:$16 sps:$4 sm:$0xff]  }
 0x405   :  { %2266 = vmatpush1.bf16.msra.mxu1 %v5529_v55  ;;  %v5561_v55 = vld [vmem:[%s9184_s5 + $0x3c4] ss:$16 sps:$4 sm:$0xff]  }
 0x406   :  { %2267 = vmatprep.subr.bf16.mxu1 %v5537_v7  ;;  %v5564_v7 = vld [vmem:[%s9184_s5 + $0x1a4] ss:$16 sps:$4 sm:$0xff]  }
 0x407   :  { %5341 = vmatmul.mubr.msk.f32.gmra.mxu1 %vm475_vm3, %v9333_v15  ;;  %v5526_v15 = vld [vmem:[%s9184_s5 + $0x60] ss:$16 sps:$4 sm:$0xff]  }
 0x408   :  { %2165 = vmatpush1.bf16.msra.mxu0 %v5526_v15  ;;  %v5556_v15 = vld [vmem:[%s9184_s5 + $0x1c0] ss:$16 sps:$4 sm:$0xff]  }
 0x409   :  { %2166 = vmatprep.subr.bf16.mxu0 %v5534_v48  ;;  %2268 = vmatpush1.bf16.msra.mxu1 %v5535_v0  ;;  %v5559_v48 = vld [vmem:[%s9184_s5 + $0x3c0] ss:$16 sps:$4 sm:$0xff]  }
 0x40a   :  { %2269 = vmatprep.subr.bf16.mxu1 %v5543_v49  ;;  %v5562_v0 = vld [vmem:[%s9184_s5 + $0x1a0] ss:$16 sps:$4 sm:$0xff]   ;;  %v5570_v49 = vld [vmem:[%s9184_s5 + $0x184] ss:$16 sps:$4 sm:$0xff]  }
 0x40c   :  { %2167 = vmatpush1.bf16.msra.mxu0 %v5532_v52  ;;  %v5567_v52 = vld [vmem:[%s9184_s5 + $0x3a4] ss:$16 sps:$4 sm:$0xff]  }
 0x40d   :  { %2168 = vmatprep.subr.bf16.mxu0 %v5540_v33  ;;  %2270 = vmatpush1.bf16.msra.mxu1 %v5541_v25  ;;  %v5565_v33 = vld [vmem:[%s9184_s5 + $0x3a0] ss:$16 sps:$4 sm:$0xff]  }
 0x40e   :  { %2271 = vmatprep.subr.bf16.mxu1 %v5549_v60  ;;  %v5568_v25 = vld [vmem:[%s9184_s5 + $0x180] ss:$16 sps:$4 sm:$0xff]   ;;  %v5576_v60 = vld [vmem:[%s9184_s5 + $0x164] ss:$16 sps:$4 sm:$0xff]  }
 0x410   :  { %2169 = vmatpush1.bf16.msra.mxu0 %v5538_v51  ;;  %v5573_v51 = vld [vmem:[%s9184_s5 + $0x384] ss:$16 sps:$4 sm:$0xff]  }
 0x411   :  { %2170 = vmatprep.subr.bf16.mxu0 %v5546_v13  ;;  %2272 = vmatpush1.bf16.msra.mxu1 %v5547_v5  ;;  %v5571_v13 = vld [vmem:[%s9184_s5 + $0x380] ss:$16 sps:$4 sm:$0xff]  }
 0x412   :  { %2273 = vmatprep.subr.bf16.mxu1 %v5555_v16  ;;  %v5574_v5 = vld [vmem:[%s9184_s5 + $0x160] ss:$16 sps:$4 sm:$0xff]  }
 0x414   :  { %2171 = vmatpush1.bf16.msra.mxu0 %v5544_v57  ;;  %v5579_v57 = vld [vmem:[%s9184_s5 + $0x364] ss:$16 sps:$4 sm:$0xff]  }
 0x415   :  { %2172 = vmatprep.subr.bf16.mxu0 %v5552_v4  ;;  %2274 = vmatpush2.bf16.msra.mxu1 %v5553_v36  ;;  %v5577_v4 = vld [vmem:[%s9184_s5 + $0x360] ss:$16 sps:$4 sm:$0xff]  }
 0x416   :  { %2275 = vmatprep.subr.bf16.mxu1 %v5561_v55 }
 0x418   :  { %2173 = vmatpush2.bf16.msra.mxu0 %v5550_v50 }
 0x419   :  { %2174 = vmatprep.subr.bf16.mxu0 %v5558_v43  ;;  %2276 = vmatpush2.bf16.msra.mxu1 %v5559_v48 }
 0x41a   :  { %2277 = vmatprep.subr.bf16.mxu1 %v5567_v52 }
 0x41c   :  { %2175 = vmatpush2.bf16.msra.mxu0 %v5556_v15 }
 0x41d   :  { %2176 = vmatprep.subr.bf16.mxu0 %v5564_v7  ;;  %2278 = vmatpush2.bf16.msra.mxu1 %v5565_v33 }
 0x41e   :  { %2279 = vmatprep.subr.bf16.mxu1 %v5573_v51 }
 0x420   :  { %2177 = vmatpush2.bf16.msra.mxu0 %v5562_v0 }
 0x421   :  { %2178 = vmatprep.subr.bf16.mxu0 %v5570_v49  ;;  %2280 = vmatpush2.bf16.msra.mxu1 %v5571_v13 }
 0x422   :  { %2281 = vmatprep.subr.bf16.mxu1 %v5579_v57  ;;  %v5580_v57 = vld [vmem:[%s9184_s5 + $0x140] ss:$16 sps:$4 sm:$0xff]  }
 0x424   :  { %2179 = vmatpush2.bf16.msra.mxu0 %v5568_v25 }
 0x425   :  { %2180 = vmatprep.subr.bf16.mxu0 %v5576_v60  ;;  %2282 = vmatpush2.bf16.msra.mxu1 %v5577_v4  ;;  %v5583_v4 = vld [vmem:[%s9184_s5 + $0x340] ss:$16 sps:$4 sm:$0xff]  }
 0x428   :  { %2181 = vmatpush2.bf16.msra.mxu0 %v5574_v5  ;;  %v5582_v5 = vld [vmem:[%s9184_s5 + $0x144] ss:$16 sps:$4 sm:$0xff]  }
 0x429   :  { %2182 = vmatprep.subr.bf16.mxu0 %v5582_v5 }
 0x42c   :  { %2183 = vmatpush2.bf16.msra.mxu0 %v5580_v57 }
 0x497   :  { %v968_v16 = vpop.f32.mrf.mxu1 }
 0x498   :  { %v969_v50 = vadd.f32 1e-05, %v968_v16 }
 0x499   :  { %v5306_v36 = vpop.f32.mrf.mxu1 }
 0x49a   :  { %5886 = vrsqrt.f32 %v969_v50  ;;  %v5585_v36 = vld [vmem:[%s9184_s5 + $0x344] ss:$16 sps:$4 sm:$0xff]  }
 0x49b   :  { %v973_v43 = vpop.f32.mrf.mxu1  ;;  %2283 = vmatprep.subr.bf16.mxu1 %v5585_v36  ;;  %v5603_v36 = vld [vmem:[%s9184_s5 + $0x2ec] ss:$16 sps:$4 sm:$0xff]  }
 0x49c   :  { %v974_v15 = vadd.f32 1e-05, %v973_v43  ;;  %2284 = vmatpush2.bf16.msra.mxu1 %v5583_v4  ;;  %v5595_v4 = vld [vmem:[%s9184_s5 + $0x300] ss:$16 sps:$4 sm:$0xff]  }
 0x49d   :  { %v5309_v55 = vpop.f32.mrf.mxu1 }
 0x49e   :  { %5888 = vrsqrt.f32 %v974_v15 }
 0x49f   :  { %v978_v48 = vpop.f32.mrf.mxu1 }
 0x4a0   :  { %v979_v7 = vadd.f32 1e-05, %v978_v48 }
 0x4a1   :  { %v5312_v52 = vpop.f32.mrf.mxu1 }
 0x4a2   :  { %5890 = vrsqrt.f32 %v979_v7  ;;  %v5586_v7 = vld [vmem:[%s9184_s5 + $0x120] ss:$16 sps:$4 sm:$0xff]   ;;  %v5588_v52 = vld [vmem:[%s9184_s5 + $0x124] ss:$16 sps:$4 sm:$0xff]  }
 0x4a3   :  { %v983_v0 = vpop.f32.mrf.mxu1  ;;  %2184 = vmatprep.subr.bf16.mxu0 %v5588_v52 }
 0x4a4   :  { %v984_v33 = vadd.f32 1e-05, %v983_v0  ;;  %v5589_v0 = vld [vmem:[%s9184_s5 + $0x320] ss:$16 sps:$4 sm:$0xff]   ;;  %2185 = vmatpush2.bf16.msra.mxu0 %v5586_v7 }
 0x4a5   :  { %v5315_v49 = vpop.f32.mrf.mxu1 }
 0x4a6   :  { %5892 = vrsqrt.f32 %v984_v33  ;;  %v5591_v49 = vld [vmem:[%s9184_s5 + $0x324] ss:$16 sps:$4 sm:$0xff]  }
 0x4a7   :  { %v5887_v51 = vpop.eup %5886  ;;  %v988_v25 = vpop.f32.mrf.mxu1  ;;  %2285 = vmatprep.subr.bf16.mxu1 %v5591_v49 }
 0x4a8   :  { %v989_v13 = vadd.f32 1e-05, %v988_v25  ;;  %1047 = vperm.xlu1 %5477, %v5887_v51   ;;  %v5594_v25 = vld [vmem:[%s9184_s5 + $0x104] ss:$16 sps:$4 sm:$0xff]   ;;  %2286 = vmatpush2.bf16.msra.mxu1 %v5589_v0 }
 0x4a9   :  { %v5318_v60 = vpop.f32.mrf.mxu1  ;;  %2186 = vmatprep.subr.bf16.mxu0 %v5594_v25 }
 0x4aa   :  { %5894 = vrsqrt.f32 %v989_v13  ;;  %v5597_v13 = vld [vmem:[%s9184_s5 + $0x304] ss:$16 sps:$4 sm:$0xff]   ;;  %v5592_v60 = vld [vmem:[%s9184_s5 + $0x100] ss:$16 sps:$4 sm:$0xff]  }
 0x4ab   :  { %v5889_v16 = vpop.eup %5888  ;;  %v993_v50 = vpop.f32.mrf.mxu1  ;;  %2287 = vmatprep.subr.bf16.mxu1 %v5597_v13  ;;  %2187 = vmatpush2.bf16.msra.mxu0 %v5592_v60 }
 0x4ac   :  { %v994_v43 = vadd.f32 1e-05, %v993_v50  ;;  %1052 = vperm.xlu0 %5476, %v5889_v16   ;;  %v5600_v16 = vld [vmem:[%s9184_s5 + $0xec] ss:$16 sps:$4 sm:$0xff]   ;;  %2288 = vmatpush2.bf16.msra.mxu1 %v5595_v4 }
 0x4ad   :  { %v5321_v15 = vpop.f32.mrf.mxu1  ;;  %2358 = vmatprep.subr.bf16.mxu0 %v5600_v16  ;;  %2459 = vmatprep.subr.bf16.mxu1 %v5603_v36 }
 0x4ae   :  { %5896 = vrsqrt.f32 %v994_v43 }
 0x4af   :  { %v5891_v55 = vpop.eup %5890  ;;  %v998_v48 = vpop.f32.mrf.mxu1 }
 0x4b0   :  { %v999_v33 = vadd.f32 1e-05, %v998_v48  ;;  %1057 = vperm.xlu1 %5477, %v5891_v55  }
 0x4b1   :  { %v5324_v51 = vpop.f32.mrf.mxu1 }
 0x4b2   :  { %5898 = vrsqrt.f32 %v999_v33 }
 0x4b3   :  { %v5893_v57 = vpop.eup %5892  ;;  %v1003_v5 = vpop.f32.mrf.mxu1 }
 0x4b4   :  { %v1004_v50 = vadd.f32 1e-05, %v1003_v5  ;;  %1062 = vperm.xlu1 %5477, %v5893_v57  }
 0x4b5   :  { %v5327_v43 = vpop.f32.mrf.mxu1 }
 0x4b6   :  { %5900 = vrsqrt.f32 %v1004_v50 }
 0x4b7   :  { %v5895_v15 = vpop.eup %5894  ;;  %v1008_v55 = vpop.f32.mrf.mxu1 }
 0x4b8   :  { %v1009_v48 = vadd.f32 1e-05, %v1008_v55  ;;  %1067 = vperm.xlu0 %5476, %v5895_v15  }
 0x4b9   :  { %v5330_v7 = vpop.f32.mrf.mxu1 }
 0x4ba   :  { %5902 = vrsqrt.f32 %v1009_v48 }
 0x4bb   :  { %v5897_v52 = vpop.eup %5896  ;;  %v1013_v0 = vpop.f32.mrf.mxu1 }
 0x4bc   :  { %v1014_v33 = vadd.f32 1e-05, %v1013_v0  ;;  %1072 = vperm.xlu1 %5477, %v5897_v52   ;;  %v1163_v0 = vlaneseq }
 0x4bd   :  { %v5333_v49 = vpop.f32.mrf.mxu1 }
 0x4be   :  { %5904 = vrsqrt.f32 %v1014_v33  ;;  %v1164_v33 = vshrl.u32 %v1163_v0, 7 }
 0x4bf   :  { %v5899_v51 = vpop.eup %5898  ;;  %v1018_v25 = vpop.f32.mrf.mxu1 }
 0x4c0   :  { %v1019_v13 = vadd.f32 1e-05, %v1018_v25  ;;  %1077 = vperm.xlu0 %5476, %v5899_v51   ;;  %v6957_v49 = vsub.s32 0, %v1164_v33  ;;  %v6959_v51 = vsub.s32 1, %v1164_v33  ;;  %v6961_v25 = vsub.s32 2, %v1164_v33 }
 0x4c1   :  { %v5336_v60 = vpop.f32.mrf.mxu1 }
 0x4c2   :  { %5906 = vrsqrt.f32 %v1019_v13  ;;  %9334 = vst [vmem:[#allocation7_spill] sm:$0xff] %v6957_v49  ;;  %9335 = vst [vmem:[#allocation9_spill] sm:$0xff] %v6959_v51  ;;  %v6963_v13 = vsub.s32 3, %v1164_v33  ;;  %v389_v60 = vld [vmem:[%s9185_s3] sm:$0xf] }
 0x4c3   :  { %v5901_v57 = vpop.eup %5900  ;;  %v1023_v5 = vpop.f32.mrf.mxu1  ;;  %9336 = vst [vmem:[#allocation8_spill] sm:$0xff] %v6961_v25 }
 0x4c4   :  { %v1024_v4 = vadd.f32 1e-05, %v1023_v5  ;;  %1082 = vperm.xlu1 %5477, %v5901_v57   ;;  %9337 = vst [vmem:[#allocation5_spill] sm:$0xff] %v6963_v13  ;;  %v390_v57 = vld [vmem:[%s9186_s4] sm:$0xf]  ;;  %v6972_v5 = vrot.slane %v389_v60, %v6957_v49 }
 0x4c5   :  { %v5339_v16 = vpop.f32.mrf.mxu1  ;;  %v6994_v0 = vrot.slane %v390_v57, %v6959_v51  ;;  %v6997_v33 = vrot.slane %v390_v57, %v6963_v13 }
 0x4c6   :  { %5908 = vrsqrt.f32 %v1024_v4  ;;  %v6975_v4 = vrot.slane %v389_v60, %v6959_v51  ;;  %v6978_v16 = vrot.slane %v389_v60, %v6961_v25 }
 0x4c7   :  { %v5903_v50 = vpop.eup %5902  ;;  %v1028_v36 = vpop.f32.mrf.mxu1 }
 0x4c8   :  { %v1029_v43 = vadd.f32 1e-05, %v1028_v36  ;;  %1087 = vperm.xlu0 %5476, %v5903_v50   ;;  %v6981_v50 = vrot.slane %v389_v60, %v6963_v13  ;;  %v6984_v36 = vrot.slane %v390_v57, %v6957_v49 }
 0x4c9   :  { %v5342_v15 = vpop.f32.mrf.mxu1 }
 0x4ca   :  { %5910 = vrsqrt.f32 %v1029_v43  ;;  %v6987_v43 = vrot.slane %v390_v57, %v6961_v25 }
 0x4cb   :  { %v5905_v55 = vpop.eup %5904 }
 0x4cc   :  { %1092 = vperm.xlu1 %5477, %v5905_v55  }
 0x4cf   :  { %v5907_v48 = vpop.eup %5906 }
 0x4d0   :  { %1097 = vperm.xlu0 %5476, %v5907_v48  }
 0x4d3   :  { %v5909_v7 = vpop.eup %5908 }
 0x4d4   :  { %1102 = vperm.xlu1 %5477, %v5909_v7  }
 0x4d7   :  { %v5911_v52 = vpop.eup %5910 }
 0x4d8   :  { %1107 = vperm.xlu0 %5476, %v5911_v52  }
 0x523   :  { %v1048_v15 = vpop.permute.xlu1 %1047 }
 0x524   :  { %v1110_v55 = vmul.f32 %v1048_v15, %v6597_v58  ;;  %v1111_v48 = vmul.f32 %v1048_v15, %v6601_v14  ;;  %v1112_v7 = vmul.f32 %v1048_v15, %v6619_v39  ;;  %v1113_v52 = vmul.f32 %v1048_v15, %v6677_v28 }
 0x526   :  { %v1183_v60 = vmul.f32 %v6972_v5, %v1110_v55  ;;  %v1184_v25 = vmul.f32 %v6975_v4, %v1111_v48  ;;  %v1185_v49 = vmul.f32 %v6978_v16, %v1112_v7  ;;  %v1186_v58 = vmul.f32 %v6981_v50, %v1113_v52 }
 0x527   :  { %v1053_v41 = vpop.permute.xlu0 %1052 }
 0x528   :  { %v1256_v14 = vadd.f32 %v6984_v36, %v1183_v60  ;;  %v1258_v39 = vadd.f32 %v6987_v43, %v1185_v49  ;;  %v1114_v28 = vmul.f32 %v1053_v41, %v6663_v22  ;;  %v1115_v15 = vmul.f32 %v1053_v41, %v6666_v38 }
 0x529   :  { %v1116_v57 = vmul.f32 %v1053_v41, %v6669_v26  ;;  %v1117_v13 = vmul.f32 %v1053_v41, %v6682_v35  ;;  %v1257_v55 = vadd.f32 %v6994_v0, %v1184_v25  ;;  %v1259_v48 = vadd.f32 %v6997_v33, %v1186_v58 }
 0x52a   :  { %v1308_v7 = vmax.f32 %v1256_v14, 0.0  ;;  %v1310_v51 = vmax.f32 %v1258_v39, 0.0  ;;  %v1187_v52 = vmul.f32 %v6972_v5, %v1114_v28  ;;  %v1188_v60 = vmul.f32 %v6975_v4, %v1115_v15 }
 0x52b   :  { %v1189_v49 = vmul.f32 %v6978_v16, %v1116_v57  ;;  %v1190_v22 = vmul.f32 %v6981_v50, %v1117_v13  ;;  %v1058_v23 = vpop.permute.xlu1 %1057  ;;  %v1309_v38 = vmax.f32 %v1257_v55, 0.0  ;;  %v1311_v59 = vmax.f32 %v1259_v48, 0.0 }
 0x52c   :  { %v1260_v26 = vadd.f32 %v6984_v36, %v1187_v52  ;;  %v1118_v35 = vmul.f32 %v1058_v23, %v6510_v12  ;;  %v1119_v41 = vmul.f32 %v1058_v23, %v6532_v10  ;;  %v1120_v25 = vmul.f32 %v1058_v23, %v6565_v62 }
 0x52d   :  { %v1262_v58 = vadd.f32 %v6987_v43, %v1189_v49  ;;  %v1121_v14 = vmul.f32 %v1058_v23, %v6649_v45  ;;  %v1261_v39 = vadd.f32 %v6994_v0, %v1188_v60  ;;  %v1263_v28 = vadd.f32 %v6997_v33, %v1190_v22 }
 0x52e   :  { %v1312_v13 = vmax.f32 %v1260_v26, 0.0  ;;  %v1191_v15 = vmul.f32 %v6972_v5, %v1118_v35  ;;  %v1192_v57 = vmul.f32 %v6975_v4, %v1119_v41  ;;  %v7026_v55 = vmul.f32 %v6978_v16, %v1120_v25  ;;  %v5598_v35 = vld [vmem:[%s9184_s5 + $0xe8] ss:$16 sps:$4 sm:$0xff]  }
 0x52f   :  { %v1314_v12 = vmax.f32 %v1262_v58, 0.0  ;;  %v1194_v10 = vmul.f32 %v6981_v50, %v1121_v14  ;;  %v1063_v62 = vpop.permute.xlu1 %1062  ;;  %v1313_v48 = vmax.f32 %v1261_v39, 0.0  ;;  %v1315_v52 = vmax.f32 %v1263_v28, 0.0  ;;  %v5601_v41 = vld [vmem:[%s9184_s5 + $0x2e8] ss:$16 sps:$4 sm:$0xff]  }
 0x530   :  { %v1122_v23 = vmul.f32 %v1063_v62, %v6637_v56  ;;  %v1123_v45 = vmul.f32 %v1063_v62, %v6640_v61  ;;  %v1124_v60 = vmul.f32 %v1063_v62, %v6645_v63  ;;  %v1125_v49 = vmul.f32 %v1063_v62, %v6660_v54  ;;  %v5609_v58 = vld [vmem:[%s9184_s5 + $0x2cc] ss:$16 sps:$4 sm:$0xff]  }
 0x531   :  { %v7033_v22 = vpack.c.bf16 %v1313_v48, %v1309_v38  ;;  %v7035_v26 = vpack.c.bf16 %v1315_v52, %v1311_v59  ;;  %v7043_v25 = vpack.c.bf16 %v1312_v13, %v1308_v7  ;;  %v7045_v56 = vpack.c.bf16 %v1314_v12, %v1310_v51  ;;  %v5606_v38 = vld [vmem:[%s9184_s5 + $0xcc] ss:$16 sps:$4 sm:$0xff]  }
 0x532   :  { %v1195_v61 = vmul.f32 %v6972_v5, %v1122_v23  ;;  %v1196_v63 = vmul.f32 %v6975_v4, %v1123_v45  ;;  %v1197_v54 = vmul.f32 %v6978_v16, %v1124_v60  ;;  %v1198_v59 = vmul.f32 %v6981_v50, %v1125_v49  ;;  %v5612_v52 = vld [vmem:[%s9184_s5 + $0xac] ss:$16 sps:$4 sm:$0xff]  }
 0x533   :  { %2188 = vmatprep.mubr.bf16.mxu0 %v7033_v22  ;;  %2289 = vmatprep.mubr.bf16.mxu1 %v7035_v26  ;;  %v1068_v51 = vpop.permute.xlu0 %1067  ;;  %v1265_v7 = vadd.f32 %v6994_v0, %v1192_v57  ;;  %v1267_v14 = vadd.f32 %v6997_v33, %v1194_v10  ;;  %v1264_v39 = vadd.f32 %v6984_v36, %v1191_v15  ;;  %v5604_v57 = vld [vmem:[%s9184_s5 + $0xc8] ss:$16 sps:$4 sm:$0xff]  }
 0x534   :  { %2189 = vmatmul.mubr.bf16.vlgmr.msra.gmra.mxu0 %v7043_v25  ;;  %2290 = vmatmul.mubr.bf16.vlgmr.msra.gmra.mxu1 %v7045_v56  ;;  %v1126_v28 = vmul.f32 %v1068_v51, %v6609_v1  ;;  %v1127_v13 = vmul.f32 %v1068_v51, %v6612_v46  ;;  %v1128_v12 = vmul.f32 %v1068_v51, %v6615_v37  ;;  %v5607_v15 = vld [vmem:[%s9184_s5 + $0x2c8] ss:$16 sps:$4 sm:$0xff]  }
 0x535   :  { %2359 = vmatpush1.bf16.msra.mxu0 %v5598_v35  ;;  %2460 = vmatpush1.bf16.msra.mxu1 %v5601_v41  ;;  %v1129_v62 = vmul.f32 %v1068_v51, %v6624_v53  ;;  %v1269_v10 = vadd.f32 %v6994_v0, %v1196_v63  ;;  %v1271_v1 = vadd.f32 %v6997_v33, %v1198_v59  ;;  %v1317_v53 = vmax.f32 %v1265_v7, 0.0 }
 0x536   :  { %v7077_v46 = vmul.f32 %v6972_v5, %v1126_v28  ;;  %v1200_v37 = vmul.f32 %v6975_v4, %v1127_v13  ;;  %v7081_v48 = vmul.f32 %v6978_v16, %v1128_v12  ;;  %2360 = vmatprep.subr.bf16.mxu0 %v5606_v38  ;;  %2461 = vmatprep.subr.bf16.mxu1 %v5609_v58  ;;  %v1319_v60 = vmax.f32 %v1267_v14, 0.0  ;;  %v5615_v58 = vld [vmem:[%s9184_s5 + $0x2ac] ss:$16 sps:$4 sm:$0xff]   ;;  %v5610_v12 = vld [vmem:[%s9184_s5 + $0xa8] ss:$16 sps:$4 sm:$0xff]  }
 0x537   :  { %v1073_v23 = vpop.permute.xlu1 %1072  ;;  %v1321_v45 = vmax.f32 %v1269_v10, 0.0  ;;  %v1323_v49 = vmax.f32 %v1271_v1, 0.0  ;;  %v1268_v35 = vadd.f32 %v6984_v36, %v1195_v61  ;;  %v1202_v41 = vmul.f32 %v6981_v50, %v1129_v62  ;;  %v5613_v61 = vld [vmem:[%s9184_s5 + $0x2a8] ss:$16 sps:$4 sm:$0xff]   ;;  %v5621_v10 = vld [vmem:[%s9184_s5 + $0x28c] ss:$16 sps:$4 sm:$0xff]  }
 0x538   :  { %v1130_v63 = vmul.f32 %v1073_v23, %v6575_v31  ;;  %v1131_v59 = vmul.f32 %v1073_v23, %v6578_v30  ;;  %v1133_v38 = vmul.f32 %v1073_v23, %v6606_v11  ;;  %v1316_v14 = vmax.f32 %v1264_v39, 0.0 }
 0x539   :  { %2361 = vmatpush1.bf16.msra.mxu0 %v5604_v57  ;;  %2462 = vmatpush1.bf16.msra.mxu1 %v5607_v15  ;;  %v7094_v51 = vpack.c.bf16 %v1321_v45, %v1317_v53  ;;  %v7096_v7 = vpack.c.bf16 %v1323_v49, %v1319_v60  ;;  %v1320_v31 = vmax.f32 %v1268_v35, 0.0  ;;  %v1132_v30 = vmul.f32 %v1073_v23, %v6583_v32  ;;  %v5618_v15 = vld [vmem:[%s9184_s5 + $0x8c] ss:$16 sps:$4 sm:$0xff]  }
 0x53a   :  { %v1203_v11 = vmul.f32 %v6972_v5, %v1130_v63  ;;  %v1204_v28 = vmul.f32 %v6975_v4, %v1131_v59  ;;  %v1206_v13 = vmul.f32 %v6981_v50, %v1133_v38  ;;  %2362 = vmatprep.subr.bf16.mxu0 %v5612_v52  ;;  %v1266_v32 = vadd.f32 %v6987_v43, %v7026_v55 }
 0x53b   :  { %2198 = vmatprep.mubr.bf16.mxu0 %v7094_v51  ;;  %2299 = vmatprep.mubr.bf16.mxu1 %v7096_v7  ;;  %v7110_v62 = vpack.c.bf16 %v1320_v31, %v1316_v14  ;;  %v1270_v39 = vadd.f32 %v6987_v43, %v1197_v54  ;;  %v1078_v57 = vpop.permute.xlu0 %1077  ;;  %v1273_v45 = vadd.f32 %v6994_v0, %v1200_v37  ;;  %v5619_v37 = vld [vmem:[%s9184_s5 + $0x288] ss:$16 sps:$4 sm:$0xff]  }
 0x53c   :  { %2463 = vmatprep.subr.bf16.mxu1 %v5615_v58  ;;  %v1134_v1 = vmul.f32 %v1078_v57, %v6545_v47  ;;  %v1135_v53 = vmul.f32 %v1078_v57, %v6548_v17  ;;  %v1136_v52 = vmul.f32 %v1078_v57, %v6551_v24  ;;  %v1137_v55 = vmul.f32 %v1078_v57, %v6557_v29  ;;  %v5616_v24 = vld [vmem:[%s9184_s5 + $0x88] ss:$16 sps:$4 sm:$0xff]  }
 0x53d   :  { %2199 = vmatmul.mubr.bf16.gmra.mxu0 %v7110_v62  ;;  %v1318_v54 = vmax.f32 %v1266_v32, 0.0  ;;  %v1322_v23 = vmax.f32 %v1270_v39, 0.0  ;;  %2464 = vmatpush1.bf16.msra.mxu1 %v5613_v61  ;;  %v1277_v60 = vadd.f32 %v6994_v0, %v1204_v28  ;;  %v1205_v49 = vmul.f32 %v6978_v16, %v1132_v30  ;;  %v5624_v61 = vld [vmem:[%s9184_s5 + $0x6c] ss:$16 sps:$4 sm:$0xff]  }
 0x53e   :  { %2363 = vmatpush1.bf16.msra.mxu0 %v5610_v12  ;;  %v7130_v47 = vmul.f32 %v6972_v5, %v1134_v1  ;;  %v7133_v17 = vmul.f32 %v6975_v4, %v1135_v53  ;;  %v7136_v29 = vmul.f32 %v6978_v16, %v1136_v52  ;;  %2465 = vmatprep.subr.bf16.mxu1 %v5621_v10  ;;  %v1325_v59 = vmax.f32 %v1273_v45, 0.0  ;;  %v5627_v12 = vld [vmem:[%s9184_s5 + $0x26c] ss:$16 sps:$4 sm:$0xff]  }
 0x53f   :  { %v7144_v35 = vpack.c.bf16 %v1322_v23, %v1318_v54  ;;  %2364 = vmatprep.subr.bf16.mxu0 %v5618_v15  ;;  %v1083_v63 = vpop.permute.xlu1 %1082  ;;  %v1329_v38 = vmax.f32 %v1277_v60, 0.0  ;;  %v1275_v58 = vadd.f32 %v6997_v33, %v1202_v41  ;;  %v1210_v41 = vmul.f32 %v6981_v50, %v1137_v55  ;;  %v5622_v15 = vld [vmem:[%s9184_s5 + $0x68] ss:$16 sps:$4 sm:$0xff]   ;;  %v5630_v55 = vld [vmem:[%s9184_s5 + $0x4c] ss:$16 sps:$4 sm:$0xff]  }
 0x540   :  { %v1138_v14 = vmul.f32 %v1083_v63, %v6519_v8  ;;  %v1139_v31 = vmul.f32 %v1083_v63, %v6522_v21  ;;  %v1140_v30 = vmul.f32 %v1083_v63, %v6537_v3  ;;  %v1141_v28 = vmul.f32 %v1083_v63, %v6568_v18 }
 0x541   :  { %2300 = vmatmul.mubr.bf16.gmra.mxu1 %v7144_v35  ;;  %v7159_v32 = vpack.c.bf16 %v1329_v38, %v1325_v59  ;;  %v1279_v39 = vadd.f32 %v6997_v33, %v1206_v13  ;;  %v1272_v8 = vadd.f32 %v6984_v36, %v7077_v46  ;;  %v1327_v57 = vmax.f32 %v1275_v58, 0.0  ;;  %v5625_v13 = vld [vmem:[%s9184_s5 + $0x268] ss:$16 sps:$4 sm:$0xff]  }
 0x542   :  { %2365 = vmatpush1.bf16.msra.mxu0 %v5616_v24  ;;  %2466 = vmatpush1.bf16.msra.mxu1 %v5619_v37  ;;  %v7165_v3 = vmul.f32 %v6972_v5, %v1138_v14  ;;  %v1212_v21 = vmul.f32 %v6975_v4, %v1139_v31  ;;  %v7169_v18 = vmul.f32 %v6978_v16, %v1140_v30  ;;  %v5636_v31 = vld [vmem:[%s9184_s5 + $0x2c] ss:$16 sps:$4 sm:$0xff]  }
 0x543   :  { %v1214_v46 = vmul.f32 %v6981_v50, %v1141_v28  ;;  %2208 = vmatprep.mubr.bf16.mxu0 %v7159_v32  ;;  %v1331_v10 = vmax.f32 %v1279_v39, 0.0  ;;  %2366 = vmatprep.subr.bf16.mxu0 %v5624_v61  ;;  %v1276_v1 = vadd.f32 %v6984_v36, %v1203_v11  ;;  %v1324_v53 = vmax.f32 %v1272_v8, 0.0  ;;  %v1088_v52 = vpop.permute.xlu0 %1087  ;;  %v5633_v11 = vld [vmem:[%s9184_s5 + $0x24c] ss:$16 sps:$4 sm:$0xff]   ;;  %v5631_v61 = vld [vmem:[%s9184_s5 + $0x248] ss:$16 sps:$4 sm:$0xff]  }
 0x544   :  { %2467 = vmatprep.subr.bf16.mxu1 %v5627_v12  ;;  %v1274_v54 = vadd.f32 %v6987_v43, %v7081_v48  ;;  %v1278_v23 = vadd.f32 %v6987_v43, %v1205_v49  ;;  %v1142_v45 = vmul.f32 %v1088_v52, %v6459_v20  ;;  %v1143_v60 = vmul.f32 %v1088_v52, %v6462_v9  ;;  %v5628_v9 = vld [vmem:[%s9184_s5 + $0x48] ss:$16 sps:$4 sm:$0xff]   ;;  %v5639_v8 = vld [vmem:[%s9184_s5 + $0x22c] ss:$16 sps:$4 sm:$0xff]  }
 0x545   :  { %v7191_v24 = vpack.c.bf16 %v1331_v10, %v1327_v57  ;;  %v1328_v37 = vmax.f32 %v1276_v1, 0.0  ;;  %v1144_v63 = vmul.f32 %v1088_v52, %v6477_v2  ;;  %v1145_v59 = vmul.f32 %v1088_v52, %v6506_v27 }
 0x546   :  { %v1326_v38 = vmax.f32 %v1274_v54, 0.0  ;;  %v1330_v58 = vmax.f32 %v1278_v23, 0.0  ;;  %2367 = vmatpush1.bf16.msra.mxu0 %v5622_v15  ;;  %2468 = vmatpush1.bf16.msra.mxu1 %v5625_v13  ;;  %v7196_v48 = vmul.f32 %v6972_v5, %v1142_v45  ;;  %v7199_v20 = vmul.f32 %v6975_v4, %v1143_v60  ;;  %v5645_v60 = vld [vmem:[%s9184_s5 + $0x20c] ss:$16 sps:$4 sm:$0xff]  }
 0x547   :  { %2309 = vmatprep.mubr.bf16.mxu1 %v7191_v24  ;;  %v7205_v49 = vpack.c.bf16 %v1328_v37, %v1324_v53  ;;  %v7208_v2 = vmul.f32 %v6978_v16, %v1144_v63  ;;  %v7211_v27 = vmul.f32 %v6981_v50, %v1145_v59  ;;  %2368 = vmatprep.subr.bf16.mxu0 %v5630_v55  ;;  %v1093_v14 = vpop.permute.xlu1 %1092  ;;  %v5637_v53 = vld [vmem:[%s9184_s5 + $0x228] ss:$16 sps:$4 sm:$0xff]  }
 0x548   :  { %v7219_v30 = vpack.c.bf16 %v1330_v58, %v1326_v38  ;;  %2469 = vmatprep.subr.bf16.mxu1 %v5633_v11  ;;  %v1146_v28 = vmul.f32 %v1093_v14, %v6443_v34  ;;  %v1147_v12 = vmul.f32 %v1093_v14, %v6446_v19  ;;  %v1148_v39 = vmul.f32 %v1093_v14, %v6484_v44 }
 0x549   :  { %2209 = vmatmul.mubr.bf16.gmra.mxu0 %v7205_v49  ;;  %v1149_v57 = vmul.f32 %v1093_v14, %v6492_v6  ;;  %v1281_v15 = vadd.f32 %v6994_v0, %v7133_v17  ;;  %v1285_v13 = vadd.f32 %v6994_v0, %v1212_v21  ;;  %v1283_v10 = vadd.f32 %v6997_v33, %v1210_v41  ;;  %v5634_v6 = vld [vmem:[%s9184_s5 + $0x28] ss:$16 sps:$4 sm:$0xff]  }
 0x54a   :  { %2310 = vmatmul.mubr.bf16.gmra.mxu1 %v7219_v30  ;;  %2369 = vmatpush1.bf16.msra.mxu0 %v5628_v9  ;;  %v7235_v34 = vmul.f32 %v6972_v5, %v1146_v28  ;;  %v1220_v19 = vmul.f32 %v6975_v4, %v1147_v12  ;;  %v7239_v44 = vmul.f32 %v6978_v16, %v1148_v39 }
 0x54b   :  { %2470 = vmatpush1.bf16.msra.mxu1 %v5631_v61  ;;  %v7245_v17 = vmul.f32 %v6981_v50, %v1149_v57  ;;  %v1333_v41 = vmax.f32 %v1281_v15, 0.0  ;;  %v1337_v21 = vmax.f32 %v1285_v13, 0.0  ;;  %v1287_v1 = vadd.f32 %v6997_v33, %v1214_v46  ;;  %2370 = vmatprep.subr.bf16.mxu0 %v5636_v31  ;;  %v1098_v52 = vpop.permute.xlu0 %1097  ;;  %v5642_v46 = vld [vmem:[%s9184_s5 + $0xc] ss:$16 sps:$4 sm:$0xff]  }
 0x54c   :  { %v1335_v55 = vmax.f32 %v1283_v10, 0.0  ;;  %2471 = vmatprep.subr.bf16.mxu1 %v5639_v8  ;;  %v1280_v54 = vadd.f32 %v6984_v36, %v7130_v47  ;;  %v1284_v23 = vadd.f32 %v6984_v36, %v7165_v3  ;;  %v1282_v45 = vadd.f32 %v6987_v43, %v7136_v29  ;;  %v9338_v61 = vld [vmem:[#allocation25_spill] sm:$0xff] }
 0x54d   :  { %v7263_v11 = vpack.c.bf16 %v1337_v21, %v1333_v41  ;;  %v1339_v37 = vmax.f32 %v1287_v1, 0.0  ;;  %v1286_v47 = vadd.f32 %v6987_v43, %v7169_v18  ;;  %v1150_v63 = vmul.f32 %v1098_v52, %v6421_v42  ;;  %v9339_v31 = vld [vmem:[#allocation29_spill] sm:$0xff]  ;;  %v9341_v1 = vld [vmem:[#allocation26_spill] sm:$0xff] }
 0x54e   :  { %v1332_v3 = vmax.f32 %v1280_v54, 0.0  ;;  %v1336_v59 = vmax.f32 %v1284_v23, 0.0  ;;  %v1334_v38 = vmax.f32 %v1282_v45, 0.0  ;;  %2371 = vmatpush1.bf16.msra.mxu0 %v5634_v6  ;;  %v1151_v29 = vmul.f32 %v1098_v52, %v6424_v40  ;;  %v5640_v42 = vld [vmem:[%s9184_s5 + $0x8] ss:$16 sps:$4 sm:$0xff]   ;;  %v9340_v6 = vld [vmem:[#allocation24_spill] sm:$0xff] }
 0x54f   :  { %2218 = vmatprep.mubr.bf16.mxu0 %v7263_v11  ;;  %v7270_v58 = vpack.c.bf16 %v1339_v37, %v1335_v55  ;;  %v1338_v9 = vmax.f32 %v1286_v47, 0.0  ;;  %2472 = vmatpush1.bf16.msra.mxu1 %v5637_v53  ;;  %v1152_v14 = vmul.f32 %v1098_v52, %v9338_v61  ;;  %v1153_v28 = vmul.f32 %v1098_v52, %v9339_v31  ;;  %v1103_v18 = vpop.permute.xlu1 %1102  ;;  %v5643_v8 = vld [vmem:[%s9184_s5 + $0x208] ss:$16 sps:$4 sm:$0xff]   ;;  %v5648_v57 = vld [vmem:[%s9184_s5 + $0x1ec] ss:$16 sps:$4 sm:$0xff]   ;;  %v9343_v54 = vld [vmem:[#allocation28_spill] sm:$0xff] }
 0x550   :  { %v7277_v12 = vpack.c.bf16 %v1336_v59, %v1332_v3  ;;  %v7280_v39 = vmul.f32 %v6972_v5, %v1150_v63  ;;  %v1224_v40 = vmul.f32 %v6975_v4, %v1151_v29  ;;  %2372 = vmatprep.subr.bf16.mxu0 %v5642_v46  ;;  %2473 = vmatprep.subr.bf16.mxu1 %v5645_v60  ;;  %v5651_v21 = vld [vmem:[%s9184_s5 + $0x3ec] ss:$16 sps:$4 sm:$0xff]   ;;  %v5646_v47 = vld [vmem:[%s9184_s5 + $0x1e8] ss:$16 sps:$4 sm:$0xff]  }
 0x551   :  { %2319 = vmatprep.mubr.bf16.mxu1 %v7270_v58  ;;  %v7290_v15 = vpack.c.bf16 %v1338_v9, %v1334_v38  ;;  %v7293_v13 = vmul.f32 %v6978_v16, %v1152_v14  ;;  %v1226_v10 = vmul.f32 %v6981_v50, %v1153_v28  ;;  %v1154_v41 = vmul.f32 %v1103_v18, %v9340_v6  ;;  %v9342_v52 = vld [vmem:[#allocation27_spill] sm:$0xff] }
 0x552   :  { %2219 = vmatmul.mubr.bf16.gmra.mxu0 %v7277_v12  ;;  %v1155_v53 = vmul.f32 %v1103_v18, %v9341_v1  ;;  %v1156_v55 = vmul.f32 %v1103_v18, %v9342_v52  ;;  %v1157_v23 = vmul.f32 %v1103_v18, %v9343_v54  ;;  %v1289_v45 = vadd.f32 %v6994_v0, %v7199_v20  ;;  %v5657_v31 = vld [vmem:[%s9184_s5 + $0x3cc] ss:$16 sps:$4 sm:$0xff]   ;;  %v5652_v1 = vld [vmem:[%s9184_s5 + $0x1c8] ss:$16 sps:$4 sm:$0xff]   ;;  %v9347_v54 = vld [vmem:[#allocation32_spill] sm:$0xff] }
 0x553   :  { %2320 = vmatmul.mubr.bf16.gmra.mxu1 %v7290_v15  ;;  %2373 = vmatpush1.bf16.msra.mxu0 %v5640_v42  ;;  %v1227_v46 = vmul.f32 %v6972_v5, %v1154_v41  ;;  %v1293_v60 = vadd.f32 %v6994_v0, %v1220_v19  ;;  %v1291_v37 = vadd.f32 %v6997_v33, %v7211_v27  ;;  %v1108_v63 = vpop.permute.xlu0 %1107  ;;  %v5649_v19 = vld [vmem:[%s9184_s5 + $0x3e8] ss:$16 sps:$4 sm:$0xff]   ;;  %v5654_v27 = vld [vmem:[%s9184_s5 + $0x1cc] ss:$16 sps:$4 sm:$0xff]  }
 0x554   :  { %2474 = vmatpush1.bf16.msra.mxu1 %v5643_v8  ;;  %v1228_v3 = vmul.f32 %v6975_v4, %v1155_v53  ;;  %v1229_v20 = vmul.f32 %v6978_v16, %v1156_v55  ;;  %v1230_v59 = vmul.f32 %v6981_v50, %v1157_v23  ;;  %v1341_v38 = vmax.f32 %v1289_v45, 0.0  ;;  %2374 = vmatprep.subr.bf16.mxu0 %v5648_v57  ;;  %v9344_v8 = vld [vmem:[#allocation30_spill] sm:$0xff]  ;;  %v5655_v45 = vld [vmem:[%s9184_s5 + $0x3c8] ss:$16 sps:$4 sm:$0xff]  }
 0x555   :  { %v1345_v29 = vmax.f32 %v1293_v60, 0.0  ;;  %v1295_v9 = vadd.f32 %v6997_v33, %v7245_v17  ;;  %v1343_v61 = vmax.f32 %v1291_v37, 0.0  ;;  %2475 = vmatprep.subr.bf16.mxu1 %v5651_v21  ;;  %v1288_v14 = vadd.f32 %v6984_v36, %v7196_v48  ;;  %v9345_v48 = vld [vmem:[#allocation31_spill] sm:$0xff] }
 0x556   :  { %v1292_v28 = vadd.f32 %v6984_v36, %v7235_v34  ;;  %v1290_v42 = vadd.f32 %v6987_v43, %v7208_v2  ;;  %v1294_v18 = vadd.f32 %v6987_v43, %v7239_v44  ;;  %v1158_v17 = vmul.f32 %v1108_v63, %v9344_v8  ;;  %v9346_v2 = vld [vmem:[#allocation10_spill] sm:$0xff]  ;;  %v5660_v37 = vld [vmem:[%s9184_s5 + $0x1ac] ss:$16 sps:$4 sm:$0xff]  }
 0x557   :  { %v7337_v57 = vpack.c.bf16 %v1345_v29, %v1341_v38  ;;  %v1347_v6 = vmax.f32 %v1295_v9, 0.0  ;;  %v1340_v41 = vmax.f32 %v1288_v14, 0.0  ;;  %2375 = vmatpush2.bf16.msra.mxu0 %v5646_v47  ;;  %v1159_v21 = vmul.f32 %v1108_v63, %v9345_v48  ;;  %v5658_v9 = vld [vmem:[%s9184_s5 + $0x1a8] ss:$16 sps:$4 sm:$0xff]   ;;  %v5669_v48 = vld [vmem:[%s9184_s5 + $0x38c] ss:$16 sps:$4 sm:$0xff]  }
 0x558   :  { %v1344_v34 = vmax.f32 %v1292_v28, 0.0  ;;  %v1342_v53 = vmax.f32 %v1290_v42, 0.0  ;;  %v1346_v52 = vmax.f32 %v1294_v18, 0.0  ;;  %2476 = vmatpush2.bf16.msra.mxu1 %v5649_v19  ;;  %v1160_v55 = vmul.f32 %v1108_v63, %v9346_v2  ;;  %2376 = vmatprep.subr.bf16.mxu0 %v5654_v27  ;;  %v5666_v28 = vld [vmem:[%s9184_s5 + $0x18c] ss:$16 sps:$4 sm:$0xff]  }
 0x559   :  { %2228 = vmatprep.mubr.bf16.mxu0 %v7337_v57  ;;  %v7345_v44 = vpack.c.bf16 %v1347_v6, %v1343_v61  ;;  %v1161_v23 = vmul.f32 %v1108_v63, %v9347_v54  ;;  %2477 = vmatprep.subr.bf16.mxu1 %v5657_v31  ;;  %v1297_v60 = vadd.f32 %v6994_v0, %v1224_v40  ;;  %v5663_v63 = vld [vmem:[%s9184_s5 + $0x3ac] ss:$16 sps:$4 sm:$0xff]  }
 0x55a   :  { %v7355_v47 = vpack.c.bf16 %v1344_v34, %v1340_v41  ;;  %v7357_v38 = vpack.c.bf16 %v1346_v52, %v1342_v53  ;;  %v1301_v19 = vadd.f32 %v6994_v0, %v1228_v3  ;;  %v1299_v27 = vadd.f32 %v6997_v33, %v1226_v10 }
 0x55b   :  { %2329 = vmatprep.mubr.bf16.mxu1 %v7345_v44  ;;  %2377 = vmatpush2.bf16.msra.mxu0 %v5652_v1  ;;  %v1349_v40 = vmax.f32 %v1297_v60, 0.0  ;;  %v1303_v29 = vadd.f32 %v6997_v33, %v1230_v59  ;;  %v1296_v61 = vadd.f32 %v6984_v36, %v7280_v39  ;;  %v1300_v3 = vadd.f32 %v6984_v36, %v1227_v46  ;;  %v5661_v39 = vld [vmem:[%s9184_s5 + $0x3a8] ss:$16 sps:$4 sm:$0xff]  }
 0x55c   :  { %2229 = vmatmul.mubr.bf16.gmra.mxu0 %v7355_v47  ;;  %2330 = vmatmul.mubr.bf16.gmra.mxu1 %v7357_v38  ;;  %v1353_v10 = vmax.f32 %v1301_v19, 0.0  ;;  %v1351_v14 = vmax.f32 %v1299_v27, 0.0  ;;  %v1298_v31 = vadd.f32 %v6987_v43, %v7293_v13  ;;  %v1302_v59 = vadd.f32 %v6987_v43, %v1229_v20  ;;  %v5681_v27 = vld [vmem:[%s9184_s5 + $0x34c] ss:$16 sps:$4 sm:$0xff]  }
 0x55d   :  { %2478 = vmatpush2.bf16.msra.mxu1 %v5655_v45  ;;  %v1355_v42 = vmax.f32 %v1303_v29, 0.0  ;;  %2378 = vmatprep.subr.bf16.mxu0 %v5660_v37  ;;  %v1348_v46 = vmax.f32 %v1296_v61, 0.0  ;;  %v1352_v18 = vmax.f32 %v1300_v3, 0.0  ;;  %v1232_v8 = vmul.f32 %v6975_v4, %v1159_v21  ;;  %v5664_v4 = vld [vmem:[%s9184_s5 + $0x188] ss:$16 sps:$4 sm:$0xff]  }
 0x55e   :  { %v7384_v6 = vpack.c.bf16 %v1353_v10, %v1349_v40  ;;  %2479 = vmatprep.subr.bf16.mxu1 %v5663_v63  ;;  %v1350_v13 = vmax.f32 %v1298_v31, 0.0  ;;  %v1354_v20 = vmax.f32 %v1302_v59, 0.0  ;;  %v1234_v41 = vmul.f32 %v6981_v50, %v1161_v23  ;;  %v5676_v63 = vld [vmem:[%s9184_s5 + $0x148] ss:$16 sps:$4 sm:$0xff]   ;;  %v5684_v61 = vld [vmem:[%s9184_s5 + $0x12c] ss:$16 sps:$4 sm:$0xff]  }
 0x55f   :  { %v7390_v1 = vpack.c.bf16 %v1355_v42, %v1351_v14  ;;  %v7392_v34 = vpack.c.bf16 %v1352_v18, %v1348_v46  ;;  %2379 = vmatpush2.bf16.msra.mxu0 %v5658_v9  ;;  %v1305_v53 = vadd.f32 %v6994_v0, %v1232_v8  ;;  %v1231_v21 = vmul.f32 %v6972_v5, %v1158_v17  ;;  %v5667_v0 = vld [vmem:[%s9184_s5 + $0x388] ss:$16 sps:$4 sm:$0xff]   ;;  %v5672_v5 = vld [vmem:[%s9184_s5 + $0x16c] ss:$16 sps:$4 sm:$0xff]  }
 0x560   :  { %2238 = vmatprep.mubr.bf16.mxu0 %v7384_v6  ;;  %v7400_v50 = vpack.c.bf16 %v1354_v20, %v1350_v13  ;;  %v1307_v52 = vadd.f32 %v6997_v33, %v1234_v41  ;;  %2380 = vmatprep.subr.bf16.mxu0 %v5666_v28  ;;  %v1233_v2 = vmul.f32 %v6978_v16, %v1160_v55  ;;  %v5670_v16 = vld [vmem:[%s9184_s5 + $0x168] ss:$16 sps:$4 sm:$0xff]   ;;  %v5675_v55 = vld [vmem:[%s9184_s5 + $0x36c] ss:$16 sps:$4 sm:$0xff]  }
 0x561   :  { %2339 = vmatprep.mubr.bf16.mxu1 %v7390_v1  ;;  %2480 = vmatpush2.bf16.msra.mxu1 %v5661_v39  ;;  %v1357_v54 = vmax.f32 %v1305_v53, 0.0  ;;  %v1304_v17 = vadd.f32 %v6984_v36, %v1231_v21  ;;  %v5678_v36 = vld [vmem:[%s9184_s5 + $0x14c] ss:$16 sps:$4 sm:$0xff]   ;;  %v5679_v9 = vld [vmem:[%s9184_s5 + $0x348] ss:$16 sps:$4 sm:$0xff]  }
 0x562   :  { %v1359_v23 = vmax.f32 %v1307_v52, 0.0  ;;  %2481 = vmatprep.subr.bf16.mxu1 %v5669_v48  ;;  %v1306_v33 = vadd.f32 %v6987_v43, %v1233_v2  ;;  %v5673_v43 = vld [vmem:[%s9184_s5 + $0x368] ss:$16 sps:$4 sm:$0xff]   ;;  %v5687_v10 = vld [vmem:[%s9184_s5 + $0x32c] ss:$16 sps:$4 sm:$0xff]  }
 0x563   :  { %v7413_v45 = vpack.c.bf16 %v1357_v54, %v1357_v54  ;;  %2381 = vmatpush2.bf16.msra.mxu0 %v5664_v4  ;;  %v1356_v37 = vmax.f32 %v1304_v17, 0.0  ;;  %v5682_v3 = vld [vmem:[%s9184_s5 + $0x128] ss:$16 sps:$4 sm:$0xff]   ;;  %v5690_v14 = vld [vmem:[%s9184_s5 + $0x10c] ss:$16 sps:$4 sm:$0xff]  }
 0x564   :  { %2239 = vmatmul.mubr.bf16.gmra.mxu0 %v7392_v34  ;;  %2340 = vmatmul.mubr.bf16.gmra.mxu1 %v7400_v50  ;;  %v7423_v60 = vpack.c.bf16 %v1359_v23, %v1359_v23  ;;  %v1358_v19 = vmax.f32 %v1306_v33, 0.0  ;;  %v5685_v31 = vld [vmem:[%s9184_s5 + $0x328] ss:$16 sps:$4 sm:$0xff]   ;;  %v5693_v28 = vld [vmem:[%s9184_s5 + $0x30c] ss:$16 sps:$4 sm:$0xff]  }
 0x565   :  { %2248 = vmatprep.mubr.bf16.mxu0 %v7413_v45  ;;  %2482 = vmatpush2.bf16.msra.mxu1 %v5667_v0  ;;  %v1384_v40 = vpack.c.bf16 %v1356_v37, %v1356_v37  ;;  %v5688_v59 = vld [vmem:[%s9184_s5 + $0x108] ss:$16 sps:$4 sm:$0xff]  }
 0x566   :  { %2349 = vmatprep.mubr.bf16.mxu1 %v7423_v60  ;;  %2382 = vmatprep.subr.bf16.mxu0 %v5672_v5  ;;  %v1386_v29 = vpack.c.bf16 %v1358_v19, %v1358_v19 }
 0x567   :  { %2483 = vmatprep.subr.bf16.mxu1 %v5675_v55  ;;  %2383 = vmatpush2.bf16.msra.mxu0 %v5670_v16 }
 0x568   :  { %2384 = vmatprep.subr.bf16.mxu0 %v5678_v36 }
 0x569   :  { %2484 = vmatpush2.bf16.msra.mxu1 %v5673_v43 }
 0x56a   :  { %2485 = vmatprep.subr.bf16.mxu1 %v5681_v27 }
 0x56b   :  { %2385 = vmatpush2.bf16.msra.mxu0 %v5676_v63 }
 0x56c   :  { %2249 = vmatmul.mubr.bf16.gmra.mxu0 %v1384_v40  ;;  %2350 = vmatmul.mubr.bf16.gmra.mxu1 %v1386_v29 }
 0x56d   :  { %2390 = vmatprep.mubr.bf16.mxu0 %v7033_v22  ;;  %2491 = vmatprep.mubr.bf16.mxu1 %v7035_v26  ;;  %v5691_v22 = vld [vmem:[%s9184_s5 + $0x308] ss:$16 sps:$4 sm:$0xff]   ;;  %v9348_v26 = vmov 0.0  }
 0x56e   :  { %2486 = vmatpush2.bf16.msra.mxu1 %v5679_v9  ;;  %2386 = vmatprep.subr.bf16.mxu0 %v5684_v61 }
 0x56f   :  { %2487 = vmatprep.subr.bf16.mxu1 %v5687_v10  ;;  %2387 = vmatpush2.bf16.msra.mxu0 %v5682_v3 }
 0x570   :  { %2388 = vmatprep.subr.bf16.mxu0 %v5690_v14 }
 0x572   :  { %2488 = vmatpush2.bf16.msra.mxu1 %v5685_v31 }
 0x573   :  { %2489 = vmatprep.subr.bf16.mxu1 %v5693_v28  ;;  %2389 = vmatpush2.bf16.msra.mxu0 %v5688_v59 }
 0x574   :  { %5343 = vmatprep.subr.mxu0 %v9348_v26 }
 0x576   :  { %2490 = vmatpush2.bf16.msra.mxu1 %v5691_v22  ;;  %2391 = vmatmul.mubr.bf16.vlgmr.msra.gmra.mxu0 %v7043_v25 }
 0x577   :  { %2400 = vmatprep.mubr.bf16.mxu0 %v7094_v51  ;;  %5408 = vmatprep.subr.mxu1 %v9348_v26 }
 0x579   :  { %2492 = vmatmul.mubr.bf16.vlgmr.msra.gmra.mxu1 %v7045_v56 }
 0x57a   :  { %2501 = vmatprep.mubr.bf16.mxu1 %v7096_v7 }
 0x57e   :  { %2401 = vmatmul.mubr.bf16.gmra.mxu0 %v7110_v62 }
 0x57f   :  { %2410 = vmatprep.mubr.bf16.mxu0 %v7159_v32 }
 0x581   :  { %2502 = vmatmul.mubr.bf16.gmra.mxu1 %v7144_v35 }
 0x582   :  { %2511 = vmatprep.mubr.bf16.mxu1 %v7191_v24 }
 0x586   :  { %2411 = vmatmul.mubr.bf16.gmra.mxu0 %v7205_v49 }
 0x587   :  { %2420 = vmatprep.mubr.bf16.mxu0 %v7263_v11 }
 0x589   :  { %2512 = vmatmul.mubr.bf16.gmra.mxu1 %v7219_v30 }
 0x58a   :  { %2521 = vmatprep.mubr.bf16.mxu1 %v7270_v58 }
 0x58e   :  { %2421 = vmatmul.mubr.bf16.gmra.mxu0 %v7277_v12 }
 0x58f   :  { %2430 = vmatprep.mubr.bf16.mxu0 %v7337_v57 }
 0x591   :  { %2522 = vmatmul.mubr.bf16.gmra.mxu1 %v7290_v15 }
 0x592   :  { %2531 = vmatprep.mubr.bf16.mxu1 %v7345_v44 }
 0x596   :  { %2431 = vmatmul.mubr.bf16.gmra.mxu0 %v7355_v47 }
 0x597   :  { %2440 = vmatprep.mubr.bf16.mxu0 %v7384_v6 }
 0x599   :  { %2532 = vmatmul.mubr.bf16.gmra.mxu1 %v7357_v38 }
 0x59a   :  { %2541 = vmatprep.mubr.bf16.mxu1 %v7390_v1 }
 0x59e   :  { %2441 = vmatmul.mubr.bf16.gmra.mxu0 %v7392_v34 }
 0x59f   :  { %2450 = vmatprep.mubr.bf16.mxu0 %v7413_v45 }
 0x5a1   :  { %2542 = vmatmul.mubr.bf16.gmra.mxu1 %v7400_v50 }
 0x5a2   :  { %2551 = vmatprep.mubr.bf16.mxu1 %v7423_v60 }
 0x5a6   :  { %2451 = vmatmul.mubr.bf16.gmra.mxu0 %v1384_v40 }
 0x5a7   :  { %5369 = vmatprep.mubr.msk.f32.mxu0 %vm5953_vm2, %v9348_v26 }
 0x5a9   :  { %2552 = vmatmul.mubr.bf16.gmra.mxu1 %v1386_v29 }
 0x5aa   :  { %5434 = vmatprep.mubr.msk.f32.mxu1 %vm5953_vm2, %v9348_v26 }
 0x5f4   :  { %v2190_v25 = vpop.f32.mrf.mxu0  ;;  %v2291_v56 = vpop.f32.mrf.mxu1 }
 0x5f5   :  { %v7498_v51 = vadd.f32 %v2291_v56, %v2190_v25 }
 0x5f6   :  { %v7500_v7 = vpop.f32.mrf.mxu0  ;;  %v7502_v62 = vpop.f32.mrf.mxu1 }
 0x5f7   :  { %9349 = vst [vmem:[#allocation6_spill] sm:$0xff] %v7498_v51  ;;  %9350 = vst [vmem:[#allocation3_spill] sm:$0xff] %v7500_v7 }
 0x5f8   :  { %9351 = vst [vmem:[#allocation2_spill] sm:$0xff] %v7502_v62  ;;  %v2194_v35 = vpop.f32.mrf.mxu0  ;;  %v2295_v32 = vpop.f32.mrf.mxu1 }
 0x5f9   :  { %v7504_v24 = vadd.f32 %v2295_v32, %v2194_v35 }
 0x5fa   :  { %v2196_v49 = vpop.f32.mrf.mxu0  ;;  %v2297_v30 = vpop.f32.mrf.mxu1 }
 0x5fb   :  { %9352 = vst [vmem:[#allocation4_spill] sm:$0xff] %v7504_v24  ;;  %v7506_v11 = vadd.f32 %v2297_v30, %v2196_v49 }
 0x5fd   :  { %9353 = vst [vmem:[#allocation11_spill] sm:$0xff] %v7506_v11  ;;  %v2200_v58 = vpop.f32.mrf.mxu0 }
 0x5ff   :  { %v7508_v12 = vpop.f32.mrf.mxu0 }
 0x601   :  { %v2301_v15 = vpop.f32.mrf.mxu1  ;;  %v2204_v57 = vpop.f32.mrf.mxu0 }
 0x602   :  { %v7510_v44 = vadd.f32 %v2301_v15, %v2200_v58 }
 0x603   :  { %v7512_v47 = vpop.f32.mrf.mxu1  ;;  %v2206_v42 = vpop.f32.mrf.mxu0 }
 0x604   :  { %9354 = vst [vmem:[#allocation12_spill] sm:$0xff] %v7510_v44 }
 0x605   :  { %v2305_v38 = vpop.f32.mrf.mxu1 }
 0x606   :  { %v7514_v39 = vadd.f32 %v2305_v38, %v2204_v57 }
 0x607   :  { %v2307_v46 = vpop.f32.mrf.mxu1 }
 0x608   :  { %9355 = vst [vmem:[#allocation13_spill] sm:$0xff] %v7514_v39  ;;  %v7516_v18 = vadd.f32 %v2307_v46, %v2206_v42 }
 0x609   :  { %v2210_v8 = vpop.f32.mrf.mxu0 }
 0x60a   :  { %9356 = vst [vmem:[#allocation14_spill] sm:$0xff] %v7516_v18  ;;  %v2311_v6 = vpop.f32.mrf.mxu1 }
 0x60b   :  { %v7518_v13 = vadd.f32 %v2311_v6, %v2210_v8  ;;  %v7520_v20 = vpop.f32.mrf.mxu0 }
 0x60c   :  { %v7522_v41 = vpop.f32.mrf.mxu1 }
 0x60d   :  { %v2214_v48 = vpop.f32.mrf.mxu0 }
 0x60e   :  { %v2315_v1 = vpop.f32.mrf.mxu1 }
 0x60f   :  { %v7524_v34 = vadd.f32 %v2315_v1, %v2214_v48  ;;  %v2216_v53 = vpop.f32.mrf.mxu0 }
 0x610   :  { %v2317_v4 = vpop.f32.mrf.mxu1 }
 0x611   :  { %v7526_v21 = vadd.f32 %v2317_v4, %v2216_v53 }
 0x612   :  { %v2220_v50 = vpop.f32.mrf.mxu0 }
 0x613   :  { %v2321_v52 = vpop.f32.mrf.mxu1 }
 0x614   :  { %v7528_v2 = vadd.f32 %v2321_v52, %v2220_v50  ;;  %v7530_v54 = vpop.f32.mrf.mxu0 }
 0x615   :  { %v7532_v0 = vpop.f32.mrf.mxu1 }
 0x616   :  { %v2224_v23 = vpop.f32.mrf.mxu0 }
 0x617   :  { %v2325_v5 = vpop.f32.mrf.mxu1 }
 0x618   :  { %v7534_v17 = vadd.f32 %v2325_v5, %v2224_v23  ;;  %v2226_v33 = vpop.f32.mrf.mxu0 }
 0x619   :  { %v2327_v45 = vpop.f32.mrf.mxu1 }
 0x61a   :  { %v7536_v16 = vadd.f32 %v2327_v45, %v2226_v33 }
 0x61c   :  { %v2230_v55 = vpop.f32.mrf.mxu0  ;;  %v2331_v60 = vpop.f32.mrf.mxu1 }
 0x61d   :  { %v7538_v36 = vadd.f32 %v2331_v60, %v2230_v55 }
 0x61e   :  { %v7540_v43 = vpop.f32.mrf.mxu0  ;;  %v7542_v37 = vpop.f32.mrf.mxu1 }
 0x620   :  { %v2234_v19 = vpop.f32.mrf.mxu0  ;;  %v2335_v27 = vpop.f32.mrf.mxu1 }
 0x621   :  { %v7544_v63 = vadd.f32 %v2335_v27, %v2234_v19 }
 0x622   :  { %v2236_v40 = vpop.f32.mrf.mxu0  ;;  %v2337_v29 = vpop.f32.mrf.mxu1 }
 0x623   :  { %v7546_v9 = vadd.f32 %v2337_v29, %v2236_v40 }
 0x624   :  { %v2240_v61 = vpop.f32.mrf.mxu0  ;;  %v2341_v3 = vpop.f32.mrf.mxu1 }
 0x625   :  { %v7548_v10 = vadd.f32 %v2341_v3, %v2240_v61 }
 0x626   :  { %v7550_v14 = vpop.f32.mrf.mxu0  ;;  %v7552_v31 = vpop.f32.mrf.mxu1 }
 0x627   :  { %9357 = vst [vmem:[#allocation15_spill] sm:$0xff] %v7548_v10  ;;  %v7608_v62 = vadd.f32 %v7552_v31, %v7550_v14  ;;  %v7625_v14 = vadd.f32 %v7542_v37, %v7540_v43 }
 0x628   :  { %v7554_v59 = vpop.f32.mrf.mxu0  ;;  %v2345_v28 = vpop.f32.mrf.mxu1 }
 0x629   :  { %9372 = vst [vmem:[#allocation30_spill] sm:$0xff] %v7608_v62  ;;  %v7611_v7 = vadd.f32 %v2345_v28, %v7554_v59  ;;  %v2612_v59 = vadd.f32 %v7608_v62, %v7548_v10 }
 0x62a   :  { %v2246_v22 = vpop.f32.mrf.mxu0  ;;  %v2347_v25 = vpop.f32.mrf.mxu1 }
 0x62b   :  { %v7604_v18 = vadd.f32 %v2347_v25, %v2246_v22 }
 0x62c   :  { %v2250_v56 = vpop.f32.mrf.mxu0  ;;  %v2351_v35 = vpop.f32.mrf.mxu1 }
 0x62e   :  { %v2252_v32 = vpop.f32.mrf.mxu0  ;;  %v2353_v49 = vpop.f32.mrf.mxu1 }
 0x630   :  { %v2254_v30 = vpop.f32.mrf.mxu0  ;;  %v2355_v58 = vpop.f32.mrf.mxu1 }
 0x632   :  { %v2255_v15 = vpop.f32.mrf.mxu0  ;;  %v2356_v57 = vpop.f32.mrf.mxu1 }
 0x636   :  { %v2392_v38 = vpop.f32.mrf.mxu0 }
 0x638   :  { %v2394_v42 = vpop.f32.mrf.mxu0 }
 0x639   :  { %v2493_v46 = vpop.f32.mrf.mxu1 }
 0x63a   :  { %v7556_v8 = vadd.f32 %v2493_v46, %v2392_v38  ;;  %v2396_v6 = vpop.f32.mrf.mxu0 }
 0x63b   :  { %v2495_v48 = vpop.f32.mrf.mxu1 }
 0x63c   :  { %9358 = vst [vmem:[#allocation16_spill] sm:$0xff] %v7556_v8  ;;  %v7558_v1 = vadd.f32 %v2495_v48, %v2394_v42  ;;  %v2398_v53 = vpop.f32.mrf.mxu0 }
 0x63d   :  { %v2497_v4 = vpop.f32.mrf.mxu1 }
 0x63e   :  { %9359 = vst [vmem:[#allocation17_spill] sm:$0xff] %v7558_v1  ;;  %v7560_v50 = vadd.f32 %v2497_v4, %v2396_v6  ;;  %v7562_v52 = vpop.f32.mrf.mxu0 }
 0x63f   :  { %v2499_v23 = vpop.f32.mrf.mxu1 }
 0x640   :  { %9360 = vst [vmem:[#allocation18_spill] sm:$0xff] %v7560_v50  ;;  %v7564_v5 = vadd.f32 %v2499_v23, %v2398_v53  ;;  %v7566_v33 = vpop.f32.mrf.mxu0 }
 0x641   :  { %9362 = vst [vmem:[#allocation20_spill] sm:$0xff] %v7566_v33  ;;  %v7568_v45 = vpop.f32.mrf.mxu1 }
 0x642   :  { %9361 = vst [vmem:[#allocation19_spill] sm:$0xff] %v7564_v5  ;;  %v7570_v55 = vpop.f32.mrf.mxu0 }
 0x643   :  { %9363 = vst [vmem:[#allocation21_spill] sm:$0xff] %v7570_v55  ;;  %v7572_v60 = vpop.f32.mrf.mxu1 }
 0x644   :  { %9364 = vst [vmem:[#allocation22_spill] sm:$0xff] %v7572_v60  ;;  %v7574_v19 = vpop.f32.mrf.mxu0 }
 0x645   :  { %9365 = vst [vmem:[#allocation23_spill] sm:$0xff] %v7574_v19  ;;  %v7576_v27 = vpop.f32.mrf.mxu1 }
 0x646   :  { %9366 = vst [vmem:[#allocation25_spill] sm:$0xff] %v7576_v27  ;;  %v7578_v40 = vpop.f32.mrf.mxu0  ;;  %v7615_v27 = vadd.f32 %v2351_v35, %v2250_v56 }
 0x647   :  { %v7580_v29 = vpop.f32.mrf.mxu1 }
 0x648   :  { %9367 = vst [vmem:[#allocation29_spill] sm:$0xff] %v7580_v29  ;;  %v7582_v61 = vpop.f32.mrf.mxu0 }
 0x649   :  { %9368 = vst [vmem:[#allocation24_spill] sm:$0xff] %v7582_v61  ;;  %v7584_v3 = vpop.f32.mrf.mxu1 }
 0x64a   :  { %v7586_v30 = vpop.f32.mrf.mxu0 }
 0x64b   :  { %v7588_v58 = vpop.f32.mrf.mxu1 }
 0x64c   :  { %9369 = vst [vmem:[#allocation26_spill] sm:$0xff] %v7588_v58  ;;  %v7590_v15 = vpop.f32.mrf.mxu0  ;;  %v2617_v58 = vadd.f32 %v7604_v18, %v7611_v7 }
 0x64d   :  { %9370 = vst [vmem:[#allocation27_spill] sm:$0xff] %v7590_v15  ;;  %v7592_v57 = vpop.f32.mrf.mxu1 }
 0x64e   :  { %v2422_v38 = vpop.f32.mrf.mxu0 }
 0x64f   :  { %v7594_v42 = vpop.f32.mrf.mxu1 }
 0x650   :  { %9371 = vst [vmem:[#allocation28_spill] sm:$0xff] %v7594_v42  ;;  %v7596_v46 = vpop.f32.mrf.mxu0  ;;  %v7613_v42 = vadd.f32 %v2353_v49, %v2252_v32 }
 0x651   :  { %v2523_v6 = vpop.f32.mrf.mxu1 }
 0x652   :  { %v2426_v48 = vpop.f32.mrf.mxu0  ;;  %v2623_v28 = vsel %vm451_vm1, %v7613_v42, 0.0 }
 0x653   :  { %v7598_v53 = vpop.f32.mrf.mxu1 }
 0x654   :  { %v7600_v4 = vpop.f32.mrf.mxu0 }
 0x655   :  { %v2527_v23 = vpop.f32.mrf.mxu1 }
 0x656   :  { %v2432_v26 = vpop.f32.mrf.mxu0 }
 0x657   :  { %v7602_v5 = vpop.f32.mrf.mxu1 }
 0x658   :  { %v2434_v1 = vpop.f32.mrf.mxu0 }
 0x659   :  { %v2533_v50 = vpop.f32.mrf.mxu1 }
 0x65a   :  { %v2436_v8 = vpop.f32.mrf.mxu0  ;;  %v7636_v49 = vadd.f32 %v2533_v50, %v2432_v26  ;;  %v2602_v26 = vadd.f32 %v7625_v14, %v7538_v36 }
 0x65b   :  { %v2535_v11 = vpop.f32.mrf.mxu1 }
 0x65c   :  { %v2438_v24 = vpop.f32.mrf.mxu0 }
 0x65d   :  { %v2537_v51 = vpop.f32.mrf.mxu1 }
 0x65e   :  { %v2442_v29 = vpop.f32.mrf.mxu0 }
 0x65f   :  { %v2539_v19 = vpop.f32.mrf.mxu1 }
 0x660   :  { %v2444_v60 = vpop.f32.mrf.mxu0 }
 0x661   :  { %v2543_v33 = vpop.f32.mrf.mxu1 }
 0x662   :  { %v2446_v39 = vpop.f32.mrf.mxu0  ;;  %v7619_v22 = vadd.f32 %v2543_v33, %v2442_v29 }
 0x663   :  { %v2545_v44 = vpop.f32.mrf.mxu1 }
 0x664   :  { %v2448_v15 = vpop.f32.mrf.mxu0  ;;  %v2613_v43 = vadd.f32 %v2612_v59, %v7619_v22  ;;  %v7639_v37 = vadd.f32 %v2545_v44, %v2444_v60 }
 0x665   :  { %v2547_v55 = vpop.f32.mrf.mxu1 }
 0x666   :  { %v7621_v25 = vadd.f32 %v2547_v55, %v2446_v39  ;;  %v2452_v61 = vpop.f32.mrf.mxu0  ;;  %v2622_v39 = vsel %vm451_vm1, %v7615_v27, 0.0  ;;  %v2614_v59 = vadd.f32 %v2613_v43, %v7639_v37 }
 0x667   :  { %v2549_v31 = vpop.f32.mrf.mxu1  ;;  %v2624_v10 = vadd.f32 %v2623_v28, %v2622_v39  ;;  %v7669_v39 = vadd.f32 %v2539_v19, %v2438_v24  ;;  %v7686_v19 = vadd.f32 %v7598_v53, %v7596_v46  ;;  %v9373_v53 = vld [vmem:[#allocation24_spill] sm:$0xff] }
 0x668   :  { %v2618_v56 = vadd.f32 %v2617_v58, %v7621_v25  ;;  %v7632_v35 = vadd.f32 %v2549_v31, %v2448_v15  ;;  %v2454_v32 = vpop.f32.mrf.mxu0  ;;  %v7644_v58 = vadd.f32 %v2537_v51, %v2436_v8  ;;  %v7648_v31 = vadd.f32 %v7532_v0, %v7530_v54 }
 0x669   :  { %v2553_v33 = vpop.f32.mrf.mxu1  ;;  %v7658_v51 = vadd.f32 %v2523_v6, %v2422_v38  ;;  %v2603_v54 = vadd.f32 %v2602_v26, %v7636_v49  ;;  %v7661_v0 = vadd.f32 %v2535_v11, %v2434_v1  ;;  %v2597_v1 = vadd.f32 %v7536_v16, %v7534_v17 }
 0x66a   :  { %v7641_v55 = vadd.f32 %v2553_v33, %v2452_v61  ;;  %v2619_v29 = vadd.f32 %v2618_v56, %v7632_v35  ;;  %v2456_v62 = vpop.f32.mrf.mxu0  ;;  %v7666_v56 = vadd.f32 %v2527_v23, %v2426_v48  ;;  %v2592_v11 = vadd.f32 %v7648_v31, %v7528_v2 }
 0x66b   :  { %v2555_v15 = vpop.f32.mrf.mxu1  ;;  %v2607_v62 = vadd.f32 %v7546_v9, %v7544_v63  ;;  %v7681_v6 = vadd.f32 %v7584_v3, %v7578_v40  ;;  %v7696_v23 = vadd.f32 %v7602_v5, %v7600_v4  ;;  %v7701_v3 = vadd.f32 %v7512_v47, %v7508_v12  ;;  %v9374_v4 = vld [vmem:[#allocation26_spill] sm:$0xff]  ;;  %v9375_v47 = vld [vmem:[#allocation21_spill] sm:$0xff] }
 0x66c   :  { %v2625_v44 = vsel %vm451_vm1, %v7641_v55, 0.0  ;;  %v7654_v50 = vadd.f32 %v2555_v15, %v2454_v32  ;;  %2620 = vadd.xlane.f32.xlu0 %v2619_v29  ;;  %v2457_v60 = vpop.f32.mrf.mxu0  ;;  %v2593_v24 = vadd.f32 %v2592_v11, %v7658_v51  ;;  %v2598_v48 = vadd.f32 %v2597_v1, %v7666_v56  ;;  %v9376_v29 = vld [vmem:[#allocation25_spill] sm:$0xff]  ;;  %v9385_v11 = vld [vmem:[#allocation20_spill] sm:$0xff]  ;;  %v9386_v1 = vld [vmem:[#allocation22_spill] sm:$0xff] }
 0x66d   :  { %v2557_v8 = vpop.f32.mrf.mxu1  ;;  %v2626_v61 = vadd.f32 %v2625_v44, %v2624_v10  ;;  %v2608_v32 = vadd.f32 %v2607_v62, %v7644_v58  ;;  %v7673_v10 = vadd.f32 %v7522_v41, %v7520_v20  ;;  %v2604_v20 = vadd.f32 %v2603_v54, %v7661_v0  ;;  %v9377_v44 = vld [vmem:[#allocation27_spill] sm:$0xff]  ;;  %v9378_v60 = vld [vmem:[#allocation28_spill] sm:$0xff] }
 0x66e   :  { %v2627_v28 = vsel %vm451_vm1, %v7654_v50, 0.0  ;;  %v7691_v41 = vadd.f32 %v7592_v57, %v7586_v30  ;;  %v2587_v30 = vadd.f32 %v7526_v21, %v7524_v34  ;;  %v7709_v57 = vadd.f32 %v7568_v45, %v7562_v52  ;;  %v9380_v45 = vld [vmem:[#allocation3_spill] sm:$0xff]  ;;  %v9381_v8 = vld [vmem:[#allocation2_spill] sm:$0xff]  ;;  %v9382_v54 = vld [vmem:[#allocation12_spill] sm:$0xff] }
 0x66f   :  { %v2558_v33 = vpop.f32.mrf.mxu1  ;;  %v2628_v38 = vadd.f32 %v2627_v28, %v2626_v61  ;;  %v2609_v40 = vadd.f32 %v2608_v32, %v7669_v39  ;;  %v2582_v46 = vadd.f32 %v7673_v10, %v7518_v13  ;;  %v7714_v43 = vadd.f32 %v9374_v4, %v9373_v53  ;;  %v9383_v28 = vld [vmem:[#allocation13_spill] sm:$0xff]  ;;  %v9384_v32 = vld [vmem:[#allocation14_spill] sm:$0xff] }
 0x670   :  { %2615 = vadd.xlane.f32.xlu0 %v2614_v59  ;;  %v2594_v12 = vadd.f32 %v2593_v24, %v7686_v19  ;;  %v7719_v15 = vadd.f32 %v9376_v29, %v9375_v47  ;;  %v2588_v26 = vadd.f32 %v2587_v30, %v7691_v41  ;;  %v7724_v62 = vadd.f32 %v9378_v60, %v9377_v44  ;;  %v9391_v4 = vld [vmem:[#allocation6_spill] sm:$0xff]  ;;  %v9392_v47 = vld [vmem:[#allocation4_spill] sm:$0xff]  ;;  %v9393_v29 = vld [vmem:[#allocation11_spill] sm:$0xff] }
 0x671   :  { %2629 = vadd.xlane.f32.xlu1 %v2628_v38  ;;  %v2583_v5 = vadd.f32 %v2582_v46, %v7681_v6  ;;  %v2599_v52 = vadd.f32 %v2598_v48, %v7696_v23  ;;  %v7729_v61 = vadd.f32 %v9381_v8, %v9380_v45  ;;  %v2572_v59 = vadd.f32 %v7701_v3, %v9382_v54  ;;  %v9389_v46 = vld [vmem:[#allocation29_spill] sm:$0xff]  ;;  %v9394_v60 = vld [vmem:[#allocation16_spill] sm:$0xff]  ;;  %v9395_v45 = vld [vmem:[#allocation18_spill] sm:$0xff] }
 0x672   :  { %9379 = vst [vmem:[#allocation31_spill] sm:$0xff] %v7724_v62  ;;  %v2577_v33 = vadd.f32 %v9384_v32, %v9383_v28  ;;  %v7738_v24 = vadd.f32 %v9386_v1, %v9385_v11  ;;  %v2589_v53 = vadd.f32 %v2588_v26, %v7724_v62  ;;  %v2567_v44 = vadd.f32 %v9393_v29, %v9392_v47  ;;  %v9397_v11 = vld [vmem:[#allocation19_spill] sm:$0xff] }
 0x673   :  { %v2573_v38 = vadd.f32 %v2572_v59, %v7709_v57 }
 0x674   :  { %2605 = vadd.xlane.f32.xlu0 %v2604_v20  ;;  %9387 = vst [vmem:[#allocation10_spill] sm:$0xff] %v7738_v24  ;;  %v2584_v20 = vadd.f32 %v2583_v5, %v7714_v43  ;;  %v2578_v48 = vadd.f32 %v2577_v33, %v7719_v15  ;;  %v2568_v8 = vadd.f32 %v2567_v44, %v9395_v45  ;;  %v9396_v33 = vld [vmem:[#allocation17_spill] sm:$0xff] }
 0x675   :  { %2610 = vadd.xlane.f32.xlu1 %v2609_v40  ;;  %v9388_v40 = vld [vmem:[#allocation23_spill] sm:$0xff]  ;;  %v2574_v5 = vadd.f32 %v2573_v38, %v7738_v24  ;;  %v9398_v38 = vmov 0.0  }
 0x676   :  { %v7744_v30 = vadd.f32 %v9389_v46, %v9388_v40  ;;  %v2569_v1 = vadd.f32 %v2568_v8, %v9397_v11 }
 0x678   :  { %2595 = vadd.xlane.f32.xlu0 %v2594_v12  ;;  %9390 = vst [vmem:[#allocation32_spill] sm:$0xff] %v7744_v30  ;;  %v2562_v12 = vadd.f32 %v7729_v61, %v9391_v4  ;;  %v2579_v59 = vadd.f32 %v2578_v48, %v7744_v30 }
 0x679   :  { %2600 = vadd.xlane.f32.xlu1 %v2599_v52 }
 0x67a   :  { %v2563_v52 = vadd.f32 %v2562_v12, %v9394_v60 }
 0x67c   :  { %2585 = vadd.xlane.f32.xlu0 %v2584_v20  ;;  %v2564_v26 = vadd.f32 %v2563_v52, %v9396_v33 }
 0x67d   :  { %2590 = vadd.xlane.f32.xlu1 %v2589_v53 }
 0x680   :  { %2575 = vadd.xlane.f32.xlu0 %v2574_v5 }
 0x681   :  { %2580 = vadd.xlane.f32.xlu1 %v2579_v59 }
 0x684   :  { %2565 = vadd.xlane.f32.xlu0 %v2564_v26 }
 0x685   :  { %2570 = vadd.xlane.f32.xlu1 %v2569_v1 }
 0x6f5   :  { %v2621_v20 = vpop.xlane.xlu0 %2620 }
 0x6f6   :  { %v2642_v29 = vmul.f32 0.001953125, %v2621_v20 }
 0x6f9   :  { %v2616_v40 = vpop.xlane.xlu0 %2615 }
 0x6fa   :  { %v2630_v46 = vpop.xlane.xlu1 %2629  ;;  %v2641_v48 = vmul.f32 0.001953125, %v2616_v40 }
 0x6fb   :  { %v2643_v53 = vmul.f32 0.001953125, %v2630_v46 }
 0x6fd   :  { %v2606_v12 = vpop.xlane.xlu0 %2605  ;;  %5344 = vmatpush3.msk.msra.mxu0 %vm451_vm1, %v2643_v53 }
 0x6fe   :  { %5345 = vmatprep.subr.mxu0 %v9398_v38  ;;  %v2611_v44 = vpop.xlane.xlu1 %2610  ;;  %v2639_v59 = vmul.f32 0.001953125, %v2606_v12 }
 0x6ff   :  { %5346 = vmatpush3.msra.mxu0 %v2642_v29  ;;  %v2640_v52 = vmul.f32 0.001953125, %v2611_v44 }
 0x700   :  { %5347 = vmatprep.subr.mxu0 %v9398_v38 }
 0x701   :  { %v2596_v5 = vpop.xlane.xlu0 %2595  ;;  %5348 = vmatpush3.msra.mxu0 %v2641_v48 }
 0x702   :  { %5349 = vmatprep.subr.mxu0 %v9398_v38  ;;  %v2601_v8 = vpop.xlane.xlu1 %2600  ;;  %v2637_v40 = vmul.f32 0.001953125, %v2596_v5 }
 0x703   :  { %5350 = vmatpush3.msra.mxu0 %v2640_v52  ;;  %v2638_v26 = vmul.f32 0.001953125, %v2601_v8 }
 0x704   :  { %5351 = vmatprep.subr.mxu0 %v9398_v38 }
 0x705   :  { %v2586_v1 = vpop.xlane.xlu0 %2585  ;;  %5352 = vmatpush3.msra.mxu0 %v2639_v59 }
 0x706   :  { %5353 = vmatprep.subr.mxu0 %v9398_v38  ;;  %v2591_v20 = vpop.xlane.xlu1 %2590  ;;  %v2635_v12 = vmul.f32 0.001953125, %v2586_v1  ;;  %v7782_v1 = vld [vmem:[%s9183_s1 + $0x8] sm:$0xff] }
 0x707   :  { %5354 = vmatpush3.msra.mxu0 %v2638_v26  ;;  %v2636_v29 = vmul.f32 0.001953125, %v2591_v20  ;;  %v7773_v26 = vld [vmem:[%s9183_s1] sm:$0xff]  ;;  %9400 = vst [vmem:[#allocation26_spill] sm:$0xff] %v7782_v1  ;;  %v7791_v20 = vld [vmem:[%s9183_s1 + $0x10] sm:$0xff] }
 0x708   :  { %5355 = vmatprep.subr.mxu0 %v9398_v38  ;;  %9399 = vst [vmem:[#allocation24_spill] sm:$0xff] %v7773_v26  ;;  %9401 = vst [vmem:[#allocation21_spill] sm:$0xff] %v7791_v20 }
 0x709   :  { %5356 = vmatpush3.msra.mxu0 %v2637_v40  ;;  %v2576_v46 = vpop.xlane.xlu0 %2575  ;;  %v7800_v40 = vld [vmem:[%s9183_s1 + $0x18] sm:$0xff] }
 0x70a   :  { %5357 = vmatprep.subr.mxu0 %v9398_v38  ;;  %v2581_v53 = vpop.xlane.xlu1 %2580  ;;  %v2633_v52 = vmul.f32 0.001953125, %v2576_v46  ;;  %9402 = vst [vmem:[#allocation25_spill] sm:$0xff] %v7800_v40  ;;  %v7818_v46 = vld [vmem:[%s9183_s1 + $0x28] sm:$0xff] }
 0x70b   :  { %5358 = vmatpush3.msra.mxu0 %v2636_v29  ;;  %v2634_v44 = vmul.f32 0.001953125, %v2581_v53  ;;  %v7809_v29 = vld [vmem:[%s9183_s1 + $0x20] sm:$0xff]  ;;  %9404 = vst [vmem:[#allocation28_spill] sm:$0xff] %v7818_v46  ;;  %v7827_v53 = vld [vmem:[%s9183_s1 + $0x30] sm:$0xff] }
 0x70c   :  { %5359 = vmatprep.subr.mxu0 %v9398_v38  ;;  %9403 = vst [vmem:[#allocation27_spill] sm:$0xff] %v7809_v29  ;;  %9405 = vst [vmem:[#allocation3_spill] sm:$0xff] %v7827_v53 }
 0x70d   :  { %5360 = vmatpush3.msra.mxu0 %v2635_v12  ;;  %v2566_v5 = vpop.xlane.xlu0 %2565  ;;  %v7836_v12 = vld [vmem:[%s9183_s1 + $0x38] sm:$0xff] }
 0x70e   :  { %5361 = vmatprep.subr.mxu0 %v9398_v38  ;;  %v2571_v48 = vpop.xlane.xlu1 %2570  ;;  %v2631_v59 = vmul.f32 0.001953125, %v2566_v5  ;;  %9406 = vst [vmem:[#allocation2_spill] sm:$0xff] %v7836_v12  ;;  %v7872_v5 = vld [vmem:[%s9183_s1 + $0x58] sm:$0xff] }
 0x70f   :  { %5362 = vmatpush3.msra.mxu0 %v2634_v44  ;;  %v2632_v8 = vmul.f32 0.001953125, %v2571_v48  ;;  %v7845_v44 = vld [vmem:[%s9183_s1 + $0x40] sm:$0xff]  ;;  %v7854_v48 = vld [vmem:[%s9183_s1 + $0x48] sm:$0xff]  ;;  %9410 = vst [vmem:[#allocation20_spill] sm:$0xff] %v7872_v5 }
 0x710   :  { %5363 = vmatprep.subr.mxu0 %v9398_v38  ;;  %9407 = vst [vmem:[#allocation12_spill] sm:$0xff] %v7845_v44  ;;  %9408 = vst [vmem:[#allocation13_spill] sm:$0xff] %v7854_v48 }
 0x711   :  { %5364 = vmatpush3.msra.mxu0 %v2633_v52  ;;  %v7863_v52 = vld [vmem:[%s9183_s1 + $0x50] sm:$0xff] }
 0x712   :  { %5365 = vmatprep.subr.mxu0 %v9398_v38  ;;  %9409 = vst [vmem:[#allocation14_spill] sm:$0xff] %v7863_v52 }
 0x713   :  { %5366 = vmatpush3.msra.mxu0 %v2632_v8  ;;  %v7881_v8 = vld [vmem:[%s9183_s1 + $0x60] sm:$0x3] }
 0x714   :  { %5367 = vmatprep.subr.mxu0 %v9398_v38  ;;  %9411 = vst [vmem:[#allocation22_spill] sm:$0xff] %v7881_v8 }
 0x715   :  { %5368 = vmatpush3.msra.mxu0 %v2631_v59 }
 0x716   :  { %5370 = vmatmul.mubr.msk.f32.vlgmr.msra.gmra.mxu0 %vm475_vm3, %v7773_v26 }
 0x717   :  { %5372 = vmatprep.mubr.msk.f32.mxu0 %vm5953_vm2, %v9398_v38 }
 0x71a   :  { %5373 = vmatmul.mubr.msk.f32.gmra.mxu0 %vm475_vm3, %v7782_v1 }
 0x71b   :  { %5375 = vmatprep.mubr.msk.f32.mxu0 %vm5953_vm2, %v9398_v38 }
 0x71e   :  { %5376 = vmatmul.mubr.msk.f32.gmra.mxu0 %vm475_vm3, %v7791_v20 }
 0x71f   :  { %5378 = vmatprep.mubr.msk.f32.mxu0 %vm5953_vm2, %v9398_v38 }
 0x722   :  { %5379 = vmatmul.mubr.msk.f32.gmra.mxu0 %vm475_vm3, %v7800_v40 }
 0x723   :  { %5381 = vmatprep.mubr.msk.f32.mxu0 %vm5953_vm2, %v9398_v38 }
 0x726   :  { %5382 = vmatmul.mubr.msk.f32.gmra.mxu0 %vm475_vm3, %v7809_v29 }
 0x727   :  { %5384 = vmatprep.mubr.msk.f32.mxu0 %vm5953_vm2, %v9398_v38 }
 0x72a   :  { %5385 = vmatmul.mubr.msk.f32.gmra.mxu0 %vm475_vm3, %v7818_v46 }
 0x72b   :  { %5387 = vmatprep.mubr.msk.f32.mxu0 %vm5953_vm2, %v9398_v38 }
 0x72e   :  { %5388 = vmatmul.mubr.msk.f32.gmra.mxu0 %vm475_vm3, %v7827_v53 }
 0x72f   :  { %5390 = vmatprep.mubr.msk.f32.mxu0 %vm5953_vm2, %v9398_v38 }
 0x732   :  { %5391 = vmatmul.mubr.msk.f32.gmra.mxu0 %vm475_vm3, %v7836_v12 }
 0x733   :  { %5393 = vmatprep.mubr.msk.f32.mxu0 %vm5953_vm2, %v9398_v38 }
 0x736   :  { %5394 = vmatmul.mubr.msk.f32.gmra.mxu0 %vm475_vm3, %v7845_v44 }
 0x737   :  { %5396 = vmatprep.mubr.msk.f32.mxu0 %vm5953_vm2, %v9398_v38 }
 0x73a   :  { %5397 = vmatmul.mubr.msk.f32.gmra.mxu0 %vm475_vm3, %v7854_v48 }
 0x73b   :  { %5399 = vmatprep.mubr.msk.f32.mxu0 %vm5953_vm2, %v9398_v38 }
 0x73e   :  { %5400 = vmatmul.mubr.msk.f32.gmra.mxu0 %vm475_vm3, %v7863_v52 }
 0x73f   :  { %5402 = vmatprep.mubr.msk.f32.mxu0 %vm5953_vm2, %v9398_v38 }
 0x742   :  { %5403 = vmatmul.mubr.msk.f32.gmra.mxu0 %vm475_vm3, %v7872_v5 }
 0x743   :  { %5405 = vmatprep.mubr.msk.f32.mxu0 %vm5953_vm2, %v9398_v38 }
 0x746   :  { %5406 = vmatmul.mubr.msk.f32.gmra.mxu0 %vm475_vm3, %v7881_v8 }
 0x7d6   :  { %v2713_v59 = vpop.f32.mrf.mxu0 }
 0x7d8   :  { %v5371_v52 = vpop.f32.mrf.mxu0 }
 0x7da   :  { %v2718_v48 = vpop.f32.mrf.mxu0 }
 0x7dc   :  { %v5374_v44 = vpop.f32.mrf.mxu0 }
 0x7de   :  { %v2723_v12 = vpop.f32.mrf.mxu0 }
 0x7e0   :  { %v5377_v53 = vpop.f32.mrf.mxu0 }
 0x7e2   :  { %v2728_v46 = vpop.f32.mrf.mxu0 }
 0x7e4   :  { %v5380_v29 = vpop.f32.mrf.mxu0 }
 0x7e6   :  { %v2733_v5 = vpop.f32.mrf.mxu0 }
 0x7e8   :  { %v5383_v40 = vpop.f32.mrf.mxu0 }
 0x7ea   :  { %v2738_v20 = vpop.f32.mrf.mxu0 }
 0x7ec   :  { %v5386_v1 = vpop.f32.mrf.mxu0 }
 0x7ee   :  { %v2743_v26 = vpop.f32.mrf.mxu0 }
 0x7f0   :  { %v5389_v38 = vpop.f32.mrf.mxu0 }
 0x7f2   :  { %v2748_v11 = vpop.f32.mrf.mxu0 }
 0x7f4   :  { %v5392_v33 = vpop.f32.mrf.mxu0 }
 0x7f6   :  { %v2753_v30 = vpop.f32.mrf.mxu0 }
 0x7f8   :  { %v5395_v24 = vpop.f32.mrf.mxu0 }
 0x7fa   :  { %v2758_v45 = vpop.f32.mrf.mxu0 }
 0x7fc   :  { %v5398_v8 = vpop.f32.mrf.mxu0 }
 0x7fe   :  { %v2763_v47 = vpop.f32.mrf.mxu0 }
 0x800   :  { %v5401_v52 = vpop.f32.mrf.mxu0 }
 0x801   :  { %v9420_v52 = vld [vmem:[#allocation15_spill] sm:$0xff] }
 0x802   :  { %v2768_v62 = vpop.f32.mrf.mxu0 }
 0x803   :  { %2834 = vperm.xlu0 %5476, %v2768_v62  }
 0x804   :  { %v5404_v44 = vpop.f32.mrf.mxu0 }
 0x806   :  { %v2773_v53 = vpop.f32.mrf.mxu0 }
 0x807   :  { %2819 = vperm.xlu0 %5476, %v2753_v30   ;;  %2839 = vperm.xlu1 %5477, %v2773_v53  }
 0x808   :  { %v5407_v29 = vpop.f32.mrf.mxu0 }
 0x809   :  { %v9421_v29 = vld [vmem:[#allocation30_spill] sm:$0xff] }
 0x80b   :  { %2809 = vperm.xlu0 %5476, %v2743_v26   ;;  %2829 = vperm.xlu1 %5477, %v2763_v47  }
 0x80f   :  { %2799 = vperm.xlu0 %5476, %v2733_v5   ;;  %2824 = vperm.xlu1 %5477, %v2758_v45  }
 0x813   :  { %2789 = vperm.xlu0 %5476, %v2723_v12   ;;  %2814 = vperm.xlu1 %5477, %v2748_v11  }
 0x817   :  { %2779 = vperm.xlu0 %5476, %v2713_v59   ;;  %2804 = vperm.xlu1 %5477, %v2738_v20  }
 0x81b   :  { %2794 = vperm.xlu1 %5477, %v2728_v46  }
 0x81f   :  { %2784 = vperm.xlu1 %5477, %v2718_v48  }
 0x87e   :  { %v2835_v24 = vpop.permute.xlu0 %2834 }
 0x87f   :  { %v7886_v33 = vsub.f32 %v7611_v7, %v2835_v24  ;;  %v7889_v62 = vsub.f32 %v7604_v18, %v2835_v24  ;;  %v7892_v30 = vsub.f32 %v7621_v25, %v2835_v24  ;;  %v7895_v47 = vsub.f32 %v7632_v35, %v2835_v24 }
 0x881   :  { %9412 = vst [vmem:[#allocation23_spill] sm:$0xff] %v7886_v33  ;;  %9413 = vst [vmem:[#allocation29_spill] sm:$0xff] %v7889_v62  ;;  %v2938_v45 = vmul.f32 %v7886_v33, %v7886_v33  ;;  %v2939_v11 = vmul.f32 %v7889_v62, %v7889_v62  ;;  %v2940_v7 = vmul.f32 %v7892_v30, %v7892_v30 }
 0x882   :  { %9414 = vst [vmem:[#allocation6_spill] sm:$0xff] %v7892_v30  ;;  %9415 = vst [vmem:[#allocation16_spill] sm:$0xff] %v7895_v47  ;;  %v2820_v38 = vpop.permute.xlu0 %2819  ;;  %v2840_v26 = vpop.permute.xlu1 %2839  ;;  %v2941_v1 = vmul.f32 %v7895_v47, %v7895_v47 }
 0x883   :  { %v7904_v18 = vsub.f32 %v7538_v36, %v2820_v38  ;;  %v7907_v25 = vsub.f32 %v7625_v14, %v2820_v38  ;;  %v7910_v35 = vsub.f32 %v7615_v27, %v2840_v26  ;;  %v7915_v20 = vsub.f32 %v7613_v42, %v2840_v26 }
 0x884   :  { %v7918_v40 = vsub.f32 %v7641_v55, %v2840_v26  ;;  %v7921_v46 = vsub.f32 %v7654_v50, %v2840_v26  ;;  %v3001_v36 = vadd.f32 %v2939_v11, %v2938_v45  ;;  %v7924_v12 = vsub.f32 %v7636_v49, %v2820_v38 }
 0x885   :  { %9416 = vst [vmem:[#allocation33_spill] sm:$0xff] %v7910_v35  ;;  %9417 = vst [vmem:[#allocation34_spill] sm:$0xff] %v7915_v20  ;;  %v2942_v27 = vmul.f32 %v7910_v35, %v7910_v35  ;;  %v7929_v14 = vsub.f32 %v7661_v0, %v2820_v38  ;;  %v2926_v42 = vmul.f32 %v7904_v18, %v7904_v18 }
 0x886   :  { %9418 = vst [vmem:[#allocation35_spill] sm:$0xff] %v7918_v40  ;;  %9419 = vst [vmem:[#allocation36_spill] sm:$0xff] %v7921_v46  ;;  %v2943_v55 = vmul.f32 %v7915_v20, %v7915_v20  ;;  %v2810_v48 = vpop.permute.xlu0 %2809  ;;  %v2830_v5 = vpop.permute.xlu1 %2829  ;;  %v3002_v50 = vadd.f32 %v3001_v36, %v2940_v7  ;;  %v2944_v8 = vmul.f32 %v7918_v40, %v7918_v40 }
 0x887   :  { %v2945_v49 = vmul.f32 %v7921_v46, %v7921_v46  ;;  %v7940_v59 = vsub.f32 %v7528_v2, %v2810_v48  ;;  %v7943_v0 = vsub.f32 %v7648_v31, %v2810_v48  ;;  %v7946_v44 = vsub.f32 %v9420_v52, %v2830_v5 }
 0x888   :  { %v2927_v53 = vmul.f32 %v7907_v25, %v7907_v25  ;;  %v7951_v24 = vsub.f32 %v9421_v29, %v2830_v5  ;;  %v7954_v45 = vsub.f32 %v7619_v22, %v2830_v5  ;;  %v3003_v11 = vadd.f32 %v3002_v50, %v2941_v1 }
 0x889   :  { %v3006_v38 = vsel %vm451_vm1, %v2942_v27, 0.0  ;;  %v7958_v2 = vsub.f32 %v7658_v51, %v2810_v48  ;;  %v3007_v31 = vsel %vm451_vm1, %v2943_v55, 0.0  ;;  %v3009_v26 = vsel %vm451_vm1, %v2944_v8, 0.0 }
 0x88a   :  { %9422 = vst [vmem:[#allocation15_spill] sm:$0xff] %v7954_v45  ;;  %v7963_v7 = vsub.f32 %v7639_v37, %v2830_v5  ;;  %3004 = vadd.xlane.f32.xlu0 %v3003_v11  ;;  %v7965_v36 = vpop.permute.xlu0 %2799  ;;  %v2825_v52 = vpop.permute.xlu1 %2824  ;;  %v3008_v29 = vadd.f32 %v3007_v31, %v3006_v38  ;;  %v3011_v22 = vsel %vm451_vm1, %v2945_v49, 0.0  ;;  %v2934_v1 = vmul.f32 %v7946_v44, %v7946_v44 }
 0x88b   :  { %v2935_v51 = vmul.f32 %v7951_v24, %v7951_v24  ;;  %v7974_v27 = vsub.f32 %v7518_v13, %v7965_v36  ;;  %v7978_v37 = vsub.f32 %v7673_v10, %v7965_v36  ;;  %v7981_v55 = vsub.f32 %v7544_v63, %v2825_v52 }
 0x88c   :  { %9423 = vst [vmem:[#allocation30_spill] sm:$0xff] %v7963_v7  ;;  %v2936_v5 = vmul.f32 %v7954_v45, %v7954_v45  ;;  %v7987_v50 = vsub.f32 %v7681_v6, %v7965_v36  ;;  %v7990_v8 = vsub.f32 %v7546_v9, %v2825_v52  ;;  %v7993_v13 = vsub.f32 %v7644_v58, %v2825_v52 }
 0x88d   :  { %v3010_v49 = vadd.f32 %v3009_v26, %v3008_v29  ;;  %v2937_v10 = vmul.f32 %v7963_v7, %v7963_v7  ;;  %v2996_v11 = vadd.f32 %v2935_v51, %v2934_v1  ;;  %v2928_v63 = vmul.f32 %v7924_v12, %v7924_v12 }
 0x88e   :  { %v2986_v38 = vadd.f32 %v2927_v53, %v2926_v42  ;;  %v7999_v31 = vpop.permute.xlu0 %2789  ;;  %v2815_v6 = vpop.permute.xlu1 %2814  ;;  %v8002_v46 = vsub.f32 %v7669_v39, %v2825_v52  ;;  %v2930_v9 = vmul.f32 %v7981_v55, %v7981_v55  ;;  %v2931_v58 = vmul.f32 %v7990_v8, %v7990_v8 }
 0x88f   :  { %v3012_v40 = vadd.f32 %v3011_v22, %v3010_v49  ;;  %v8010_v26 = vsub.f32 %v9382_v54, %v7999_v31  ;;  %v8014_v42 = vsub.f32 %v7701_v3, %v7999_v31  ;;  %v8018_v53 = vsub.f32 %v7709_v57, %v7999_v31 }
 0x890   :  { %v2929_v39 = vmul.f32 %v7929_v14, %v7929_v14  ;;  %v8023_v52 = vsub.f32 %v7534_v17, %v2815_v6  ;;  %v8026_v29 = vsub.f32 %v7536_v16, %v2815_v6  ;;  %v2997_v54 = vadd.f32 %v2996_v11, %v2936_v5 }
 0x891   :  { %3013 = vadd.xlane.f32.xlu1 %v3012_v40  ;;  %v2987_v22 = vadd.f32 %v2986_v38, %v2928_v63  ;;  %v8029_v1 = vsub.f32 %v7666_v56, %v2815_v6  ;;  %v2932_v3 = vmul.f32 %v7993_v13, %v7993_v13  ;;  %v2933_v57 = vmul.f32 %v8002_v46, %v8002_v46 }
 0x892   :  { %v2991_v51 = vadd.f32 %v2931_v58, %v2930_v9  ;;  %v2998_v49 = vadd.f32 %v2997_v54, %v2937_v10  ;;  %v8035_v40 = vpop.permute.xlu0 %2779  ;;  %v2805_v17 = vpop.permute.xlu1 %2804  ;;  %v8038_v20 = vsub.f32 %v7686_v19, %v2810_v48  ;;  %v2918_v16 = vmul.f32 %v7940_v59, %v7940_v59 }
 0x893   :  { %v2919_v56 = vmul.f32 %v7943_v0, %v7943_v0  ;;  %v8046_v5 = vsub.f32 %v9391_v4, %v8035_v40  ;;  %v8050_v11 = vsub.f32 %v7729_v61, %v8035_v40  ;;  %v8054_v10 = vsub.f32 %v9394_v60, %v8035_v40 }
 0x894   :  { %v2988_v19 = vadd.f32 %v2987_v22, %v2929_v39  ;;  %2999 = vadd.xlane.f32.xlu0 %v2998_v49  ;;  %v8057_v48 = vsub.f32 %v7524_v34, %v2805_v17  ;;  %v8060_v63 = vsub.f32 %v7526_v21, %v2805_v17  ;;  %v8063_v38 = vsub.f32 %v7691_v41, %v2805_v17 }
 0x895   :  { %v2992_v4 = vadd.f32 %v2991_v51, %v2932_v3  ;;  %v2920_v61 = vmul.f32 %v7958_v2, %v7958_v2  ;;  %v2976_v9 = vadd.f32 %v2919_v56, %v2918_v16  ;;  %v8068_v58 = vsub.f32 %v7696_v23, %v2815_v6 }
 0x896   :  { %v2922_v60 = vmul.f32 %v8023_v52, %v8023_v52  ;;  %v2795_v34 = vpop.permute.xlu1 %2794  ;;  %v2921_v21 = vmul.f32 %v8038_v20, %v8038_v20  ;;  %v2923_v41 = vmul.f32 %v8026_v29, %v8026_v29  ;;  %v2924_v54 = vmul.f32 %v8029_v1, %v8029_v1 }
 0x897   :  { %v2993_v39 = vadd.f32 %v2992_v4, %v2933_v57  ;;  %v8079_v22 = vsub.f32 %v9383_v28, %v2795_v34  ;;  %v8082_v23 = vsub.f32 %v9384_v32, %v2795_v34  ;;  %v2977_v6 = vadd.f32 %v2976_v9, %v2920_v61  ;;  %v9425_v9 = vld [vmem:[#allocation4_spill] sm:$0xff] }
 0x898   :  { %v8086_v3 = vsub.f32 %v7714_v43, %v7965_v36  ;;  %2989 = vadd.xlane.f32.xlu0 %v2988_v19  ;;  %v8089_v57 = vsub.f32 %v7719_v15, %v2795_v34  ;;  %v2981_v51 = vadd.f32 %v2923_v41, %v2922_v60  ;;  %v2910_v49 = vmul.f32 %v7974_v27, %v7974_v27  ;;  %v9424_v19 = vld [vmem:[#allocation31_spill] sm:$0xff] }
 0x899   :  { %2994 = vadd.xlane.f32.xlu1 %v2993_v39  ;;  %v2978_v16 = vadd.f32 %v2977_v6, %v2921_v21  ;;  %v2925_v28 = vmul.f32 %v8068_v58, %v8068_v58  ;;  %v2911_v32 = vmul.f32 %v7978_v37, %v7978_v37  ;;  %v2912_v43 = vmul.f32 %v7987_v50, %v7987_v50  ;;  %v9426_v39 = vld [vmem:[#allocation11_spill] sm:$0xff] }
 0x89a   :  { %v2982_v36 = vadd.f32 %v2981_v51, %v2924_v54  ;;  %v2785_v56 = vpop.permute.xlu1 %2784  ;;  %v8100_v4 = vsub.f32 %v9424_v19, %v2805_v17  ;;  %v2914_v15 = vmul.f32 %v8057_v48, %v8057_v48  ;;  %v2915_v61 = vmul.f32 %v8060_v63, %v8060_v63  ;;  %v9427_v17 = vld [vmem:[#allocation18_spill] sm:$0xff] }
 0x89b   :  { %v8107_v60 = vsub.f32 %v9425_v9, %v2785_v56  ;;  %v8110_v21 = vsub.f32 %v9426_v39, %v2785_v56  ;;  %v2913_v41 = vmul.f32 %v8086_v3, %v8086_v3  ;;  %v2966_v54 = vadd.f32 %v2911_v32, %v2910_v49  ;;  %v9428_v9 = vld [vmem:[#allocation10_spill] sm:$0xff]  ;;  %v9429_v32 = vld [vmem:[#allocation32_spill] sm:$0xff] }
 0x89c   :  { %2979 = vadd.xlane.f32.xlu0 %v2978_v16  ;;  %v2983_v6 = vadd.f32 %v2982_v36, %v2925_v28  ;;  %v8115_v51 = vsub.f32 %v9427_v17, %v2785_v56  ;;  %v2916_v19 = vmul.f32 %v8063_v38, %v8063_v38  ;;  %v2971_v35 = vadd.f32 %v2915_v61, %v2914_v15 }
 0x89d   :  { %v2967_v47 = vadd.f32 %v2966_v54, %v2912_v43  ;;  %v8121_v30 = vsub.f32 %v9428_v9, %v7999_v31  ;;  %v2902_v39 = vmul.f32 %v8010_v26, %v8010_v26  ;;  %v2903_v49 = vmul.f32 %v8014_v42, %v8014_v42 }
 0x89e   :  { %2984 = vadd.xlane.f32.xlu1 %v2983_v6  ;;  %v2917_v16 = vmul.f32 %v8100_v4, %v8100_v4  ;;  %v2972_v28 = vadd.f32 %v2971_v35, %v2916_v19  ;;  %v8130_v36 = vsub.f32 %v9429_v32, %v2795_v34  ;;  %v2906_v43 = vmul.f32 %v8079_v22, %v8079_v22  ;;  %v9430_v34 = vld [vmem:[#allocation17_spill] sm:$0xff] }
 0x89f   :  { %v2968_v15 = vadd.f32 %v2967_v47, %v2913_v41  ;;  %v2904_v31 = vmul.f32 %v8018_v53, %v8018_v53  ;;  %v2956_v61 = vadd.f32 %v2903_v49, %v2902_v39  ;;  %v2907_v54 = vmul.f32 %v8082_v23, %v8082_v23 }
 0x8a0   :  { %v2973_v17 = vadd.f32 %v2972_v28, %v2917_v16  ;;  %v2905_v6 = vmul.f32 %v8121_v30, %v8121_v30  ;;  %v2908_v35 = vmul.f32 %v8089_v57, %v8089_v57  ;;  %v8144_v19 = vsub.f32 %v9430_v34, %v8035_v40  ;;  %v9431_v28 = vld [vmem:[#allocation19_spill] sm:$0xff] }
 0x8a1   :  { %2969 = vadd.xlane.f32.xlu0 %v2968_v15  ;;  %v2957_v47 = vadd.f32 %v2956_v61, %v2904_v31  ;;  %v2961_v41 = vadd.f32 %v2907_v54, %v2906_v43  ;;  %v2894_v9 = vmul.f32 %v8046_v5, %v8046_v5  ;;  %v2895_v39 = vmul.f32 %v8050_v11, %v8050_v11 }
 0x8a2   :  { %2974 = vadd.xlane.f32.xlu1 %v2973_v17  ;;  %v2909_v49 = vmul.f32 %v8130_v36, %v8130_v36  ;;  %v2896_v16 = vmul.f32 %v8054_v10, %v8054_v10  ;;  %v8155_v32 = vsub.f32 %v9431_v28, %v2785_v56  ;;  %v2898_v40 = vmul.f32 %v8107_v60, %v8107_v60 }
 0x8a3   :  { %v2958_v43 = vadd.f32 %v2957_v47, %v2905_v6  ;;  %v2962_v15 = vadd.f32 %v2961_v41, %v2908_v35  ;;  %v2946_v31 = vadd.f32 %v2895_v39, %v2894_v9  ;;  %v2899_v61 = vmul.f32 %v8110_v21, %v8110_v21 }
 0x8a4   :  { %v2897_v54 = vmul.f32 %v8144_v19, %v8144_v19  ;;  %v2900_v62 = vmul.f32 %v8115_v51, %v8115_v51  ;;  %v2901_v6 = vmul.f32 %v8155_v32, %v8155_v32 }
 0x8a5   :  { %2959 = vadd.xlane.f32.xlu0 %v2958_v43  ;;  %v2963_v17 = vadd.f32 %v2962_v15, %v2909_v49  ;;  %v2947_v34 = vadd.f32 %v2946_v31, %v2896_v16  ;;  %v2951_v56 = vadd.f32 %v2899_v61, %v2898_v40  ;;  %v9432_v16 = vmov 0.0  }
 0x8a7   :  { %2964 = vadd.xlane.f32.xlu1 %v2963_v17  ;;  %v2948_v28 = vadd.f32 %v2947_v34, %v2897_v54  ;;  %v2952_v35 = vadd.f32 %v2951_v56, %v2900_v62 }
 0x8a9   :  { %2949 = vadd.xlane.f32.xlu0 %v2948_v28  ;;  %v2953_v47 = vadd.f32 %v2952_v35, %v2901_v6 }
 0x8ab   :  { %2954 = vadd.xlane.f32.xlu1 %v2953_v47 }
 0x913   :  { %v3005_v41 = vpop.xlane.xlu0 %3004 }
 0x914   :  { %v3026_v33 = vmul.f32 0.001953125, %v3005_v41 }
 0x91a   :  { %v3014_v9 = vpop.xlane.xlu1 %3013 }
 0x91b   :  { %v3027_v39 = vmul.f32 0.001953125, %v3014_v9 }
 0x91d   :  { %5409 = vmatpush3.msk.msra.mxu1 %vm451_vm1, %v3027_v39  ;;  %v3000_v49 = vpop.xlane.xlu0 %2999 }
 0x91e   :  { %5410 = vmatprep.subr.mxu1 %v9432_v16  ;;  %v3025_v43 = vmul.f32 0.001953125, %v3000_v49 }
 0x91f   :  { %5411 = vmatpush3.msra.mxu1 %v3026_v33 }
 0x920   :  { %5412 = vmatprep.subr.mxu1 %v9432_v16 }
 0x921   :  { %5413 = vmatpush3.msra.mxu1 %v3025_v43  ;;  %v2990_v40 = vpop.xlane.xlu0 %2989 }
 0x922   :  { %v2995_v15 = vpop.xlane.xlu1 %2994  ;;  %5414 = vmatprep.subr.mxu1 %v9432_v16  ;;  %v3023_v31 = vmul.f32 0.001953125, %v2990_v40 }
 0x923   :  { %v3024_v62 = vmul.f32 0.001953125, %v2995_v15  ;;  %v9433_v15 = vld [vmem:[#allocation24_spill] sm:$0xff] }
 0x925   :  { %5415 = vmatpush3.msra.mxu1 %v3024_v62  ;;  %v2980_v61 = vpop.xlane.xlu0 %2979  ;;  %v9434_v62 = vld [vmem:[#allocation26_spill] sm:$0xff] }
 0x926   :  { %5416 = vmatprep.subr.mxu1 %v9432_v16  ;;  %v3021_v34 = vmul.f32 0.001953125, %v2980_v61  ;;  %v9436_v61 = vld [vmem:[#allocation25_spill] sm:$0xff] }
 0x927   :  { %5417 = vmatpush3.msra.mxu1 %v3023_v31  ;;  %v2985_v54 = vpop.xlane.xlu1 %2984  ;;  %v9435_v31 = vld [vmem:[#allocation21_spill] sm:$0xff] }
 0x928   :  { %5418 = vmatprep.subr.mxu1 %v9432_v16  ;;  %v3022_v17 = vmul.f32 0.001953125, %v2985_v54  ;;  %v9437_v54 = vld [vmem:[#allocation27_spill] sm:$0xff] }
 0x92a   :  { %5419 = vmatpush3.msra.mxu1 %v3022_v17  ;;  %v2970_v33 = vpop.xlane.xlu0 %2969  ;;  %v9438_v17 = vld [vmem:[#allocation28_spill] sm:$0xff] }
 0x92b   :  { %5420 = vmatprep.subr.mxu1 %v9432_v16  ;;  %v2975_v56 = vpop.xlane.xlu1 %2974  ;;  %v3019_v6 = vmul.f32 0.001953125, %v2970_v33  ;;  %v9440_v33 = vld [vmem:[#allocation2_spill] sm:$0xff] }
 0x92c   :  { %v3020_v28 = vmul.f32 0.001953125, %v2975_v56  ;;  %5421 = vmatpush3.msra.mxu1 %v3021_v34  ;;  %v9439_v34 = vld [vmem:[#allocation3_spill] sm:$0xff]  ;;  %v9441_v56 = vld [vmem:[#allocation12_spill] sm:$0xff] }
 0x92d   :  { %5422 = vmatprep.subr.mxu1 %v9432_v16 }
 0x92e   :  { %5423 = vmatpush3.msra.mxu1 %v3020_v28  ;;  %v2960_v35 = vpop.xlane.xlu0 %2959  ;;  %v9442_v28 = vld [vmem:[#allocation13_spill] sm:$0xff] }
 0x92f   :  { %5424 = vmatprep.subr.mxu1 %v9432_v16  ;;  %v3017_v9 = vmul.f32 0.001953125, %v2960_v35  ;;  %v9444_v35 = vld [vmem:[#allocation20_spill] sm:$0xff] }
 0x930   :  { %v2965_v47 = vpop.xlane.xlu1 %2964  ;;  %5425 = vmatpush3.msra.mxu1 %v3019_v6  ;;  %v9443_v6 = vld [vmem:[#allocation14_spill] sm:$0xff] }
 0x931   :  { %v3018_v41 = vmul.f32 0.001953125, %v2965_v47  ;;  %5426 = vmatprep.subr.mxu1 %v9432_v16  ;;  %v9445_v47 = vld [vmem:[#allocation22_spill] sm:$0xff] }
 0x932   :  { %v2950_v39 = vpop.xlane.xlu0 %2949 }
 0x933   :  { %5427 = vmatpush3.msra.mxu1 %v3018_v41  ;;  %v3015_v40 = vmul.f32 0.001953125, %v2950_v39  ;;  %v5694_v41 = vld [vmem:[%s9187_s8 + $0xe0] ss:$16 sps:$4 sm:$0xff]  }
 0x934   :  { %5428 = vmatprep.subr.mxu1 %v9432_v16  ;;  %v2955_v49 = vpop.xlane.xlu1 %2954  ;;  %v5697_v39 = vld [vmem:[%s9187_s8 + $0x2e0] ss:$16 sps:$4 sm:$0xff]  }
 0x935   :  { %v3016_v43 = vmul.f32 0.001953125, %v2955_v49  ;;  %5429 = vmatpush3.msra.mxu1 %v3017_v9  ;;  %v5696_v9 = vld [vmem:[%s9187_s8 + $0xe4] ss:$16 sps:$4 sm:$0xff]  }
 0x936   :  { %5430 = vmatprep.subr.mxu1 %v9432_v16  ;;  %v5699_v49 = vld [vmem:[%s9187_s8 + $0x2e4] ss:$16 sps:$4 sm:$0xff]   ;;  %4307 = vmatprep.subr.bf16.mxu0 %v5696_v9 }
 0x937   :  { %5431 = vmatpush3.msra.mxu1 %v3016_v43  ;;  %v5702_v43 = vld [vmem:[%s9187_s8 + $0xc4] ss:$16 sps:$4 sm:$0xff]   ;;  %4308 = vmatpush1.bf16.msra.mxu0 %v5694_v41 }
 0x938   :  { %5432 = vmatprep.subr.mxu1 %v9432_v16  ;;  %4309 = vmatprep.subr.bf16.mxu0 %v5702_v43  ;;  %v5726_v41 = vld [vmem:[%s9187_s8 + $0x44] ss:$16 sps:$4 sm:$0xff]  }
 0x939   :  { %5433 = vmatpush3.msra.mxu1 %v3015_v40  ;;  %v5703_v40 = vld [vmem:[%s9187_s8 + $0x2c0] ss:$16 sps:$4 sm:$0xff]   ;;  %v5729_v9 = vld [vmem:[%s9187_s8 + $0x244] ss:$16 sps:$4 sm:$0xff]  }
 0x93a   :  { %5435 = vmatmul.mubr.msk.f32.vlgmr.msra.gmra.mxu1 %vm475_vm3, %v9433_v15  ;;  %4408 = vmatprep.subr.bf16.mxu1 %v5699_v49  ;;  %v5705_v15 = vld [vmem:[%s9187_s8 + $0x2c4] ss:$16 sps:$4 sm:$0xff]   ;;  %v5727_v49 = vld [vmem:[%s9187_s8 + $0x240] ss:$16 sps:$4 sm:$0xff]  }
 0x93b   :  { %5437 = vmatprep.mubr.msk.f32.mxu1 %vm5953_vm2, %v9432_v16  ;;  %4409 = vmatpush1.bf16.msra.mxu1 %v5697_v39  ;;  %v5724_v39 = vld [vmem:[%s9187_s8 + $0x40] ss:$16 sps:$4 sm:$0xff]   ;;  %v5735_v43 = vld [vmem:[%s9187_s8 + $0x224] ss:$16 sps:$4 sm:$0xff]  }
 0x93c   :  { %4410 = vmatprep.subr.bf16.mxu1 %v5705_v15  ;;  %v5733_v15 = vld [vmem:[%s9187_s8 + $0x220] ss:$16 sps:$4 sm:$0xff]  }
 0x93e   :  { %5438 = vmatmul.mubr.msk.f32.gmra.mxu1 %vm475_vm3, %v9434_v62  ;;  %v5708_v62 = vld [vmem:[%s9187_s8 + $0xa4] ss:$16 sps:$4 sm:$0xff]  }
 0x93f   :  { %5440 = vmatprep.mubr.msk.f32.mxu1 %vm5953_vm2, %v9432_v16  ;;  %4411 = vmatpush1.bf16.msra.mxu1 %v5703_v40  ;;  %v5730_v40 = vld [vmem:[%s9187_s8 + $0x20] ss:$16 sps:$4 sm:$0xff]  }
 0x942   :  { %5441 = vmatmul.mubr.msk.f32.gmra.mxu1 %vm475_vm3, %v9435_v31  ;;  %v5706_v31 = vld [vmem:[%s9187_s8 + $0xa0] ss:$16 sps:$4 sm:$0xff]  }
 0x943   :  { %5443 = vmatprep.mubr.msk.f32.mxu1 %vm5953_vm2, %v9432_v16 }
 0x946   :  { %5444 = vmatmul.mubr.msk.f32.gmra.mxu1 %vm475_vm3, %v9436_v61  ;;  %v5711_v61 = vld [vmem:[%s9187_s8 + $0x2a4] ss:$16 sps:$4 sm:$0xff]  }
 0x947   :  { %5446 = vmatprep.mubr.msk.f32.mxu1 %vm5953_vm2, %v9432_v16  ;;  %4412 = vmatprep.subr.bf16.mxu1 %v5711_v61  ;;  %v5736_v61 = vld [vmem:[%s9187_s8] ss:$16 sps:$4 sm:$0xff]  }
 0x94a   :  { %5447 = vmatmul.mubr.msk.f32.gmra.mxu1 %vm475_vm3, %v9437_v54  ;;  %v5709_v54 = vld [vmem:[%s9187_s8 + $0x2a0] ss:$16 sps:$4 sm:$0xff]  }
 0x94b   :  { %5449 = vmatprep.mubr.msk.f32.mxu1 %vm5953_vm2, %v9432_v16  ;;  %4413 = vmatpush1.bf16.msra.mxu1 %v5709_v54  ;;  %v5739_v54 = vld [vmem:[%s9187_s8 + $0x200] ss:$16 sps:$4 sm:$0xff]  }
 0x94e   :  { %5450 = vmatmul.mubr.msk.f32.gmra.mxu1 %vm475_vm3, %v9438_v17  ;;  %v5714_v17 = vld [vmem:[%s9187_s8 + $0x84] ss:$16 sps:$4 sm:$0xff]  }
 0x94f   :  { %5452 = vmatprep.mubr.msk.f32.mxu1 %vm5953_vm2, %v9432_v16 }
 0x952   :  { %5453 = vmatmul.mubr.msk.f32.gmra.mxu1 %vm475_vm3, %v9439_v34  ;;  %v5717_v34 = vld [vmem:[%s9187_s8 + $0x284] ss:$16 sps:$4 sm:$0xff]  }
 0x953   :  { %5455 = vmatprep.mubr.msk.f32.mxu1 %vm5953_vm2, %v9432_v16  ;;  %4414 = vmatprep.subr.bf16.mxu1 %v5717_v34  ;;  %v5747_v34 = vld [vmem:[%s9187_s8 + $0x3e4] ss:$16 sps:$4 sm:$0xff]  }
 0x956   :  { %5456 = vmatmul.mubr.msk.f32.gmra.mxu1 %vm475_vm3, %v9440_v33  ;;  %v5712_v33 = vld [vmem:[%s9187_s8 + $0x80] ss:$16 sps:$4 sm:$0xff]  }
 0x957   :  { %5458 = vmatprep.mubr.msk.f32.mxu1 %vm5953_vm2, %v9432_v16 }
 0x95a   :  { %5459 = vmatmul.mubr.msk.f32.gmra.mxu1 %vm475_vm3, %v9441_v56  ;;  %v5715_v56 = vld [vmem:[%s9187_s8 + $0x280] ss:$16 sps:$4 sm:$0xff]  }
 0x95b   :  { %5461 = vmatprep.mubr.msk.f32.mxu1 %vm5953_vm2, %v9432_v16  ;;  %4415 = vmatpush1.bf16.msra.mxu1 %v5715_v56  ;;  %v5745_v56 = vld [vmem:[%s9187_s8 + $0x3e0] ss:$16 sps:$4 sm:$0xff]  }
 0x95e   :  { %5462 = vmatmul.mubr.msk.f32.gmra.mxu1 %vm475_vm3, %v9442_v28  ;;  %v5720_v28 = vld [vmem:[%s9187_s8 + $0x64] ss:$16 sps:$4 sm:$0xff]  }
 0x95f   :  { %5464 = vmatprep.mubr.msk.f32.mxu1 %vm5953_vm2, %v9432_v16 }
 0x962   :  { %5465 = vmatmul.mubr.msk.f32.gmra.mxu1 %vm475_vm3, %v9443_v6  ;;  %v5723_v6 = vld [vmem:[%s9187_s8 + $0x264] ss:$16 sps:$4 sm:$0xff]  }
 0x963   :  { %5467 = vmatprep.mubr.msk.f32.mxu1 %vm5953_vm2, %v9432_v16  ;;  %4416 = vmatprep.subr.bf16.mxu1 %v5723_v6  ;;  %v5748_v6 = vld [vmem:[%s9187_s8 + $0x1c0] ss:$16 sps:$4 sm:$0xff]  }
 0x966   :  { %5468 = vmatmul.mubr.msk.f32.gmra.mxu1 %vm475_vm3, %v9444_v35  ;;  %v5718_v35 = vld [vmem:[%s9187_s8 + $0x60] ss:$16 sps:$4 sm:$0xff]  }
 0x967   :  { %5470 = vmatprep.mubr.msk.f32.mxu1 %vm5953_vm2, %v9432_v16  ;;  %v5700_v16 = vld [vmem:[%s9187_s8 + $0xc0] ss:$16 sps:$4 sm:$0xff]  }
 0x968   :  { %4310 = vmatpush1.bf16.msra.mxu0 %v5700_v16  ;;  %v5732_v16 = vld [vmem:[%s9187_s8 + $0x24] ss:$16 sps:$4 sm:$0xff]  }
 0x969   :  { %4311 = vmatprep.subr.bf16.mxu0 %v5708_v62  ;;  %v5738_v62 = vld [vmem:[%s9187_s8 + $0x4] ss:$16 sps:$4 sm:$0xff]  }
 0x96a   :  { %5471 = vmatmul.mubr.msk.f32.gmra.mxu1 %vm475_vm3, %v9445_v47  ;;  %v5721_v47 = vld [vmem:[%s9187_s8 + $0x260] ss:$16 sps:$4 sm:$0xff]  }
 0x96b   :  { %4417 = vmatpush1.bf16.msra.mxu1 %v5721_v47  ;;  %v5751_v47 = vld [vmem:[%s9187_s8 + $0x3c0] ss:$16 sps:$4 sm:$0xff]  }
 0x96c   :  { %4312 = vmatpush1.bf16.msra.mxu0 %v5706_v31  ;;  %4418 = vmatprep.subr.bf16.mxu1 %v5729_v9  ;;  %v5741_v31 = vld [vmem:[%s9187_s8 + $0x204] ss:$16 sps:$4 sm:$0xff]  }
 0x96d   :  { %4313 = vmatprep.subr.bf16.mxu0 %v5714_v17  ;;  %v5744_v17 = vld [vmem:[%s9187_s8 + $0x1e4] ss:$16 sps:$4 sm:$0xff]  }
 0x96e   :  { %v5759_v9 = vld [vmem:[%s9187_s8 + $0x3a4] ss:$16 sps:$4 sm:$0xff]  }
 0x96f   :  { %4419 = vmatpush1.bf16.msra.mxu1 %v5727_v49  ;;  %v5757_v49 = vld [vmem:[%s9187_s8 + $0x3a0] ss:$16 sps:$4 sm:$0xff]  }
 0x970   :  { %4314 = vmatpush1.bf16.msra.mxu0 %v5712_v33  ;;  %4420 = vmatprep.subr.bf16.mxu1 %v5735_v43  ;;  %v5742_v33 = vld [vmem:[%s9187_s8 + $0x1e0] ss:$16 sps:$4 sm:$0xff]   ;;  %v5765_v43 = vld [vmem:[%s9187_s8 + $0x384] ss:$16 sps:$4 sm:$0xff]  }
 0x971   :  { %4315 = vmatprep.subr.bf16.mxu0 %v5720_v28  ;;  %v5750_v28 = vld [vmem:[%s9187_s8 + $0x1c4] ss:$16 sps:$4 sm:$0xff]  }
 0x973   :  { %4421 = vmatpush1.bf16.msra.mxu1 %v5733_v15  ;;  %v5763_v15 = vld [vmem:[%s9187_s8 + $0x380] ss:$16 sps:$4 sm:$0xff]  }
 0x974   :  { %4316 = vmatpush1.bf16.msra.mxu0 %v5718_v35  ;;  %4422 = vmatprep.subr.bf16.mxu1 %v5741_v31  ;;  %v5753_v35 = vld [vmem:[%s9187_s8 + $0x3c4] ss:$16 sps:$4 sm:$0xff]  }
 0x975   :  { %4317 = vmatprep.subr.bf16.mxu0 %v5726_v41  ;;  %v5756_v41 = vld [vmem:[%s9187_s8 + $0x1a4] ss:$16 sps:$4 sm:$0xff]  }
 0x976   :  { %v5771_v31 = vld [vmem:[%s9187_s8 + $0x364] ss:$16 sps:$4 sm:$0xff]  }
 0x977   :  { %4423 = vmatpush1.bf16.msra.mxu1 %v5739_v54  ;;  %v5769_v54 = vld [vmem:[%s9187_s8 + $0x360] ss:$16 sps:$4 sm:$0xff]  }
 0x978   :  { %4318 = vmatpush1.bf16.msra.mxu0 %v5724_v39  ;;  %4424 = vmatprep.subr.bf16.mxu1 %v5747_v34  ;;  %v5754_v39 = vld [vmem:[%s9187_s8 + $0x1a0] ss:$16 sps:$4 sm:$0xff]  }
 0x979   :  { %4319 = vmatprep.subr.bf16.mxu0 %v5732_v16  ;;  %v5762_v16 = vld [vmem:[%s9187_s8 + $0x184] ss:$16 sps:$4 sm:$0xff]  }
 0x97b   :  { %4425 = vmatpush2.bf16.msra.mxu1 %v5745_v56 }
 0x97c   :  { %4320 = vmatpush1.bf16.msra.mxu0 %v5730_v40  ;;  %4426 = vmatprep.subr.bf16.mxu1 %v5753_v35  ;;  %v5760_v40 = vld [vmem:[%s9187_s8 + $0x180] ss:$16 sps:$4 sm:$0xff]  }
 0x97d   :  { %4321 = vmatprep.subr.bf16.mxu0 %v5738_v62  ;;  %v5768_v62 = vld [vmem:[%s9187_s8 + $0x164] ss:$16 sps:$4 sm:$0xff]  }
 0x97f   :  { %4427 = vmatpush2.bf16.msra.mxu1 %v5751_v47 }
 0x980   :  { %4322 = vmatpush1.bf16.msra.mxu0 %v5736_v61  ;;  %4428 = vmatprep.subr.bf16.mxu1 %v5759_v9  ;;  %v5766_v61 = vld [vmem:[%s9187_s8 + $0x160] ss:$16 sps:$4 sm:$0xff]  }
 0x981   :  { %4323 = vmatprep.subr.bf16.mxu0 %v5744_v17 }
 0x983   :  { %4429 = vmatpush2.bf16.msra.mxu1 %v5757_v49 }
 0x984   :  { %4324 = vmatpush2.bf16.msra.mxu0 %v5742_v33  ;;  %4430 = vmatprep.subr.bf16.mxu1 %v5765_v43 }
 0x985   :  { %4325 = vmatprep.subr.bf16.mxu0 %v5750_v28 }
 0x987   :  { %4431 = vmatpush2.bf16.msra.mxu1 %v5763_v15 }
 0x988   :  { %4326 = vmatpush2.bf16.msra.mxu0 %v5748_v6  ;;  %4432 = vmatprep.subr.bf16.mxu1 %v5771_v31  ;;  %v5774_v31 = vld [vmem:[%s9187_s8 + $0x144] ss:$16 sps:$4 sm:$0xff]  }
 0x989   :  { %4327 = vmatprep.subr.bf16.mxu0 %v5756_v41 }
 0x98b   :  { %4433 = vmatpush2.bf16.msra.mxu1 %v5769_v54 }
 0x98c   :  { %4328 = vmatpush2.bf16.msra.mxu0 %v5754_v39 }
 0x98d   :  { %4329 = vmatprep.subr.bf16.mxu0 %v5762_v16 }
 0x990   :  { %4330 = vmatpush2.bf16.msra.mxu0 %v5760_v40 }
 0x991   :  { %4331 = vmatprep.subr.bf16.mxu0 %v5768_v62  ;;  %v5772_v62 = vld [vmem:[%s9187_s8 + $0x140] ss:$16 sps:$4 sm:$0xff]  }
 0x994   :  { %4332 = vmatpush2.bf16.msra.mxu0 %v5766_v61  ;;  %v5775_v61 = vld [vmem:[%s9187_s8 + $0x340] ss:$16 sps:$4 sm:$0xff]  }
 0x995   :  { %4333 = vmatprep.subr.bf16.mxu0 %v5774_v31  ;;  %v5787_v31 = vld [vmem:[%s9187_s8 + $0x300] ss:$16 sps:$4 sm:$0xff]  }
 0x998   :  { %4334 = vmatpush2.bf16.msra.mxu0 %v5772_v62  ;;  %v5784_v62 = vld [vmem:[%s9187_s8 + $0x100] ss:$16 sps:$4 sm:$0xff]  }
 0x9fa   :  { %v3097_v17 = vpop.f32.mrf.mxu1 }
 0x9fb   :  { %v3098_v34 = vadd.f32 1e-05, %v3097_v17 }
 0x9fc   :  { %v5436_v33 = vpop.f32.mrf.mxu1 }
 0x9fd   :  { %5912 = vrsqrt.f32 %v3098_v34  ;;  %v5777_v34 = vld [vmem:[%s9187_s8 + $0x344] ss:$16 sps:$4 sm:$0xff]  }
 0x9fe   :  { %v3102_v56 = vpop.f32.mrf.mxu1  ;;  %4434 = vmatprep.subr.bf16.mxu1 %v5777_v34  ;;  %v5795_v34 = vld [vmem:[%s9187_s8 + $0x2ec] ss:$16 sps:$4 sm:$0xff]  }
 0x9ff   :  { %v3103_v28 = vadd.f32 1e-05, %v3102_v56  ;;  %4435 = vmatpush2.bf16.msra.mxu1 %v5775_v61 }
 0xa00   :  { %v5439_v6 = vpop.f32.mrf.mxu1 }
 0xa01   :  { %5914 = vrsqrt.f32 %v3103_v28 }
 0xa02   :  { %v3107_v35 = vpop.f32.mrf.mxu1 }
 0xa03   :  { %v3108_v47 = vadd.f32 1e-05, %v3107_v35 }
 0xa04   :  { %v5442_v41 = vpop.f32.mrf.mxu1 }
 0xa05   :  { %5916 = vrsqrt.f32 %v3108_v47  ;;  %v5780_v47 = vld [vmem:[%s9187_s8 + $0x124] ss:$16 sps:$4 sm:$0xff]  }
 0xa06   :  { %v3112_v9 = vpop.f32.mrf.mxu1  ;;  %v5783_v41 = vld [vmem:[%s9187_s8 + $0x324] ss:$16 sps:$4 sm:$0xff]   ;;  %4335 = vmatprep.subr.bf16.mxu0 %v5780_v47 }
 0xa07   :  { %v3113_v39 = vadd.f32 1e-05, %v3112_v9  ;;  %4436 = vmatprep.subr.bf16.mxu1 %v5783_v41 }
 0xa08   :  { %v5445_v49 = vpop.f32.mrf.mxu1 }
 0xa09   :  { %5918 = vrsqrt.f32 %v3113_v39  ;;  %v5778_v39 = vld [vmem:[%s9187_s8 + $0x120] ss:$16 sps:$4 sm:$0xff]  }
 0xa0a   :  { %v5913_v16 = vpop.eup %5912  ;;  %v3117_v43 = vpop.f32.mrf.mxu1  ;;  %v5781_v49 = vld [vmem:[%s9187_s8 + $0x320] ss:$16 sps:$4 sm:$0xff]   ;;  %4336 = vmatpush2.bf16.msra.mxu0 %v5778_v39 }
 0xa0b   :  { %v3118_v40 = vadd.f32 1e-05, %v3117_v43  ;;  %3176 = vperm.xlu1 %5477, %v5913_v16   ;;  %v5786_v16 = vld [vmem:[%s9187_s8 + $0x104] ss:$16 sps:$4 sm:$0xff]   ;;  %4437 = vmatpush2.bf16.msra.mxu1 %v5781_v49 }
 0xa0c   :  { %v5448_v15 = vpop.f32.mrf.mxu1  ;;  %v5789_v43 = vld [vmem:[%s9187_s8 + $0x304] ss:$16 sps:$4 sm:$0xff]   ;;  %4337 = vmatprep.subr.bf16.mxu0 %v5786_v16 }
 0xa0d   :  { %5920 = vrsqrt.f32 %v3118_v40  ;;  %4438 = vmatprep.subr.bf16.mxu1 %v5789_v43 }
 0xa0e   :  { %v5915_v54 = vpop.eup %5914  ;;  %v3122_v17 = vpop.f32.mrf.mxu1  ;;  %4338 = vmatpush2.bf16.msra.mxu0 %v5784_v62 }
 0xa0f   :  { %v3123_v33 = vadd.f32 1e-05, %v3122_v17  ;;  %3181 = vperm.xlu0 %5476, %v5915_v54   ;;  %v5792_v17 = vld [vmem:[%s9187_s8 + $0xec] ss:$16 sps:$4 sm:$0xff]   ;;  %4439 = vmatpush2.bf16.msra.mxu1 %v5787_v31 }
 0xa10   :  { %v5451_v56 = vpop.f32.mrf.mxu1  ;;  %4509 = vmatprep.subr.bf16.mxu0 %v5792_v17  ;;  %4610 = vmatprep.subr.bf16.mxu1 %v5795_v34 }
 0xa11   :  { %5922 = vrsqrt.f32 %v3123_v33 }
 0xa12   :  { %v5917_v28 = vpop.eup %5916  ;;  %v3127_v6 = vpop.f32.mrf.mxu1 }
 0xa13   :  { %v3128_v35 = vadd.f32 1e-05, %v3127_v6  ;;  %3186 = vperm.xlu1 %5477, %v5917_v28  }
 0xa14   :  { %v5454_v9 = vpop.f32.mrf.mxu1 }
 0xa15   :  { %5924 = vrsqrt.f32 %v3128_v35 }
 0xa16   :  { %v5919_v40 = vpop.eup %5918  ;;  %v3132_v15 = vpop.f32.mrf.mxu1 }
 0xa17   :  { %v3133_v61 = vadd.f32 1e-05, %v3132_v15  ;;  %3191 = vperm.xlu1 %5477, %v5919_v40  }
 0xa18   :  { %v5457_v54 = vpop.f32.mrf.mxu1 }
 0xa19   :  { %5926 = vrsqrt.f32 %v3133_v61 }
 0xa1a   :  { %v5921_v33 = vpop.eup %5920  ;;  %v3137_v56 = vpop.f32.mrf.mxu1 }
 0xa1b   :  { %v3138_v28 = vadd.f32 1e-05, %v3137_v56  ;;  %3196 = vperm.xlu0 %5476, %v5921_v33  }
 0xa1c   :  { %v5460_v6 = vpop.f32.mrf.mxu1 }
 0xa1d   :  { %5928 = vrsqrt.f32 %v3138_v28 }
 0xa1e   :  { %v5923_v35 = vpop.eup %5922  ;;  %v3142_v47 = vpop.f32.mrf.mxu1 }
 0xa1f   :  { %v3143_v41 = vadd.f32 1e-05, %v3142_v47  ;;  %3201 = vperm.xlu1 %5477, %v5923_v35   ;;  %v2560_v35 = vld [vmem:[%s9188_s6] sm:$0xf] }
 0xa20   :  { %v5463_v9 = vpop.f32.mrf.mxu1  ;;  %v2561_v47 = vld [vmem:[%s9189_s7] sm:$0xf] }
 0xa21   :  { %5930 = vrsqrt.f32 %v3143_v41  ;;  %v9446_v41 = vld [vmem:[#allocation7_spill] sm:$0xff] }
 0xa22   :  { %v5925_v39 = vpop.eup %5924  ;;  %v3147_v49 = vpop.f32.mrf.mxu1  ;;  %v8435_v9 = vrot.slane %v2560_v35, %v9446_v41 }
 0xa23   :  { %v3148_v16 = vadd.f32 1e-05, %v3147_v49  ;;  %3206 = vperm.xlu0 %5476, %v5925_v39   ;;  %v9447_v39 = vld [vmem:[#allocation9_spill] sm:$0xff] }
 0xa24   :  { %v5466_v43 = vpop.f32.mrf.mxu1  ;;  %v8438_v49 = vrot.slane %v2560_v35, %v9447_v39 }
 0xa25   :  { %5932 = vrsqrt.f32 %v3148_v16  ;;  %v9448_v16 = vld [vmem:[#allocation8_spill] sm:$0xff] }
 0xa26   :  { %v5927_v40 = vpop.eup %5926  ;;  %v3152_v15 = vpop.f32.mrf.mxu1  ;;  %v8441_v43 = vrot.slane %v2560_v35, %v9448_v16 }
 0xa27   :  { %v3153_v62 = vadd.f32 1e-05, %v3152_v15  ;;  %3211 = vperm.xlu1 %5477, %v5927_v40   ;;  %v9449_v40 = vld [vmem:[#allocation5_spill] sm:$0xff] }
 0xa28   :  { %v5469_v31 = vpop.f32.mrf.mxu1  ;;  %v8444_v15 = vrot.slane %v2560_v35, %v9449_v40 }
 0xa29   :  { %5934 = vrsqrt.f32 %v3153_v62  ;;  %v8447_v62 = vrot.slane %v2561_v47, %v9446_v41  ;;  %v8450_v31 = vrot.slane %v2561_v47, %v9448_v16 }
 0xa2a   :  { %v5929_v61 = vpop.eup %5928  ;;  %v3157_v54 = vpop.f32.mrf.mxu1 }
 0xa2b   :  { %v3158_v17 = vadd.f32 1e-05, %v3157_v54  ;;  %3216 = vperm.xlu0 %5476, %v5929_v61  }
 0xa2c   :  { %v5472_v34 = vpop.f32.mrf.mxu1 }
 0xa2d   :  { %5936 = vrsqrt.f32 %v3158_v17 }
 0xa2e   :  { %v5931_v33 = vpop.eup %5930 }
 0xa2f   :  { %3221 = vperm.xlu1 %5477, %v5931_v33  }
 0xa32   :  { %v5933_v56 = vpop.eup %5932 }
 0xa33   :  { %3226 = vperm.xlu0 %5476, %v5933_v56   ;;  %v8457_v56 = vrot.slane %v2561_v47, %v9447_v39 }
 0xa36   :  { %v5935_v28 = vpop.eup %5934 }
 0xa37   :  { %3231 = vperm.xlu1 %5477, %v5935_v28   ;;  %v8460_v28 = vrot.slane %v2561_v47, %v9449_v40 }
 0xa3a   :  { %v5937_v6 = vpop.eup %5936 }
 0xa3b   :  { %3236 = vperm.xlu0 %5476, %v5937_v6  }
 0xa86   :  { %v3177_v61 = vpop.permute.xlu1 %3176 }
 0xa87   :  { %v3239_v54 = vmul.f32 %v3177_v61, %v8046_v5  ;;  %v3240_v17 = vmul.f32 %v3177_v61, %v8050_v11  ;;  %v3241_v34 = vmul.f32 %v3177_v61, %v8054_v10  ;;  %v3242_v33 = vmul.f32 %v3177_v61, %v8144_v19 }
 0xa89   :  { %v3312_v6 = vmul.f32 %v8435_v9, %v3239_v54  ;;  %v3313_v35 = vmul.f32 %v8438_v49, %v3240_v17  ;;  %v3314_v16 = vmul.f32 %v8441_v43, %v3241_v34  ;;  %v3315_v5 = vmul.f32 %v8444_v15, %v3242_v33 }
 0xa8a   :  { %v3182_v41 = vpop.permute.xlu0 %3181 }
 0xa8b   :  { %v3385_v11 = vadd.f32 %v8447_v62, %v3312_v6  ;;  %v3387_v10 = vadd.f32 %v8450_v31, %v3314_v16  ;;  %v3243_v19 = vmul.f32 %v3182_v41, %v8107_v60  ;;  %v3244_v61 = vmul.f32 %v3182_v41, %v8110_v21 }
 0xa8c   :  { %v3245_v47 = vmul.f32 %v3182_v41, %v8115_v51  ;;  %v3246_v40 = vmul.f32 %v3182_v41, %v8155_v32  ;;  %v3386_v54 = vadd.f32 %v8457_v56, %v3313_v35  ;;  %v3388_v17 = vadd.f32 %v8460_v28, %v3315_v5 }
 0xa8d   :  { %v3437_v34 = vmax.f32 %v3385_v11, 0.0  ;;  %v3439_v39 = vmax.f32 %v3387_v10, 0.0  ;;  %v3316_v33 = vmul.f32 %v8435_v9, %v3243_v19  ;;  %v3317_v6 = vmul.f32 %v8438_v49, %v3244_v61 }
 0xa8e   :  { %v3318_v16 = vmul.f32 %v8441_v43, %v3245_v47  ;;  %v3319_v60 = vmul.f32 %v8444_v15, %v3246_v40  ;;  %v3187_v7 = vpop.permute.xlu1 %3186  ;;  %v3438_v21 = vmax.f32 %v3386_v54, 0.0  ;;  %v3440_v45 = vmax.f32 %v3388_v17, 0.0 }
 0xa8f   :  { %v3389_v51 = vadd.f32 %v8447_v62, %v3316_v33  ;;  %v3247_v32 = vmul.f32 %v3187_v7, %v8010_v26  ;;  %v3248_v41 = vmul.f32 %v3187_v7, %v8014_v42  ;;  %v3249_v35 = vmul.f32 %v3187_v7, %v8018_v53 }
 0xa90   :  { %v3391_v5 = vadd.f32 %v8450_v31, %v3318_v16  ;;  %v3250_v11 = vmul.f32 %v3187_v7, %v8121_v30  ;;  %v3390_v10 = vadd.f32 %v8457_v56, %v3317_v6  ;;  %v3392_v19 = vadd.f32 %v8460_v28, %v3319_v60 }
 0xa91   :  { %v3441_v40 = vmax.f32 %v3389_v51, 0.0  ;;  %v3320_v61 = vmul.f32 %v8435_v9, %v3247_v32  ;;  %v3321_v47 = vmul.f32 %v8438_v49, %v3248_v41  ;;  %v3322_v54 = vmul.f32 %v8441_v43, %v3249_v35 }
 0xa92   :  { %v3443_v26 = vmax.f32 %v3391_v5, 0.0  ;;  %v3323_v42 = vmul.f32 %v8444_v15, %v3250_v11  ;;  %v3192_v17 = vpop.permute.xlu1 %3191  ;;  %v3442_v53 = vmax.f32 %v3390_v10, 0.0  ;;  %v3444_v33 = vmax.f32 %v3392_v19, 0.0  ;;  %v5790_v11 = vld [vmem:[%s9187_s8 + $0xe8] ss:$16 sps:$4 sm:$0xff]  }
 0xa93   :  { %v8490_v16 = vpack.c.bf16 %v3441_v40, %v3437_v34  ;;  %v8493_v30 = vadd.f32 %v8447_v62, %v3320_v61  ;;  %v8496_v7 = vadd.f32 %v8450_v31, %v3322_v54  ;;  %v3251_v6 = vmul.f32 %v3192_v17, %v8079_v22  ;;  %v5793_v22 = vld [vmem:[%s9187_s8 + $0x2e8] ss:$16 sps:$4 sm:$0xff]   ;;  %v5801_v10 = vld [vmem:[%s9187_s8 + $0x2cc] ss:$16 sps:$4 sm:$0xff]  }
 0xa94   :  { %v8499_v60 = vpack.c.bf16 %v3443_v26, %v3439_v39  ;;  %v3252_v51 = vmul.f32 %v3192_v17, %v8082_v23  ;;  %v3253_v32 = vmul.f32 %v3192_v17, %v8089_v57  ;;  %v3254_v41 = vmul.f32 %v3192_v17, %v8130_v36 }
 0xa95   :  { %v3324_v35 = vmul.f32 %v8435_v9, %v3251_v6  ;;  %v8505_v34 = vpack.c.bf16 %v3442_v53, %v3438_v21  ;;  %v8507_v5 = vpack.c.bf16 %v3444_v33, %v3440_v45  ;;  %v3394_v23 = vadd.f32 %v8457_v56, %v3321_v47  ;;  %v5798_v45 = vld [vmem:[%s9187_s8 + $0xcc] ss:$16 sps:$4 sm:$0xff]   ;;  %v5799_v6 = vld [vmem:[%s9187_s8 + $0x2c8] ss:$16 sps:$4 sm:$0xff]  }
 0xa96   :  { %v3325_v57 = vmul.f32 %v8438_v49, %v3252_v51  ;;  %v3326_v36 = vmul.f32 %v8441_v43, %v3253_v32  ;;  %v3327_v39 = vmul.f32 %v8444_v15, %v3254_v41  ;;  %v3197_v21 = vpop.permute.xlu0 %3196  ;;  %v3396_v19 = vadd.f32 %v8460_v28, %v3323_v42 }
 0xa97   :  { %v3397_v40 = vadd.f32 %v8447_v62, %v3324_v35  ;;  %4339 = vmatprep.mubr.bf16.mxu0 %v8505_v34  ;;  %4440 = vmatprep.mubr.bf16.mxu1 %v8507_v5  ;;  %v3255_v61 = vmul.f32 %v3197_v21, %v7974_v27  ;;  %v3256_v47 = vmul.f32 %v3197_v21, %v7978_v37  ;;  %v3446_v54 = vmax.f32 %v3394_v23, 0.0  ;;  %v5796_v37 = vld [vmem:[%s9187_s8 + $0xc8] ss:$16 sps:$4 sm:$0xff]  }
 0xa98   :  { %v3399_v26 = vadd.f32 %v8450_v31, %v3326_v36  ;;  %4340 = vmatmul.mubr.bf16.vlgmr.msra.gmra.mxu0 %v8490_v16  ;;  %4441 = vmatmul.mubr.bf16.vlgmr.msra.gmra.mxu1 %v8499_v60  ;;  %v3257_v17 = vmul.f32 %v3197_v21, %v7987_v50  ;;  %v3258_v42 = vmul.f32 %v3197_v21, %v8086_v3  ;;  %v3448_v53 = vmax.f32 %v3396_v19, 0.0 }
 0xa99   :  { %4510 = vmatpush1.bf16.msra.mxu0 %v5790_v11  ;;  %4611 = vmatpush1.bf16.msra.mxu1 %v5793_v22  ;;  %v3328_v33 = vmul.f32 %v8435_v9, %v3255_v61  ;;  %v3329_v27 = vmul.f32 %v8438_v49, %v3256_v47  ;;  %v3398_v51 = vadd.f32 %v8457_v56, %v3325_v57  ;;  %v3445_v50 = vmax.f32 %v8493_v30, 0.0  ;;  %v5804_v11 = vld [vmem:[%s9187_s8 + $0xac] ss:$16 sps:$4 sm:$0xff]  }
 0xa9a   :  { %v3330_v3 = vmul.f32 %v8441_v43, %v3257_v17  ;;  %v8548_v32 = vmul.f32 %v8444_v15, %v3258_v42  ;;  %4511 = vmatprep.subr.bf16.mxu0 %v5798_v45  ;;  %4612 = vmatprep.subr.bf16.mxu1 %v5801_v10  ;;  %v3202_v41 = vpop.permute.xlu1 %3201  ;;  %v3400_v35 = vadd.f32 %v8460_v28, %v3327_v39  ;;  %v5807_v22 = vld [vmem:[%s9187_s8 + $0x2ac] ss:$16 sps:$4 sm:$0xff]   ;;  %v3449_v23 = vmax.f32 %v3397_v40, 0.0  ;;  %v5802_v42 = vld [vmem:[%s9187_s8 + $0xa8] ss:$16 sps:$4 sm:$0xff]  }
 0xa9b   :  { %v8558_v30 = vadd.f32 %v8447_v62, %v3328_v33  ;;  %v3259_v57 = vmul.f32 %v3202_v41, %v8057_v48  ;;  %v3260_v36 = vmul.f32 %v3202_v41, %v8060_v63  ;;  %v3261_v21 = vmul.f32 %v3202_v41, %v8063_v38  ;;  %v5805_v48 = vld [vmem:[%s9187_s8 + $0x2a8] ss:$16 sps:$4 sm:$0xff]  }
 0xa9c   :  { %v8564_v39 = vadd.f32 %v8450_v31, %v3330_v3  ;;  %v3262_v45 = vmul.f32 %v3202_v41, %v8100_v4  ;;  %v3450_v10 = vmax.f32 %v3398_v51, 0.0  ;;  %v3452_v19 = vmax.f32 %v3400_v35, 0.0 }
 0xa9d   :  { %4512 = vmatpush1.bf16.msra.mxu0 %v5796_v37  ;;  %4613 = vmatpush1.bf16.msra.mxu1 %v5799_v6  ;;  %v3332_v40 = vmul.f32 %v8435_v9, %v3259_v57  ;;  %v3333_v61 = vmul.f32 %v8438_v49, %v3260_v36  ;;  %v3334_v47 = vmul.f32 %v8441_v43, %v3261_v21  ;;  %v3447_v63 = vmax.f32 %v8496_v7, 0.0  ;;  %v5819_v21 = vld [vmem:[%s9187_s8 + $0x26c] ss:$16 sps:$4 sm:$0xff]  }
 0xa9e   :  { %v3335_v38 = vmul.f32 %v8444_v15, %v3262_v45  ;;  %v8575_v17 = vpack.c.bf16 %v3450_v10, %v3446_v54  ;;  %v8577_v4 = vpack.c.bf16 %v3452_v19, %v3448_v53  ;;  %4513 = vmatprep.subr.bf16.mxu0 %v5804_v11  ;;  %4614 = vmatprep.subr.bf16.mxu1 %v5807_v22  ;;  %v3451_v33 = vmax.f32 %v3399_v26, 0.0  ;;  %v3207_v37 = vpop.permute.xlu0 %3206  ;;  %v5810_v54 = vld [vmem:[%s9187_s8 + $0x8c] ss:$16 sps:$4 sm:$0xff]   ;;  %v5811_v22 = vld [vmem:[%s9187_s8 + $0x288] ss:$16 sps:$4 sm:$0xff]  }
 0xa9f   :  { %v3405_v6 = vadd.f32 %v8447_v62, %v3332_v40  ;;  %v3407_v51 = vadd.f32 %v8450_v31, %v3334_v47  ;;  %v8584_v3 = vpack.c.bf16 %v3449_v23, %v3445_v50  ;;  %v3263_v7 = vmul.f32 %v3207_v37, %v7940_v59  ;;  %v5813_v53 = vld [vmem:[%s9187_s8 + $0x28c] ss:$16 sps:$4 sm:$0xff]  }
 0xaa0   :  { %4349 = vmatprep.mubr.bf16.mxu0 %v8575_v17  ;;  %4450 = vmatprep.mubr.bf16.mxu1 %v8577_v4  ;;  %v8595_v26 = vpack.c.bf16 %v3451_v33, %v3447_v63  ;;  %v3264_v41 = vmul.f32 %v3207_v37, %v7943_v0  ;;  %v3265_v50 = vmul.f32 %v3207_v37, %v7958_v2  ;;  %v3453_v59 = vmax.f32 %v8558_v30, 0.0 }
 0xaa1   :  { %4350 = vmatmul.mubr.bf16.gmra.mxu0 %v8584_v3  ;;  %4615 = vmatpush1.bf16.msra.mxu1 %v5805_v48  ;;  %v3266_v35 = vmul.f32 %v3207_v37, %v8038_v20  ;;  %v3336_v11 = vmul.f32 %v8435_v9, %v3263_v7  ;;  %v3402_v23 = vadd.f32 %v8457_v56, %v3329_v27  ;;  %v3457_v57 = vmax.f32 %v3405_v6, 0.0  ;;  %v5808_v20 = vld [vmem:[%s9187_s8 + $0x88] ss:$16 sps:$4 sm:$0xff]  }
 0xaa2   :  { %4451 = vmatmul.mubr.bf16.gmra.mxu1 %v8595_v26  ;;  %4514 = vmatpush1.bf16.msra.mxu0 %v5802_v42  ;;  %v3337_v0 = vmul.f32 %v8438_v49, %v3264_v41  ;;  %v3338_v2 = vmul.f32 %v8441_v43, %v3265_v50  ;;  %v3212_v30 = vpop.permute.xlu1 %3211  ;;  %v3406_v36 = vadd.f32 %v8457_v56, %v3333_v61  ;;  %v3455_v27 = vmax.f32 %v8564_v39, 0.0  ;;  %v5816_v61 = vld [vmem:[%s9187_s8 + $0x6c] ss:$16 sps:$4 sm:$0xff]   ;;  %v5817_v6 = vld [vmem:[%s9187_s8 + $0x268] ss:$16 sps:$4 sm:$0xff]  }
 0xaa3   :  { %v8619_v45 = vmul.f32 %v8444_v15, %v3266_v35  ;;  %v8622_v10 = vadd.f32 %v8447_v62, %v3336_v11  ;;  %4515 = vmatprep.subr.bf16.mxu0 %v5810_v54  ;;  %4616 = vmatprep.subr.bf16.mxu1 %v5813_v53  ;;  %v3267_v19 = vmul.f32 %v3212_v30, %v8023_v52  ;;  %v3454_v40 = vmax.f32 %v3402_v23, 0.0  ;;  %v5814_v35 = vld [vmem:[%s9187_s8 + $0x68] ss:$16 sps:$4 sm:$0xff]  }
 0xaa4   :  { %v8629_v47 = vadd.f32 %v8450_v31, %v3338_v2  ;;  %v3268_v39 = vmul.f32 %v3212_v30, %v8026_v29  ;;  %v3269_v48 = vmul.f32 %v3212_v30, %v8029_v1  ;;  %v3270_v63 = vmul.f32 %v3212_v30, %v8068_v58  ;;  %v5822_v2 = vld [vmem:[%s9187_s8 + $0x4c] ss:$16 sps:$4 sm:$0xff]  }
 0xaa5   :  { %4617 = vmatpush1.bf16.msra.mxu1 %v5811_v22  ;;  %v3340_v42 = vmul.f32 %v8435_v9, %v3267_v19  ;;  %v3458_v33 = vmax.f32 %v3406_v36, 0.0  ;;  %v3404_v52 = vadd.f32 %v8460_v28, %v8548_v32  ;;  %v3408_v37 = vadd.f32 %v8460_v28, %v3335_v38  ;;  %v5825_v32 = vld [vmem:[%s9187_s8 + $0x24c] ss:$16 sps:$4 sm:$0xff]   ;;  %v5820_v19 = vld [vmem:[%s9187_s8 + $0x48] ss:$16 sps:$4 sm:$0xff]  }
 0xaa6   :  { %4516 = vmatpush1.bf16.msra.mxu0 %v5808_v20  ;;  %v3341_v29 = vmul.f32 %v8438_v49, %v3268_v39  ;;  %v3342_v1 = vmul.f32 %v8441_v43, %v3269_v48  ;;  %v3343_v58 = vmul.f32 %v8444_v15, %v3270_v63  ;;  %4618 = vmatprep.subr.bf16.mxu1 %v5819_v21  ;;  %v3459_v7 = vmax.f32 %v3407_v51, 0.0  ;;  %v3217_v54 = vpop.permute.xlu0 %3216  ;;  %v5828_v63 = vld [vmem:[%s9187_s8 + $0x2c] ss:$16 sps:$4 sm:$0xff]  }
 0xaa7   :  { %v8648_v38 = vadd.f32 %v8447_v62, %v3340_v42  ;;  %v8650_v53 = vpack.c.bf16 %v3458_v33, %v3454_v40  ;;  %v3456_v41 = vmax.f32 %v3404_v52, 0.0  ;;  %v3460_v50 = vmax.f32 %v3408_v37, 0.0  ;;  %4517 = vmatprep.subr.bf16.mxu0 %v5816_v61  ;;  %v5829_v37 = vld [vmem:[%s9187_s8 + $0x228] ss:$16 sps:$4 sm:$0xff]  }
 0xaa8   :  { %v8656_v11 = vadd.f32 %v8450_v31, %v3342_v1  ;;  %v8658_v51 = vpack.c.bf16 %v3457_v57, %v3453_v59  ;;  %v8660_v22 = vpack.c.bf16 %v3459_v7, %v3455_v27  ;;  %v3271_v23 = vmul.f32 %v3217_v54, %v7904_v18  ;;  %v5823_v59 = vld [vmem:[%s9187_s8 + $0x248] ss:$16 sps:$4 sm:$0xff]  }
 0xaa9   :  { %4359 = vmatprep.mubr.bf16.mxu0 %v8650_v53  ;;  %v8667_v20 = vpack.c.bf16 %v3460_v50, %v3456_v41  ;;  %4619 = vmatpush1.bf16.msra.mxu1 %v5817_v6  ;;  %v3272_v30 = vmul.f32 %v3217_v54, %v7907_v25  ;;  %v3273_v36 = vmul.f32 %v3217_v54, %v7924_v12  ;;  %v5831_v25 = vld [vmem:[%s9187_s8 + $0x22c] ss:$16 sps:$4 sm:$0xff]   ;;  %v3461_v40 = vmax.f32 %v8622_v10, 0.0 }
 0xaaa   :  { %4360 = vmatmul.mubr.bf16.gmra.mxu0 %v8658_v51  ;;  %v3274_v18 = vmul.f32 %v3217_v54, %v7929_v14  ;;  %v3344_v57 = vmul.f32 %v8435_v9, %v3271_v23  ;;  %4620 = vmatprep.subr.bf16.mxu1 %v5825_v32  ;;  %v3222_v21 = vpop.permute.xlu1 %3221  ;;  %v3410_v27 = vadd.f32 %v8457_v56, %v3337_v0  ;;  %v3465_v61 = vmax.f32 %v8648_v38, 0.0 }
 0xaab   :  { %4460 = vmatprep.mubr.bf16.mxu1 %v8667_v20  ;;  %4518 = vmatpush1.bf16.msra.mxu0 %v5814_v35  ;;  %v3346_v12 = vmul.f32 %v8441_v43, %v3273_v36  ;;  %v3275_v14 = vmul.f32 %v3222_v21, %v7981_v55  ;;  %v8691_v0 = vmul.f32 %v8438_v49, %v3272_v30  ;;  %v3463_v55 = vmax.f32 %v8629_v47, 0.0  ;;  %v9450_v30 = vld [vmem:[#allocation15_spill] sm:$0xff] }
 0xaac   :  { %4461 = vmatmul.mubr.bf16.gmra.mxu1 %v8660_v22  ;;  %v8694_v39 = vmul.f32 %v8444_v15, %v3274_v18  ;;  %4519 = vmatprep.subr.bf16.mxu0 %v5822_v2  ;;  %v3276_v48 = vmul.f32 %v3222_v21, %v7990_v8  ;;  %v8702_v10 = vadd.f32 %v8447_v62, %v3344_v57  ;;  %v3462_v52 = vmax.f32 %v3410_v27, 0.0 }
 0xaad   :  { %4621 = vmatpush1.bf16.msra.mxu1 %v5823_v59  ;;  %v3277_v42 = vmul.f32 %v3222_v21, %v7993_v13  ;;  %v3348_v33 = vmul.f32 %v8435_v9, %v3275_v14  ;;  %v8710_v8 = vadd.f32 %v8450_v31, %v3346_v12  ;;  %v3414_v6 = vadd.f32 %v8457_v56, %v3341_v29  ;;  %v5837_v13 = vld [vmem:[%s9187_s8 + $0x20c] ss:$16 sps:$4 sm:$0xff]   ;;  %v5832_v14 = vld [vmem:[%s9187_s8 + $0x8] ss:$16 sps:$4 sm:$0xff]  }
 0xaae   :  { %v3412_v47 = vadd.f32 %v8460_v28, %v8619_v45  ;;  %v3416_v1 = vadd.f32 %v8460_v28, %v3343_v58  ;;  %4622 = vmatprep.subr.bf16.mxu1 %v5831_v25  ;;  %v3227_v7 = vpop.permute.xlu0 %3226  ;;  %v3278_v54 = vmul.f32 %v3222_v21, %v8002_v46  ;;  %v3349_v32 = vmul.f32 %v8438_v49, %v3276_v48  ;;  %v5826_v45 = vld [vmem:[%s9187_s8 + $0x28] ss:$16 sps:$4 sm:$0xff]   ;;  %v9451_v21 = vld [vmem:[#allocation30_spill] sm:$0xff] }
 0xaaf   :  { %4520 = vmatpush1.bf16.msra.mxu0 %v5820_v19  ;;  %v3350_v38 = vmul.f32 %v8441_v43, %v3277_v42  ;;  %v8723_v29 = vadd.f32 %v8447_v62, %v3348_v33  ;;  %v3466_v58 = vmax.f32 %v3414_v6, 0.0  ;;  %v3467_v35 = vmax.f32 %v8656_v11, 0.0  ;;  %v5834_v11 = vld [vmem:[%s9187_s8 + $0xc] ss:$16 sps:$4 sm:$0xff]   ;;  %v9454_v42 = vld [vmem:[#allocation6_spill] sm:$0xff] }
 0xab0   :  { %v3464_v41 = vmax.f32 %v3412_v47, 0.0  ;;  %v3468_v50 = vmax.f32 %v3416_v1, 0.0  ;;  %4521 = vmatprep.subr.bf16.mxu0 %v5828_v63  ;;  %v8729_v23 = vpack.c.bf16 %v3465_v61, %v3461_v40  ;;  %v3279_v46 = vmul.f32 %v3227_v7, %v7946_v44  ;;  %v5835_v44 = vld [vmem:[%s9187_s8 + $0x208] ss:$16 sps:$4 sm:$0xff]   ;;  %v9455_v1 = vld [vmem:[#allocation16_spill] sm:$0xff] }
 0xab1   :  { %4623 = vmatpush1.bf16.msra.mxu1 %v5829_v37  ;;  %v3280_v2 = vmul.f32 %v3227_v7, %v7951_v24  ;;  %v3281_v36 = vmul.f32 %v3227_v7, %v9450_v30  ;;  %v8734_v59 = vpack.c.bf16 %v3466_v58, %v3462_v52  ;;  %v8738_v57 = vpack.c.bf16 %v3467_v35, %v3463_v55  ;;  %v9452_v40 = vld [vmem:[#allocation23_spill] sm:$0xff]  ;;  %v9453_v63 = vld [vmem:[#allocation29_spill] sm:$0xff] }
 0xab2   :  { %v8736_v18 = vpack.c.bf16 %v3468_v50, %v3464_v41  ;;  %v3282_v27 = vmul.f32 %v3227_v7, %v9451_v21  ;;  %4624 = vmatprep.subr.bf16.mxu1 %v5837_v13  ;;  %v3232_v24 = vpop.permute.xlu1 %3231  ;;  %v3351_v25 = vmul.f32 %v8444_v15, %v3278_v54  ;;  %v3423_v12 = vadd.f32 %v8450_v31, %v3350_v38  ;;  %v5840_v52 = vld [vmem:[%s9187_s8 + $0x1ec] ss:$16 sps:$4 sm:$0xff]   ;;  %v5841_v38 = vld [vmem:[%s9187_s8 + $0x3e8] ss:$16 sps:$4 sm:$0xff]  }
 0xab3   :  { %4522 = vmatpush1.bf16.msra.mxu0 %v5826_v45  ;;  %v3352_v19 = vmul.f32 %v8435_v9, %v3279_v46  ;;  %v3283_v61 = vmul.f32 %v3232_v24, %v9452_v40  ;;  %4369 = vmatprep.mubr.bf16.mxu0 %v8734_v59  ;;  %v3353_v48 = vmul.f32 %v8438_v49, %v3280_v2  ;;  %v5843_v37 = vld [vmem:[%s9187_s8 + $0x3ec] ss:$16 sps:$4 sm:$0xff]   ;;  %v3469_v45 = vmax.f32 %v8702_v10, 0.0  ;;  %v5838_v2 = vld [vmem:[%s9187_s8 + $0x1e8] ss:$16 sps:$4 sm:$0xff]  }
 0xab4   :  { %4470 = vmatprep.mubr.bf16.mxu1 %v8736_v18  ;;  %v3284_v55 = vmul.f32 %v3232_v24, %v9453_v63  ;;  %v3285_v33 = vmul.f32 %v3232_v24, %v9454_v42  ;;  %4370 = vmatmul.mubr.bf16.gmra.mxu0 %v8729_v23  ;;  %v3354_v6 = vmul.f32 %v8441_v43, %v3281_v36  ;;  %v3473_v58 = vmax.f32 %v8723_v29, 0.0  ;;  %v9456_v40 = vld [vmem:[#allocation33_spill] sm:$0xff]  ;;  %v9457_v63 = vld [vmem:[#allocation34_spill] sm:$0xff] }
 0xab5   :  { %4471 = vmatmul.mubr.bf16.gmra.mxu1 %v8738_v57  ;;  %v3355_v47 = vmul.f32 %v8444_v15, %v3282_v27  ;;  %v3286_v7 = vmul.f32 %v3232_v24, %v9455_v1  ;;  %4523 = vmatprep.subr.bf16.mxu0 %v5834_v11  ;;  %v3356_v13 = vmul.f32 %v8435_v9, %v3283_v61  ;;  %v3471_v30 = vmax.f32 %v8710_v8, 0.0  ;;  %v5844_v42 = vld [vmem:[%s9187_s8 + $0x1c8] ss:$16 sps:$4 sm:$0xff]  }
 0xab6   :  { %4625 = vmatpush1.bf16.msra.mxu1 %v5835_v44  ;;  %v3358_v54 = vmul.f32 %v8441_v43, %v3285_v33  ;;  %v8778_v41 = vadd.f32 %v8447_v62, %v3352_v19  ;;  %v3418_v50 = vadd.f32 %v8457_v56, %v8691_v0  ;;  %v3422_v35 = vadd.f32 %v8457_v56, %v3349_v32  ;;  %v3237_v21 = vpop.permute.xlu0 %3236  ;;  %v5846_v0 = vld [vmem:[%s9187_s8 + $0x1cc] ss:$16 sps:$4 sm:$0xff]   ;;  %v5847_v1 = vld [vmem:[%s9187_s8 + $0x3c8] ss:$16 sps:$4 sm:$0xff]  }
 0xab7   :  { %4524 = vmatpush1.bf16.msra.mxu0 %v5832_v14  ;;  %v3420_v46 = vadd.f32 %v8460_v28, %v8694_v39  ;;  %v3357_v10 = vmul.f32 %v8438_v49, %v3284_v55  ;;  %v3424_v29 = vadd.f32 %v8460_v28, %v3351_v25  ;;  %4626 = vmatprep.subr.bf16.mxu1 %v5843_v37  ;;  %v3475_v36 = vmax.f32 %v3423_v12, 0.0  ;;  %v5849_v39 = vld [vmem:[%s9187_s8 + $0x3cc] ss:$16 sps:$4 sm:$0xff]  }
 0xab8   :  { %4525 = vmatprep.subr.bf16.mxu0 %v5840_v52  ;;  %v3359_v32 = vmul.f32 %v8444_v15, %v3286_v7  ;;  %v3429_v27 = vadd.f32 %v8447_v62, %v3356_v13  ;;  %v3470_v11 = vmax.f32 %v3418_v50, 0.0  ;;  %v3474_v44 = vmax.f32 %v3422_v35, 0.0  ;;  %v9458_v52 = vld [vmem:[#allocation36_spill] sm:$0xff]  ;;  %v5852_v13 = vld [vmem:[%s9187_s8 + $0x1ac] ss:$16 sps:$4 sm:$0xff]  }
 0xab9   :  { %v3431_v24 = vadd.f32 %v8450_v31, %v3358_v54  ;;  %v3472_v25 = vmax.f32 %v3420_v46, 0.0  ;;  %v3476_v8 = vmax.f32 %v3424_v29, 0.0  ;;  %v8800_v12 = vpack.c.bf16 %v3473_v58, %v3469_v45  ;;  %v5855_v35 = vld [vmem:[%s9187_s8 + $0x3ac] ss:$16 sps:$4 sm:$0xff]  }
 0xaba   :  { %4627 = vmatpush2.bf16.msra.mxu1 %v5841_v38  ;;  %v8802_v19 = vpack.c.bf16 %v3474_v44, %v3470_v11  ;;  %v8804_v14 = vpack.c.bf16 %v3475_v36, %v3471_v30  ;;  %v3287_v61 = vmul.f32 %v3237_v21, %v9456_v40  ;;  %v3288_v55 = vmul.f32 %v3237_v21, %v9457_v63  ;;  %v9459_v38 = vld [vmem:[#allocation35_spill] sm:$0xff] }
 0xabb   :  { %4526 = vmatpush2.bf16.msra.mxu0 %v5838_v2  ;;  %v8811_v33 = vpack.c.bf16 %v3476_v8, %v3472_v25  ;;  %v3290_v37 = vmul.f32 %v3237_v21, %v9458_v52  ;;  %4628 = vmatprep.subr.bf16.mxu1 %v5849_v39  ;;  %v3426_v7 = vadd.f32 %v8457_v56, %v3353_v48  ;;  %v3481_v46 = vmax.f32 %v3429_v27, 0.0  ;;  %v5850_v30 = vld [vmem:[%s9187_s8 + $0x1a8] ss:$16 sps:$4 sm:$0xff]   ;;  %v5861_v44 = vld [vmem:[%s9187_s8 + $0x38c] ss:$16 sps:$4 sm:$0xff]  }
 0xabc   :  { %4527 = vmatprep.subr.bf16.mxu0 %v5846_v0  ;;  %v3427_v54 = vadd.f32 %v8450_v31, %v3354_v6  ;;  %4379 = vmatprep.mubr.bf16.mxu0 %v8802_v19  ;;  %v3289_v45 = vmul.f32 %v3237_v21, %v9459_v38  ;;  %v3361_v58 = vmul.f32 %v8438_v49, %v3288_v55  ;;  %v3483_v29 = vmax.f32 %v3431_v24, 0.0  ;;  %v5867_v52 = vld [vmem:[%s9187_s8 + $0x36c] ss:$16 sps:$4 sm:$0xff]  }
 0xabd   :  { %v3430_v50 = vadd.f32 %v8457_v56, %v3357_v10  ;;  %4480 = vmatprep.mubr.bf16.mxu1 %v8811_v33  ;;  %4380 = vmatmul.mubr.bf16.gmra.mxu0 %v8800_v12  ;;  %v3363_v48 = vmul.f32 %v8444_v15, %v3290_v37  ;;  %v3428_v6 = vadd.f32 %v8460_v28, %v3355_v47  ;;  %v3478_v49 = vmax.f32 %v3426_v7, 0.0  ;;  %v5853_v47 = vld [vmem:[%s9187_s8 + $0x3a8] ss:$16 sps:$4 sm:$0xff]  }
 0xabe   :  { %v3432_v2 = vadd.f32 %v8460_v28, %v3359_v32  ;;  %4481 = vmatmul.mubr.bf16.gmra.mxu1 %v8804_v14  ;;  %v3477_v36 = vmax.f32 %v8778_v41, 0.0  ;;  %v3360_v21 = vmul.f32 %v8435_v9, %v3287_v61  ;;  %v3434_v39 = vadd.f32 %v8457_v56, %v3361_v58  ;;  %v5858_v9 = vld [vmem:[%s9187_s8 + $0x18c] ss:$16 sps:$4 sm:$0xff]   ;;  %v5856_v61 = vld [vmem:[%s9187_s8 + $0x188] ss:$16 sps:$4 sm:$0xff]  }
 0xabf   :  { %4528 = vmatpush2.bf16.msra.mxu0 %v5844_v42  ;;  %v3482_v10 = vmax.f32 %v3430_v50, 0.0  ;;  %4629 = vmatpush2.bf16.msra.mxu1 %v5847_v1  ;;  %v3480_v15 = vmax.f32 %v3428_v6, 0.0  ;;  %v3362_v32 = vmul.f32 %v8441_v43, %v3289_v45  ;;  %v3479_v11 = vmax.f32 %v3427_v54, 0.0  ;;  %v5859_v42 = vld [vmem:[%s9187_s8 + $0x388] ss:$16 sps:$4 sm:$0xff]  }
 0xac0   :  { %v3484_v0 = vmax.f32 %v3432_v2, 0.0  ;;  %4529 = vmatprep.subr.bf16.mxu0 %v5852_v13  ;;  %4630 = vmatprep.subr.bf16.mxu1 %v5855_v35  ;;  %v3436_v41 = vadd.f32 %v8460_v28, %v3363_v48  ;;  %v8856_v25 = vpack.c.bf16 %v3481_v46, %v3477_v36  ;;  %v3486_v56 = vmax.f32 %v3434_v39, 0.0  ;;  %v5865_v1 = vld [vmem:[%s9187_s8 + $0x368] ss:$16 sps:$4 sm:$0xff]   ;;  %v5870_v13 = vld [vmem:[%s9187_s8 + $0x14c] ss:$16 sps:$4 sm:$0xff]  }
 0xac1   :  { %v8845_v27 = vpack.c.bf16 %v3482_v10, %v3478_v49  ;;  %v8859_v43 = vpack.c.bf16 %v3483_v29, %v3479_v11  ;;  %v3433_v28 = vadd.f32 %v8447_v62, %v3360_v21  ;;  %v3435_v63 = vadd.f32 %v8450_v31, %v3362_v32  ;;  %v5864_v62 = vld [vmem:[%s9187_s8 + $0x16c] ss:$16 sps:$4 sm:$0xff]   ;;  %v5862_v31 = vld [vmem:[%s9187_s8 + $0x168] ss:$16 sps:$4 sm:$0xff]  }
 0xac2   :  { %v8854_v24 = vpack.c.bf16 %v3484_v0, %v3480_v15  ;;  %v3488_v8 = vmax.f32 %v3436_v41, 0.0  ;;  %v8863_v40 = vpack.c.bf16 %v3486_v56, %v3486_v56  ;;  %v5873_v54 = vld [vmem:[%s9187_s8 + $0x34c] ss:$16 sps:$4 sm:$0xff]   ;;  %v5868_v45 = vld [vmem:[%s9187_s8 + $0x148] ss:$16 sps:$4 sm:$0xff]  }
 0xac3   :  { %4389 = vmatprep.mubr.bf16.mxu0 %v8845_v27  ;;  %4530 = vmatpush2.bf16.msra.mxu0 %v5850_v30  ;;  %v3485_v37 = vmax.f32 %v3433_v28, 0.0  ;;  %v3487_v7 = vmax.f32 %v3435_v63, 0.0  ;;  %v5871_v50 = vld [vmem:[%s9187_s8 + $0x348] ss:$16 sps:$4 sm:$0xff]   ;;  %v5876_v35 = vld [vmem:[%s9187_s8 + $0x12c] ss:$16 sps:$4 sm:$0xff]  }
 0xac4   :  { %4490 = vmatprep.mubr.bf16.mxu1 %v8854_v24  ;;  %4631 = vmatpush2.bf16.msra.mxu1 %v5853_v47  ;;  %v8869_v55 = vpack.c.bf16 %v3488_v8, %v3488_v8  ;;  %v5879_v46 = vld [vmem:[%s9187_s8 + $0x32c] ss:$16 sps:$4 sm:$0xff]   ;;  %v5874_v48 = vld [vmem:[%s9187_s8 + $0x128] ss:$16 sps:$4 sm:$0xff]  }
 0xac5   :  { %4531 = vmatprep.subr.bf16.mxu0 %v5858_v9  ;;  %4632 = vmatprep.subr.bf16.mxu1 %v5861_v44  ;;  %v3513_v38 = vpack.c.bf16 %v3485_v37, %v3485_v37  ;;  %v3515_v58 = vpack.c.bf16 %v3487_v7, %v3487_v7  ;;  %v5877_v6 = vld [vmem:[%s9187_s8 + $0x328] ss:$16 sps:$4 sm:$0xff]   ;;  %v5882_v2 = vld [vmem:[%s9187_s8 + $0x10c] ss:$16 sps:$4 sm:$0xff]  }
 0xac6   :  { %4390 = vmatmul.mubr.bf16.gmra.mxu0 %v8856_v25  ;;  %4491 = vmatmul.mubr.bf16.gmra.mxu1 %v8859_v43  ;;  %v5883_v29 = vld [vmem:[%s9187_s8 + $0x308] ss:$16 sps:$4 sm:$0xff]  }
 0xac7   :  { %4399 = vmatprep.mubr.bf16.mxu0 %v8863_v40  ;;  %4500 = vmatprep.mubr.bf16.mxu1 %v8869_v55 }
 0xac8   :  { %4532 = vmatpush2.bf16.msra.mxu0 %v5856_v61  ;;  %4633 = vmatpush2.bf16.msra.mxu1 %v5859_v42 }
 0xac9   :  { %4533 = vmatprep.subr.bf16.mxu0 %v5864_v62  ;;  %4634 = vmatprep.subr.bf16.mxu1 %v5867_v52 }
 0xacc   :  { %4534 = vmatpush2.bf16.msra.mxu0 %v5862_v31  ;;  %4635 = vmatpush2.bf16.msra.mxu1 %v5865_v1 }
 0xacd   :  { %4535 = vmatprep.subr.bf16.mxu0 %v5870_v13  ;;  %4636 = vmatprep.subr.bf16.mxu1 %v5873_v54 }
 0xace   :  { %4400 = vmatmul.mubr.bf16.gmra.mxu0 %v3513_v38  ;;  %4501 = vmatmul.mubr.bf16.gmra.mxu1 %v3515_v58 }
 0xacf   :  { %4541 = vmatprep.mubr.bf16.mxu0 %v8505_v34  ;;  %4642 = vmatprep.mubr.bf16.mxu1 %v8507_v5  ;;  %v5885_v34 = vld [vmem:[%s9187_s8 + $0x30c] ss:$16 sps:$4 sm:$0xff]   ;;  %v5880_v5 = vld [vmem:[%s9187_s8 + $0x108] ss:$16 sps:$4 sm:$0xff]  }
 0xad0   :  { %4536 = vmatpush2.bf16.msra.mxu0 %v5868_v45  ;;  %4637 = vmatpush2.bf16.msra.mxu1 %v5871_v50 }
 0xad1   :  { %4537 = vmatprep.subr.bf16.mxu0 %v5876_v35  ;;  %4638 = vmatprep.subr.bf16.mxu1 %v5879_v46 }
 0xad4   :  { %4538 = vmatpush2.bf16.msra.mxu0 %v5874_v48  ;;  %4639 = vmatpush2.bf16.msra.mxu1 %v5877_v6 }
 0xad5   :  { %4539 = vmatprep.subr.bf16.mxu0 %v5882_v2  ;;  %4640 = vmatprep.subr.bf16.mxu1 %v5885_v34 }
 0xad8   :  { %4540 = vmatpush2.bf16.msra.mxu0 %v5880_v5  ;;  %4641 = vmatpush2.bf16.msra.mxu1 %v5883_v29 }
 0xadb   :  { %4542 = vmatmul.mubr.bf16.vlgmr.msra.gmra.mxu0 %v8490_v16  ;;  %4643 = vmatmul.mubr.bf16.vlgmr.msra.gmra.mxu1 %v8499_v60  ;;  %v8955_v16 = vld [vmem:[%s9190_s9] sm:$0xf]  ;;  %v9460_v60 = vld [vmem:[#allocation7_spill] sm:$0xff] }
 0xadc   :  { %4551 = vmatprep.mubr.bf16.mxu0 %v8575_v17  ;;  %4652 = vmatprep.mubr.bf16.mxu1 %v8577_v4  ;;  %v8959_v17 = vrot.slane %v8955_v16, %v9460_v60  ;;  %v9461_v4 = vld [vmem:[#allocation9_spill] sm:$0xff] }
 0xae3   :  { %4552 = vmatmul.mubr.bf16.gmra.mxu0 %v8584_v3  ;;  %4653 = vmatmul.mubr.bf16.gmra.mxu1 %v8595_v26  ;;  %v8963_v3 = vrot.slane %v8955_v16, %v9461_v4 }
 0xae4   :  { %4561 = vmatprep.mubr.bf16.mxu0 %v8650_v53  ;;  %4662 = vmatprep.mubr.bf16.mxu1 %v8667_v20 }
 0xaeb   :  { %4562 = vmatmul.mubr.bf16.gmra.mxu0 %v8658_v51  ;;  %4663 = vmatmul.mubr.bf16.gmra.mxu1 %v8660_v22 }
 0xaec   :  { %4571 = vmatprep.mubr.bf16.mxu0 %v8734_v59  ;;  %4672 = vmatprep.mubr.bf16.mxu1 %v8736_v18 }
 0xaf3   :  { %4572 = vmatmul.mubr.bf16.gmra.mxu0 %v8729_v23  ;;  %4673 = vmatmul.mubr.bf16.gmra.mxu1 %v8738_v57 }
 0xaf4   :  { %4581 = vmatprep.mubr.bf16.mxu0 %v8802_v19  ;;  %4682 = vmatprep.mubr.bf16.mxu1 %v8811_v33 }
 0xafb   :  { %4582 = vmatmul.mubr.bf16.gmra.mxu0 %v8800_v12  ;;  %4683 = vmatmul.mubr.bf16.gmra.mxu1 %v8804_v14 }
 0xafc   :  { %4591 = vmatprep.mubr.bf16.mxu0 %v8845_v27  ;;  %4692 = vmatprep.mubr.bf16.mxu1 %v8854_v24 }
 0xb03   :  { %4592 = vmatmul.mubr.bf16.gmra.mxu0 %v8856_v25  ;;  %4693 = vmatmul.mubr.bf16.gmra.mxu1 %v8859_v43 }
 0xb04   :  { %4601 = vmatprep.mubr.bf16.mxu0 %v8863_v40  ;;  %4702 = vmatprep.mubr.bf16.mxu1 %v8869_v55 }
 0xb0b   :  { %4602 = vmatmul.mubr.bf16.gmra.mxu0 %v3513_v38  ;;  %4703 = vmatmul.mubr.bf16.gmra.mxu1 %v3515_v58 }
 0xb58   :  { %v4341_v26 = vpop.f32.mrf.mxu0  ;;  %v4442_v53 = vpop.f32.mrf.mxu1 }
 0xb59   :  { %v4342_v51 = vadd.f32 %v4341_v26, %v8959_v17 }
 0xb5a   :  { %v4343_v22 = vpop.f32.mrf.mxu0  ;;  %v4444_v20 = vpop.f32.mrf.mxu1 }
 0xb5b   :  { %v4443_v23 = vadd.f32 %v4442_v53, %v4342_v51  ;;  %v4344_v59 = vadd.f32 %v4343_v22, %v8963_v3 }
 0xb5c   :  { %v4345_v18 = vpop.f32.mrf.mxu0  ;;  %v4446_v57 = vpop.f32.mrf.mxu1 }
 0xb5d   :  { %4711 = vst [vmem:[%s9191_s10] sm:$0xff] %v4443_v23  ;;  %v4445_v12 = vadd.f32 %v4444_v20, %v4344_v59  ;;  %v4346_v19 = vadd.f32 %v4345_v18, %v8959_v17 }
 0xb5e   :  { %v4347_v14 = vpop.f32.mrf.mxu0  ;;  %v4448_v33 = vpop.f32.mrf.mxu1 }
 0xb5f   :  { %4712 = vst [vmem:[%s9191_s10 + $0x8] sm:$0xff] %v4445_v12  ;;  %v4447_v49 = vadd.f32 %v4446_v57, %v4346_v19  ;;  %v4348_v10 = vadd.f32 %v4347_v14, %v8963_v3 }
 0xb61   :  { %4715 = vst [vmem:[%s9191_s10 + $0x20] sm:$0xff] %v4447_v49  ;;  %v4449_v30 = vadd.f32 %v4448_v33, %v4348_v10  ;;  %v4351_v36 = vpop.f32.mrf.mxu0 }
 0xb62   :  { %v4352_v21 = vadd.f32 %v4351_v36, %v8959_v17  ;;  %v4452_v15 = vpop.f32.mrf.mxu1 }
 0xb63   :  { %4716 = vst [vmem:[%s9191_s10 + $0x28] sm:$0xff] %v4449_v30  ;;  %v4353_v0 = vpop.f32.mrf.mxu0 }
 0xb64   :  { %v4453_v47 = vadd.f32 %v4452_v15, %v4352_v21  ;;  %v4354_v39 = vadd.f32 %v4353_v0, %v8963_v3  ;;  %v4454_v32 = vpop.f32.mrf.mxu1 }
 0xb65   :  { %v4355_v27 = vpop.f32.mrf.mxu0 }
 0xb66   :  { %4719 = vst [vmem:[%s9191_s10 + $0x40] sm:$0xff] %v4453_v47  ;;  %v4455_v11 = vadd.f32 %v4454_v32, %v4354_v39  ;;  %v4356_v41 = vadd.f32 %v4355_v27, %v8959_v17  ;;  %v4456_v9 = vpop.f32.mrf.mxu1 }
 0xb67   :  { %v4357_v44 = vpop.f32.mrf.mxu0 }
 0xb68   :  { %4720 = vst [vmem:[%s9191_s10 + $0x48] sm:$0xff] %v4455_v11  ;;  %v4457_v24 = vadd.f32 %v4456_v9, %v4356_v41  ;;  %v4358_v25 = vadd.f32 %v4357_v44, %v8963_v3  ;;  %v4458_v56 = vpop.f32.mrf.mxu1 }
 0xb6a   :  { %4723 = vst [vmem:[%s9191_s10 + $0x60] sm:$0xff] %v4457_v24  ;;  %v4459_v43 = vadd.f32 %v4458_v56, %v4358_v25  ;;  %v4361_v8 = vpop.f32.mrf.mxu0 }
 0xb6b   :  { %v4362_v28 = vadd.f32 %v4361_v8, %v8959_v17 }
 0xb6c   :  { %4724 = vst [vmem:[%s9191_s10 + $0x68] sm:$0xff] %v4459_v43  ;;  %v4462_v40 = vpop.f32.mrf.mxu1  ;;  %v4363_v61 = vpop.f32.mrf.mxu0 }
 0xb6d   :  { %v4463_v63 = vadd.f32 %v4462_v40, %v4362_v28  ;;  %v4364_v55 = vadd.f32 %v4363_v61, %v8963_v3 }
 0xb6e   :  { %v4464_v42 = vpop.f32.mrf.mxu1  ;;  %v4365_v62 = vpop.f32.mrf.mxu0 }
 0xb6f   :  { %4727 = vst [vmem:[%s9191_s10 + $0x80] sm:$0xff] %v4463_v63  ;;  %v4465_v52 = vadd.f32 %v4464_v42, %v4364_v55  ;;  %v4366_v31 = vadd.f32 %v4365_v62, %v8959_v17 }
 0xb70   :  { %v4466_v37 = vpop.f32.mrf.mxu1  ;;  %v4367_v1 = vpop.f32.mrf.mxu0 }
 0xb71   :  { %4728 = vst [vmem:[%s9191_s10 + $0x88] sm:$0xff] %v4465_v52  ;;  %v4467_v7 = vadd.f32 %v4466_v37, %v4366_v31  ;;  %v4368_v13 = vadd.f32 %v4367_v1, %v8963_v3 }
 0xb72   :  { %v4468_v54 = vpop.f32.mrf.mxu1 }
 0xb73   :  { %4731 = vst [vmem:[%s9191_s10 + $0xa0] sm:$0xff] %v4467_v7  ;;  %v4469_v38 = vadd.f32 %v4468_v54, %v4368_v13  ;;  %v9462_v54 = vld [vmem:[#allocation8_spill] sm:$0xff] }
 0xb74   :  { %v4371_v45 = vpop.f32.mrf.mxu0 }
 0xb75   :  { %4732 = vst [vmem:[%s9191_s10 + $0xa8] sm:$0xff] %v4469_v38  ;;  %v4472_v58 = vpop.f32.mrf.mxu1  ;;  %v4372_v50 = vadd.f32 %v4371_v45, %v8959_v17  ;;  %v9071_v38 = vrot.slane %v8955_v16, %v9462_v54  ;;  %v9463_v45 = vld [vmem:[#allocation5_spill] sm:$0xff] }
 0xb76   :  { %v4373_v35 = vpop.f32.mrf.mxu0 }
 0xb77   :  { %v4474_v46 = vpop.f32.mrf.mxu1  ;;  %v4473_v48 = vadd.f32 %v4472_v58, %v4372_v50  ;;  %v4374_v6 = vadd.f32 %v4373_v35, %v8963_v3 }
 0xb78   :  { %v4375_v2 = vpop.f32.mrf.mxu0 }
 0xb79   :  { %v4476_v34 = vpop.f32.mrf.mxu1  ;;  %4735 = vst [vmem:[%s9191_s10 + $0xc0] sm:$0xff] %v4473_v48  ;;  %v4475_v5 = vadd.f32 %v4474_v46, %v4374_v6  ;;  %v4376_v29 = vadd.f32 %v4375_v2, %v8959_v17 }
 0xb7a   :  { %v4377_v60 = vpop.f32.mrf.mxu0 }
 0xb7b   :  { %v4478_v4 = vpop.f32.mrf.mxu1  ;;  %4736 = vst [vmem:[%s9191_s10 + $0xc8] sm:$0xff] %v4475_v5  ;;  %v4477_v26 = vadd.f32 %v4476_v34, %v4376_v29  ;;  %v4378_v53 = vadd.f32 %v4377_v60, %v8963_v3 }
 0xb7d   :  { %4739 = vst [vmem:[%s9191_s10 + $0xe0] sm:$0xff] %v4477_v26  ;;  %v4479_v51 = vadd.f32 %v4478_v4, %v4378_v53  ;;  %v4381_v22 = vpop.f32.mrf.mxu0 }
 0xb7e   :  { %v4382_v20 = vadd.f32 %v4381_v22, %v8959_v17  ;;  %v4482_v23 = vpop.f32.mrf.mxu1 }
 0xb7f   :  { %4740 = vst [vmem:[%s9191_s10 + $0xe8] sm:$0xff] %v4479_v51  ;;  %v4383_v59 = vpop.f32.mrf.mxu0 }
 0xb80   :  { %v4483_v18 = vadd.f32 %v4482_v23, %v4382_v20  ;;  %v4384_v57 = vadd.f32 %v4383_v59, %v8963_v3  ;;  %v4484_v12 = vpop.f32.mrf.mxu1 }
 0xb81   :  { %v4385_v19 = vpop.f32.mrf.mxu0 }
 0xb82   :  { %4743 = vst [vmem:[%s9191_s10 + $0x100] sm:$0xff] %v4483_v18  ;;  %v4485_v14 = vadd.f32 %v4484_v12, %v4384_v57  ;;  %v4386_v33 = vadd.f32 %v4385_v19, %v8959_v17  ;;  %v4486_v49 = vpop.f32.mrf.mxu1 }
 0xb83   :  { %v4387_v10 = vpop.f32.mrf.mxu0 }
 0xb84   :  { %4744 = vst [vmem:[%s9191_s10 + $0x108] sm:$0xff] %v4485_v14  ;;  %v4487_v30 = vadd.f32 %v4486_v49, %v4386_v33  ;;  %v4388_v36 = vadd.f32 %v4387_v10, %v8963_v3  ;;  %v4488_v21 = vpop.f32.mrf.mxu1 }
 0xb86   :  { %v4391_v15 = vpop.f32.mrf.mxu0  ;;  %4747 = vst [vmem:[%s9191_s10 + $0x120] sm:$0xff] %v4487_v30  ;;  %v4489_v0 = vadd.f32 %v4488_v21, %v4388_v36  ;;  %v4492_v39 = vpop.f32.mrf.mxu1 }
 0xb87   :  { %v4392_v47 = vadd.f32 %v4391_v15, %v8959_v17 }
 0xb88   :  { %v4393_v32 = vpop.f32.mrf.mxu0  ;;  %4748 = vst [vmem:[%s9191_s10 + $0x128] sm:$0xff] %v4489_v0  ;;  %v4494_v41 = vpop.f32.mrf.mxu1 }
 0xb89   :  { %v4493_v27 = vadd.f32 %v4492_v39, %v4392_v47  ;;  %v4394_v11 = vadd.f32 %v4393_v32, %v8963_v3 }
 0xb8a   :  { %v4395_v9 = vpop.f32.mrf.mxu0  ;;  %v4496_v25 = vpop.f32.mrf.mxu1 }
 0xb8b   :  { %4751 = vst [vmem:[%s9191_s10 + $0x140] sm:$0xff] %v4493_v27  ;;  %v4495_v44 = vadd.f32 %v4494_v41, %v4394_v11  ;;  %v4396_v24 = vadd.f32 %v4395_v9, %v8959_v17 }
 0xb8c   :  { %v4397_v56 = vpop.f32.mrf.mxu0  ;;  %v4498_v28 = vpop.f32.mrf.mxu1 }
 0xb8d   :  { %4752 = vst [vmem:[%s9191_s10 + $0x148] sm:$0xff] %v4495_v44  ;;  %v4497_v43 = vadd.f32 %v4496_v25, %v4396_v24  ;;  %v4398_v8 = vadd.f32 %v4397_v56, %v8963_v3 }
 0xb8e   :  { %v4401_v40 = vpop.f32.mrf.mxu0  ;;  %v4502_v55 = vpop.f32.mrf.mxu1 }
 0xb8f   :  { %4755 = vst [vmem:[%s9191_s10 + $0x160] sm:$0xff] %v4497_v43  ;;  %v4499_v61 = vadd.f32 %v4498_v28, %v4398_v8  ;;  %v4402_v63 = vadd.f32 %v4401_v40, %v8959_v17 }
 0xb90   :  { %v4403_v42 = vpop.f32.mrf.mxu0  ;;  %v4504_v31 = vpop.f32.mrf.mxu1 }
 0xb91   :  { %4756 = vst [vmem:[%s9191_s10 + $0x168] sm:$0xff] %v4499_v61  ;;  %v4503_v62 = vadd.f32 %v4502_v55, %v4402_v63  ;;  %v4404_v52 = vadd.f32 %v4403_v42, %v8963_v3  ;;  %v9075_v3 = vrot.slane %v8955_v16, %v9463_v45 }
 0xb92   :  { %v4405_v37 = vpop.f32.mrf.mxu0  ;;  %v4506_v7 = vpop.f32.mrf.mxu1 }
 0xb93   :  { %4759 = vst [vmem:[%s9191_s10 + $0x180] sm:$0x3] %v4503_v62  ;;  %v4505_v1 = vadd.f32 %v4504_v31, %v4404_v52 }
 0xb94   :  { %v4406_v13 = vpop.f32.mrf.mxu0  ;;  %v4507_v17 = vpop.f32.mrf.mxu1 }
 0xb95   :  { %4760 = vst [vmem:[%s9191_s10 + $0x188] sm:$0x3] %v4505_v1 }
 0xb9b   :  { %v4543_v58 = vpop.f32.mrf.mxu0  ;;  %v4644_v35 = vpop.f32.mrf.mxu1 }
 0xb9c   :  { %v4544_v50 = vadd.f32 %v4543_v58, %v9071_v38 }
 0xb9d   :  { %v4545_v46 = vpop.f32.mrf.mxu0  ;;  %v4646_v2 = vpop.f32.mrf.mxu1 }
 0xb9e   :  { %v4645_v48 = vadd.f32 %v4644_v35, %v4544_v50  ;;  %v4546_v6 = vadd.f32 %v4545_v46, %v9075_v3 }
 0xb9f   :  { %v4547_v34 = vpop.f32.mrf.mxu0  ;;  %v4648_v60 = vpop.f32.mrf.mxu1 }
 0xba0   :  { %4713 = vst [vmem:[%s9191_s10 + $0x10] sm:$0xff] %v4645_v48  ;;  %v4647_v5 = vadd.f32 %v4646_v2, %v4546_v6  ;;  %v4548_v29 = vadd.f32 %v4547_v34, %v9071_v38 }
 0xba1   :  { %v4549_v16 = vpop.f32.mrf.mxu0  ;;  %v4650_v53 = vpop.f32.mrf.mxu1 }
 0xba2   :  { %4714 = vst [vmem:[%s9191_s10 + $0x18] sm:$0xff] %v4647_v5  ;;  %v4649_v4 = vadd.f32 %v4648_v60, %v4548_v29  ;;  %v4550_v26 = vadd.f32 %v4549_v16, %v9075_v3 }
 0xba3   :  { %v4553_v51 = vpop.f32.mrf.mxu0  ;;  %v4654_v23 = vpop.f32.mrf.mxu1 }
 0xba4   :  { %4717 = vst [vmem:[%s9191_s10 + $0x30] sm:$0xff] %v4649_v4  ;;  %v4651_v22 = vadd.f32 %v4650_v53, %v4550_v26  ;;  %v4554_v20 = vadd.f32 %v4553_v51, %v9071_v38 }
 0xba5   :  { %v4555_v59 = vpop.f32.mrf.mxu0  ;;  %v4656_v12 = vpop.f32.mrf.mxu1 }
 0xba6   :  { %4718 = vst [vmem:[%s9191_s10 + $0x38] sm:$0xff] %v4651_v22  ;;  %v4655_v18 = vadd.f32 %v4654_v23, %v4554_v20  ;;  %v4556_v57 = vadd.f32 %v4555_v59, %v9075_v3 }
 0xba7   :  { %v4557_v19 = vpop.f32.mrf.mxu0  ;;  %v4658_v49 = vpop.f32.mrf.mxu1 }
 0xba8   :  { %4721 = vst [vmem:[%s9191_s10 + $0x50] sm:$0xff] %v4655_v18  ;;  %v4657_v14 = vadd.f32 %v4656_v12, %v4556_v57  ;;  %v4558_v33 = vadd.f32 %v4557_v19, %v9071_v38 }
 0xba9   :  { %v4559_v10 = vpop.f32.mrf.mxu0  ;;  %v4660_v21 = vpop.f32.mrf.mxu1 }
 0xbaa   :  { %4722 = vst [vmem:[%s9191_s10 + $0x58] sm:$0xff] %v4657_v14  ;;  %v4659_v30 = vadd.f32 %v4658_v49, %v4558_v33  ;;  %v4560_v36 = vadd.f32 %v4559_v10, %v9075_v3 }
 0xbab   :  { %v4563_v15 = vpop.f32.mrf.mxu0  ;;  %v4664_v39 = vpop.f32.mrf.mxu1 }
 0xbac   :  { %4725 = vst [vmem:[%s9191_s10 + $0x70] sm:$0xff] %v4659_v30  ;;  %v4661_v0 = vadd.f32 %v4660_v21, %v4560_v36  ;;  %v4564_v47 = vadd.f32 %v4563_v15, %v9071_v38 }
 0xbad   :  { %v4565_v32 = vpop.f32.mrf.mxu0  ;;  %v4666_v41 = vpop.f32.mrf.mxu1 }
 0xbae   :  { %4726 = vst [vmem:[%s9191_s10 + $0x78] sm:$0xff] %v4661_v0  ;;  %v4665_v27 = vadd.f32 %v4664_v39, %v4564_v47  ;;  %v4566_v11 = vadd.f32 %v4565_v32, %v9075_v3 }
 0xbaf   :  { %v4567_v9 = vpop.f32.mrf.mxu0  ;;  %v4668_v25 = vpop.f32.mrf.mxu1 }
 0xbb0   :  { %4729 = vst [vmem:[%s9191_s10 + $0x90] sm:$0xff] %v4665_v27  ;;  %v4667_v44 = vadd.f32 %v4666_v41, %v4566_v11  ;;  %v4568_v24 = vadd.f32 %v4567_v9, %v9071_v38 }
 0xbb1   :  { %v4569_v56 = vpop.f32.mrf.mxu0  ;;  %v4670_v28 = vpop.f32.mrf.mxu1 }
 0xbb2   :  { %4730 = vst [vmem:[%s9191_s10 + $0x98] sm:$0xff] %v4667_v44  ;;  %v4669_v43 = vadd.f32 %v4668_v25, %v4568_v24  ;;  %v4570_v8 = vadd.f32 %v4569_v56, %v9075_v3 }
 0xbb3   :  { %v4573_v40 = vpop.f32.mrf.mxu0  ;;  %v4674_v55 = vpop.f32.mrf.mxu1 }
 0xbb4   :  { %4733 = vst [vmem:[%s9191_s10 + $0xb0] sm:$0xff] %v4669_v43  ;;  %v4671_v61 = vadd.f32 %v4670_v28, %v4570_v8  ;;  %v4574_v63 = vadd.f32 %v4573_v40, %v9071_v38 }
 0xbb5   :  { %v4575_v42 = vpop.f32.mrf.mxu0  ;;  %v4676_v31 = vpop.f32.mrf.mxu1 }
 0xbb6   :  { %4734 = vst [vmem:[%s9191_s10 + $0xb8] sm:$0xff] %v4671_v61  ;;  %v4675_v62 = vadd.f32 %v4674_v55, %v4574_v63  ;;  %v4576_v52 = vadd.f32 %v4575_v42, %v9075_v3 }
 0xbb7   :  { %v4577_v37 = vpop.f32.mrf.mxu0  ;;  %v4678_v13 = vpop.f32.mrf.mxu1 }
 0xbb8   :  { %4737 = vst [vmem:[%s9191_s10 + $0xd0] sm:$0xff] %v4675_v62  ;;  %v4677_v1 = vadd.f32 %v4676_v31, %v4576_v52  ;;  %v4578_v7 = vadd.f32 %v4577_v37, %v9071_v38 }
 0xbb9   :  { %v4579_v17 = vpop.f32.mrf.mxu0  ;;  %v4680_v58 = vpop.f32.mrf.mxu1 }
 0xbba   :  { %4738 = vst [vmem:[%s9191_s10 + $0xd8] sm:$0xff] %v4677_v1  ;;  %v4679_v54 = vadd.f32 %v4678_v13, %v4578_v7  ;;  %v4580_v45 = vadd.f32 %v4579_v17, %v9075_v3 }
 0xbbb   :  { %v4583_v50 = vpop.f32.mrf.mxu0  ;;  %v4684_v48 = vpop.f32.mrf.mxu1 }
 0xbbc   :  { %4741 = vst [vmem:[%s9191_s10 + $0xf0] sm:$0xff] %v4679_v54  ;;  %v4681_v35 = vadd.f32 %v4680_v58, %v4580_v45  ;;  %v4584_v46 = vadd.f32 %v4583_v50, %v9071_v38 }
 0xbbd   :  { %v4585_v6 = vpop.f32.mrf.mxu0  ;;  %v4686_v5 = vpop.f32.mrf.mxu1 }
 0xbbe   :  { %4742 = vst [vmem:[%s9191_s10 + $0xf8] sm:$0xff] %v4681_v35  ;;  %v4685_v2 = vadd.f32 %v4684_v48, %v4584_v46  ;;  %v4586_v34 = vadd.f32 %v4585_v6, %v9075_v3 }
 0xbbf   :  { %v4587_v29 = vpop.f32.mrf.mxu0  ;;  %v4688_v4 = vpop.f32.mrf.mxu1 }
 0xbc0   :  { %4745 = vst [vmem:[%s9191_s10 + $0x110] sm:$0xff] %v4685_v2  ;;  %v4687_v60 = vadd.f32 %v4686_v5, %v4586_v34  ;;  %v4588_v16 = vadd.f32 %v4587_v29, %v9071_v38 }
 0xbc1   :  { %v4589_v26 = vpop.f32.mrf.mxu0  ;;  %v4690_v22 = vpop.f32.mrf.mxu1 }
 0xbc2   :  { %4746 = vst [vmem:[%s9191_s10 + $0x118] sm:$0xff] %v4687_v60  ;;  %v4689_v53 = vadd.f32 %v4688_v4, %v4588_v16  ;;  %v4590_v51 = vadd.f32 %v4589_v26, %v9075_v3 }
 0xbc3   :  { %v4593_v20 = vpop.f32.mrf.mxu0  ;;  %v4694_v18 = vpop.f32.mrf.mxu1 }
 0xbc4   :  { %4749 = vst [vmem:[%s9191_s10 + $0x130] sm:$0xff] %v4689_v53  ;;  %v4691_v23 = vadd.f32 %v4690_v22, %v4590_v51  ;;  %v4594_v59 = vadd.f32 %v4593_v20, %v9071_v38 }
 0xbc5   :  { %v4595_v57 = vpop.f32.mrf.mxu0  ;;  %v4696_v14 = vpop.f32.mrf.mxu1 }
 0xbc6   :  { %4750 = vst [vmem:[%s9191_s10 + $0x138] sm:$0xff] %v4691_v23  ;;  %v4695_v12 = vadd.f32 %v4694_v18, %v4594_v59  ;;  %v4596_v19 = vadd.f32 %v4595_v57, %v9075_v3 }
 0xbc7   :  { %v4597_v33 = vpop.f32.mrf.mxu0  ;;  %v4698_v30 = vpop.f32.mrf.mxu1 }
 0xbc8   :  { %4753 = vst [vmem:[%s9191_s10 + $0x150] sm:$0xff] %v4695_v12  ;;  %v4697_v49 = vadd.f32 %v4696_v14, %v4596_v19  ;;  %v4598_v10 = vadd.f32 %v4597_v33, %v9071_v38 }
 0xbc9   :  { %v4599_v36 = vpop.f32.mrf.mxu0  ;;  %v4700_v0 = vpop.f32.mrf.mxu1 }
 0xbca   :  { %4754 = vst [vmem:[%s9191_s10 + $0x158] sm:$0xff] %v4697_v49  ;;  %v4699_v21 = vadd.f32 %v4698_v30, %v4598_v10  ;;  %v4600_v15 = vadd.f32 %v4599_v36, %v9075_v3 }
 0xbcb   :  { %v4603_v47 = vpop.f32.mrf.mxu0  ;;  %v4704_v27 = vpop.f32.mrf.mxu1 }
 0xbcc   :  { %4757 = vst [vmem:[%s9191_s10 + $0x170] sm:$0xff] %v4699_v21  ;;  %v4701_v39 = vadd.f32 %v4700_v0, %v4600_v15  ;;  %v4604_v32 = vadd.f32 %v4603_v47, %v9071_v38 }
 0xbcd   :  { %v4605_v11 = vpop.f32.mrf.mxu0  ;;  %v4706_v44 = vpop.f32.mrf.mxu1 }
 0xbce   :  { %4758 = vst [vmem:[%s9191_s10 + $0x178] sm:$0xff] %v4701_v39  ;;  %v4705_v41 = vadd.f32 %v4704_v27, %v4604_v32  ;;  %v4606_v9 = vadd.f32 %v4605_v11, %v9075_v3 }
 0xbcf   :  { %v4607_v24 = vpop.f32.mrf.mxu0  ;;  %v4708_v56 = vpop.f32.mrf.mxu1 }
 0xbd0   :  { %4761 = vst [vmem:[%s9191_s10 + $0x190] sm:$0x3] %v4705_v41  ;;  %v4707_v25 = vadd.f32 %v4706_v44, %v4606_v9 }
 0xbd1   :  { %v4608_v43 = vpop.f32.mrf.mxu0  ;;  %v4709_v38 = vpop.f32.mrf.mxu1 }
 0xbd2   :  { %4762 = vst [vmem:[%s9191_s10 + $0x198] sm:$0x3] %v4707_v25 }

// kernel: brain_network2_forward.2
= control target key start
LH: loop header
LB: loop body
LE: loop exit
PB: predicated region body
PF: predicated region fallthrough
CT: control target
= control target key end

     0   :  { %s13113_s0 = inlined_call_operand.vmem [shape: f32[4,128], index: 0, kind: input, shape index: {}]   ;;  %s13114_s1 = inlined_call_operand.vmem [shape: f32[4,128], index: 1, kind: input, shape index: {}]   ;;  %s13115_s2 = inlined_call_operand.vmem [shape: f32[4,1,128], index: 2, kind: input, shape index: {}]   ;;  %s13116_s3 = inlined_call_operand.vmem [shape: f32[4,1,128], index: 3, kind: input, shape index: {}]   ;;  %s13117_s4 = inlined_call_operand.vmem [shape: bf16[4,128,128], index: 4, kind: input, shape index: {}]   ;;  %s13118_s5 = inlined_call_operand.vmem [shape: f32[4,1,128], index: 5, kind: input, shape index: {}]   ;;  %s13119_s6 = inlined_call_operand.vmem [shape: bf16[4,128,128], index: 6, kind: input, shape index: {}]   ;;  %s13120_s7 = inlined_call_operand.vmem [shape: f32[4,1,128], index: 7, kind: input, shape index: {}]   ;;  %s13121_s8 = inlined_call_operand.vmem [shape: f32[4,2,1], index: 8, kind: input, shape index: {}]   ;;  %s13122_s9 = inlined_call_operand.vmem [shape: f32[4,2,1], index: 9, kind: input, shape index: {}]   ;;  %s13123_s10 = inlined_call_operand.vmem [shape: f32[4,2,2], index: 10, kind: input, shape index: {}]   ;;  %s13124_s11 = inlined_call_operand.vmem [shape: f32[4,2,1], index: 11, kind: input, shape index: {}]   ;;  %s13125_s12 = inlined_call_operand.vmem [shape: f32[4,2,2], index: 12, kind: input, shape index: {}]   ;;  %s13126_s13 = inlined_call_operand.vmem [shape: f32[4,2,1], index: 13, kind: input, shape index: {}]   ;;  %s13127_s14 = inlined_call_operand.vmem [shape: bf16[2,128,128], index: 14, kind: input, shape index: {}]   ;;  %s13128_s15 = inlined_call_operand.vmem [shape: f32[1,128], index: 15, kind: input, shape index: {}]   ;;  %s13129_s16 = inlined_call_operand.vmem [shape: f32[3,1,128], index: 16, kind: input, shape index: {}]   ;;  %s13130_s17 = inlined_call_operand.vmem [shape: f32[3,1,128], index: 17, kind: input, shape index: {}]   ;;  %s13131_s18 = inlined_call_operand.vmem [shape: bf16[3,128,128], index: 18, kind: input, shape index: {}]   ;;  %s13132_s19 = inlined_call_operand.vmem [shape: f32[3,1,128], index: 19, kind: input, shape index: {}]   ;;  %s13133_s20 = inlined_call_operand.vmem [shape: bf16[2,128,3136], index: 20, kind: input, shape index: {}]   ;;  %s13134_s21 = inlined_call_operand.vmem [shape: f32[1,3136], index: 21, kind: input, shape index: {}]   ;;  %s13135_s22 = inlined_call_operand.vmem [shape: f32[1,3136], index: 22, kind: input, shape index: {}]   ;;  %s13136_s23 = inlined_call_operand.vmem [shape: f32[1,3136], index: 23, kind: input, shape index: {}]   ;;  %s13137_s24 = inlined_call_operand.hbm [shape: f32[2,128], index: 24, kind: output, shape index: {0}]   ;;  %s13138_s25 = inlined_call_operand.hbm [shape: f32[2,128], index: 25, kind: output, shape index: {1}]   ;;  %s13139_s26 = inlined_call_operand.vmem [shape: f32[2,3136], index: 26, kind: output, shape index: {2}]  }
   0x1   :  { %13152 = sst [smem:[#allocation9_spill]] %s13113_s0 }
   0x2   :  { %13153 = sst [smem:[#allocation10_spill]] %s13114_s1 }
   0x3   :  { %13154 = sst [smem:[#allocation11_spill]] %s13115_s2 }
   0x4   :  { %13155 = sst [smem:[#allocation12_spill]] %s13116_s3 }
   0x5   :  { %13156 = sst [smem:[#allocation13_spill]] %s13117_s4 }
   0x6   :  { %13157 = sst [smem:[#allocation14_spill]] %s13118_s5 }
   0x7   :  { %13158 = sst [smem:[#allocation15_spill]] %s13119_s6 }
   0x8   :  { %13159 = sst [smem:[#allocation16_spill]] %s13120_s7 }
   0x9   :  { %13160 = sst [smem:[#allocation17_spill]] %s13121_s8 }
   0xa   :  { %13161 = sst [smem:[#allocation18_spill]] %s13122_s9 }
   0xb   :  { %13162 = sst [smem:[#allocation19_spill]] %s13123_s10 }
   0xc   :  { %13163 = sst [smem:[#allocation20_spill]] %s13136_s23 }
   0xd   :  { %13164 = sst [smem:[#allocation21_spill]] %s13137_s24 }
   0xe   :  { %13165 = sst [smem:[#allocation22_spill]] %s13138_s25 }
   0xf   :  { %13166 = sst [smem:[#allocation23_spill]] %s13139_s26 }
  0x10   :  { %32 = vsyncpa [#allocation3], 0  ;;  %s13167_s7 = sld [smem:[#allocation9_spill]]  ;;  %vm88_vm0 = vcmask 1043456   ;;  %v10168_v6 = vmov 0.0   ;;  %vm10169_vm1 = vmmov 0  }
  0x11   :  { %s13168_s4 = sld [smem:[#allocation10_spill]]  ;;  %8978 = vmatprep.subr.bf16.mxu0 %v10168_v6  ;;  %8998 = vmatprep.subr.bf16.mxu1 %v10168_v6 }
  0x12   :  { %s13169_s9 = sld [smem:[#allocation13_spill]]  ;;  %8994 = vmatprep.mubr.msk.bf16.mxu0 %vm10169_vm1, %v10168_v6  ;;  %9014 = vmatprep.mubr.msk.bf16.mxu1 %vm10169_vm1, %v10168_v6 }
  0x16   :  { %v83_v0 = vld [vmem:[%s13167_s7] sm:$0xf] }
  0x17   :  { %v84_v1 = vld [vmem:[%s13168_s4] sm:$0xf] }
  0x18   :  { %v10315_v2 = vadd.f32 %v84_v1, %v83_v0  ;;  %v9366_v4 = vld [vmem:[%s13169_s9 + $0x38] sm:$0xff]   ;;  %v9367_v5 = vld [vmem:[%s13169_s9 + $0x30] sm:$0xff]   ;;  %v9368_v12 = vld [vmem:[%s13169_s9 + $0x28] sm:$0xff]  }
  0x19   :  { %8979 = vmatpush3.bf16.msra.mxu0 %v9366_v4  ;;  %v9369_v13 = vld [vmem:[%s13169_s9 + $0x20] sm:$0xff]   ;;  %v9370_v14 = vld [vmem:[%s13169_s9 + $0x18] sm:$0xff]   ;;  %v9371_v15 = vld [vmem:[%s13169_s9 + $0x10] sm:$0xff]  }
  0x1a   :  { %v89_v3 = vsel %vm88_vm0, %v10315_v2, 0.0  ;;  %8980 = vmatprep.subr.bf16.mxu0 %v10168_v6  ;;  %v9372_v16 = vld [vmem:[%s13169_s9 + $0x8] sm:$0xff]   ;;  %v9373_v17 = vld [vmem:[%s13169_s9] sm:$0xff]  }
  0x1b   :  { %90 = vadd.xlane.f32.xlu0 %v89_v3 }
  0x1d   :  { %8981 = vmatpush3.bf16.msra.mxu0 %v9367_v5 }
  0x1e   :  { %8982 = vmatprep.subr.bf16.mxu0 %v10168_v6 }
  0x21   :  { %8983 = vmatpush3.bf16.msra.mxu0 %v9368_v12 }
  0x22   :  { %8984 = vmatprep.subr.bf16.mxu0 %v10168_v6 }
  0x25   :  { %8985 = vmatpush3.bf16.msra.mxu0 %v9369_v13 }
  0x26   :  { %8986 = vmatprep.subr.bf16.mxu0 %v10168_v6 }
  0x29   :  { %8987 = vmatpush3.bf16.msra.mxu0 %v9370_v14 }
  0x2a   :  { %8988 = vmatprep.subr.bf16.mxu0 %v10168_v6 }
  0x2d   :  { %8989 = vmatpush3.bf16.msra.mxu0 %v9371_v15 }
  0x2e   :  { %8990 = vmatprep.subr.bf16.mxu0 %v10168_v6 }
  0x31   :  { %8991 = vmatpush3.bf16.msra.mxu0 %v9372_v16 }
  0x32   :  { %8992 = vmatprep.subr.bf16.mxu0 %v10168_v6 }
  0x35   :  { %8993 = vmatpush3.bf16.msra.mxu0 %v9373_v17 }
  0x36   :  { %9038 = vmatprep.subr.bf16.mxu0 %v10168_v6 }
  0xa4   :  { %v91_v7 = vpop.xlane.xlu0 %90 }
  0xa5   :  { %v93_v8 = vmul.f32 0.0078125, %v91_v7 }
  0xa7   :  { %v94_v9 = vsub.f32 %v10315_v2, %v93_v8 }
  0xa9   :  { %v95_v10 = vmul.f32 %v94_v9, %v94_v9 }
  0xab   :  { %v96_v11 = vsel %vm88_vm0, %v95_v10, 0.0 }
  0xac   :  { %97 = vadd.xlane.f32.xlu0 %v96_v11 }
  0xad   :  { %33 = vsyncpa [#allocation5], 0  ;;  %s13170_s5 = sld [smem:[#allocation11_spill]]  ;;  %v10170_v37 = vmov 0   ;;  %v354_v39 = vld [vmem:[%s13126_s13] sm:$0x3] }
  0xae   :  { %s13171_s1 = sld [smem:[#allocation12_spill]]  ;;  %9364 = vset.pattern.permute.xlu1 %v10170_v37  ;;  %9365 = vset.pattern.permute.xlu0 %v10170_v37  ;;  %v352_v56 = vld [vmem:[%s13124_s11] sm:$0x3]  ;;  %v7943_v58 = vld [vmem:[%s13124_s11 + $0x2] sm:$0x3]  ;;  %vm357_vm2 = vcmask 1041408  }
  0xaf   :  { %s13172_s7 = sld [smem:[#allocation15_spill]]  ;;  %v7945_v59 = vld [vmem:[%s13126_s13 + $0x2] sm:$0x3]  ;;  %vm397_vm3 = vcmask 15360   ;;  %vm2819_vm4 = vcmask 1040384   ;;  %vm7226_vm5 = vcmask 517120  }
  0xb0   :  { %s13173_s30 = sld [smem:[#allocation17_spill]] }
  0xb1   :  { %s13174_s6 = sld [smem:[#allocation18_spill]] }
  0xb2   :  { %s13175_s4 = sld [smem:[#allocation14_spill]] }
  0xb3   :  { %v7858_v22 = vld [vmem:[%s13170_s5] ss:$0 sm:$0xff]  ;;  %s13176_s29 = sld [smem:[#allocation16_spill]] }
  0xb4   :  { %v7859_v24 = vld [vmem:[%s13171_s1] ss:$0 sm:$0xff]  ;;  %s13177_s0 = sld [smem:[#allocation19_spill]] }
  0xb5   :  { %v9374_v28 = vld [vmem:[%s13172_s7 + $0x38] sm:$0xff]   ;;  %v9375_v29 = vld [vmem:[%s13172_s7 + $0x30] sm:$0xff]   ;;  %v9376_v30 = vld [vmem:[%s13172_s7 + $0x28] sm:$0xff]   ;;  %s13178_s8 = sld [smem:[#allocation20_spill]] }
  0xb6   :  { %8999 = vmatpush3.bf16.msra.mxu1 %v9374_v28  ;;  %v9377_v31 = vld [vmem:[%s13172_s7 + $0x20] sm:$0xff]   ;;  %v9378_v32 = vld [vmem:[%s13172_s7 + $0x18] sm:$0xff]   ;;  %v9379_v33 = vld [vmem:[%s13172_s7 + $0x10] sm:$0xff]  }
  0xb7   :  { %9000 = vmatprep.subr.bf16.mxu1 %v10168_v6  ;;  %v9380_v34 = vld [vmem:[%s13172_s7 + $0x8] sm:$0xff]   ;;  %v9381_v35 = vld [vmem:[%s13172_s7] sm:$0xff]  }
  0xb8   :  { %v355_v36 = vld [vmem:[%s13173_s30] sm:$0x3]  ;;  %v7946_v57 = vld [vmem:[%s13173_s30 + $0x2] sm:$0x3] }
  0xb9   :  { %382 = vperm.xlu1 %9364, %v355_v36   ;;  %v356_v38 = vld [vmem:[%s13174_s6] sm:$0x3] }
  0xba   :  { %9001 = vmatpush3.bf16.msra.mxu1 %v9375_v29  ;;  %v7860_v40 = vld [vmem:[%s13175_s4] ss:$0 sm:$0xff] }
  0xbb   :  { %9002 = vmatprep.subr.bf16.mxu1 %v10168_v6  ;;  %v7869_v60 = vld [vmem:[%s13176_s29] ss:$0 sm:$0xff] }
  0xbd   :  { %388 = vperm.xlu1 %9364, %v356_v38  }
  0xbe   :  { %9003 = vmatpush3.bf16.msra.mxu1 %v9376_v30  ;;  %v351_v30 = vld [vmem:[%s13177_s0] sm:$0x3] }
  0xbf   :  { %9004 = vmatprep.subr.bf16.mxu1 %v10168_v6 }
  0xc1   :  { %485 = vperm.xlu1 %9364, %v354_v39  }
  0xc2   :  { %9005 = vmatpush3.bf16.msra.mxu1 %v9377_v31  ;;  %394 = vperm.xlu0 %9365, %v352_v56  }
  0xc3   :  { %9006 = vmatprep.subr.bf16.mxu1 %v10168_v6 }
  0xc6   :  { %9007 = vmatpush3.bf16.msra.mxu1 %v9378_v32  ;;  %1066 = vperm.xlu0 %9365, %v7946_v57  }
  0xc7   :  { %9008 = vmatprep.subr.bf16.mxu1 %v10168_v6 }
  0xca   :  { %9009 = vmatpush3.bf16.msra.mxu1 %v9379_v33  ;;  %1078 = vperm.xlu0 %9365, %v7943_v58  }
  0xcb   :  { %9010 = vmatprep.subr.bf16.mxu1 %v10168_v6 }
  0xce   :  { %9011 = vmatpush3.bf16.msra.mxu1 %v9380_v34  ;;  %1168 = vperm.xlu0 %9365, %v7945_v59  }
  0xcf   :  { %9012 = vmatprep.subr.bf16.mxu1 %v10168_v6 }
  0xd2   :  { %9013 = vmatpush3.bf16.msra.mxu1 %v9381_v35 }
  0xd3   :  { %9018 = vmatprep.subr.mxu1 %v10168_v6 }
 0x135   :  { %v98_v18 = vpop.xlane.xlu0 %97 }
 0x136   :  { %v99_v19 = vmul.f32 0.0078125, %v98_v18 }
 0x138   :  { %v100_v20 = vadd.f32 1e-05, %v99_v19 }
 0x13a   :  { %10062 = vrsqrt.f32 %v100_v20 }
 0x147   :  { %v10063_v21 = vpop.eup %10062 }
 0x148   :  { %v102_v23 = vmul.f32 %v10063_v21, %v94_v9 }
 0x14a   :  { %v109_v25 = vmul.f32 %v7858_v22, %v102_v23 }
 0x14c   :  { %v116_v26 = vadd.f32 %v7859_v24, %v109_v25  ;;  %v383_v24 = vpop.permute.xlu1 %382 }
 0x14e   :  { %v117_v27 = vpack.c.bf16 %v116_v26, %v116_v26 }
 0x150   :  { %8995 = vmatmul.mubr.bf16.vlgmr.msra.gmra.mxu0 %v117_v27  ;;  %v389_v28 = vpop.permute.xlu1 %388 }
 0x151   :  { %9054 = vmatprep.mubr.msk.bf16.mxu0 %vm10169_vm1, %v10168_v6 }
 0x210   :  { %v223_v41 = vpop.f32.mrf.mxu0 }
 0x211   :  { %v224_v42 = vadd.f32 %v7860_v40, %v223_v41 }
 0x212   :  { %v8996_v43 = vpop.f32.mrf.mxu0 }
 0x213   :  { %v230_v44 = vmul.f32 0.044715, %v224_v42  ;;  %v229_v52 = vmul.f32 0.5, %v224_v42 }
 0x214   :  { %v226_v45 = vpop.f32.mrf.mxu0 }
 0x215   :  { %v231_v46 = vmul.f32 %v230_v44, %v224_v42 }
 0x216   :  { %v8997_v47 = vpop.f32.mrf.mxu0 }
 0x217   :  { %v232_v48 = vmul.f32 %v231_v46, %v224_v42 }
 0x219   :  { %v233_v49 = vadd.f32 %v232_v48, %v224_v42 }
 0x21b   :  { %v234_v50 = vmul.f32 0.7978846, %v233_v49 }
 0x21d   :  { %10064 = vtanh.f32 %v234_v50 }
 0x22a   :  { %v10065_v51 = vpop.eup %10064 }
 0x22b   :  { %v236_v53 = vadd.f32 1.0, %v10065_v51 }
 0x22d   :  { %v237_v54 = vmul.f32 %v236_v53, %v229_v52  ;;  %v395_v53 = vpop.permute.xlu0 %394 }
 0x22f   :  { %v238_v55 = vpack.c.bf16 %v237_v54, %v237_v54 }
 0x231   :  { %9015 = vmatmul.mubr.bf16.vlgmr.msra.gmra.mxu1 %v238_v55 }
 0x232   :  { %9020 = vmatprep.mubr.msk.f32.mxu1 %vm10169_vm1, %v10168_v6 }
 0x2f1   :  { %v344_v61 = vpop.f32.mrf.mxu1 }
 0x2f2   :  { %v345_v62 = vadd.f32 %v7869_v60, %v344_v61 }
 0x2f3   :  { %v9016_v63 = vpop.f32.mrf.mxu1 }
 0x2f4   :  { %v10431_v0 = vadd.f32 %v345_v62, %v10315_v2 }
 0x2f5   :  { %v347_v1 = vpop.f32.mrf.mxu1 }
 0x2f6   :  { %v358_v3 = vsel %vm357_vm2, %v10431_v0, 0.0  ;;  %v566_v31 = vrot.slane %v10431_v0, 2  ;;  %v592_v1 = vrot.slane %v383_v24, 6 }
 0x2f7   :  { %v9017_v4 = vpop.f32.mrf.mxu1  ;;  %v359_v5 = vrot.slane %v358_v3, 4 }
 0x2f8   :  { %v568_v32 = vsel %vm357_vm2, %v566_v31, 0.0  ;;  %v595_v4 = vrot.slane %v389_v28, 6 }
 0x2f9   :  { %v360_v7 = vadd.f32 %v359_v5, %v358_v3  ;;  %v569_v33 = vrot.slane %v568_v32, 4 }
 0x2fb   :  { %v361_v8 = vrot.slane %v360_v7, 2  ;;  %v570_v34 = vadd.f32 %v569_v33, %v568_v32 }
 0x2fd   :  { %v362_v9 = vadd.f32 %v361_v8, %v360_v7  ;;  %v571_v35 = vrot.slane %v570_v34, 2 }
 0x2ff   :  { %v363_v10 = vrot.slane %v362_v9, 1  ;;  %v572_v36 = vadd.f32 %v571_v35, %v570_v34 }
 0x301   :  { %v364_v11 = vadd.f32 %v363_v10, %v362_v9  ;;  %v573_v38 = vrot.slane %v572_v36, 1 }
 0x303   :  { %v366_v12 = vmul.f32 0.5, %v364_v11  ;;  %v574_v39 = vadd.f32 %v573_v38, %v572_v36  ;;  %v353_v11 = vld [vmem:[%s13125_s12] sm:$0x3] }
 0x305   :  { %v367_v13 = vsub.f32 %v10431_v0, %v366_v12  ;;  %v575_v40 = vmul.f32 0.5, %v574_v39  ;;  %v9382_v39 = vld [vmem:[%s13169_s9 + $0x78] sm:$0xff]  }
 0x306   :  { %9039 = vmatpush3.bf16.msra.mxu0 %v9382_v39 }
 0x307   :  { %v368_v14 = vmul.f32 %v367_v13, %v367_v13  ;;  %v576_v41 = vsub.f32 %v10431_v0, %v575_v40  ;;  %v9383_v40 = vld [vmem:[%s13169_s9 + $0x70] sm:$0xff]   ;;  %9040 = vmatprep.subr.bf16.mxu0 %v10168_v6 }
 0x309   :  { %v369_v15 = vsel %vm357_vm2, %v368_v14, 0.0  ;;  %v577_v42 = vmul.f32 %v576_v41, %v576_v41 }
 0x30a   :  { %v370_v16 = vrot.slane %v369_v15, 4  ;;  %9041 = vmatpush3.bf16.msra.mxu0 %v9383_v40 }
 0x30b   :  { %v579_v43 = vrot.slane %v577_v42, 2  ;;  %9042 = vmatprep.subr.bf16.mxu0 %v10168_v6 }
 0x30c   :  { %v371_v17 = vadd.f32 %v370_v16, %v369_v15 }
 0x30d   :  { %v581_v44 = vsel %vm357_vm2, %v579_v43, 0.0 }
 0x30e   :  { %v372_v18 = vrot.slane %v371_v17, 2  ;;  %v582_v45 = vrot.slane %v581_v44, 4 }
 0x310   :  { %v373_v19 = vadd.f32 %v372_v18, %v371_v17  ;;  %v583_v46 = vadd.f32 %v582_v45, %v581_v44  ;;  %v9384_v45 = vld [vmem:[%s13169_s9 + $0x68] sm:$0xff]  }
 0x311   :  { %9043 = vmatpush3.bf16.msra.mxu0 %v9384_v45 }
 0x312   :  { %v374_v20 = vrot.slane %v373_v19, 1  ;;  %v584_v47 = vrot.slane %v583_v46, 2  ;;  %9044 = vmatprep.subr.bf16.mxu0 %v10168_v6 }
 0x314   :  { %v375_v21 = vadd.f32 %v374_v20, %v373_v19  ;;  %v585_v48 = vadd.f32 %v584_v47, %v583_v46  ;;  %v7947_v46 = vld [vmem:[%s13174_s6 + $0x2] sm:$0x3] }
 0x315   :  { %v9385_v47 = vld [vmem:[%s13169_s9 + $0x60] sm:$0xff]  }
 0x316   :  { %v376_v22 = vmul.f32 0.5, %v375_v21  ;;  %v586_v49 = vrot.slane %v585_v48, 1  ;;  %9045 = vmatpush3.bf16.msra.mxu0 %v9385_v47 }
 0x317   :  { %9046 = vmatprep.subr.bf16.mxu0 %v10168_v6 }
 0x318   :  { %v377_v23 = vadd.f32 1e-05, %v376_v22  ;;  %v587_v50 = vadd.f32 %v586_v49, %v585_v48  ;;  %v9386_v48 = vld [vmem:[%s13169_s9 + $0x58] sm:$0xff]   ;;  %v9387_v49 = vld [vmem:[%s13169_s9 + $0x50] sm:$0xff]  }
 0x31a   :  { %10066 = vrsqrt.f32 %v377_v23  ;;  %v588_v51 = vmul.f32 0.5, %v587_v50  ;;  %9047 = vmatpush3.bf16.msra.mxu0 %v9386_v48  ;;  %v9388_v50 = vld [vmem:[%s13169_s9 + $0x48] sm:$0xff]  }
 0x31b   :  { %9048 = vmatprep.subr.bf16.mxu0 %v10168_v6 }
 0x31c   :  { %v589_v52 = vadd.f32 1e-05, %v588_v51  ;;  %v9389_v51 = vld [vmem:[%s13169_s9 + $0x40] sm:$0xff]  }
 0x31e   :  { %10068 = vrsqrt.f32 %v589_v52  ;;  %9049 = vmatpush3.bf16.msra.mxu0 %v9387_v49 }
 0x31f   :  { %9050 = vmatprep.subr.bf16.mxu0 %v10168_v6 }
 0x322   :  { %9051 = vmatpush3.bf16.msra.mxu0 %v9388_v50 }
 0x323   :  { %9052 = vmatprep.subr.bf16.mxu0 %v10168_v6 }
 0x326   :  { %9053 = vmatpush3.bf16.msra.mxu0 %v9389_v51 }
 0x327   :  { %v10067_v25 = vpop.eup %10066  ;;  %9088 = vmatprep.subr.mxu0 %v10168_v6 }
 0x328   :  { %v379_v26 = vmul.f32 %v10067_v25, %v367_v13 }
 0x32a   :  { %v385_v27 = vmul.f32 %v383_v24, %v379_v26 }
 0x32b   :  { %v10069_v62 = vpop.eup %10068 }
 0x32c   :  { %v391_v29 = vadd.f32 %v389_v28, %v385_v27  ;;  %v591_v63 = vmul.f32 %v10069_v62, %v576_v41  ;;  %v755_v27 = vrot.slane %v10315_v2, 2  ;;  %v486_v28 = vpop.permute.xlu1 %485  ;;  %v9390_v62 = vld [vmem:[%s13172_s7 + $0x78] sm:$0xff]  }
 0x32e   :  { %9019 = vmatpush3.msk.msra.mxu1 %vm357_vm2, %v391_v29  ;;  %v594_v3 = vmul.f32 %v592_v1, %v591_v63  ;;  %v9391_v63 = vld [vmem:[%s13172_s7 + $0x70] sm:$0xff]   ;;  %v9392_v1 = vld [vmem:[%s13172_s7 + $0x68] sm:$0xff]  }
 0x32f   :  { %9021 = vmatmul.mubr.msk.f32.vlgmr.msra.gmra.mxu1 %vm397_vm3, %v351_v30  ;;  %9023 = vmatprep.subr.mxu1 %v10168_v6 }
 0x330   :  { %9025 = vmatprep.mubr.msk.f32.mxu1 %vm10169_vm1, %v10168_v6  ;;  %v597_v7 = vadd.f32 %v595_v4, %v594_v3  ;;  %v9393_v3 = vld [vmem:[%s13172_s7 + $0x60] sm:$0xff]   ;;  %v9394_v4 = vld [vmem:[%s13172_s7 + $0x58] sm:$0xff]  }
 0x332   :  { %v599_v12 = vrot.slane %v597_v7, 2  ;;  %v9396_v7 = vld [vmem:[%s13172_s7 + $0x48] sm:$0xff]  }
 0x3ef   :  { %v470_v54 = vpop.f32.mrf.mxu1 }
 0x3f0   :  { %v471_v55 = vadd.f32 %v470_v54, %v395_v53 }
 0x3f1   :  { %v9022_v56 = vpop.f32.mrf.mxu1 }
 0x3f2   :  { %v475_v57 = vmul.f32 0.044715, %v471_v55  ;;  %v474_v8 = vmul.f32 0.5, %v471_v55  ;;  %v7888_v56 = vld [vmem:[%s13170_s5 + $0x1] ss:$0 sm:$0xff] }
 0x3f4   :  { %v476_v58 = vmul.f32 %v475_v57, %v471_v55 }
 0x3f6   :  { %v477_v59 = vmul.f32 %v476_v58, %v471_v55  ;;  %v7889_v58 = vld [vmem:[%s13171_s1 + $0x1] ss:$0 sm:$0xff] }
 0x3f8   :  { %v478_v60 = vadd.f32 %v477_v59, %v471_v55 }
 0x3fa   :  { %v479_v61 = vmul.f32 0.7978846, %v478_v60 }
 0x3fc   :  { %10070 = vtanh.f32 %v479_v61 }
 0x409   :  { %v10071_v5 = vpop.eup %10070 }
 0x40a   :  { %v481_v9 = vadd.f32 1.0, %v10071_v5  ;;  %v9395_v5 = vld [vmem:[%s13172_s7 + $0x50] sm:$0xff]  }
 0x40c   :  { %v482_v10 = vmul.f32 %v481_v9, %v474_v8  ;;  %v9397_v8 = vld [vmem:[%s13172_s7 + $0x40] sm:$0xff]  }
 0x40d   :  { %v7907_v9 = vld [vmem:[%s13175_s4 + $0x1] ss:$0 sm:$0xff] }
 0x40e   :  { %9024 = vmatpush3.msk.msra.mxu1 %vm357_vm2, %v482_v10 }
 0x40f   :  { %9026 = vmatmul.mubr.msk.f32.vlgmr.msra.gmra.mxu1 %vm397_vm3, %v353_v11  ;;  %9028 = vmatprep.subr.mxu1 %v10168_v6 }
 0x410   :  { %9029 = vmatpush3.msk.msra.mxu1 %vm357_vm2, %v599_v12  ;;  %9030 = vmatprep.mubr.msk.f32.mxu1 %vm10169_vm1, %v10168_v6 }
 0x411   :  { %9033 = vmatprep.subr.mxu1 %v10168_v6 }
 0x413   :  { %9031 = vmatmul.mubr.msk.f32.vlgmr.msra.gmra.mxu1 %vm397_vm3, %v351_v30 }
 0x414   :  { %9035 = vmatprep.mubr.msk.f32.mxu1 %vm10169_vm1, %v10168_v6 }
 0x4cf   :  { %v560_v13 = vpop.f32.mrf.mxu1 }
 0x4d0   :  { %v561_v30 = vadd.f32 %v560_v13, %v486_v28 }
 0x4d1   :  { %v9027_v14 = vpop.f32.mrf.mxu1 }
 0x4d2   :  { %v564_v34 = vadd.f32 %v561_v30, %v10315_v2 }
 0x4d3   :  { %v668_v15 = vpop.f32.mrf.mxu1 }
 0x4d4   :  { %v669_v16 = vadd.f32 %v668_v15, %v395_v53 }
 0x4d5   :  { %v9032_v17 = vpop.f32.mrf.mxu1 }
 0x4d6   :  { %v673_v18 = vmul.f32 0.044715, %v669_v16  ;;  %v672_v24 = vmul.f32 0.5, %v669_v16 }
 0x4d8   :  { %v674_v19 = vmul.f32 %v673_v18, %v669_v16 }
 0x4da   :  { %v675_v20 = vmul.f32 %v674_v19, %v669_v16 }
 0x4dc   :  { %v676_v21 = vadd.f32 %v675_v20, %v669_v16 }
 0x4de   :  { %v677_v22 = vmul.f32 0.7978846, %v676_v21 }
 0x4e0   :  { %10072 = vtanh.f32 %v677_v22 }
 0x4ed   :  { %v10073_v23 = vpop.eup %10072 }
 0x4ee   :  { %v679_v25 = vadd.f32 1.0, %v10073_v23 }
 0x4f0   :  { %v680_v26 = vmul.f32 %v679_v25, %v672_v24  ;;  %v7933_v25 = vld [vmem:[%s13176_s29 + $0x1] ss:$0 sm:$0xff] }
 0x4f2   :  { %9034 = vmatpush3.msk.msra.mxu1 %vm357_vm2, %v680_v26 }
 0x4f3   :  { %9036 = vmatmul.mubr.msk.f32.vlgmr.msra.gmra.mxu1 %vm397_vm3, %v353_v11  ;;  %9058 = vmatprep.subr.bf16.mxu1 %v10168_v6 }
 0x4f4   :  { %9074 = vmatprep.mubr.msk.bf16.mxu1 %vm10169_vm1, %v10168_v6  ;;  %9059 = vmatpush3.bf16.msra.mxu1 %v9390_v62 }
 0x4f5   :  { %9060 = vmatprep.subr.bf16.mxu1 %v10168_v6 }
 0x4f8   :  { %9061 = vmatpush3.bf16.msra.mxu1 %v9391_v63 }
 0x4f9   :  { %9062 = vmatprep.subr.bf16.mxu1 %v10168_v6 }
 0x4fc   :  { %9063 = vmatpush3.bf16.msra.mxu1 %v9392_v1 }
 0x4fd   :  { %9064 = vmatprep.subr.bf16.mxu1 %v10168_v6 }
 0x500   :  { %9065 = vmatpush3.bf16.msra.mxu1 %v9393_v3 }
 0x501   :  { %9066 = vmatprep.subr.bf16.mxu1 %v10168_v6 }
 0x504   :  { %9067 = vmatpush3.bf16.msra.mxu1 %v9394_v4 }
 0x505   :  { %9068 = vmatprep.subr.bf16.mxu1 %v10168_v6 }
 0x508   :  { %9069 = vmatpush3.bf16.msra.mxu1 %v9395_v5 }
 0x509   :  { %9070 = vmatprep.subr.bf16.mxu1 %v10168_v6 }
 0x50c   :  { %9071 = vmatpush3.bf16.msra.mxu1 %v9396_v7 }
 0x50d   :  { %9072 = vmatprep.subr.bf16.mxu1 %v10168_v6 }
 0x510   :  { %9073 = vmatpush3.bf16.msra.mxu1 %v9397_v8 }
 0x511   :  { %9078 = vmatprep.subr.mxu1 %v10168_v6 }
 0x5b3   :  { %v750_v29 = vpop.f32.mrf.mxu1 }
 0x5b4   :  { %v751_v31 = vadd.f32 %v750_v29, %v486_v28 }
 0x5b5   :  { %v9037_v32 = vpop.f32.mrf.mxu1 }
 0x5b6   :  { %v757_v33 = vadd.f32 %v755_v27, %v751_v31 }
 0x5b8   :  { %v759_v35 = vrot.slane %v757_v33, 6 }
 0x5ba   :  { %v10470_v36 = vsel %vm357_vm2, %v564_v34, %v759_v35 }
 0x5bb   :  { %v766_v38 = vsel %vm88_vm0, %v10470_v36, 0.0 }
 0x5bc   :  { %767 = vadd.xlane.f32.xlu1 %v766_v38 }
 0x645   :  { %v768_v2 = vpop.xlane.xlu1 %767 }
 0x646   :  { %v769_v41 = vmul.f32 0.0078125, %v768_v2 }
 0x648   :  { %v770_v42 = vsub.f32 %v10470_v36, %v769_v41 }
 0x64a   :  { %v771_v43 = vmul.f32 %v770_v42, %v770_v42 }
 0x64c   :  { %v772_v44 = vsel %vm88_vm0, %v771_v43, 0.0 }
 0x64d   :  { %773 = vadd.xlane.f32.xlu1 %v772_v44 }
 0x65e   :  { %1072 = vperm.xlu1 %9364, %v7947_v46  }
 0x6d6   :  { %v774_v52 = vpop.xlane.xlu1 %773 }
 0x6d7   :  { %v775_v53 = vmul.f32 0.0078125, %v774_v52 }
 0x6d9   :  { %v776_v54 = vadd.f32 1e-05, %v775_v53 }
 0x6db   :  { %10074 = vrsqrt.f32 %v776_v54 }
 0x6e8   :  { %v10075_v55 = vpop.eup %10074 }
 0x6e9   :  { %v778_v57 = vmul.f32 %v10075_v55, %v770_v42 }
 0x6eb   :  { %v785_v59 = vmul.f32 %v7888_v56, %v778_v57 }
 0x6ed   :  { %v792_v60 = vadd.f32 %v7889_v58, %v785_v59 }
 0x6ef   :  { %v793_v61 = vpack.c.bf16 %v792_v60, %v792_v60 }
 0x6f1   :  { %9055 = vmatmul.mubr.bf16.vlgmr.msra.gmra.mxu0 %v793_v61 }
 0x6f2   :  { %9090 = vmatprep.mubr.msk.f32.mxu0 %vm10169_vm1, %v10168_v6 }
 0x7b1   :  { %v901_v10 = vpop.f32.mrf.mxu0 }
 0x7b2   :  { %v902_v11 = vadd.f32 %v7907_v9, %v901_v10 }
 0x7b3   :  { %v9056_v12 = vpop.f32.mrf.mxu0 }
 0x7b4   :  { %v908_v13 = vmul.f32 0.044715, %v902_v11  ;;  %v907_v21 = vmul.f32 0.5, %v902_v11 }
 0x7b5   :  { %v904_v14 = vpop.f32.mrf.mxu0 }
 0x7b6   :  { %v909_v15 = vmul.f32 %v908_v13, %v902_v11  ;;  %v1067_v13 = vpop.permute.xlu0 %1066 }
 0x7b7   :  { %v9057_v16 = vpop.f32.mrf.mxu0 }
 0x7b8   :  { %v910_v17 = vmul.f32 %v909_v15, %v902_v11  ;;  %v1073_v16 = vpop.permute.xlu1 %1072 }
 0x7ba   :  { %v911_v18 = vadd.f32 %v910_v17, %v902_v11  ;;  %v1275_v17 = vrot.slane %v1067_v13, 6 }
 0x7bc   :  { %v912_v19 = vmul.f32 0.7978846, %v911_v18 }
 0x7be   :  { %10076 = vtanh.f32 %v912_v19  ;;  %v7942_v19 = vld [vmem:[%s13177_s0 + $0x2] sm:$0x3] }
 0x7cb   :  { %v10077_v20 = vpop.eup %10076 }
 0x7cc   :  { %v914_v22 = vadd.f32 1.0, %v10077_v20 }
 0x7ce   :  { %v915_v23 = vmul.f32 %v914_v22, %v907_v21  ;;  %v1278_v21 = vrot.slane %v1073_v16, 6 }
 0x7d0   :  { %v916_v24 = vpack.c.bf16 %v915_v23, %v915_v23 }
 0x7d2   :  { %9075 = vmatmul.mubr.bf16.vlgmr.msra.gmra.mxu1 %v916_v24 }
 0x7d3   :  { %9080 = vmatprep.mubr.msk.f32.mxu1 %vm10169_vm1, %v10168_v6 }
 0x892   :  { %v1024_v26 = vpop.f32.mrf.mxu1 }
 0x893   :  { %v1025_v27 = vadd.f32 %v7933_v25, %v1024_v26  ;;  %v1079_v25 = vpop.permute.xlu0 %1078 }
 0x894   :  { %v9076_v28 = vpop.f32.mrf.mxu1 }
 0x895   :  { %v10560_v29 = vadd.f32 %v1025_v27, %v10431_v0 }
 0x896   :  { %v1027_v30 = vpop.f32.mrf.mxu1 }
 0x897   :  { %v1043_v31 = vsel %vm357_vm2, %v10560_v29, 0.0  ;;  %v1249_v32 = vrot.slane %v10560_v29, 2 }
 0x898   :  { %v1044_v33 = vrot.slane %v1043_v31, 4  ;;  %v9077_v34 = vpop.f32.mrf.mxu1 }
 0x899   :  { %v1251_v35 = vsel %vm357_vm2, %v1249_v32, 0.0 }
 0x89a   :  { %v1045_v38 = vadd.f32 %v1044_v33, %v1043_v31  ;;  %v1252_v39 = vrot.slane %v1251_v35, 4 }
 0x89c   :  { %v1046_v40 = vrot.slane %v1045_v38, 2  ;;  %v1253_v2 = vadd.f32 %v1252_v39, %v1251_v35 }
 0x89e   :  { %v1047_v41 = vadd.f32 %v1046_v40, %v1045_v38  ;;  %v1254_v42 = vrot.slane %v1253_v2, 2 }
 0x8a0   :  { %v1048_v43 = vrot.slane %v1047_v41, 1  ;;  %v1255_v44 = vadd.f32 %v1254_v42, %v1253_v2 }
 0x8a2   :  { %v1049_v0 = vadd.f32 %v1048_v43, %v1047_v41  ;;  %v1256_v45 = vrot.slane %v1255_v44, 1 }
 0x8a4   :  { %v1050_v46 = vmul.f32 0.5, %v1049_v0  ;;  %v1257_v47 = vadd.f32 %v1256_v45, %v1255_v44 }
 0x8a6   :  { %v1051_v48 = vsub.f32 %v10560_v29, %v1050_v46  ;;  %v1258_v49 = vmul.f32 0.5, %v1257_v47  ;;  %v7944_v47 = vld [vmem:[%s13125_s12 + $0x2] sm:$0x3] }
 0x8a8   :  { %v1052_v50 = vmul.f32 %v1051_v48, %v1051_v48  ;;  %v1259_v51 = vsub.f32 %v10560_v29, %v1258_v49 }
 0x8aa   :  { %v1053_v52 = vsel %vm357_vm2, %v1052_v50, 0.0  ;;  %v1260_v53 = vmul.f32 %v1259_v51, %v1259_v51 }
 0x8ab   :  { %v1054_v54 = vrot.slane %v1053_v52, 4 }
 0x8ac   :  { %v1262_v55 = vrot.slane %v1260_v53, 2 }
 0x8ad   :  { %v1055_v56 = vadd.f32 %v1054_v54, %v1053_v52  ;;  %v1169_v54 = vpop.permute.xlu0 %1168 }
 0x8ae   :  { %v1264_v57 = vsel %vm357_vm2, %v1262_v55, 0.0 }
 0x8af   :  { %v1056_v58 = vrot.slane %v1055_v56, 2  ;;  %v1265_v59 = vrot.slane %v1264_v57, 4 }
 0x8b1   :  { %v1057_v60 = vadd.f32 %v1056_v58, %v1055_v56  ;;  %v1266_v61 = vadd.f32 %v1265_v59, %v1264_v57  ;;  %v1438_v58 = vrot.slane %v10470_v36, 2 }
 0x8b3   :  { %v1058_v62 = vrot.slane %v1057_v60, 1  ;;  %v1267_v63 = vrot.slane %v1266_v61, 2 }
 0x8b5   :  { %v1059_v1 = vadd.f32 %v1058_v62, %v1057_v60  ;;  %v1268_v3 = vadd.f32 %v1267_v63, %v1266_v61 }
 0x8b7   :  { %v1060_v4 = vmul.f32 0.5, %v1059_v1  ;;  %v1269_v5 = vrot.slane %v1268_v3, 1 }
 0x8b9   :  { %v1061_v7 = vadd.f32 1e-05, %v1060_v4  ;;  %v1270_v8 = vadd.f32 %v1269_v5, %v1268_v3  ;;  %v8016_v3 = vld [vmem:[%s13173_s30 + $0x4] sm:$0x3]  ;;  %v9398_v5 = vld [vmem:[%s13169_s9 + $0xb8] sm:$0xff]  }
 0x8ba   :  { %v8013_v4 = vld [vmem:[%s13124_s11 + $0x4] sm:$0x3] }
 0x8bb   :  { %10078 = vrsqrt.f32 %v1061_v7  ;;  %v1271_v9 = vmul.f32 0.5, %v1270_v8  ;;  %v9399_v7 = vld [vmem:[%s13169_s9 + $0xb0] sm:$0xff]  }
 0x8bd   :  { %v1272_v10 = vadd.f32 1e-05, %v1271_v9 }
 0x8bf   :  { %10080 = vrsqrt.f32 %v1272_v10 }
 0x8c8   :  { %v10079_v11 = vpop.eup %10078 }
 0x8c9   :  { %v1063_v12 = vmul.f32 %v10079_v11, %v1051_v48 }
 0x8cb   :  { %v1069_v14 = vmul.f32 %v1067_v13, %v1063_v12  ;;  %v9400_v13 = vld [vmem:[%s13169_s9 + $0xa8] sm:$0xff]  }
 0x8cc   :  { %v10081_v15 = vpop.eup %10080 }
 0x8cd   :  { %v1075_v18 = vadd.f32 %v1073_v16, %v1069_v14  ;;  %v1274_v20 = vmul.f32 %v10081_v15, %v1259_v51  ;;  %v8017_v14 = vld [vmem:[%s13174_s6 + $0x4] sm:$0x3]  ;;  %v9402_v16 = vld [vmem:[%s13169_s9 + $0x98] sm:$0xff]  }
 0x8ce   :  { %v9401_v15 = vld [vmem:[%s13169_s9 + $0xa0] sm:$0xff]  }
 0x8cf   :  { %9079 = vmatpush3.msk.msra.mxu1 %vm357_vm2, %v1075_v18  ;;  %v1277_v22 = vmul.f32 %v1275_v17, %v1274_v20  ;;  %v9403_v17 = vld [vmem:[%s13169_s9 + $0x90] sm:$0xff]   ;;  %v9404_v18 = vld [vmem:[%s13169_s9 + $0x88] sm:$0xff]  }
 0x8d0   :  { %9081 = vmatmul.mubr.msk.f32.vlgmr.msra.gmra.mxu1 %vm397_vm3, %v7942_v19  ;;  %9083 = vmatprep.subr.mxu1 %v10168_v6 }
 0x8d1   :  { %v1280_v23 = vadd.f32 %v1278_v21, %v1277_v22  ;;  %9085 = vmatprep.mubr.msk.f32.mxu1 %vm10169_vm1, %v10168_v6 }
 0x8d3   :  { %v1282_v24 = vrot.slane %v1280_v23, 2 }
 0x8d5   :  { %9089 = vmatpush3.msk.msra.mxu0 %vm357_vm2, %v1282_v24  ;;  %v7958_v24 = vld [vmem:[%s13170_s5 + $0x2] ss:$0 sm:$0xff] }
 0x8d6   :  { %9091 = vmatmul.mubr.msk.f32.vlgmr.msra.gmra.mxu0 %vm397_vm3, %v7942_v19  ;;  %9098 = vmatprep.subr.bf16.mxu0 %v10168_v6  ;;  %v9405_v19 = vld [vmem:[%s13169_s9 + $0x80] sm:$0xff]  }
 0x8d7   :  { %9114 = vmatprep.mubr.msk.bf16.mxu0 %vm10169_vm1, %v10168_v6  ;;  %9099 = vmatpush3.bf16.msra.mxu0 %v9398_v5 }
 0x8d8   :  { %9100 = vmatprep.subr.bf16.mxu0 %v10168_v6 }
 0x8db   :  { %9101 = vmatpush3.bf16.msra.mxu0 %v9399_v7 }
 0x8dc   :  { %9102 = vmatprep.subr.bf16.mxu0 %v10168_v6 }
 0x8df   :  { %9103 = vmatpush3.bf16.msra.mxu0 %v9400_v13 }
 0x8e0   :  { %9104 = vmatprep.subr.bf16.mxu0 %v10168_v6 }
 0x8e3   :  { %9105 = vmatpush3.bf16.msra.mxu0 %v9401_v15 }
 0x8e4   :  { %9106 = vmatprep.subr.bf16.mxu0 %v10168_v6 }
 0x8e7   :  { %9107 = vmatpush3.bf16.msra.mxu0 %v9402_v16 }
 0x8e8   :  { %9108 = vmatprep.subr.bf16.mxu0 %v10168_v6 }
 0x8eb   :  { %9109 = vmatpush3.bf16.msra.mxu0 %v9403_v17 }
 0x8ec   :  { %9110 = vmatprep.subr.bf16.mxu0 %v10168_v6 }
 0x8ef   :  { %9111 = vmatpush3.bf16.msra.mxu0 %v9404_v18 }
 0x8f0   :  { %9112 = vmatprep.subr.bf16.mxu0 %v10168_v6 }
 0x8f3   :  { %9113 = vmatpush3.bf16.msra.mxu0 %v9405_v19 }
 0x8f4   :  { %9138 = vmatprep.subr.mxu0 %v10168_v6 }
 0x990   :  { %v1153_v26 = vpop.f32.mrf.mxu1 }
 0x991   :  { %v1154_v27 = vadd.f32 %v1153_v26, %v1079_v25  ;;  %v7959_v26 = vld [vmem:[%s13171_s1 + $0x2] ss:$0 sm:$0xff] }
 0x992   :  { %v9082_v28 = vpop.f32.mrf.mxu1 }
 0x993   :  { %v1158_v30 = vmul.f32 0.044715, %v1154_v27  ;;  %v1157_v0 = vmul.f32 0.5, %v1154_v27 }
 0x995   :  { %v1159_v31 = vmul.f32 %v1158_v30, %v1154_v27 }
 0x996   :  { %v1351_v32 = vpop.f32.mrf.mxu0 }
 0x997   :  { %v1160_v33 = vmul.f32 %v1159_v31, %v1154_v27  ;;  %v1352_v34 = vadd.f32 %v1351_v32, %v1079_v25  ;;  %v9406_v31 = vld [vmem:[%s13172_s7 + $0xb8] sm:$0xff]   ;;  %v9407_v32 = vld [vmem:[%s13172_s7 + $0xb0] sm:$0xff]  }
 0x998   :  { %v9092_v35 = vpop.f32.mrf.mxu0 }
 0x999   :  { %v1161_v38 = vadd.f32 %v1160_v33, %v1154_v27  ;;  %v1356_v39 = vmul.f32 0.044715, %v1352_v34  ;;  %v1355_v49 = vmul.f32 0.5, %v1352_v34  ;;  %v9408_v33 = vld [vmem:[%s13172_s7 + $0xa8] sm:$0xff]   ;;  %v9410_v35 = vld [vmem:[%s13172_s7 + $0x98] sm:$0xff]  }
 0x99b   :  { %v1162_v40 = vmul.f32 0.7978846, %v1161_v38  ;;  %v1357_v2 = vmul.f32 %v1356_v39, %v1352_v34  ;;  %v9411_v38 = vld [vmem:[%s13172_s7 + $0x90] sm:$0xff]   ;;  %v9412_v39 = vld [vmem:[%s13172_s7 + $0x88] sm:$0xff]  }
 0x99d   :  { %10082 = vtanh.f32 %v1162_v40  ;;  %v1358_v41 = vmul.f32 %v1357_v2, %v1352_v34  ;;  %v9413_v40 = vld [vmem:[%s13172_s7 + $0x80] sm:$0xff]  }
 0x99e   :  { %v7977_v2 = vld [vmem:[%s13175_s4 + $0x2] ss:$0 sm:$0xff] }
 0x99f   :  { %v1359_v42 = vadd.f32 %v1358_v41, %v1352_v34  ;;  %v9409_v34 = vld [vmem:[%s13172_s7 + $0xa0] sm:$0xff]  }
 0x9a1   :  { %v1360_v43 = vmul.f32 0.7978846, %v1359_v42 }
 0x9a3   :  { %10084 = vtanh.f32 %v1360_v43 }
 0x9aa   :  { %v10083_v44 = vpop.eup %10082 }
 0x9ab   :  { %v1164_v45 = vadd.f32 1.0, %v10083_v44 }
 0x9ad   :  { %v1165_v46 = vmul.f32 %v1164_v45, %v1157_v0 }
 0x9af   :  { %9084 = vmatpush3.msk.msra.mxu1 %vm357_vm2, %v1165_v46 }
 0x9b0   :  { %v10085_v48 = vpop.eup %10084  ;;  %9086 = vmatmul.mubr.msk.f32.vlgmr.msra.gmra.mxu1 %vm397_vm3, %v7944_v47  ;;  %9093 = vmatprep.subr.mxu1 %v10168_v6 }
 0x9b1   :  { %v1362_v50 = vadd.f32 1.0, %v10085_v48  ;;  %9095 = vmatprep.mubr.msk.f32.mxu1 %vm10169_vm1, %v10168_v6 }
 0x9b3   :  { %v1363_v51 = vmul.f32 %v1362_v50, %v1355_v49 }
 0x9b5   :  { %9094 = vmatpush3.msk.msra.mxu1 %vm357_vm2, %v1363_v51 }
 0x9b6   :  { %9096 = vmatmul.mubr.msk.f32.vlgmr.msra.gmra.mxu1 %vm397_vm3, %v7944_v47  ;;  %9118 = vmatprep.subr.bf16.mxu1 %v10168_v6 }
 0x9b7   :  { %9134 = vmatprep.mubr.msk.bf16.mxu1 %vm10169_vm1, %v10168_v6  ;;  %9119 = vmatpush3.bf16.msra.mxu1 %v9406_v31 }
 0x9b8   :  { %9120 = vmatprep.subr.bf16.mxu1 %v10168_v6 }
 0x9bb   :  { %9121 = vmatpush3.bf16.msra.mxu1 %v9407_v32 }
 0x9bc   :  { %9122 = vmatprep.subr.bf16.mxu1 %v10168_v6 }
 0x9bf   :  { %9123 = vmatpush3.bf16.msra.mxu1 %v9408_v33 }
 0x9c0   :  { %9124 = vmatprep.subr.bf16.mxu1 %v10168_v6 }
 0x9c3   :  { %9125 = vmatpush3.bf16.msra.mxu1 %v9409_v34 }
 0x9c4   :  { %9126 = vmatprep.subr.bf16.mxu1 %v10168_v6 }
 0x9c7   :  { %9127 = vmatpush3.bf16.msra.mxu1 %v9410_v35 }
 0x9c8   :  { %9128 = vmatprep.subr.bf16.mxu1 %v10168_v6 }
 0x9cb   :  { %9129 = vmatpush3.bf16.msra.mxu1 %v9411_v38 }
 0x9cc   :  { %9130 = vmatprep.subr.bf16.mxu1 %v10168_v6 }
 0x9cf   :  { %9131 = vmatpush3.bf16.msra.mxu1 %v9412_v39 }
 0x9d0   :  { %9132 = vmatprep.subr.bf16.mxu1 %v10168_v6 }
 0x9d3   :  { %9133 = vmatpush3.bf16.msra.mxu1 %v9413_v40 }
 0x9d4   :  { %9143 = vmatprep.subr.mxu1 %v10168_v6 }
 0xa70   :  { %v1243_v52 = vpop.f32.mrf.mxu1 }
 0xa71   :  { %v1244_v56 = vadd.f32 %v1243_v52, %v1169_v54 }
 0xa72   :  { %v9087_v53 = vpop.f32.mrf.mxu1 }
 0xa73   :  { %v1247_v61 = vadd.f32 %v1244_v56, %v10470_v36  ;;  %v8015_v36 = vld [vmem:[%s13126_s13 + $0x4] sm:$0x3] }
 0xa76   :  { %v1433_v55 = vpop.f32.mrf.mxu1 }
 0xa77   :  { %v1434_v57 = vadd.f32 %v1433_v55, %v1169_v54  ;;  %v8003_v55 = vld [vmem:[%s13176_s29 + $0x2] ss:$0 sm:$0xff] }
 0xa78   :  { %v9097_v59 = vpop.f32.mrf.mxu1 }
 0xa79   :  { %v1440_v60 = vadd.f32 %v1438_v58, %v1434_v57 }
 0xa7b   :  { %v1442_v62 = vrot.slane %v1440_v60, 6 }
 0xa7d   :  { %v10599_v63 = vsel %vm357_vm2, %v1247_v61, %v1442_v62 }
 0xa7e   :  { %v1449_v1 = vsel %vm88_vm0, %v10599_v63, 0.0 }
 0xa7f   :  { %1450 = vadd.xlane.f32.xlu0 %v1449_v1 }
 0xa95   :  { %1749 = vperm.xlu0 %9365, %v8016_v3  }
 0xa99   :  { %1761 = vperm.xlu0 %9365, %v8013_v4  }
 0xa9d   :  { %1851 = vperm.xlu0 %9365, %v8015_v36  }
 0xb08   :  { %v1451_v8 = vpop.xlane.xlu0 %1450 }
 0xb09   :  { %v1452_v9 = vmul.f32 0.0078125, %v1451_v8 }
 0xb0b   :  { %v1453_v10 = vsub.f32 %v10599_v63, %v1452_v9 }
 0xb0d   :  { %v1454_v11 = vmul.f32 %v1453_v10, %v1453_v10 }
 0xb0f   :  { %v1455_v12 = vsel %vm88_vm0, %v1454_v11, 0.0 }
 0xb10   :  { %1456 = vadd.xlane.f32.xlu1 %v1455_v12 }
 0xb21   :  { %1755 = vperm.xlu1 %9364, %v8017_v14  }
 0xb99   :  { %v1457_v20 = vpop.xlane.xlu1 %1456 }
 0xb9a   :  { %v1458_v21 = vmul.f32 0.0078125, %v1457_v20 }
 0xb9c   :  { %v1459_v22 = vadd.f32 1e-05, %v1458_v21 }
 0xb9e   :  { %10086 = vrsqrt.f32 %v1459_v22 }
 0xbab   :  { %v10087_v23 = vpop.eup %10086 }
 0xbac   :  { %v1461_v25 = vmul.f32 %v10087_v23, %v1453_v10 }
 0xbae   :  { %v1468_v27 = vmul.f32 %v7958_v24, %v1461_v25 }
 0xbb0   :  { %v1475_v28 = vadd.f32 %v7959_v26, %v1468_v27 }
 0xbb2   :  { %v1476_v30 = vpack.c.bf16 %v1475_v28, %v1475_v28 }
 0xbb4   :  { %9115 = vmatmul.mubr.bf16.vlgmr.msra.gmra.mxu0 %v1476_v30 }
 0xbb5   :  { %9140 = vmatprep.mubr.msk.f32.mxu0 %vm10169_vm1, %v10168_v6 }
 0xc74   :  { %v1584_v41 = vpop.f32.mrf.mxu0 }
 0xc75   :  { %v1585_v42 = vadd.f32 %v7977_v2, %v1584_v41 }
 0xc76   :  { %v9116_v43 = vpop.f32.mrf.mxu0 }
 0xc77   :  { %v1591_v44 = vmul.f32 0.044715, %v1585_v42  ;;  %v1590_v51 = vmul.f32 0.5, %v1585_v42 }
 0xc78   :  { %v1587_v0 = vpop.f32.mrf.mxu0 }
 0xc79   :  { %v1592_v45 = vmul.f32 %v1591_v44, %v1585_v42  ;;  %v1750_v44 = vpop.permute.xlu0 %1749 }
 0xc7a   :  { %v9117_v46 = vpop.f32.mrf.mxu0 }
 0xc7b   :  { %v1593_v47 = vmul.f32 %v1592_v45, %v1585_v42  ;;  %v1756_v46 = vpop.permute.xlu1 %1755 }
 0xc7d   :  { %v1594_v48 = vadd.f32 %v1593_v47, %v1585_v42  ;;  %v1958_v47 = vrot.slane %v1750_v44, 6 }
 0xc7f   :  { %v1595_v49 = vmul.f32 0.7978846, %v1594_v48 }
 0xc81   :  { %10088 = vtanh.f32 %v1595_v49  ;;  %v8012_v49 = vld [vmem:[%s13177_s0 + $0x4] sm:$0x3] }
 0xc8e   :  { %v10089_v50 = vpop.eup %10088 }
 0xc8f   :  { %v1597_v52 = vadd.f32 1.0, %v10089_v50 }
 0xc91   :  { %v1598_v53 = vmul.f32 %v1597_v52, %v1590_v51  ;;  %v1961_v51 = vrot.slane %v1756_v46, 6 }
 0xc93   :  { %v1599_v54 = vpack.c.bf16 %v1598_v53, %v1598_v53 }
 0xc95   :  { %9135 = vmatmul.mubr.bf16.vlgmr.msra.gmra.mxu1 %v1599_v54 }
 0xc96   :  { %9145 = vmatprep.mubr.msk.f32.mxu1 %vm10169_vm1, %v10168_v6 }
 0xd55   :  { %v1707_v56 = vpop.f32.mrf.mxu1 }
 0xd56   :  { %v1708_v57 = vadd.f32 %v8003_v55, %v1707_v56  ;;  %v1762_v55 = vpop.permute.xlu0 %1761 }
 0xd57   :  { %v9136_v58 = vpop.f32.mrf.mxu1 }
 0xd58   :  { %v10698_v59 = vadd.f32 %v1708_v57, %v10560_v29 }
 0xd59   :  { %v1710_v60 = vpop.f32.mrf.mxu1 }
 0xd5a   :  { %v1726_v61 = vsel %vm357_vm2, %v10698_v59, 0.0  ;;  %v1932_v62 = vrot.slane %v10698_v59, 2 }
 0xd5b   :  { %v1727_v1 = vrot.slane %v1726_v61, 4  ;;  %v9137_v3 = vpop.f32.mrf.mxu1 }
 0xd5c   :  { %v1934_v4 = vsel %vm357_vm2, %v1932_v62, 0.0 }
 0xd5d   :  { %v1728_v36 = vadd.f32 %v1727_v1, %v1726_v61  ;;  %v1935_v5 = vrot.slane %v1934_v4, 4 }
 0xd5f   :  { %v1729_v7 = vrot.slane %v1728_v36, 2  ;;  %v1936_v8 = vadd.f32 %v1935_v5, %v1934_v4 }
 0xd61   :  { %v1730_v9 = vadd.f32 %v1729_v7, %v1728_v36  ;;  %v1937_v10 = vrot.slane %v1936_v8, 2 }
 0xd63   :  { %v1731_v11 = vrot.slane %v1730_v9, 1  ;;  %v1938_v12 = vadd.f32 %v1937_v10, %v1936_v8 }
 0xd65   :  { %v1732_v29 = vadd.f32 %v1731_v11, %v1730_v9  ;;  %v1939_v13 = vrot.slane %v1938_v12, 1 }
 0xd67   :  { %v1733_v14 = vmul.f32 0.5, %v1732_v29  ;;  %v1940_v15 = vadd.f32 %v1939_v13, %v1938_v12 }
 0xd69   :  { %v1734_v16 = vsub.f32 %v10698_v59, %v1733_v14  ;;  %v1941_v17 = vmul.f32 0.5, %v1940_v15  ;;  %v8014_v15 = vld [vmem:[%s13125_s12 + $0x4] sm:$0x3] }
 0xd6b   :  { %v1735_v18 = vmul.f32 %v1734_v16, %v1734_v16  ;;  %v1942_v19 = vsub.f32 %v10698_v59, %v1941_v17 }
 0xd6d   :  { %v1736_v20 = vsel %vm357_vm2, %v1735_v18, 0.0  ;;  %v1943_v21 = vmul.f32 %v1942_v19, %v1942_v19 }
 0xd6e   :  { %v1737_v22 = vrot.slane %v1736_v20, 4 }
 0xd6f   :  { %v1945_v23 = vrot.slane %v1943_v21, 2 }
 0xd70   :  { %v1738_v24 = vadd.f32 %v1737_v22, %v1736_v20  ;;  %v1852_v22 = vpop.permute.xlu0 %1851 }
 0xd71   :  { %v1947_v25 = vsel %vm357_vm2, %v1945_v23, 0.0 }
 0xd72   :  { %v1739_v26 = vrot.slane %v1738_v24, 2  ;;  %v1948_v27 = vrot.slane %v1947_v25, 4 }
 0xd74   :  { %v1740_v28 = vadd.f32 %v1739_v26, %v1738_v24  ;;  %v1949_v30 = vadd.f32 %v1948_v27, %v1947_v25  ;;  %v2121_v26 = vrot.slane %v10599_v63, 2 }
 0xd76   :  { %v1741_v31 = vrot.slane %v1740_v28, 1  ;;  %v1950_v32 = vrot.slane %v1949_v30, 2 }
 0xd78   :  { %v1742_v33 = vadd.f32 %v1741_v31, %v1740_v28  ;;  %v1951_v34 = vadd.f32 %v1950_v32, %v1949_v30 }
 0xd7a   :  { %v1743_v35 = vmul.f32 0.5, %v1742_v33  ;;  %v1952_v38 = vrot.slane %v1951_v34, 1 }
 0xd7c   :  { %v1744_v39 = vadd.f32 1e-05, %v1743_v35  ;;  %v1953_v40 = vadd.f32 %v1952_v38, %v1951_v34  ;;  %v8087_v34 = vld [vmem:[%s13174_s6 + $0x6] sm:$0x3]  ;;  %v9415_v38 = vld [vmem:[%s13169_s9 + $0xf0] sm:$0xff]  }
 0xd7d   :  { %v8083_v35 = vld [vmem:[%s13124_s11 + $0x6] sm:$0x3] }
 0xd7e   :  { %10090 = vrsqrt.f32 %v1744_v39  ;;  %v1954_v2 = vmul.f32 0.5, %v1953_v40 }
 0xd80   :  { %v1955_v41 = vadd.f32 1e-05, %v1954_v2 }
 0xd82   :  { %10092 = vrsqrt.f32 %v1955_v41 }
 0xd8b   :  { %v10091_v42 = vpop.eup %10090 }
 0xd8c   :  { %v1746_v43 = vmul.f32 %v10091_v42, %v1734_v16 }
 0xd8e   :  { %v1752_v0 = vmul.f32 %v1750_v44, %v1746_v43  ;;  %v9416_v43 = vld [vmem:[%s13169_s9 + $0xe8] sm:$0xff]   ;;  %v9417_v44 = vld [vmem:[%s13169_s9 + $0xe0] sm:$0xff]  }
 0xd8f   :  { %v10093_v45 = vpop.eup %10092 }
 0xd90   :  { %v1758_v48 = vadd.f32 %v1756_v46, %v1752_v0  ;;  %v1957_v50 = vmul.f32 %v10093_v45, %v1942_v19  ;;  %v9418_v0 = vld [vmem:[%s13169_s9 + $0xd8] sm:$0xff]   ;;  %v8086_v45 = vld [vmem:[%s13173_s30 + $0x6] sm:$0x3]  ;;  %v9419_v46 = vld [vmem:[%s13169_s9 + $0xd0] sm:$0xff]  }
 0xd92   :  { %9139 = vmatpush3.msk.msra.mxu0 %vm357_vm2, %v1758_v48  ;;  %v1960_v52 = vmul.f32 %v1958_v47, %v1957_v50  ;;  %v8085_v47 = vld [vmem:[%s13126_s13 + $0x6] sm:$0x3]  ;;  %v9420_v48 = vld [vmem:[%s13169_s9 + $0xc8] sm:$0xff]   ;;  %s13217_s13 = sld [smem:[#allocation23_spill]] }
 0xd93   :  { %9141 = vmatmul.mubr.msk.f32.vlgmr.msra.gmra.mxu0 %vm397_vm3, %v8012_v49  ;;  %9148 = vmatprep.subr.mxu0 %v10168_v6 }
 0xd94   :  { %v1963_v53 = vadd.f32 %v1961_v51, %v1960_v52  ;;  %9150 = vmatprep.mubr.msk.f32.mxu0 %vm10169_vm1, %v10168_v6 }
 0xd96   :  { %v1965_v54 = vrot.slane %v1963_v53, 2 }
 0xd98   :  { %9149 = vmatpush3.msk.msra.mxu0 %vm357_vm2, %v1965_v54  ;;  %v8028_v54 = vld [vmem:[%s13170_s5 + $0x3] ss:$0 sm:$0xff] }
 0xd99   :  { %9151 = vmatmul.mubr.msk.f32.vlgmr.msra.gmra.mxu0 %vm397_vm3, %v8012_v49  ;;  %9158 = vmatprep.subr.bf16.mxu0 %v10168_v6  ;;  %v9421_v49 = vld [vmem:[%s13169_s9 + $0xc0] sm:$0xff]  }
 0xd9a   :  { %9174 = vmatprep.mubr.msk.bf16.mxu0 %vm10169_vm1, %v10168_v6 }
 0xe53   :  { %v1836_v56 = vpop.f32.mrf.mxu0 }
 0xe54   :  { %v1837_v57 = vadd.f32 %v1836_v56, %v1762_v55  ;;  %v8029_v56 = vld [vmem:[%s13171_s1 + $0x3] ss:$0 sm:$0xff] }
 0xe55   :  { %v9142_v58 = vpop.f32.mrf.mxu0 }
 0xe56   :  { %v1841_v60 = vmul.f32 0.044715, %v1837_v57  ;;  %v1840_v29 = vmul.f32 0.5, %v1837_v57 }
 0xe58   :  { %v1842_v61 = vmul.f32 %v1841_v60, %v1837_v57 }
 0xe59   :  { %v2034_v62 = vpop.f32.mrf.mxu0 }
 0xe5a   :  { %v1843_v1 = vmul.f32 %v1842_v61, %v1837_v57  ;;  %v2035_v3 = vadd.f32 %v2034_v62, %v1762_v55  ;;  %v9422_v61 = vld [vmem:[%s13172_s7 + $0xf8] sm:$0xff]   ;;  %v9423_v62 = vld [vmem:[%s13172_s7 + $0xf0] sm:$0xff]  }
 0xe5b   :  { %v9152_v4 = vpop.f32.mrf.mxu0 }
 0xe5c   :  { %v1844_v36 = vadd.f32 %v1843_v1, %v1837_v57  ;;  %v2039_v5 = vmul.f32 0.044715, %v2035_v3  ;;  %v2038_v17 = vmul.f32 0.5, %v2035_v3  ;;  %v9424_v1 = vld [vmem:[%s13172_s7 + $0xe8] sm:$0xff]   ;;  %v9426_v4 = vld [vmem:[%s13172_s7 + $0xd8] sm:$0xff]  }
 0xe5e   :  { %v1845_v7 = vmul.f32 0.7978846, %v1844_v36  ;;  %v2040_v8 = vmul.f32 %v2039_v5, %v2035_v3  ;;  %v9427_v36 = vld [vmem:[%s13172_s7 + $0xd0] sm:$0xff]   ;;  %v9428_v5 = vld [vmem:[%s13172_s7 + $0xc8] sm:$0xff]  }
 0xe60   :  { %10094 = vtanh.f32 %v1845_v7  ;;  %v2041_v9 = vmul.f32 %v2040_v8, %v2035_v3  ;;  %v9429_v7 = vld [vmem:[%s13172_s7 + $0xc0] sm:$0xff]  }
 0xe61   :  { %v8047_v8 = vld [vmem:[%s13175_s4 + $0x3] ss:$0 sm:$0xff] }
 0xe62   :  { %v2042_v10 = vadd.f32 %v2041_v9, %v2035_v3  ;;  %v9425_v3 = vld [vmem:[%s13172_s7 + $0xe0] sm:$0xff]  }
 0xe64   :  { %v2043_v11 = vmul.f32 0.7978846, %v2042_v10 }
 0xe66   :  { %10096 = vtanh.f32 %v2043_v11 }
 0xe6d   :  { %v10095_v12 = vpop.eup %10094 }
 0xe6e   :  { %v1847_v13 = vadd.f32 1.0, %v10095_v12 }
 0xe70   :  { %v1848_v14 = vmul.f32 %v1847_v13, %v1840_v29 }
 0xe72   :  { %9144 = vmatpush3.msk.msra.mxu1 %vm357_vm2, %v1848_v14 }
 0xe73   :  { %v10097_v16 = vpop.eup %10096  ;;  %9146 = vmatmul.mubr.msk.f32.vlgmr.msra.gmra.mxu1 %vm397_vm3, %v8014_v15  ;;  %9153 = vmatprep.subr.mxu1 %v10168_v6 }
 0xe74   :  { %v2045_v18 = vadd.f32 1.0, %v10097_v16  ;;  %9155 = vmatprep.mubr.msk.f32.mxu1 %vm10169_vm1, %v10168_v6 }
 0xe76   :  { %v2046_v19 = vmul.f32 %v2045_v18, %v2038_v17 }
 0xe78   :  { %9154 = vmatpush3.msk.msra.mxu1 %vm357_vm2, %v2046_v19 }
 0xe79   :  { %9156 = vmatmul.mubr.msk.f32.vlgmr.msra.gmra.mxu1 %vm397_vm3, %v8014_v15  ;;  %9178 = vmatprep.subr.bf16.mxu1 %v10168_v6 }
 0xe7a   :  { %9194 = vmatprep.mubr.msk.bf16.mxu1 %vm10169_vm1, %v10168_v6  ;;  %9179 = vmatpush3.bf16.msra.mxu1 %v9422_v61 }
 0xe7b   :  { %9180 = vmatprep.subr.bf16.mxu1 %v10168_v6 }
 0xe7e   :  { %9181 = vmatpush3.bf16.msra.mxu1 %v9423_v62 }
 0xe7f   :  { %9182 = vmatprep.subr.bf16.mxu1 %v10168_v6 }
 0xe82   :  { %9183 = vmatpush3.bf16.msra.mxu1 %v9424_v1 }
 0xe83   :  { %9184 = vmatprep.subr.bf16.mxu1 %v10168_v6 }
 0xe86   :  { %9185 = vmatpush3.bf16.msra.mxu1 %v9425_v3 }
 0xe87   :  { %9186 = vmatprep.subr.bf16.mxu1 %v10168_v6 }
 0xe8a   :  { %9187 = vmatpush3.bf16.msra.mxu1 %v9426_v4 }
 0xe8b   :  { %9188 = vmatprep.subr.bf16.mxu1 %v10168_v6 }
 0xe8e   :  { %9189 = vmatpush3.bf16.msra.mxu1 %v9427_v36 }
 0xe8f   :  { %9190 = vmatprep.subr.bf16.mxu1 %v10168_v6 }
 0xe92   :  { %9191 = vmatpush3.bf16.msra.mxu1 %v9428_v5 }
 0xe93   :  { %9192 = vmatprep.subr.bf16.mxu1 %v10168_v6 }
 0xe96   :  { %9193 = vmatpush3.bf16.msra.mxu1 %v9429_v7 }
 0xe97   :  { %9203 = vmatprep.subr.mxu1 %v10168_v6 }
 0xf33   :  { %v1926_v20 = vpop.f32.mrf.mxu1 }
 0xf34   :  { %v1927_v24 = vadd.f32 %v1926_v20, %v1852_v22 }
 0xf35   :  { %v9147_v21 = vpop.f32.mrf.mxu1 }
 0xf36   :  { %v1930_v30 = vadd.f32 %v1927_v24, %v10599_v63  ;;  %v9414_v63 = vld [vmem:[%s13169_s9 + $0xf8] sm:$0xff]  }
 0xf37   :  { %9159 = vmatpush3.bf16.msra.mxu0 %v9414_v63 }
 0xf38   :  { %9160 = vmatprep.subr.bf16.mxu0 %v10168_v6 }
 0xf39   :  { %v2116_v23 = vpop.f32.mrf.mxu1 }
 0xf3a   :  { %v2117_v25 = vadd.f32 %v2116_v23, %v1852_v22  ;;  %v8073_v23 = vld [vmem:[%s13176_s29 + $0x3] ss:$0 sm:$0xff] }
 0xf3b   :  { %v9157_v27 = vpop.f32.mrf.mxu1  ;;  %9161 = vmatpush3.bf16.msra.mxu0 %v9415_v38 }
 0xf3c   :  { %v2123_v28 = vadd.f32 %v2121_v26, %v2117_v25  ;;  %9162 = vmatprep.subr.bf16.mxu0 %v10168_v6 }
 0xf3e   :  { %v2125_v31 = vrot.slane %v2123_v28, 6 }
 0xf3f   :  { %9163 = vmatpush3.bf16.msra.mxu0 %v9416_v43 }
 0xf40   :  { %v10737_v32 = vsel %vm357_vm2, %v1930_v30, %v2125_v31  ;;  %9164 = vmatprep.subr.bf16.mxu0 %v10168_v6 }
 0xf41   :  { %v2132_v33 = vsel %vm88_vm0, %v10737_v32, 0.0 }
 0xf42   :  { %2133 = vadd.xlane.f32.xlu1 %v2132_v33 }
 0xf43   :  { %9165 = vmatpush3.bf16.msra.mxu0 %v9417_v44 }
 0xf44   :  { %9166 = vmatprep.subr.bf16.mxu0 %v10168_v6 }
 0xf47   :  { %9167 = vmatpush3.bf16.msra.mxu0 %v9418_v0 }
 0xf48   :  { %9168 = vmatprep.subr.bf16.mxu0 %v10168_v6 }
 0xf4b   :  { %9169 = vmatpush3.bf16.msra.mxu0 %v9419_v46 }
 0xf4c   :  { %9170 = vmatprep.subr.bf16.mxu0 %v10168_v6 }
 0xf4f   :  { %9171 = vmatpush3.bf16.msra.mxu0 %v9420_v48 }
 0xf50   :  { %9172 = vmatprep.subr.bf16.mxu0 %v10168_v6 }
 0xf53   :  { %2438 = vperm.xlu1 %9364, %v8087_v34   ;;  %9173 = vmatpush3.bf16.msra.mxu0 %v9421_v49 }
 0xf54   :  { %9198 = vmatprep.subr.mxu0 %v10168_v6 }
 0xf57   :  { %2444 = vperm.xlu1 %9364, %v8083_v35  }
 0xfcb   :  { %v2134_v39 = vpop.xlane.xlu1 %2133 }
 0xfcc   :  { %v2135_v40 = vmul.f32 0.0078125, %v2134_v39 }
 0xfce   :  { %v2136_v2 = vsub.f32 %v10737_v32, %v2135_v40 }
 0xfd0   :  { %v2137_v41 = vmul.f32 %v2136_v2, %v2136_v2 }
 0xfd2   :  { %v2138_v42 = vsel %vm88_vm0, %v2137_v41, 0.0 }
 0xfd3   :  { %2139 = vadd.xlane.f32.xlu0 %v2138_v42 }
 0xfe9   :  { %2432 = vperm.xlu0 %9365, %v8086_v45  }
 0xfed   :  { %2534 = vperm.xlu0 %9365, %v8085_v47  }
0x105c   :  { %v2140_v50 = vpop.xlane.xlu0 %2139 }
0x105d   :  { %v2141_v51 = vmul.f32 0.0078125, %v2140_v50 }
0x105f   :  { %v2142_v52 = vadd.f32 1e-05, %v2141_v51 }
0x1061   :  { %10098 = vrsqrt.f32 %v2142_v52 }
0x106e   :  { %v10099_v53 = vpop.eup %10098 }
0x106f   :  { %v2144_v55 = vmul.f32 %v10099_v53, %v2136_v2 }
0x1071   :  { %v2151_v57 = vmul.f32 %v8028_v54, %v2144_v55 }
0x1073   :  { %v2158_v58 = vadd.f32 %v8029_v56, %v2151_v57 }
0x1075   :  { %v2159_v60 = vpack.c.bf16 %v2158_v58, %v2158_v58 }
0x1077   :  { %9175 = vmatmul.mubr.bf16.vlgmr.msra.gmra.mxu0 %v2159_v60 }
0x1078   :  { %9200 = vmatprep.mubr.msk.f32.mxu0 %vm10169_vm1, %v10168_v6 }
0x1137   :  { %v2267_v9 = vpop.f32.mrf.mxu0 }
0x1138   :  { %v2268_v10 = vadd.f32 %v8047_v8, %v2267_v9 }
0x1139   :  { %v9176_v11 = vpop.f32.mrf.mxu0 }
0x113a   :  { %v2274_v12 = vmul.f32 0.044715, %v2268_v10  ;;  %v2273_v19 = vmul.f32 0.5, %v2268_v10 }
0x113b   :  { %v2270_v29 = vpop.f32.mrf.mxu0 }
0x113c   :  { %v2275_v13 = vmul.f32 %v2274_v12, %v2268_v10  ;;  %v2433_v12 = vpop.permute.xlu0 %2432 }
0x113d   :  { %v9177_v14 = vpop.f32.mrf.mxu0 }
0x113e   :  { %v2276_v15 = vmul.f32 %v2275_v13, %v2268_v10  ;;  %v2439_v14 = vpop.permute.xlu1 %2438 }
0x1140   :  { %v2277_v16 = vadd.f32 %v2276_v15, %v2268_v10  ;;  %v2641_v15 = vrot.slane %v2433_v12, 6 }
0x1142   :  { %v2278_v17 = vmul.f32 0.7978846, %v2277_v16 }
0x1144   :  { %10100 = vtanh.f32 %v2278_v17 }
0x1151   :  { %v10101_v18 = vpop.eup %10100 }
0x1152   :  { %v2280_v20 = vadd.f32 1.0, %v10101_v18  ;;  %v8082_v18 = vld [vmem:[%s13177_s0 + $0x6] sm:$0x3] }
0x1154   :  { %v2281_v21 = vmul.f32 %v2280_v20, %v2273_v19  ;;  %v2644_v19 = vrot.slane %v2439_v14, 6 }
0x1156   :  { %v2282_v22 = vpack.c.bf16 %v2281_v21, %v2281_v21 }
0x1158   :  { %9195 = vmatmul.mubr.bf16.vlgmr.msra.gmra.mxu1 %v2282_v22 }
0x1159   :  { %9205 = vmatprep.mubr.msk.f32.mxu1 %vm10169_vm1, %v10168_v6 }
0x1218   :  { %v2390_v24 = vpop.f32.mrf.mxu1 }
0x1219   :  { %v2391_v25 = vadd.f32 %v8073_v23, %v2390_v24  ;;  %v9433_v23 = vld [vmem:[%s13127_s14 + $0x38] sm:$0xff]   ;;  %v9437_v24 = vld [vmem:[%s13127_s14 + $0x30] sm:$0xff]  }
0x121a   :  { %v9196_v26 = vpop.f32.mrf.mxu1 }
0x121b   :  { %v2396_v27 = vadd.f32 %v2391_v25, %v10698_v59  ;;  %v9441_v25 = vld [vmem:[%s13127_s14 + $0x28] sm:$0xff]   ;;  %v9445_v26 = vld [vmem:[%s13127_s14 + $0x20] sm:$0xff]  }
0x121c   :  { %v2393_v28 = vpop.f32.mrf.mxu1 }
0x121d   :  { %v2409_v30 = vsel %vm357_vm2, %v2396_v27, 0.0  ;;  %v2615_v31 = vrot.slane %v2396_v27, 2 }
0x121e   :  { %v2410_v33 = vrot.slane %v2409_v30, 4  ;;  %v9197_v34 = vpop.f32.mrf.mxu1 }
0x121f   :  { %v2617_v35 = vsel %vm357_vm2, %v2615_v31, 0.0 }
0x1220   :  { %v2411_v63 = vadd.f32 %v2410_v33, %v2409_v30  ;;  %v2618_v38 = vrot.slane %v2617_v35, 4 }
0x1222   :  { %v2412_v39 = vrot.slane %v2411_v63, 2  ;;  %v2619_v40 = vadd.f32 %v2618_v38, %v2617_v35 }
0x1224   :  { %v2413_v2 = vadd.f32 %v2412_v39, %v2411_v63  ;;  %v2620_v41 = vrot.slane %v2619_v40, 2 }
0x1226   :  { %v2414_v42 = vrot.slane %v2413_v2, 1  ;;  %v2621_v43 = vadd.f32 %v2620_v41, %v2619_v40 }
0x1228   :  { %v2415_v44 = vadd.f32 %v2414_v42, %v2413_v2  ;;  %v2622_v0 = vrot.slane %v2621_v43, 1 }
0x122a   :  { %v2416_v45 = vmul.f32 0.5, %v2415_v44  ;;  %v2623_v59 = vadd.f32 %v2622_v0, %v2621_v43 }
0x122c   :  { %v2417_v46 = vsub.f32 %v2396_v27, %v2416_v45  ;;  %v2624_v47 = vmul.f32 0.5, %v2623_v59 }
0x122e   :  { %v2418_v48 = vmul.f32 %v2417_v46, %v2417_v46  ;;  %v2625_v49 = vsub.f32 %v2396_v27, %v2624_v47  ;;  %v2445_v27 = vpop.permute.xlu1 %2444 }
0x1230   :  { %v2419_v50 = vsel %vm357_vm2, %v2418_v48, 0.0  ;;  %v2626_v51 = vmul.f32 %v2625_v49, %v2625_v49  ;;  %v8084_v48 = vld [vmem:[%s13125_s12 + $0x6] sm:$0x3] }
0x1231   :  { %v2420_v52 = vrot.slane %v2419_v50, 4 }
0x1232   :  { %v2628_v53 = vrot.slane %v2626_v51, 2 }
0x1233   :  { %v2421_v54 = vadd.f32 %v2420_v52, %v2419_v50  ;;  %v9432_v52 = vld [vmem:[%s13133_s20 + $0x57c] ss:$100 sps:$4 sm:$0xff]  }
0x1234   :  { %v2630_v55 = vsel %vm357_vm2, %v2628_v53, 0.0 }
0x1235   :  { %v2422_v56 = vrot.slane %v2421_v54, 2  ;;  %v2631_v57 = vrot.slane %v2630_v55, 4 }
0x1237   :  { %v2423_v58 = vadd.f32 %v2422_v56, %v2421_v54  ;;  %v2632_v60 = vadd.f32 %v2631_v57, %v2630_v55  ;;  %v9430_v54 = vld [vmem:[%s13133_s20 + $0x578] ss:$100 sps:$4 sm:$0xff]   ;;  %v9434_v56 = vld [vmem:[%s13133_s20 + $0x4b0] ss:$100 sps:$4 sm:$0xff]  }
0x1238   :  { %v9436_v55 = vld [vmem:[%s13133_s20 + $0x4b4] ss:$100 sps:$4 sm:$0xff]   ;;  %v9440_v57 = vld [vmem:[%s13133_s20 + $0x3ec] ss:$100 sps:$4 sm:$0xff]  }
0x1239   :  { %v2424_v61 = vrot.slane %v2423_v58, 1  ;;  %v2633_v62 = vrot.slane %v2632_v60, 2 }
0x123b   :  { %v2425_v1 = vadd.f32 %v2424_v61, %v2423_v58  ;;  %v2634_v3 = vadd.f32 %v2633_v62, %v2632_v60  ;;  %v9438_v58 = vld [vmem:[%s13133_s20 + $0x3e8] ss:$100 sps:$4 sm:$0xff]   ;;  %v9442_v61 = vld [vmem:[%s13133_s20 + $0x320] ss:$100 sps:$4 sm:$0xff]  }
0x123c   :  { %v9444_v60 = vld [vmem:[%s13133_s20 + $0x324] ss:$100 sps:$4 sm:$0xff]   ;;  %v9448_v62 = vld [vmem:[%s13133_s20 + $0x25c] ss:$100 sps:$4 sm:$0xff]  }
0x123d   :  { %v2426_v4 = vmul.f32 0.5, %v2425_v1  ;;  %v2635_v36 = vrot.slane %v2634_v3, 1  ;;  %v9446_v1 = vld [vmem:[%s13133_s20 + $0x258] ss:$100 sps:$4 sm:$0xff]  }
0x123f   :  { %v2427_v5 = vadd.f32 1e-05, %v2426_v4  ;;  %v2636_v7 = vadd.f32 %v2635_v36, %v2634_v3  ;;  %v9449_v3 = vld [vmem:[%s13127_s14 + $0x18] sm:$0xff]   ;;  %v9450_v36 = vld [vmem:[%s13133_s20 + $0x190] ss:$100 sps:$4 sm:$0xff]  }
0x1240   :  { %v9452_v4 = vld [vmem:[%s13133_s20 + $0x194] ss:$100 sps:$4 sm:$0xff]  }
0x1241   :  { %10102 = vrsqrt.f32 %v2427_v5  ;;  %v2637_v8 = vmul.f32 0.5, %v2636_v7  ;;  %v9453_v5 = vld [vmem:[%s13127_s14 + $0x10] sm:$0xff]  }
0x1242   :  { %v9456_v7 = vld [vmem:[%s13133_s20 + $0xcc] ss:$100 sps:$4 sm:$0xff]  }
0x1243   :  { %v2638_v9 = vadd.f32 1e-05, %v2637_v8  ;;  %v9454_v8 = vld [vmem:[%s13133_s20 + $0xc8] ss:$100 sps:$4 sm:$0xff]  }
0x1245   :  { %10104 = vrsqrt.f32 %v2638_v9  ;;  %v9457_v9 = vld [vmem:[%s13127_s14 + $0x8] sm:$0xff]  }
0x124e   :  { %v10103_v10 = vpop.eup %10102 }
0x124f   :  { %v2429_v11 = vmul.f32 %v10103_v10, %v2417_v46  ;;  %v9460_v10 = vld [vmem:[%s13133_s20 + $0x4] ss:$100 sps:$4 sm:$0xff]  }
0x1251   :  { %v2435_v29 = vmul.f32 %v2433_v12, %v2429_v11  ;;  %v9458_v11 = vld [vmem:[%s13133_s20] ss:$100 sps:$4 sm:$0xff]  }
0x1252   :  { %v10105_v13 = vpop.eup %10104  ;;  %v9461_v12 = vld [vmem:[%s13127_s14] sm:$0xff]  }
0x1253   :  { %v2640_v16 = vmul.f32 %v10105_v13, %v2625_v49  ;;  %v2441_v17 = vadd.f32 %v2439_v14, %v2435_v29  ;;  %v9464_v29 = vld [vmem:[%s13133_s20 + $0x584] ss:$100 sps:$4 sm:$0xff]   ;;  %v9467_v13 = vld [vmem:[%s13133_s20 + $0x58c] ss:$100 sps:$4 sm:$0xff]  }
0x1255   :  { %9199 = vmatpush3.msk.msra.mxu0 %vm357_vm2, %v2441_v17  ;;  %v2643_v20 = vmul.f32 %v2641_v15, %v2640_v16  ;;  %v2535_v16 = vpop.permute.xlu0 %2534 }
0x1256   :  { %9201 = vmatmul.mubr.msk.f32.vlgmr.msra.gmra.mxu0 %vm397_vm3, %v8082_v18  ;;  %9208 = vmatprep.subr.mxu0 %v10168_v6 }
0x1257   :  { %v2646_v21 = vadd.f32 %v2644_v19, %v2643_v20  ;;  %9210 = vmatprep.mubr.msk.f32.mxu0 %vm10169_vm1, %v10168_v6  ;;  %v2804_v20 = vrot.slane %v10737_v32, 2 }
0x1259   :  { %v2648_v22 = vrot.slane %v2646_v21, 2 }
0x125b   :  { %9209 = vmatpush3.msk.msra.mxu0 %vm357_vm2, %v2648_v22 }
0x125c   :  { %9211 = vmatmul.mubr.msk.f32.vlgmr.msra.gmra.mxu0 %vm397_vm3, %v8082_v18  ;;  %9218 = vmatprep.subr.bf16.mxu0 %v10168_v6 }
0x125d   :  { %9234 = vmatprep.mubr.msk.bf16.mxu0 %vm10169_vm1, %v10168_v6  ;;  %9219 = vmatpush3.bf16.msra.mxu0 %v9433_v23 }
0x125e   :  { %9220 = vmatprep.subr.bf16.mxu0 %v10168_v6 }
0x1261   :  { %9221 = vmatpush3.bf16.msra.mxu0 %v9437_v24 }
0x1262   :  { %9222 = vmatprep.subr.bf16.mxu0 %v10168_v6 }
0x1265   :  { %9223 = vmatpush3.bf16.msra.mxu0 %v9441_v25 }
0x1266   :  { %9224 = vmatprep.subr.bf16.mxu0 %v10168_v6 }
0x1269   :  { %9225 = vmatpush3.bf16.msra.mxu0 %v9445_v26 }
0x126a   :  { %9226 = vmatprep.subr.bf16.mxu0 %v10168_v6 }
0x126d   :  { %9227 = vmatpush3.bf16.msra.mxu0 %v9449_v3  ;;  %v9513_v3 = vld [vmem:[%s13133_s20 + $0x598] ss:$100 sps:$4 sm:$0xff]  }
0x126e   :  { %9228 = vmatprep.subr.bf16.mxu0 %v10168_v6 }
0x1271   :  { %9229 = vmatpush3.bf16.msra.mxu0 %v9453_v5  ;;  %v9516_v5 = vld [vmem:[%s13133_s20 + $0x4c8] ss:$100 sps:$4 sm:$0xff]  }
0x1272   :  { %9230 = vmatprep.subr.bf16.mxu0 %v10168_v6 }
0x1275   :  { %9231 = vmatpush3.bf16.msra.mxu0 %v9457_v9  ;;  %v9527_v9 = vld [vmem:[%s13133_s20 + $0x40c] ss:$100 sps:$4 sm:$0xff]  }
0x1276   :  { %9232 = vmatprep.subr.bf16.mxu0 %v10168_v6 }
0x1279   :  { %9233 = vmatpush3.bf16.msra.mxu0 %v9461_v12  ;;  %v9530_v12 = vld [vmem:[%s13133_s20 + $0x33c] ss:$100 sps:$4 sm:$0xff]  }
0x127a   :  { %4190 = vmatprep.subr.bf16.mxu0 %v9464_v29  ;;  %v9533_v29 = vld [vmem:[%s13133_s20 + $0x344] ss:$100 sps:$4 sm:$0xff]  }
0x1316   :  { %v2519_v28 = vpop.f32.mrf.mxu0 }
0x1317   :  { %v2520_v30 = vadd.f32 %v2519_v28, %v2445_v27 }
0x1318   :  { %v9202_v31 = vpop.f32.mrf.mxu0 }
0x1319   :  { %v2524_v33 = vmul.f32 0.044715, %v2520_v30  ;;  %v2523_v59 = vmul.f32 0.5, %v2520_v30  ;;  %v9462_v31 = vld [vmem:[%s13133_s20 + $0x580] ss:$100 sps:$4 sm:$0xff]  }
0x131b   :  { %v2525_v34 = vmul.f32 %v2524_v33, %v2520_v30  ;;  %v9465_v33 = vld [vmem:[%s13133_s20 + $0x588] ss:$100 sps:$4 sm:$0xff]  }
0x131c   :  { %v2717_v35 = vpop.f32.mrf.mxu0 }
0x131d   :  { %v2526_v63 = vmul.f32 %v2525_v34, %v2520_v30  ;;  %v2718_v38 = vadd.f32 %v2717_v35, %v2445_v27  ;;  %v9473_v35 = vld [vmem:[%s13133_s20 + $0x4c4] ss:$100 sps:$4 sm:$0xff]  }
0x131e   :  { %v9212_v39 = vpop.f32.mrf.mxu0 }
0x131f   :  { %v2527_v40 = vadd.f32 %v2526_v63, %v2520_v30  ;;  %v2722_v2 = vmul.f32 0.044715, %v2718_v38  ;;  %v2721_v50 = vmul.f32 0.5, %v2718_v38  ;;  %v9468_v63 = vld [vmem:[%s13133_s20 + $0x4b8] ss:$100 sps:$4 sm:$0xff]  }
0x1320   :  { %v9476_v39 = vld [vmem:[%s13133_s20 + $0x3f4] ss:$100 sps:$4 sm:$0xff]  }
0x1321   :  { %v2528_v41 = vmul.f32 0.7978846, %v2527_v40  ;;  %v2723_v42 = vmul.f32 %v2722_v2, %v2718_v38  ;;  %v9479_v40 = vld [vmem:[%s13133_s20 + $0x3fc] ss:$100 sps:$4 sm:$0xff]   ;;  %v9474_v2 = vld [vmem:[%s13133_s20 + $0x3f0] ss:$100 sps:$4 sm:$0xff]  }
0x1323   :  { %10106 = vtanh.f32 %v2528_v41  ;;  %v2724_v43 = vmul.f32 %v2723_v42, %v2718_v38  ;;  %v9477_v41 = vld [vmem:[%s13133_s20 + $0x3f8] ss:$100 sps:$4 sm:$0xff]   ;;  %v9482_v42 = vld [vmem:[%s13133_s20 + $0x32c] ss:$100 sps:$4 sm:$0xff]  }
0x1325   :  { %v2725_v44 = vadd.f32 %v2724_v43, %v2718_v38  ;;  %v9471_v38 = vld [vmem:[%s13133_s20 + $0x4c0] ss:$100 sps:$4 sm:$0xff]   ;;  %v9485_v43 = vld [vmem:[%s13133_s20 + $0x334] ss:$100 sps:$4 sm:$0xff]  }
0x1327   :  { %v2726_v0 = vmul.f32 0.7978846, %v2725_v44  ;;  %v9480_v44 = vld [vmem:[%s13133_s20 + $0x328] ss:$100 sps:$4 sm:$0xff]  }
0x1329   :  { %10108 = vtanh.f32 %v2726_v0  ;;  %v9483_v0 = vld [vmem:[%s13133_s20 + $0x330] ss:$100 sps:$4 sm:$0xff]  }
0x1330   :  { %v10107_v45 = vpop.eup %10106 }
0x1331   :  { %v2530_v46 = vadd.f32 1.0, %v10107_v45  ;;  %v9488_v45 = vld [vmem:[%s13133_s20 + $0x264] ss:$100 sps:$4 sm:$0xff]  }
0x1333   :  { %v2531_v47 = vmul.f32 %v2530_v46, %v2523_v59  ;;  %v9491_v59 = vld [vmem:[%s13133_s20 + $0x26c] ss:$100 sps:$4 sm:$0xff]   ;;  %v9486_v46 = vld [vmem:[%s13133_s20 + $0x260] ss:$100 sps:$4 sm:$0xff]  }
0x1335   :  { %9204 = vmatpush3.msk.msra.mxu1 %vm357_vm2, %v2531_v47  ;;  %v9489_v47 = vld [vmem:[%s13133_s20 + $0x268] ss:$100 sps:$4 sm:$0xff]  }
0x1336   :  { %v10109_v49 = vpop.eup %10108  ;;  %9206 = vmatmul.mubr.msk.f32.vlgmr.msra.gmra.mxu1 %vm397_vm3, %v8084_v48  ;;  %9213 = vmatprep.subr.mxu1 %v10168_v6 }
0x1337   :  { %v2728_v51 = vadd.f32 1.0, %v10109_v49  ;;  %9215 = vmatprep.mubr.msk.f32.mxu1 %vm10169_vm1, %v10168_v6  ;;  %v9497_v49 = vld [vmem:[%s13133_s20 + $0x1a4] ss:$100 sps:$4 sm:$0xff]  }
0x1339   :  { %v2729_v53 = vmul.f32 %v2728_v51, %v2721_v50  ;;  %v9492_v50 = vld [vmem:[%s13133_s20 + $0x198] ss:$100 sps:$4 sm:$0xff]   ;;  %v9495_v51 = vld [vmem:[%s13133_s20 + $0x1a0] ss:$100 sps:$4 sm:$0xff]  }
0x133b   :  { %9214 = vmatpush3.msk.msra.mxu1 %vm357_vm2, %v2729_v53  ;;  %v9503_v53 = vld [vmem:[%s13133_s20 + $0xdc] ss:$100 sps:$4 sm:$0xff]  }
0x133c   :  { %9216 = vmatmul.mubr.msk.f32.vlgmr.msra.gmra.mxu1 %vm397_vm3, %v8084_v48  ;;  %4149 = vmatprep.subr.bf16.mxu1 %v9432_v52  ;;  %v9494_v48 = vld [vmem:[%s13133_s20 + $0x19c] ss:$100 sps:$4 sm:$0xff]   ;;  %v9500_v52 = vld [vmem:[%s13133_s20 + $0xd4] ss:$100 sps:$4 sm:$0xff]  }
0x133d   :  { %4150 = vmatpush1.bf16.msra.mxu1 %v9430_v54  ;;  %4181 = vmatprep.mubr.bf16.mxu1 %v10170_v37  ;;  %v9498_v54 = vld [vmem:[%s13133_s20 + $0xd0] ss:$100 sps:$4 sm:$0xff]  }
0x133e   :  { %4151 = vmatprep.subr.bf16.mxu1 %v9436_v55  ;;  %v9501_v55 = vld [vmem:[%s13133_s20 + $0xd8] ss:$100 sps:$4 sm:$0xff]  }
0x1341   :  { %4152 = vmatpush1.bf16.msra.mxu1 %v9434_v56  ;;  %v9506_v56 = vld [vmem:[%s13133_s20 + $0xc] ss:$100 sps:$4 sm:$0xff]  }
0x1342   :  { %4153 = vmatprep.subr.bf16.mxu1 %v9440_v57  ;;  %v9509_v57 = vld [vmem:[%s13133_s20 + $0x14] ss:$100 sps:$4 sm:$0xff]  }
0x1345   :  { %4154 = vmatpush1.bf16.msra.mxu1 %v9438_v58  ;;  %v9504_v58 = vld [vmem:[%s13133_s20 + $0x8] ss:$100 sps:$4 sm:$0xff]  }
0x1346   :  { %4155 = vmatprep.subr.bf16.mxu1 %v9444_v60  ;;  %v9507_v60 = vld [vmem:[%s13133_s20 + $0x10] ss:$100 sps:$4 sm:$0xff]  }
0x1349   :  { %4156 = vmatpush1.bf16.msra.mxu1 %v9442_v61  ;;  %v9512_v61 = vld [vmem:[%s13133_s20 + $0x594] ss:$100 sps:$4 sm:$0xff]  }
0x134a   :  { %4157 = vmatprep.subr.bf16.mxu1 %v9448_v62  ;;  %v9515_v62 = vld [vmem:[%s13133_s20 + $0x59c] ss:$100 sps:$4 sm:$0xff]  }
0x134d   :  { %4158 = vmatpush1.bf16.msra.mxu1 %v9446_v1  ;;  %v9510_v1 = vld [vmem:[%s13133_s20 + $0x590] ss:$100 sps:$4 sm:$0xff]  }
0x134e   :  { %4159 = vmatprep.subr.bf16.mxu1 %v9452_v4  ;;  %v9518_v4 = vld [vmem:[%s13133_s20 + $0x4cc] ss:$100 sps:$4 sm:$0xff]  }
0x1351   :  { %4160 = vmatpush1.bf16.msra.mxu1 %v9450_v36  ;;  %v9521_v36 = vld [vmem:[%s13133_s20 + $0x4d4] ss:$100 sps:$4 sm:$0xff]  }
0x1352   :  { %4161 = vmatprep.subr.bf16.mxu1 %v9456_v7  ;;  %v9519_v7 = vld [vmem:[%s13133_s20 + $0x4d0] ss:$100 sps:$4 sm:$0xff]  }
0x1355   :  { %4162 = vmatpush1.bf16.msra.mxu1 %v9454_v8  ;;  %v9524_v8 = vld [vmem:[%s13133_s20 + $0x404] ss:$100 sps:$4 sm:$0xff]  }
0x1356   :  { %4163 = vmatprep.subr.bf16.mxu1 %v9460_v10  ;;  %v9522_v10 = vld [vmem:[%s13133_s20 + $0x400] ss:$100 sps:$4 sm:$0xff]  }
0x1359   :  { %4164 = vmatpush1.bf16.msra.mxu1 %v9458_v11  ;;  %v9525_v11 = vld [vmem:[%s13133_s20 + $0x408] ss:$100 sps:$4 sm:$0xff]  }
0x135a   :  { %4231 = vmatprep.subr.bf16.mxu1 %v9467_v13  ;;  %v9528_v13 = vld [vmem:[%s13133_s20 + $0x338] ss:$100 sps:$4 sm:$0xff]  }
0x13f6   :  { %v2609_v14 = vpop.f32.mrf.mxu1 }
0x13f7   :  { %v2610_v18 = vadd.f32 %v2609_v14, %v2535_v16  ;;  %v9531_v14 = vld [vmem:[%s13133_s20 + $0x340] ss:$100 sps:$4 sm:$0xff]  }
0x13f8   :  { %v9207_v15 = vpop.f32.mrf.mxu1 }
0x13f9   :  { %v2613_v23 = vadd.f32 %v2610_v18, %v10737_v32  ;;  %v9470_v32 = vld [vmem:[%s13133_s20 + $0x4bc] ss:$100 sps:$4 sm:$0xff]   ;;  %v9536_v15 = vld [vmem:[%s13133_s20 + $0x274] ss:$100 sps:$4 sm:$0xff]  }
0x13fa   :  { %v9537_v18 = vld [vmem:[%s13133_s20 + $0x278] ss:$100 sps:$4 sm:$0xff]  }
0x13fc   :  { %v2799_v17 = vpop.f32.mrf.mxu1 }
0x13fd   :  { %v2800_v19 = vadd.f32 %v2799_v17, %v2535_v16  ;;  %v9539_v16 = vld [vmem:[%s13133_s20 + $0x27c] ss:$100 sps:$4 sm:$0xff]   ;;  %v9534_v17 = vld [vmem:[%s13133_s20 + $0x270] ss:$100 sps:$4 sm:$0xff]  }
0x13fe   :  { %v9217_v21 = vpop.f32.mrf.mxu1 }
0x13ff   :  { %v2806_v22 = vadd.f32 %v2804_v20, %v2800_v19  ;;  %v9542_v19 = vld [vmem:[%s13133_s20 + $0x1ac] ss:$100 sps:$4 sm:$0xff]   ;;  %v9545_v20 = vld [vmem:[%s13133_s20 + $0x1b4] ss:$100 sps:$4 sm:$0xff]  }
0x1400   :  { %v9540_v21 = vld [vmem:[%s13133_s20 + $0x1a8] ss:$100 sps:$4 sm:$0xff]  }
0x1401   :  { %v2808_v24 = vrot.slane %v2806_v22, 6  ;;  %v9543_v22 = vld [vmem:[%s13133_s20 + $0x1b0] ss:$100 sps:$4 sm:$0xff]  }
0x1403   :  { %v2810_v25 = vsel %vm357_vm2, %v2613_v23, %v2808_v24  ;;  %v9548_v23 = vld [vmem:[%s13133_s20 + $0xe4] ss:$100 sps:$4 sm:$0xff]   ;;  %v9551_v24 = vld [vmem:[%s13133_s20 + $0xec] ss:$100 sps:$4 sm:$0xff]  }
0x1404   :  { %v2817_v26 = vrot.slane %v2810_v25, 1  ;;  %v4835_v27 = vrot.slane %v2810_v25, 2 }
0x1406   :  { %v2820_v28 = vsel %vm2819_vm4, %v2810_v25, %v2817_v26  ;;  %v10952_v30 = vsel %vm2819_vm4, %v2817_v26, %v4835_v27  ;;  %v9546_v25 = vld [vmem:[%s13133_s20 + $0xe0] ss:$100 sps:$4 sm:$0xff]   ;;  %v9549_v26 = vld [vmem:[%s13133_s20 + $0xe8] ss:$100 sps:$4 sm:$0xff]  }
0x1407   :  { %v10960_v34 = vpack.c.bf16 %v2820_v28, %v2820_v28  ;;  %v9554_v27 = vld [vmem:[%s13133_s20 + $0x1c] ss:$100 sps:$4 sm:$0xff]   ;;  %v9557_v28 = vld [vmem:[%s13133_s20 + $0x24] ss:$100 sps:$4 sm:$0xff]  }
0x1409   :  { %9235 = vmatmul.mubr.bf16.vlgmr.msra.gmra.mxu0 %v10960_v34  ;;  %4182 = vmatmul.mubr.bf16.vlgmr.msra.gmra.mxu1 %v10960_v34 }
0x140a   :  { %4191 = vmatpush1.bf16.msra.mxu0 %v9462_v31  ;;  %4232 = vmatpush1.bf16.msra.mxu1 %v9465_v33  ;;  %v9552_v31 = vld [vmem:[%s13133_s20 + $0x18] ss:$100 sps:$4 sm:$0xff]   ;;  %v9555_v33 = vld [vmem:[%s13133_s20 + $0x20] ss:$100 sps:$4 sm:$0xff]  }
0x140b   :  { %4192 = vmatprep.subr.bf16.mxu0 %v9470_v32  ;;  %4233 = vmatprep.subr.bf16.mxu1 %v9473_v35  ;;  %v9560_v32 = vld [vmem:[%s13133_s20 + $0x5a4] ss:$100 sps:$4 sm:$0xff]   ;;  %v9563_v35 = vld [vmem:[%s13133_s20 + $0x5ac] ss:$100 sps:$4 sm:$0xff]  }
0x140c   :  { %4222 = vmatprep.mubr.bf16.mxu0 %v10170_v37  ;;  %4263 = vmatprep.mubr.bf16.mxu1 %v10170_v37 }
0x140e   :  { %4193 = vmatpush1.bf16.msra.mxu0 %v9468_v63  ;;  %4234 = vmatpush1.bf16.msra.mxu1 %v9471_v38  ;;  %v9558_v63 = vld [vmem:[%s13133_s20 + $0x5a0] ss:$100 sps:$4 sm:$0xff]   ;;  %v9561_v38 = vld [vmem:[%s13133_s20 + $0x5a8] ss:$100 sps:$4 sm:$0xff]  }
0x140f   :  { %4194 = vmatprep.subr.bf16.mxu0 %v9476_v39  ;;  %4235 = vmatprep.subr.bf16.mxu1 %v9479_v40  ;;  %v9566_v39 = vld [vmem:[%s13133_s20 + $0x4dc] ss:$100 sps:$4 sm:$0xff]   ;;  %v9569_v40 = vld [vmem:[%s13133_s20 + $0x4e4] ss:$100 sps:$4 sm:$0xff]  }
0x1412   :  { %4195 = vmatpush1.bf16.msra.mxu0 %v9474_v2  ;;  %4236 = vmatpush1.bf16.msra.mxu1 %v9477_v41  ;;  %v9564_v2 = vld [vmem:[%s13133_s20 + $0x4d8] ss:$100 sps:$4 sm:$0xff]   ;;  %v9567_v41 = vld [vmem:[%s13133_s20 + $0x4e0] ss:$100 sps:$4 sm:$0xff]  }
0x1413   :  { %4196 = vmatprep.subr.bf16.mxu0 %v9482_v42  ;;  %4237 = vmatprep.subr.bf16.mxu1 %v9485_v43  ;;  %v9572_v42 = vld [vmem:[%s13133_s20 + $0x414] ss:$100 sps:$4 sm:$0xff]   ;;  %v9575_v43 = vld [vmem:[%s13133_s20 + $0x41c] ss:$100 sps:$4 sm:$0xff]  }
0x1416   :  { %4197 = vmatpush1.bf16.msra.mxu0 %v9480_v44  ;;  %4238 = vmatpush1.bf16.msra.mxu1 %v9483_v0  ;;  %v9570_v44 = vld [vmem:[%s13133_s20 + $0x410] ss:$100 sps:$4 sm:$0xff]   ;;  %v9573_v0 = vld [vmem:[%s13133_s20 + $0x418] ss:$100 sps:$4 sm:$0xff]  }
0x1417   :  { %4198 = vmatprep.subr.bf16.mxu0 %v9488_v45  ;;  %4239 = vmatprep.subr.bf16.mxu1 %v9491_v59  ;;  %v9578_v45 = vld [vmem:[%s13133_s20 + $0x34c] ss:$100 sps:$4 sm:$0xff]   ;;  %v9581_v59 = vld [vmem:[%s13133_s20 + $0x354] ss:$100 sps:$4 sm:$0xff]  }
0x141a   :  { %4199 = vmatpush1.bf16.msra.mxu0 %v9486_v46  ;;  %4240 = vmatpush1.bf16.msra.mxu1 %v9489_v47  ;;  %v9576_v46 = vld [vmem:[%s13133_s20 + $0x348] ss:$100 sps:$4 sm:$0xff]   ;;  %v9579_v47 = vld [vmem:[%s13133_s20 + $0x350] ss:$100 sps:$4 sm:$0xff]  }
0x141b   :  { %4200 = vmatprep.subr.bf16.mxu0 %v9494_v48  ;;  %4241 = vmatprep.subr.bf16.mxu1 %v9497_v49  ;;  %v9584_v48 = vld [vmem:[%s13133_s20 + $0x284] ss:$100 sps:$4 sm:$0xff]   ;;  %v9587_v49 = vld [vmem:[%s13133_s20 + $0x28c] ss:$100 sps:$4 sm:$0xff]  }
0x141e   :  { %4201 = vmatpush1.bf16.msra.mxu0 %v9492_v50  ;;  %4242 = vmatpush1.bf16.msra.mxu1 %v9495_v51  ;;  %v9582_v50 = vld [vmem:[%s13133_s20 + $0x280] ss:$100 sps:$4 sm:$0xff]   ;;  %v9585_v51 = vld [vmem:[%s13133_s20 + $0x288] ss:$100 sps:$4 sm:$0xff]  }
0x141f   :  { %4202 = vmatprep.subr.bf16.mxu0 %v9500_v52  ;;  %4243 = vmatprep.subr.bf16.mxu1 %v9503_v53  ;;  %v9590_v52 = vld [vmem:[%s13133_s20 + $0x1bc] ss:$100 sps:$4 sm:$0xff]   ;;  %v9593_v53 = vld [vmem:[%s13133_s20 + $0x1c4] ss:$100 sps:$4 sm:$0xff]  }
0x1422   :  { %4203 = vmatpush1.bf16.msra.mxu0 %v9498_v54  ;;  %4244 = vmatpush1.bf16.msra.mxu1 %v9501_v55  ;;  %v9588_v54 = vld [vmem:[%s13133_s20 + $0x1b8] ss:$100 sps:$4 sm:$0xff]   ;;  %v9591_v55 = vld [vmem:[%s13133_s20 + $0x1c0] ss:$100 sps:$4 sm:$0xff]  }
0x1423   :  { %4204 = vmatprep.subr.bf16.mxu0 %v9506_v56  ;;  %4245 = vmatprep.subr.bf16.mxu1 %v9509_v57  ;;  %v9596_v56 = vld [vmem:[%s13133_s20 + $0xf4] ss:$100 sps:$4 sm:$0xff]   ;;  %v9599_v57 = vld [vmem:[%s13133_s20 + $0xfc] ss:$100 sps:$4 sm:$0xff]  }
0x1426   :  { %4205 = vmatpush1.bf16.msra.mxu0 %v9504_v58  ;;  %4246 = vmatpush1.bf16.msra.mxu1 %v9507_v60  ;;  %v9594_v58 = vld [vmem:[%s13133_s20 + $0xf0] ss:$100 sps:$4 sm:$0xff]   ;;  %v9597_v60 = vld [vmem:[%s13133_s20 + $0xf8] ss:$100 sps:$4 sm:$0xff]  }
0x1427   :  { %4272 = vmatprep.subr.bf16.mxu0 %v9512_v61  ;;  %4313 = vmatprep.subr.bf16.mxu1 %v9515_v62  ;;  %v9602_v61 = vld [vmem:[%s13133_s20 + $0x2c] ss:$100 sps:$4 sm:$0xff]   ;;  %v9605_v62 = vld [vmem:[%s13133_s20 + $0x34] ss:$100 sps:$4 sm:$0xff]  }
0x1429   :  { %4223 = vmatmul.mubr.bf16.vlgmr.msra.gmra.mxu0 %v10960_v34  ;;  %4264 = vmatmul.mubr.bf16.vlgmr.msra.gmra.mxu1 %v10960_v34 }
0x142a   :  { %4273 = vmatpush1.bf16.msra.mxu0 %v9510_v1  ;;  %4314 = vmatpush1.bf16.msra.mxu1 %v9513_v3  ;;  %v9600_v1 = vld [vmem:[%s13133_s20 + $0x28] ss:$100 sps:$4 sm:$0xff]   ;;  %v9603_v3 = vld [vmem:[%s13133_s20 + $0x30] ss:$100 sps:$4 sm:$0xff]  }
0x142b   :  { %4274 = vmatprep.subr.bf16.mxu0 %v9518_v4  ;;  %4315 = vmatprep.subr.bf16.mxu1 %v9521_v36  ;;  %v9608_v4 = vld [vmem:[%s13133_s20 + $0x5b4] ss:$100 sps:$4 sm:$0xff]   ;;  %v9611_v36 = vld [vmem:[%s13133_s20 + $0x5bc] ss:$100 sps:$4 sm:$0xff]  }
0x142c   :  { %4304 = vmatprep.mubr.bf16.mxu0 %v10170_v37  ;;  %4345 = vmatprep.mubr.bf16.mxu1 %v10170_v37 }
0x142e   :  { %4275 = vmatpush1.bf16.msra.mxu0 %v9516_v5  ;;  %4316 = vmatpush1.bf16.msra.mxu1 %v9519_v7  ;;  %v9606_v5 = vld [vmem:[%s13133_s20 + $0x5b0] ss:$100 sps:$4 sm:$0xff]   ;;  %v9609_v7 = vld [vmem:[%s13133_s20 + $0x5b8] ss:$100 sps:$4 sm:$0xff]  }
0x142f   :  { %4276 = vmatprep.subr.bf16.mxu0 %v9524_v8  ;;  %4317 = vmatprep.subr.bf16.mxu1 %v9527_v9  ;;  %v9614_v8 = vld [vmem:[%s13133_s20 + $0x4ec] ss:$100 sps:$4 sm:$0xff]   ;;  %v9617_v9 = vld [vmem:[%s13133_s20 + $0x4f4] ss:$100 sps:$4 sm:$0xff]  }
0x1432   :  { %4277 = vmatpush1.bf16.msra.mxu0 %v9522_v10  ;;  %4318 = vmatpush1.bf16.msra.mxu1 %v9525_v11  ;;  %v9612_v10 = vld [vmem:[%s13133_s20 + $0x4e8] ss:$100 sps:$4 sm:$0xff]   ;;  %v9615_v11 = vld [vmem:[%s13133_s20 + $0x4f0] ss:$100 sps:$4 sm:$0xff]  }
0x1433   :  { %4278 = vmatprep.subr.bf16.mxu0 %v9530_v12  ;;  %4319 = vmatprep.subr.bf16.mxu1 %v9533_v29  ;;  %v9620_v12 = vld [vmem:[%s13133_s20 + $0x424] ss:$100 sps:$4 sm:$0xff]   ;;  %v9623_v29 = vld [vmem:[%s13133_s20 + $0x42c] ss:$100 sps:$4 sm:$0xff]  }
0x1436   :  { %4279 = vmatpush1.bf16.msra.mxu0 %v9528_v13  ;;  %4320 = vmatpush1.bf16.msra.mxu1 %v9531_v14  ;;  %v9618_v13 = vld [vmem:[%s13133_s20 + $0x420] ss:$100 sps:$4 sm:$0xff]   ;;  %v9621_v14 = vld [vmem:[%s13133_s20 + $0x428] ss:$100 sps:$4 sm:$0xff]  }
0x1437   :  { %4280 = vmatprep.subr.bf16.mxu0 %v9536_v15  ;;  %4321 = vmatprep.subr.bf16.mxu1 %v9539_v16  ;;  %v9626_v15 = vld [vmem:[%s13133_s20 + $0x35c] ss:$100 sps:$4 sm:$0xff]   ;;  %v9629_v16 = vld [vmem:[%s13133_s20 + $0x364] ss:$100 sps:$4 sm:$0xff]  }
0x143a   :  { %4281 = vmatpush1.bf16.msra.mxu0 %v9534_v17  ;;  %4322 = vmatpush1.bf16.msra.mxu1 %v9537_v18  ;;  %v9624_v17 = vld [vmem:[%s13133_s20 + $0x358] ss:$100 sps:$4 sm:$0xff]   ;;  %v9627_v18 = vld [vmem:[%s13133_s20 + $0x360] ss:$100 sps:$4 sm:$0xff]  }
0x143b   :  { %4282 = vmatprep.subr.bf16.mxu0 %v9542_v19  ;;  %4323 = vmatprep.subr.bf16.mxu1 %v9545_v20  ;;  %v9632_v19 = vld [vmem:[%s13133_s20 + $0x294] ss:$100 sps:$4 sm:$0xff]   ;;  %v9635_v20 = vld [vmem:[%s13133_s20 + $0x29c] ss:$100 sps:$4 sm:$0xff]  }
0x143e   :  { %4283 = vmatpush1.bf16.msra.mxu0 %v9540_v21  ;;  %4324 = vmatpush1.bf16.msra.mxu1 %v9543_v22  ;;  %v9630_v21 = vld [vmem:[%s13133_s20 + $0x290] ss:$100 sps:$4 sm:$0xff]   ;;  %v9633_v22 = vld [vmem:[%s13133_s20 + $0x298] ss:$100 sps:$4 sm:$0xff]  }
0x143f   :  { %4284 = vmatprep.subr.bf16.mxu0 %v9548_v23  ;;  %4325 = vmatprep.subr.bf16.mxu1 %v9551_v24  ;;  %v9638_v23 = vld [vmem:[%s13133_s20 + $0x1cc] ss:$100 sps:$4 sm:$0xff]   ;;  %v9641_v24 = vld [vmem:[%s13133_s20 + $0x1d4] ss:$100 sps:$4 sm:$0xff]  }
0x1442   :  { %4285 = vmatpush1.bf16.msra.mxu0 %v9546_v25  ;;  %4326 = vmatpush1.bf16.msra.mxu1 %v9549_v26  ;;  %v9636_v25 = vld [vmem:[%s13133_s20 + $0x1c8] ss:$100 sps:$4 sm:$0xff]   ;;  %v9639_v26 = vld [vmem:[%s13133_s20 + $0x1d0] ss:$100 sps:$4 sm:$0xff]  }
0x1443   :  { %4286 = vmatprep.subr.bf16.mxu0 %v9554_v27  ;;  %4327 = vmatprep.subr.bf16.mxu1 %v9557_v28  ;;  %v9644_v27 = vld [vmem:[%s13133_s20 + $0x104] ss:$100 sps:$4 sm:$0xff]   ;;  %v9647_v28 = vld [vmem:[%s13133_s20 + $0x10c] ss:$100 sps:$4 sm:$0xff]  }
0x1446   :  { %4287 = vmatpush1.bf16.msra.mxu0 %v9552_v31  ;;  %4328 = vmatpush1.bf16.msra.mxu1 %v9555_v33  ;;  %v9642_v31 = vld [vmem:[%s13133_s20 + $0x100] ss:$100 sps:$4 sm:$0xff]   ;;  %v9645_v33 = vld [vmem:[%s13133_s20 + $0x108] ss:$100 sps:$4 sm:$0xff]  }
0x1447   :  { %4354 = vmatprep.subr.bf16.mxu0 %v9560_v32  ;;  %4395 = vmatprep.subr.bf16.mxu1 %v9563_v35  ;;  %v9650_v32 = vld [vmem:[%s13133_s20 + $0x3c] ss:$100 sps:$4 sm:$0xff]   ;;  %v9653_v35 = vld [vmem:[%s13133_s20 + $0x44] ss:$100 sps:$4 sm:$0xff]  }
0x1449   :  { %4305 = vmatmul.mubr.bf16.vlgmr.msra.gmra.mxu0 %v10960_v34  ;;  %4346 = vmatmul.mubr.bf16.vlgmr.msra.gmra.mxu1 %v10960_v34 }
0x144a   :  { %4355 = vmatpush1.bf16.msra.mxu0 %v9558_v63  ;;  %4396 = vmatpush1.bf16.msra.mxu1 %v9561_v38  ;;  %v9648_v63 = vld [vmem:[%s13133_s20 + $0x38] ss:$100 sps:$4 sm:$0xff]   ;;  %v9651_v38 = vld [vmem:[%s13133_s20 + $0x40] ss:$100 sps:$4 sm:$0xff]  }
0x144b   :  { %4356 = vmatprep.subr.bf16.mxu0 %v9566_v39  ;;  %4397 = vmatprep.subr.bf16.mxu1 %v9569_v40  ;;  %v9656_v39 = vld [vmem:[%s13133_s20 + $0x5c4] ss:$100 sps:$4 sm:$0xff]   ;;  %v9659_v40 = vld [vmem:[%s13133_s20 + $0x5cc] ss:$100 sps:$4 sm:$0xff]  }
0x144c   :  { %4386 = vmatprep.mubr.bf16.mxu0 %v10170_v37  ;;  %4427 = vmatprep.mubr.bf16.mxu1 %v10170_v37 }
0x144e   :  { %4357 = vmatpush1.bf16.msra.mxu0 %v9564_v2  ;;  %4398 = vmatpush1.bf16.msra.mxu1 %v9567_v41  ;;  %v9654_v2 = vld [vmem:[%s13133_s20 + $0x5c0] ss:$100 sps:$4 sm:$0xff]   ;;  %v9657_v41 = vld [vmem:[%s13133_s20 + $0x5c8] ss:$100 sps:$4 sm:$0xff]  }
0x144f   :  { %4358 = vmatprep.subr.bf16.mxu0 %v9572_v42  ;;  %4399 = vmatprep.subr.bf16.mxu1 %v9575_v43  ;;  %v9662_v42 = vld [vmem:[%s13133_s20 + $0x4fc] ss:$100 sps:$4 sm:$0xff]   ;;  %v9665_v43 = vld [vmem:[%s13133_s20 + $0x504] ss:$100 sps:$4 sm:$0xff]  }
0x1452   :  { %4359 = vmatpush1.bf16.msra.mxu0 %v9570_v44  ;;  %4400 = vmatpush1.bf16.msra.mxu1 %v9573_v0  ;;  %v9660_v44 = vld [vmem:[%s13133_s20 + $0x4f8] ss:$100 sps:$4 sm:$0xff]   ;;  %v9663_v0 = vld [vmem:[%s13133_s20 + $0x500] ss:$100 sps:$4 sm:$0xff]  }
0x1453   :  { %4360 = vmatprep.subr.bf16.mxu0 %v9578_v45  ;;  %4401 = vmatprep.subr.bf16.mxu1 %v9581_v59  ;;  %v9668_v45 = vld [vmem:[%s13133_s20 + $0x434] ss:$100 sps:$4 sm:$0xff]   ;;  %v9671_v59 = vld [vmem:[%s13133_s20 + $0x43c] ss:$100 sps:$4 sm:$0xff]  }
0x1456   :  { %4361 = vmatpush1.bf16.msra.mxu0 %v9576_v46  ;;  %4402 = vmatpush1.bf16.msra.mxu1 %v9579_v47  ;;  %v9666_v46 = vld [vmem:[%s13133_s20 + $0x430] ss:$100 sps:$4 sm:$0xff]   ;;  %v9669_v47 = vld [vmem:[%s13133_s20 + $0x438] ss:$100 sps:$4 sm:$0xff]  }
0x1457   :  { %4362 = vmatprep.subr.bf16.mxu0 %v9584_v48  ;;  %4403 = vmatprep.subr.bf16.mxu1 %v9587_v49  ;;  %v9674_v48 = vld [vmem:[%s13133_s20 + $0x36c] ss:$100 sps:$4 sm:$0xff]   ;;  %v9677_v49 = vld [vmem:[%s13133_s20 + $0x374] ss:$100 sps:$4 sm:$0xff]  }
0x145a   :  { %4363 = vmatpush1.bf16.msra.mxu0 %v9582_v50  ;;  %4404 = vmatpush1.bf16.msra.mxu1 %v9585_v51  ;;  %v9672_v50 = vld [vmem:[%s13133_s20 + $0x368] ss:$100 sps:$4 sm:$0xff]   ;;  %v9675_v51 = vld [vmem:[%s13133_s20 + $0x370] ss:$100 sps:$4 sm:$0xff]  }
0x145b   :  { %4364 = vmatprep.subr.bf16.mxu0 %v9590_v52  ;;  %4405 = vmatprep.subr.bf16.mxu1 %v9593_v53  ;;  %v9680_v52 = vld [vmem:[%s13133_s20 + $0x2a4] ss:$100 sps:$4 sm:$0xff]   ;;  %v9683_v53 = vld [vmem:[%s13133_s20 + $0x2ac] ss:$100 sps:$4 sm:$0xff]  }
0x145e   :  { %4365 = vmatpush1.bf16.msra.mxu0 %v9588_v54  ;;  %4406 = vmatpush1.bf16.msra.mxu1 %v9591_v55  ;;  %v9678_v54 = vld [vmem:[%s13133_s20 + $0x2a0] ss:$100 sps:$4 sm:$0xff]   ;;  %v9681_v55 = vld [vmem:[%s13133_s20 + $0x2a8] ss:$100 sps:$4 sm:$0xff]  }
0x145f   :  { %4366 = vmatprep.subr.bf16.mxu0 %v9596_v56  ;;  %4407 = vmatprep.subr.bf16.mxu1 %v9599_v57  ;;  %v9686_v56 = vld [vmem:[%s13133_s20 + $0x1dc] ss:$100 sps:$4 sm:$0xff]   ;;  %v9689_v57 = vld [vmem:[%s13133_s20 + $0x1e4] ss:$100 sps:$4 sm:$0xff]  }
0x1462   :  { %4367 = vmatpush1.bf16.msra.mxu0 %v9594_v58  ;;  %4408 = vmatpush1.bf16.msra.mxu1 %v9597_v60  ;;  %v9684_v58 = vld [vmem:[%s13133_s20 + $0x1d8] ss:$100 sps:$4 sm:$0xff]   ;;  %v9687_v60 = vld [vmem:[%s13133_s20 + $0x1e0] ss:$100 sps:$4 sm:$0xff]  }
0x1463   :  { %4368 = vmatprep.subr.bf16.mxu0 %v9602_v61  ;;  %4409 = vmatprep.subr.bf16.mxu1 %v9605_v62  ;;  %v9692_v61 = vld [vmem:[%s13133_s20 + $0x114] ss:$100 sps:$4 sm:$0xff]   ;;  %v9695_v62 = vld [vmem:[%s13133_s20 + $0x11c] ss:$100 sps:$4 sm:$0xff]  }
0x1466   :  { %4369 = vmatpush1.bf16.msra.mxu0 %v9600_v1  ;;  %4410 = vmatpush1.bf16.msra.mxu1 %v9603_v3  ;;  %v9690_v1 = vld [vmem:[%s13133_s20 + $0x110] ss:$100 sps:$4 sm:$0xff]   ;;  %v9693_v3 = vld [vmem:[%s13133_s20 + $0x118] ss:$100 sps:$4 sm:$0xff]  }
0x1467   :  { %4436 = vmatprep.subr.bf16.mxu0 %v9608_v4  ;;  %4477 = vmatprep.subr.bf16.mxu1 %v9611_v36  ;;  %v9698_v4 = vld [vmem:[%s13133_s20 + $0x4c] ss:$100 sps:$4 sm:$0xff]   ;;  %v9701_v36 = vld [vmem:[%s13133_s20 + $0x54] ss:$100 sps:$4 sm:$0xff]  }
0x1469   :  { %4387 = vmatmul.mubr.bf16.vlgmr.msra.gmra.mxu0 %v10960_v34  ;;  %4428 = vmatmul.mubr.bf16.vlgmr.msra.gmra.mxu1 %v10960_v34 }
0x146a   :  { %4437 = vmatpush1.bf16.msra.mxu0 %v9606_v5  ;;  %4478 = vmatpush1.bf16.msra.mxu1 %v9609_v7  ;;  %v9696_v5 = vld [vmem:[%s13133_s20 + $0x48] ss:$100 sps:$4 sm:$0xff]   ;;  %v9699_v7 = vld [vmem:[%s13133_s20 + $0x50] ss:$100 sps:$4 sm:$0xff]  }
0x146b   :  { %4438 = vmatprep.subr.bf16.mxu0 %v9614_v8  ;;  %4479 = vmatprep.subr.bf16.mxu1 %v9617_v9  ;;  %v9704_v8 = vld [vmem:[%s13133_s20 + $0x5d4] ss:$100 sps:$4 sm:$0xff]  }
0x146c   :  { %4468 = vmatprep.mubr.bf16.mxu0 %v10170_v37  ;;  %4509 = vmatprep.mubr.bf16.mxu1 %v10170_v37  ;;  %v9702_v9 = vld [vmem:[%s13133_s20 + $0x5d0] ss:$100 sps:$4 sm:$0xff]  }
0x146e   :  { %4439 = vmatpush1.bf16.msra.mxu0 %v9612_v10  ;;  %4480 = vmatpush1.bf16.msra.mxu1 %v9615_v11  ;;  %v9705_v10 = vld [vmem:[%s13133_s20 + $0x5d8] ss:$100 sps:$4 sm:$0xff]   ;;  %v9708_v11 = vld [vmem:[%s13133_s20 + $0x50c] ss:$100 sps:$4 sm:$0xff]  }
0x146f   :  { %4440 = vmatprep.subr.bf16.mxu0 %v9620_v12  ;;  %4481 = vmatprep.subr.bf16.mxu1 %v9623_v29  ;;  %v9706_v12 = vld [vmem:[%s13133_s20 + $0x508] ss:$100 sps:$4 sm:$0xff]   ;;  %v9709_v29 = vld [vmem:[%s13133_s20 + $0x510] ss:$100 sps:$4 sm:$0xff]  }
0x1472   :  { %4441 = vmatpush1.bf16.msra.mxu0 %v9618_v13  ;;  %4482 = vmatpush1.bf16.msra.mxu1 %v9621_v14  ;;  %v9712_v13 = vld [vmem:[%s13133_s20 + $0x444] ss:$100 sps:$4 sm:$0xff]  }
0x1473   :  { %4442 = vmatprep.subr.bf16.mxu0 %v9626_v15  ;;  %4483 = vmatprep.subr.bf16.mxu1 %v9629_v16  ;;  %v9710_v14 = vld [vmem:[%s13133_s20 + $0x440] ss:$100 sps:$4 sm:$0xff]   ;;  %v9713_v15 = vld [vmem:[%s13133_s20 + $0x448] ss:$100 sps:$4 sm:$0xff]  }
0x1474   :  { %v9716_v16 = vld [vmem:[%s13133_s20 + $0x37c] ss:$100 sps:$4 sm:$0xff]  }
0x1476   :  { %4443 = vmatpush1.bf16.msra.mxu0 %v9624_v17  ;;  %4484 = vmatpush1.bf16.msra.mxu1 %v9627_v18  ;;  %v9714_v17 = vld [vmem:[%s13133_s20 + $0x378] ss:$100 sps:$4 sm:$0xff]   ;;  %v9717_v18 = vld [vmem:[%s13133_s20 + $0x380] ss:$100 sps:$4 sm:$0xff]  }
0x1477   :  { %4444 = vmatprep.subr.bf16.mxu0 %v9632_v19  ;;  %4485 = vmatprep.subr.bf16.mxu1 %v9635_v20  ;;  %v9720_v19 = vld [vmem:[%s13133_s20 + $0x2b4] ss:$100 sps:$4 sm:$0xff]  }
0x1478   :  { %v9718_v20 = vld [vmem:[%s13133_s20 + $0x2b0] ss:$100 sps:$4 sm:$0xff]  }
0x147a   :  { %4445 = vmatpush1.bf16.msra.mxu0 %v9630_v21  ;;  %4486 = vmatpush1.bf16.msra.mxu1 %v9633_v22  ;;  %v9721_v21 = vld [vmem:[%s13133_s20 + $0x2b8] ss:$100 sps:$4 sm:$0xff]   ;;  %v9724_v22 = vld [vmem:[%s13133_s20 + $0x1ec] ss:$100 sps:$4 sm:$0xff]  }
0x147b   :  { %4446 = vmatprep.subr.bf16.mxu0 %v9638_v23  ;;  %4487 = vmatprep.subr.bf16.mxu1 %v9641_v24  ;;  %v9722_v23 = vld [vmem:[%s13133_s20 + $0x1e8] ss:$100 sps:$4 sm:$0xff]   ;;  %v9725_v24 = vld [vmem:[%s13133_s20 + $0x1f0] ss:$100 sps:$4 sm:$0xff]  }
0x147e   :  { %4447 = vmatpush1.bf16.msra.mxu0 %v9636_v25  ;;  %4488 = vmatpush1.bf16.msra.mxu1 %v9639_v26  ;;  %v9728_v25 = vld [vmem:[%s13133_s20 + $0x124] ss:$100 sps:$4 sm:$0xff]  }
0x147f   :  { %4448 = vmatprep.subr.bf16.mxu0 %v9644_v27  ;;  %4489 = vmatprep.subr.bf16.mxu1 %v9647_v28  ;;  %v9726_v26 = vld [vmem:[%s13133_s20 + $0x120] ss:$100 sps:$4 sm:$0xff]   ;;  %v9729_v27 = vld [vmem:[%s13133_s20 + $0x128] ss:$100 sps:$4 sm:$0xff]  }
0x1480   :  { %v9732_v28 = vld [vmem:[%s13133_s20 + $0x5c] ss:$100 sps:$4 sm:$0xff]  }
0x1482   :  { %4449 = vmatpush1.bf16.msra.mxu0 %v9642_v31  ;;  %4490 = vmatpush1.bf16.msra.mxu1 %v9645_v33  ;;  %v9730_v31 = vld [vmem:[%s13133_s20 + $0x58] ss:$100 sps:$4 sm:$0xff]   ;;  %v9733_v33 = vld [vmem:[%s13133_s20 + $0x60] ss:$100 sps:$4 sm:$0xff]  }
0x1483   :  { %4450 = vmatprep.subr.bf16.mxu0 %v9650_v32  ;;  %4491 = vmatprep.subr.bf16.mxu1 %v9653_v35  ;;  %v9736_v32 = vld [vmem:[%s13133_s20 + $0xbbc] ss:$100 sps:$4 sm:$0xff]  }
0x1484   :  { %v9734_v35 = vld [vmem:[%s13133_s20 + $0xbb8] ss:$100 sps:$4 sm:$0xff]  }
0x1486   :  { %4451 = vmatpush1.bf16.msra.mxu0 %v9648_v63  ;;  %4492 = vmatpush1.bf16.msra.mxu1 %v9651_v38  ;;  %v9737_v63 = vld [vmem:[%s13127_s14 + $0x78] sm:$0xff]  }
0x1487   :  { %4518 = vmatprep.subr.bf16.mxu0 %v9656_v39  ;;  %4559 = vmatprep.subr.bf16.mxu1 %v9659_v40  ;;  %v9740_v38 = vld [vmem:[%s13133_s20 + $0xaf4] ss:$100 sps:$4 sm:$0xff]  }
0x1489   :  { %4469 = vmatmul.mubr.bf16.vlgmr.msra.gmra.mxu0 %v10960_v34  ;;  %4510 = vmatmul.mubr.bf16.vlgmr.msra.gmra.mxu1 %v10960_v34 }
0x148a   :  { %4519 = vmatpush1.bf16.msra.mxu0 %v9654_v2  ;;  %4560 = vmatpush1.bf16.msra.mxu1 %v9657_v41  ;;  %v9738_v2 = vld [vmem:[%s13133_s20 + $0xaf0] ss:$100 sps:$4 sm:$0xff]  }
0x148b   :  { %4520 = vmatprep.subr.bf16.mxu0 %v9662_v42  ;;  %4561 = vmatprep.subr.bf16.mxu1 %v9665_v43  ;;  %v9741_v41 = vld [vmem:[%s13127_s14 + $0x70] sm:$0xff]  }
0x148c   :  { %4550 = vmatprep.mubr.bf16.mxu0 %v10170_v37  ;;  %4591 = vmatprep.mubr.bf16.mxu1 %v10170_v37 }
0x148e   :  { %4521 = vmatpush1.bf16.msra.mxu0 %v9660_v44  ;;  %4562 = vmatpush1.bf16.msra.mxu1 %v9663_v0 }
0x148f   :  { %4522 = vmatprep.subr.bf16.mxu0 %v9668_v45  ;;  %4563 = vmatprep.subr.bf16.mxu1 %v9671_v59  ;;  %v9742_v45 = vld [vmem:[%s13133_s20 + $0xa28] ss:$100 sps:$4 sm:$0xff]  }
0x1490   :  { %v9745_v59 = vld [vmem:[%s13127_s14 + $0x68] sm:$0xff]  }
0x1492   :  { %4523 = vmatpush1.bf16.msra.mxu0 %v9666_v46  ;;  %4564 = vmatpush1.bf16.msra.mxu1 %v9669_v47 }
0x1493   :  { %4524 = vmatprep.subr.bf16.mxu0 %v9674_v48  ;;  %4565 = vmatprep.subr.bf16.mxu1 %v9677_v49  ;;  %v9748_v48 = vld [vmem:[%s13133_s20 + $0x964] ss:$100 sps:$4 sm:$0xff]  }
0x1494   :  { %v9746_v49 = vld [vmem:[%s13133_s20 + $0x960] ss:$100 sps:$4 sm:$0xff]  }
0x1496   :  { %4525 = vmatpush1.bf16.msra.mxu0 %v9672_v50  ;;  %4566 = vmatpush1.bf16.msra.mxu1 %v9675_v51  ;;  %v9749_v50 = vld [vmem:[%s13127_s14 + $0x60] sm:$0xff]  }
0x1497   :  { %4526 = vmatprep.subr.bf16.mxu0 %v9680_v52  ;;  %4567 = vmatprep.subr.bf16.mxu1 %v9683_v53  ;;  %v9752_v51 = vld [vmem:[%s13133_s20 + $0x89c] ss:$100 sps:$4 sm:$0xff]  }
0x1498   :  { %v9750_v52 = vld [vmem:[%s13133_s20 + $0x898] ss:$100 sps:$4 sm:$0xff]  }
0x1499   :  { %v9753_v53 = vld [vmem:[%s13127_s14 + $0x58] sm:$0xff]  }
0x149a   :  { %4527 = vmatpush1.bf16.msra.mxu0 %v9678_v54  ;;  %4568 = vmatpush1.bf16.msra.mxu1 %v9681_v55  ;;  %v9756_v54 = vld [vmem:[%s13133_s20 + $0x7d4] ss:$100 sps:$4 sm:$0xff]  }
0x149b   :  { %4528 = vmatprep.subr.bf16.mxu0 %v9686_v56  ;;  %4569 = vmatprep.subr.bf16.mxu1 %v9689_v57  ;;  %v9754_v55 = vld [vmem:[%s13133_s20 + $0x7d0] ss:$100 sps:$4 sm:$0xff]  }
0x149c   :  { %v9757_v56 = vld [vmem:[%s13127_s14 + $0x50] sm:$0xff]  }
0x149d   :  { %v9760_v57 = vld [vmem:[%s13133_s20 + $0x70c] ss:$100 sps:$4 sm:$0xff]  }
0x149e   :  { %4529 = vmatpush1.bf16.msra.mxu0 %v9684_v58  ;;  %4570 = vmatpush1.bf16.msra.mxu1 %v9687_v60  ;;  %v9758_v58 = vld [vmem:[%s13133_s20 + $0x708] ss:$100 sps:$4 sm:$0xff]  }
0x149f   :  { %4530 = vmatprep.subr.bf16.mxu0 %v9692_v61  ;;  %4571 = vmatprep.subr.bf16.mxu1 %v9695_v62  ;;  %v9761_v60 = vld [vmem:[%s13127_s14 + $0x48] sm:$0xff]   ;;  %v9762_v62 = vld [vmem:[%s13133_s20 + $0x640] ss:$100 sps:$4 sm:$0xff]  }
0x14a0   :  { %v9764_v61 = vld [vmem:[%s13133_s20 + $0x644] ss:$100 sps:$4 sm:$0xff]  }
0x14a2   :  { %4531 = vmatpush1.bf16.msra.mxu0 %v9690_v1  ;;  %4572 = vmatpush1.bf16.msra.mxu1 %v9693_v3  ;;  %v9765_v1 = vld [vmem:[%s13127_s14 + $0x40] sm:$0xff]  }
0x14a3   :  { %4532 = vmatprep.subr.bf16.mxu0 %v9698_v4  ;;  %4573 = vmatprep.subr.bf16.mxu1 %v9701_v36  ;;  %v9768_v3 = vld [vmem:[%s13133_s20 + $0xbc4] ss:$100 sps:$4 sm:$0xff]   ;;  %v9771_v4 = vld [vmem:[%s13133_s20 + $0xbcc] ss:$100 sps:$4 sm:$0xff]  }
0x14a4   :  { %v9766_v36 = vld [vmem:[%s13133_s20 + $0xbc0] ss:$100 sps:$4 sm:$0xff]  }
0x14a6   :  { %4533 = vmatpush1.bf16.msra.mxu0 %v9696_v5  ;;  %4574 = vmatpush1.bf16.msra.mxu1 %v9699_v7  ;;  %v9769_v5 = vld [vmem:[%s13133_s20 + $0xbc8] ss:$100 sps:$4 sm:$0xff]   ;;  %v11640_v7 = vpack.c.bf16 %v10952_v30, %v10952_v30  ;;  %v9772_v30 = vld [vmem:[%s13133_s20 + $0xaf8] ss:$100 sps:$4 sm:$0xff]  }
0x14a7   :  { %4600 = vmatprep.subr.bf16.mxu0 %v9704_v8  ;;  %9238 = vmatprep.subr.bf16.mxu1 %v10168_v6  ;;  %v9774_v8 = vld [vmem:[%s13133_s20 + $0xafc] ss:$100 sps:$4 sm:$0xff]  }
0x14a9   :  { %4551 = vmatmul.mubr.bf16.vlgmr.msra.gmra.mxu0 %v10960_v34  ;;  %4592 = vmatmul.mubr.bf16.vlgmr.msra.gmra.mxu1 %v10960_v34 }
0x14aa   :  { %4601 = vmatpush1.bf16.msra.mxu0 %v9702_v9  ;;  %9239 = vmatpush3.bf16.msra.mxu1 %v9705_v10  ;;  %v9777_v9 = vld [vmem:[%s13133_s20 + $0xb04] ss:$100 sps:$4 sm:$0xff]  }
0x14ab   :  { %4602 = vmatprep.subr.bf16.mxu0 %v9708_v11  ;;  %9240 = vmatprep.subr.bf16.mxu1 %v10168_v6 }
0x14ac   :  { %4632 = vmatprep.mubr.bf16.mxu0 %v10170_v37  ;;  %9254 = vmatprep.mubr.msk.bf16.mxu1 %vm10169_vm1, %v10168_v6 }
0x14ae   :  { %4603 = vmatpush1.bf16.msra.mxu0 %v9706_v12  ;;  %9241 = vmatpush3.bf16.msra.mxu1 %v9709_v29  ;;  %v9775_v12 = vld [vmem:[%s13133_s20 + $0xb00] ss:$100 sps:$4 sm:$0xff]  }
0x14af   :  { %4604 = vmatprep.subr.bf16.mxu0 %v9712_v13  ;;  %9242 = vmatprep.subr.bf16.mxu1 %v10168_v6 }
0x14b2   :  { %4605 = vmatpush1.bf16.msra.mxu0 %v9710_v14  ;;  %9243 = vmatpush3.bf16.msra.mxu1 %v9713_v15  ;;  %v9780_v14 = vld [vmem:[%s13133_s20 + $0xa34] ss:$100 sps:$4 sm:$0xff]   ;;  %v9783_v15 = vld [vmem:[%s13133_s20 + $0xa3c] ss:$100 sps:$4 sm:$0xff]  }
0x14b3   :  { %4606 = vmatprep.subr.bf16.mxu0 %v9716_v16  ;;  %9244 = vmatprep.subr.bf16.mxu1 %v10168_v6 }
0x14b6   :  { %4607 = vmatpush1.bf16.msra.mxu0 %v9714_v17  ;;  %9245 = vmatpush3.bf16.msra.mxu1 %v9717_v18  ;;  %v9778_v18 = vld [vmem:[%s13133_s20 + $0xa30] ss:$100 sps:$4 sm:$0xff]  }
0x14b7   :  { %4608 = vmatprep.subr.bf16.mxu0 %v9720_v19  ;;  %9246 = vmatprep.subr.bf16.mxu1 %v10168_v6  ;;  %v9781_v19 = vld [vmem:[%s13133_s20 + $0xa38] ss:$100 sps:$4 sm:$0xff]  }
0x14ba   :  { %4609 = vmatpush1.bf16.msra.mxu0 %v9718_v20  ;;  %9247 = vmatpush3.bf16.msra.mxu1 %v9721_v21 }
0x14bb   :  { %4610 = vmatprep.subr.bf16.mxu0 %v9724_v22  ;;  %9248 = vmatprep.subr.bf16.mxu1 %v10168_v6  ;;  %v9786_v22 = vld [vmem:[%s13133_s20 + $0x96c] ss:$100 sps:$4 sm:$0xff]  }
0x14be   :  { %4611 = vmatpush1.bf16.msra.mxu0 %v9722_v23  ;;  %9249 = vmatpush3.bf16.msra.mxu1 %v9725_v24  ;;  %v9789_v23 = vld [vmem:[%s13133_s20 + $0x974] ss:$100 sps:$4 sm:$0xff]   ;;  %v9784_v24 = vld [vmem:[%s13133_s20 + $0x968] ss:$100 sps:$4 sm:$0xff]  }
0x14bf   :  { %4612 = vmatprep.subr.bf16.mxu0 %v9728_v25  ;;  %9250 = vmatprep.subr.bf16.mxu1 %v10168_v6  ;;  %v9787_v25 = vld [vmem:[%s13133_s20 + $0x970] ss:$100 sps:$4 sm:$0xff]  }
0x14c2   :  { %4613 = vmatpush1.bf16.msra.mxu0 %v9726_v26  ;;  %9251 = vmatpush3.bf16.msra.mxu1 %v9729_v27  ;;  %v9792_v26 = vld [vmem:[%s13133_s20 + $0x8a4] ss:$100 sps:$4 sm:$0xff]   ;;  %v9795_v27 = vld [vmem:[%s13133_s20 + $0x8ac] ss:$100 sps:$4 sm:$0xff]  }
0x14c3   :  { %4614 = vmatprep.subr.bf16.mxu0 %v9732_v28  ;;  %9252 = vmatprep.subr.bf16.mxu1 %v10168_v6  ;;  %v9790_v28 = vld [vmem:[%s13133_s20 + $0x8a0] ss:$100 sps:$4 sm:$0xff]  }
0x14c6   :  { %4615 = vmatpush1.bf16.msra.mxu0 %v9730_v31  ;;  %9253 = vmatpush3.bf16.msra.mxu1 %v9733_v33  ;;  %v9793_v31 = vld [vmem:[%s13133_s20 + $0x8a8] ss:$100 sps:$4 sm:$0xff]   ;;  %v9798_v33 = vld [vmem:[%s13133_s20 + $0x7dc] ss:$100 sps:$4 sm:$0xff]  }
0x14c7   :  { %9258 = vmatprep.subr.bf16.mxu0 %v10168_v6  ;;  %6162 = vmatprep.subr.bf16.mxu1 %v9736_v32  ;;  %v9801_v32 = vld [vmem:[%s13133_s20 + $0x7e4] ss:$100 sps:$4 sm:$0xff]  }
0x14c9   :  { %4633 = vmatmul.mubr.bf16.vlgmr.msra.gmra.mxu0 %v10960_v34  ;;  %9255 = vmatmul.mubr.bf16.vlgmr.msra.gmra.mxu1 %v10960_v34  ;;  %v11550_v39 = vpop.f32.mrf.mxu0  ;;  %v11552_v40 = vpop.f32.mrf.mxu1  ;;  %v9744_v34 = vld [vmem:[%s13133_s20 + $0xa2c] ss:$100 sps:$4 sm:$0xff]  }
0x14ca   :  { %9259 = vmatpush3.bf16.msra.mxu0 %v9737_v63  ;;  %6163 = vmatpush1.bf16.msra.mxu1 %v9734_v35  ;;  %v9796_v35 = vld [vmem:[%s13133_s20 + $0x7d8] ss:$100 sps:$4 sm:$0xff]   ;;  %v9799_v63 = vld [vmem:[%s13133_s20 + $0x7e0] ss:$100 sps:$4 sm:$0xff]  }
0x14cb   :  { %v9236_v42 = vpop.f32.mrf.mxu0  ;;  %v11560_v43 = vpop.f32.mrf.mxu1  ;;  %9260 = vmatprep.subr.bf16.mxu0 %v10168_v6  ;;  %6164 = vmatprep.subr.bf16.mxu1 %v9740_v38  ;;  %v9804_v38 = vld [vmem:[%s13133_s20 + $0x714] ss:$100 sps:$4 sm:$0xff]  }
0x14cc   :  { %9274 = vmatprep.mubr.msk.bf16.mxu0 %vm10169_vm1, %v10168_v6  ;;  %6194 = vmatprep.mubr.bf16.mxu1 %v10170_v37  ;;  %v9805_v42 = vld [vmem:[%s13133_s20 + $0x718] ss:$100 sps:$4 sm:$0xff]  }
0x14cd   :  { %v2923_v44 = vpop.f32.mrf.mxu0  ;;  %v4187_v0 = vpop.f32.mrf.mxu1 }
0x14ce   :  { %9261 = vmatpush3.bf16.msra.mxu0 %v9741_v41  ;;  %6165 = vmatpush1.bf16.msra.mxu1 %v9738_v2  ;;  %v9807_v2 = vld [vmem:[%s13133_s20 + $0x71c] ss:$100 sps:$4 sm:$0xff]   ;;  %v9802_v41 = vld [vmem:[%s13133_s20 + $0x710] ss:$100 sps:$4 sm:$0xff]   ;;  %v9808_v0 = vld [vmem:[%s13133_s20 + $0x648] ss:$100 sps:$4 sm:$0xff]  }
0x14cf   :  { %v9237_v46 = vpop.f32.mrf.mxu0  ;;  %v4188_v47 = vpop.f32.mrf.mxu1  ;;  %9262 = vmatprep.subr.bf16.mxu0 %v10168_v6  ;;  %6166 = vmatprep.subr.bf16.mxu1 %v9744_v34  ;;  %v9810_v34 = vld [vmem:[%s13133_s20 + $0x64c] ss:$100 sps:$4 sm:$0xff]   ;;  %v9813_v44 = vld [vmem:[%s13133_s20 + $0x654] ss:$100 sps:$4 sm:$0xff]  }
0x14d0   :  { %v9819_v46 = vld [vmem:[%s13133_s20 + $0xbdc] ss:$100 sps:$4 sm:$0xff]   ;;  %v9814_v47 = vld [vmem:[%s13133_s20 + $0xbd0] ss:$100 sps:$4 sm:$0xff]  }
0x14d2   :  { %9263 = vmatpush3.bf16.msra.mxu0 %v9745_v59  ;;  %6167 = vmatpush1.bf16.msra.mxu1 %v9742_v45  ;;  %v9811_v45 = vld [vmem:[%s13133_s20 + $0x650] ss:$100 sps:$4 sm:$0xff]  }
0x14d3   :  { %9264 = vmatprep.subr.bf16.mxu0 %v10168_v6  ;;  %6168 = vmatprep.subr.bf16.mxu1 %v9748_v48  ;;  %v9816_v59 = vld [vmem:[%s13133_s20 + $0xbd4] ss:$100 sps:$4 sm:$0xff]  }
0x14d4   :  { %v9817_v48 = vld [vmem:[%s13133_s20 + $0xbd8] ss:$100 sps:$4 sm:$0xff]  }
0x14d6   :  { %9265 = vmatpush3.bf16.msra.mxu0 %v9749_v50  ;;  %6169 = vmatpush1.bf16.msra.mxu1 %v9746_v49  ;;  %v9822_v49 = vld [vmem:[%s13133_s20 + $0xb0c] ss:$100 sps:$4 sm:$0xff]   ;;  %v9825_v50 = vld [vmem:[%s13133_s20 + $0xb14] ss:$100 sps:$4 sm:$0xff]  }
0x14d7   :  { %9266 = vmatprep.subr.bf16.mxu0 %v10168_v6  ;;  %6170 = vmatprep.subr.bf16.mxu1 %v9752_v51 }
0x14da   :  { %9267 = vmatpush3.bf16.msra.mxu0 %v9753_v53  ;;  %6171 = vmatpush1.bf16.msra.mxu1 %v9750_v52  ;;  %v9820_v53 = vld [vmem:[%s13133_s20 + $0xb08] ss:$100 sps:$4 sm:$0xff]  }
0x14db   :  { %9268 = vmatprep.subr.bf16.mxu0 %v10168_v6  ;;  %6172 = vmatprep.subr.bf16.mxu1 %v9756_v54  ;;  %v9823_v54 = vld [vmem:[%s13133_s20 + $0xb10] ss:$100 sps:$4 sm:$0xff]  }
0x14de   :  { %9269 = vmatpush3.bf16.msra.mxu0 %v9757_v56  ;;  %6173 = vmatpush1.bf16.msra.mxu1 %v9754_v55 }
0x14df   :  { %9270 = vmatprep.subr.bf16.mxu0 %v10168_v6  ;;  %6174 = vmatprep.subr.bf16.mxu1 %v9760_v57  ;;  %v9828_v57 = vld [vmem:[%s13133_s20 + $0xa44] ss:$100 sps:$4 sm:$0xff]  }
0x14e2   :  { %9271 = vmatpush3.bf16.msra.mxu0 %v9761_v60  ;;  %6175 = vmatpush1.bf16.msra.mxu1 %v9758_v58  ;;  %v9831_v58 = vld [vmem:[%s13133_s20 + $0xa4c] ss:$100 sps:$4 sm:$0xff]  }
0x14e3   :  { %9272 = vmatprep.subr.bf16.mxu0 %v10168_v6  ;;  %6176 = vmatprep.subr.bf16.mxu1 %v9764_v61 }
0x14e6   :  { %9273 = vmatpush3.bf16.msra.mxu0 %v9765_v1  ;;  %6177 = vmatpush1.bf16.msra.mxu1 %v9762_v62  ;;  %v9826_v62 = vld [vmem:[%s13133_s20 + $0xa40] ss:$100 sps:$4 sm:$0xff]   ;;  %v9829_v1 = vld [vmem:[%s13133_s20 + $0xa48] ss:$100 sps:$4 sm:$0xff]  }
0x14e7   :  { %6203 = vmatprep.subr.bf16.mxu0 %v9768_v3  ;;  %6244 = vmatprep.subr.bf16.mxu1 %v9771_v4 }
0x14e9   :  { %v11648_v10 = vpop.f32.mrf.mxu0  ;;  %v11650_v11 = vpop.f32.mrf.mxu1  ;;  %9275 = vmatmul.mubr.bf16.vlgmr.msra.gmra.mxu0 %v11640_v7  ;;  %6195 = vmatmul.mubr.bf16.vlgmr.msra.gmra.mxu1 %v11640_v7 }
0x14ea   :  { %6204 = vmatpush1.bf16.msra.mxu0 %v9766_v36  ;;  %6245 = vmatpush1.bf16.msra.mxu1 %v9769_v5  ;;  %v9834_v36 = vld [vmem:[%s13133_s20 + $0x97c] ss:$100 sps:$4 sm:$0xff]   ;;  %v9837_v5 = vld [vmem:[%s13133_s20 + $0x984] ss:$100 sps:$4 sm:$0xff]  }
0x14eb   :  { %v11660_v29 = vpop.f32.mrf.mxu0  ;;  %v11662_v13 = vpop.f32.mrf.mxu1  ;;  %6205 = vmatprep.subr.bf16.mxu0 %v9774_v8  ;;  %6246 = vmatprep.subr.bf16.mxu1 %v9777_v9  ;;  %v9832_v8 = vld [vmem:[%s13133_s20 + $0x978] ss:$100 sps:$4 sm:$0xff]   ;;  %v9835_v9 = vld [vmem:[%s13133_s20 + $0x980] ss:$100 sps:$4 sm:$0xff]  }
0x14ec   :  { %6235 = vmatprep.mubr.bf16.mxu0 %v10170_v37  ;;  %6276 = vmatprep.mubr.bf16.mxu1 %v10170_v37 }
0x14ed   :  { %v4228_v16 = vpop.f32.mrf.mxu0  ;;  %v4269_v17 = vpop.f32.mrf.mxu1 }
0x14ee   :  { %6206 = vmatpush1.bf16.msra.mxu0 %v9772_v30  ;;  %6247 = vmatpush1.bf16.msra.mxu1 %v9775_v12  ;;  %v9840_v30 = vld [vmem:[%s13133_s20 + $0x8b4] ss:$100 sps:$4 sm:$0xff]   ;;  %v9843_v12 = vld [vmem:[%s13133_s20 + $0x8bc] ss:$100 sps:$4 sm:$0xff]   ;;  %v9846_v16 = vld [vmem:[%s13133_s20 + $0x7ec] ss:$100 sps:$4 sm:$0xff]  }
0x14ef   :  { %v4229_v20 = vpop.f32.mrf.mxu0  ;;  %v4270_v21 = vpop.f32.mrf.mxu1  ;;  %6207 = vmatprep.subr.bf16.mxu0 %v9780_v14  ;;  %6248 = vmatprep.subr.bf16.mxu1 %v9783_v15  ;;  %v9838_v14 = vld [vmem:[%s13133_s20 + $0x8b0] ss:$100 sps:$4 sm:$0xff]   ;;  %v9841_v15 = vld [vmem:[%s13133_s20 + $0x8b8] ss:$100 sps:$4 sm:$0xff]  }
0x14f0   :  { %v9849_v17 = vld [vmem:[%s13133_s20 + $0x7f4] ss:$100 sps:$4 sm:$0xff]   ;;  %v9852_v20 = vld [vmem:[%s13133_s20 + $0x724] ss:$100 sps:$4 sm:$0xff]   ;;  %v9855_v21 = vld [vmem:[%s13133_s20 + $0x72c] ss:$100 sps:$4 sm:$0xff]  }
0x14f2   :  { %6208 = vmatpush1.bf16.msra.mxu0 %v9778_v18  ;;  %6249 = vmatpush1.bf16.msra.mxu1 %v9781_v19  ;;  %v9844_v18 = vld [vmem:[%s13133_s20 + $0x7e8] ss:$100 sps:$4 sm:$0xff]   ;;  %v9847_v19 = vld [vmem:[%s13133_s20 + $0x7f0] ss:$100 sps:$4 sm:$0xff]  }
0x14f3   :  { %6209 = vmatprep.subr.bf16.mxu0 %v9786_v22  ;;  %6250 = vmatprep.subr.bf16.mxu1 %v9789_v23  ;;  %v9850_v22 = vld [vmem:[%s13133_s20 + $0x720] ss:$100 sps:$4 sm:$0xff]   ;;  %v9853_v23 = vld [vmem:[%s13133_s20 + $0x728] ss:$100 sps:$4 sm:$0xff]  }
0x14f6   :  { %6210 = vmatpush1.bf16.msra.mxu0 %v9784_v24  ;;  %6251 = vmatpush1.bf16.msra.mxu1 %v9787_v25  ;;  %v9858_v24 = vld [vmem:[%s13133_s20 + $0x65c] ss:$100 sps:$4 sm:$0xff]   ;;  %v9861_v25 = vld [vmem:[%s13133_s20 + $0x664] ss:$100 sps:$4 sm:$0xff]  }
0x14f7   :  { %6211 = vmatprep.subr.bf16.mxu0 %v9792_v26  ;;  %6252 = vmatprep.subr.bf16.mxu1 %v9795_v27  ;;  %v9856_v26 = vld [vmem:[%s13133_s20 + $0x658] ss:$100 sps:$4 sm:$0xff]   ;;  %v9859_v27 = vld [vmem:[%s13133_s20 + $0x660] ss:$100 sps:$4 sm:$0xff]  }
0x14fa   :  { %6212 = vmatpush1.bf16.msra.mxu0 %v9790_v28  ;;  %6253 = vmatpush1.bf16.msra.mxu1 %v9793_v31  ;;  %v9864_v28 = vld [vmem:[%s13133_s20 + $0xbe4] ss:$100 sps:$4 sm:$0xff]   ;;  %v9867_v31 = vld [vmem:[%s13133_s20 + $0xbec] ss:$100 sps:$4 sm:$0xff]  }
0x14fb   :  { %6213 = vmatprep.subr.bf16.mxu0 %v9798_v33  ;;  %6254 = vmatprep.subr.bf16.mxu1 %v9801_v32  ;;  %v9862_v33 = vld [vmem:[%s13133_s20 + $0xbe0] ss:$100 sps:$4 sm:$0xff]   ;;  %v9865_v32 = vld [vmem:[%s13133_s20 + $0xbe8] ss:$100 sps:$4 sm:$0xff]  }
0x14fe   :  { %6214 = vmatpush1.bf16.msra.mxu0 %v9796_v35  ;;  %6255 = vmatpush1.bf16.msra.mxu1 %v9799_v63  ;;  %v9870_v35 = vld [vmem:[%s13133_s20 + $0xb1c] ss:$100 sps:$4 sm:$0xff]   ;;  %v9873_v63 = vld [vmem:[%s13133_s20 + $0xb24] ss:$100 sps:$4 sm:$0xff]  }
0x14ff   :  { %6215 = vmatprep.subr.bf16.mxu0 %v9804_v38  ;;  %6256 = vmatprep.subr.bf16.mxu1 %v9807_v2 }
0x1502   :  { %6216 = vmatpush1.bf16.msra.mxu0 %v9802_v41  ;;  %6257 = vmatpush1.bf16.msra.mxu1 %v9805_v42  ;;  %v9868_v41 = vld [vmem:[%s13133_s20 + $0xb18] ss:$100 sps:$4 sm:$0xff]   ;;  %v9871_v42 = vld [vmem:[%s13133_s20 + $0xb20] ss:$100 sps:$4 sm:$0xff]  }
0x1503   :  { %6217 = vmatprep.subr.bf16.mxu0 %v9810_v34  ;;  %6258 = vmatprep.subr.bf16.mxu1 %v9813_v44 }
0x1506   :  { %6218 = vmatpush1.bf16.msra.mxu0 %v9808_v0  ;;  %6259 = vmatpush1.bf16.msra.mxu1 %v9811_v45  ;;  %v9876_v0 = vld [vmem:[%s13133_s20 + $0xa54] ss:$100 sps:$4 sm:$0xff]   ;;  %v9879_v45 = vld [vmem:[%s13133_s20 + $0xa5c] ss:$100 sps:$4 sm:$0xff]  }
0x1507   :  { %6285 = vmatprep.subr.bf16.mxu0 %v9816_v59  ;;  %6326 = vmatprep.subr.bf16.mxu1 %v9819_v46 }
0x1509   :  { %v11756_v51 = vpop.f32.mrf.mxu0  ;;  %v11758_v52 = vpop.f32.mrf.mxu1  ;;  %6236 = vmatmul.mubr.bf16.vlgmr.msra.gmra.mxu0 %v11640_v7  ;;  %6277 = vmatmul.mubr.bf16.vlgmr.msra.gmra.mxu1 %v11640_v7 }
0x150a   :  { %6286 = vmatpush1.bf16.msra.mxu0 %v9814_v47  ;;  %6327 = vmatpush1.bf16.msra.mxu1 %v9817_v48  ;;  %v9874_v47 = vld [vmem:[%s13133_s20 + $0xa50] ss:$100 sps:$4 sm:$0xff]   ;;  %v9877_v48 = vld [vmem:[%s13133_s20 + $0xa58] ss:$100 sps:$4 sm:$0xff]  }
0x150b   :  { %v11768_v55 = vpop.f32.mrf.mxu0  ;;  %v11770_v56 = vpop.f32.mrf.mxu1  ;;  %6287 = vmatprep.subr.bf16.mxu0 %v9822_v49  ;;  %6328 = vmatprep.subr.bf16.mxu1 %v9825_v50 }
0x150c   :  { %6317 = vmatprep.mubr.bf16.mxu0 %v10170_v37  ;;  %6358 = vmatprep.mubr.bf16.mxu1 %v10170_v37 }
0x150d   :  { %v4310_v60 = vpop.f32.mrf.mxu0  ;;  %v4351_v61 = vpop.f32.mrf.mxu1 }
0x150e   :  { %6288 = vmatpush1.bf16.msra.mxu0 %v9820_v53  ;;  %6329 = vmatpush1.bf16.msra.mxu1 %v9823_v54  ;;  %v9882_v53 = vld [vmem:[%s13133_s20 + $0x98c] ss:$100 sps:$4 sm:$0xff]   ;;  %v9885_v54 = vld [vmem:[%s13133_s20 + $0x994] ss:$100 sps:$4 sm:$0xff]   ;;  %v9888_v60 = vld [vmem:[%s13133_s20 + $0x8c4] ss:$100 sps:$4 sm:$0xff]  }
0x150f   :  { %v4311_v3 = vpop.f32.mrf.mxu0  ;;  %v4352_v4 = vpop.f32.mrf.mxu1  ;;  %6289 = vmatprep.subr.bf16.mxu0 %v9828_v57  ;;  %6330 = vmatprep.subr.bf16.mxu1 %v9831_v58  ;;  %v9880_v57 = vld [vmem:[%s13133_s20 + $0x988] ss:$100 sps:$4 sm:$0xff]   ;;  %v9883_v58 = vld [vmem:[%s13133_s20 + $0x990] ss:$100 sps:$4 sm:$0xff]  }
0x1510   :  { %v9891_v61 = vld [vmem:[%s13133_s20 + $0x8cc] ss:$100 sps:$4 sm:$0xff]   ;;  %v9894_v3 = vld [vmem:[%s13133_s20 + $0x7fc] ss:$100 sps:$4 sm:$0xff]   ;;  %v9897_v4 = vld [vmem:[%s13133_s20 + $0x804] ss:$100 sps:$4 sm:$0xff]  }
0x1512   :  { %6290 = vmatpush1.bf16.msra.mxu0 %v9826_v62  ;;  %6331 = vmatpush1.bf16.msra.mxu1 %v9829_v1  ;;  %v9886_v62 = vld [vmem:[%s13133_s20 + $0x8c0] ss:$100 sps:$4 sm:$0xff]   ;;  %v9889_v1 = vld [vmem:[%s13133_s20 + $0x8c8] ss:$100 sps:$4 sm:$0xff]  }
0x1513   :  { %6291 = vmatprep.subr.bf16.mxu0 %v9834_v36  ;;  %6332 = vmatprep.subr.bf16.mxu1 %v9837_v5  ;;  %v9892_v36 = vld [vmem:[%s13133_s20 + $0x7f8] ss:$100 sps:$4 sm:$0xff]   ;;  %v9895_v5 = vld [vmem:[%s13133_s20 + $0x800] ss:$100 sps:$4 sm:$0xff]  }
0x1516   :  { %6292 = vmatpush1.bf16.msra.mxu0 %v9832_v8  ;;  %6333 = vmatpush1.bf16.msra.mxu1 %v9835_v9  ;;  %v9900_v8 = vld [vmem:[%s13133_s20 + $0x734] ss:$100 sps:$4 sm:$0xff]   ;;  %v9903_v9 = vld [vmem:[%s13133_s20 + $0x73c] ss:$100 sps:$4 sm:$0xff]  }
0x1517   :  { %6293 = vmatprep.subr.bf16.mxu0 %v9840_v30  ;;  %6334 = vmatprep.subr.bf16.mxu1 %v9843_v12  ;;  %v9898_v30 = vld [vmem:[%s13133_s20 + $0x730] ss:$100 sps:$4 sm:$0xff]   ;;  %v9901_v12 = vld [vmem:[%s13133_s20 + $0x738] ss:$100 sps:$4 sm:$0xff]  }
0x151a   :  { %6294 = vmatpush1.bf16.msra.mxu0 %v9838_v14  ;;  %6335 = vmatpush1.bf16.msra.mxu1 %v9841_v15  ;;  %v9906_v14 = vld [vmem:[%s13133_s20 + $0x66c] ss:$100 sps:$4 sm:$0xff]   ;;  %v9909_v15 = vld [vmem:[%s13133_s20 + $0x674] ss:$100 sps:$4 sm:$0xff]  }
0x151b   :  { %6295 = vmatprep.subr.bf16.mxu0 %v9846_v16  ;;  %6336 = vmatprep.subr.bf16.mxu1 %v9849_v17  ;;  %v9904_v16 = vld [vmem:[%s13133_s20 + $0x668] ss:$100 sps:$4 sm:$0xff]   ;;  %v9907_v17 = vld [vmem:[%s13133_s20 + $0x670] ss:$100 sps:$4 sm:$0xff]  }
0x151e   :  { %6296 = vmatpush1.bf16.msra.mxu0 %v9844_v18  ;;  %6337 = vmatpush1.bf16.msra.mxu1 %v9847_v19  ;;  %v9912_v18 = vld [vmem:[%s13133_s20 + $0xbf4] ss:$100 sps:$4 sm:$0xff]   ;;  %v9915_v19 = vld [vmem:[%s13133_s20 + $0xbfc] ss:$100 sps:$4 sm:$0xff]  }
0x151f   :  { %6297 = vmatprep.subr.bf16.mxu0 %v9852_v20  ;;  %6338 = vmatprep.subr.bf16.mxu1 %v9855_v21  ;;  %v9910_v20 = vld [vmem:[%s13133_s20 + $0xbf0] ss:$100 sps:$4 sm:$0xff]   ;;  %v9913_v21 = vld [vmem:[%s13133_s20 + $0xbf8] ss:$100 sps:$4 sm:$0xff]  }
0x1522   :  { %6298 = vmatpush1.bf16.msra.mxu0 %v9850_v22  ;;  %6339 = vmatpush1.bf16.msra.mxu1 %v9853_v23  ;;  %v9918_v22 = vld [vmem:[%s13133_s20 + $0xb2c] ss:$100 sps:$4 sm:$0xff]   ;;  %v9921_v23 = vld [vmem:[%s13133_s20 + $0xb34] ss:$100 sps:$4 sm:$0xff]  }
0x1523   :  { %6299 = vmatprep.subr.bf16.mxu0 %v9858_v24  ;;  %6340 = vmatprep.subr.bf16.mxu1 %v9861_v25 }
0x1526   :  { %6300 = vmatpush1.bf16.msra.mxu0 %v9856_v26  ;;  %6341 = vmatpush1.bf16.msra.mxu1 %v9859_v27  ;;  %v9916_v26 = vld [vmem:[%s13133_s20 + $0xb28] ss:$100 sps:$4 sm:$0xff]   ;;  %v9919_v27 = vld [vmem:[%s13133_s20 + $0xb30] ss:$100 sps:$4 sm:$0xff]  }
0x1527   :  { %6367 = vmatprep.subr.bf16.mxu0 %v9864_v28  ;;  %6408 = vmatprep.subr.bf16.mxu1 %v9867_v31 }
0x1529   :  { %v11864_v38 = vpop.f32.mrf.mxu0  ;;  %v11866_v2 = vpop.f32.mrf.mxu1  ;;  %6318 = vmatmul.mubr.bf16.vlgmr.msra.gmra.mxu0 %v11640_v7  ;;  %6359 = vmatmul.mubr.bf16.vlgmr.msra.gmra.mxu1 %v11640_v7 }
0x152a   :  { %6368 = vmatpush1.bf16.msra.mxu0 %v9862_v33  ;;  %6409 = vmatpush1.bf16.msra.mxu1 %v9865_v32  ;;  %v9924_v33 = vld [vmem:[%s13133_s20 + $0xa64] ss:$100 sps:$4 sm:$0xff]   ;;  %v9927_v32 = vld [vmem:[%s13133_s20 + $0xa6c] ss:$100 sps:$4 sm:$0xff]  }
0x152b   :  { %v11876_v34 = vpop.f32.mrf.mxu0  ;;  %v11878_v44 = vpop.f32.mrf.mxu1  ;;  %6369 = vmatprep.subr.bf16.mxu0 %v9870_v35  ;;  %6410 = vmatprep.subr.bf16.mxu1 %v9873_v63 }
0x152c   :  { %6399 = vmatprep.mubr.bf16.mxu0 %v10170_v37  ;;  %6440 = vmatprep.mubr.bf16.mxu1 %v10170_v37 }
0x152d   :  { %v4392_v59 = vpop.f32.mrf.mxu0  ;;  %v4433_v46 = vpop.f32.mrf.mxu1 }
0x152e   :  { %6370 = vmatpush1.bf16.msra.mxu0 %v9868_v41  ;;  %6411 = vmatpush1.bf16.msra.mxu1 %v9871_v42  ;;  %v9922_v41 = vld [vmem:[%s13133_s20 + $0xa60] ss:$100 sps:$4 sm:$0xff]   ;;  %v9925_v42 = vld [vmem:[%s13133_s20 + $0xa68] ss:$100 sps:$4 sm:$0xff]  }
0x152f   :  { %v4393_v49 = vpop.f32.mrf.mxu0  ;;  %v4434_v50 = vpop.f32.mrf.mxu1  ;;  %6371 = vmatprep.subr.bf16.mxu0 %v9876_v0  ;;  %6412 = vmatprep.subr.bf16.mxu1 %v9879_v45  ;;  %v9930_v59 = vld [vmem:[%s13133_s20 + $0x99c] ss:$100 sps:$4 sm:$0xff]   ;;  %v9933_v46 = vld [vmem:[%s13133_s20 + $0x9a4] ss:$100 sps:$4 sm:$0xff]  }
0x1530   :  { %v9936_v49 = vld [vmem:[%s13133_s20 + $0x8d4] ss:$100 sps:$4 sm:$0xff]   ;;  %v9939_v50 = vld [vmem:[%s13133_s20 + $0x8dc] ss:$100 sps:$4 sm:$0xff]  }
0x1532   :  { %6372 = vmatpush1.bf16.msra.mxu0 %v9874_v47  ;;  %6413 = vmatpush1.bf16.msra.mxu1 %v9877_v48  ;;  %v9928_v47 = vld [vmem:[%s13133_s20 + $0x998] ss:$100 sps:$4 sm:$0xff]   ;;  %v9931_v48 = vld [vmem:[%s13133_s20 + $0x9a0] ss:$100 sps:$4 sm:$0xff]  }
0x1533   :  { %6373 = vmatprep.subr.bf16.mxu0 %v9882_v53  ;;  %6414 = vmatprep.subr.bf16.mxu1 %v9885_v54  ;;  %v9934_v53 = vld [vmem:[%s13133_s20 + $0x8d0] ss:$100 sps:$4 sm:$0xff]   ;;  %v9937_v54 = vld [vmem:[%s13133_s20 + $0x8d8] ss:$100 sps:$4 sm:$0xff]  }
0x1536   :  { %6374 = vmatpush1.bf16.msra.mxu0 %v9880_v57  ;;  %6415 = vmatpush1.bf16.msra.mxu1 %v9883_v58  ;;  %v9942_v57 = vld [vmem:[%s13133_s20 + $0x80c] ss:$100 sps:$4 sm:$0xff]   ;;  %v9945_v58 = vld [vmem:[%s13133_s20 + $0x814] ss:$100 sps:$4 sm:$0xff]  }
0x1537   :  { %6375 = vmatprep.subr.bf16.mxu0 %v9888_v60  ;;  %6416 = vmatprep.subr.bf16.mxu1 %v9891_v61  ;;  %v9940_v60 = vld [vmem:[%s13133_s20 + $0x808] ss:$100 sps:$4 sm:$0xff]   ;;  %v9943_v61 = vld [vmem:[%s13133_s20 + $0x810] ss:$100 sps:$4 sm:$0xff]  }
0x153a   :  { %6376 = vmatpush1.bf16.msra.mxu0 %v9886_v62  ;;  %6417 = vmatpush1.bf16.msra.mxu1 %v9889_v1  ;;  %v9948_v62 = vld [vmem:[%s13133_s20 + $0x744] ss:$100 sps:$4 sm:$0xff]   ;;  %v9951_v1 = vld [vmem:[%s13133_s20 + $0x74c] ss:$100 sps:$4 sm:$0xff]  }
0x153b   :  { %6377 = vmatprep.subr.bf16.mxu0 %v9894_v3  ;;  %6418 = vmatprep.subr.bf16.mxu1 %v9897_v4  ;;  %v9946_v3 = vld [vmem:[%s13133_s20 + $0x740] ss:$100 sps:$4 sm:$0xff]   ;;  %v9949_v4 = vld [vmem:[%s13133_s20 + $0x748] ss:$100 sps:$4 sm:$0xff]  }
0x153e   :  { %6378 = vmatpush1.bf16.msra.mxu0 %v9892_v36  ;;  %6419 = vmatpush1.bf16.msra.mxu1 %v9895_v5  ;;  %v9954_v36 = vld [vmem:[%s13133_s20 + $0x67c] ss:$100 sps:$4 sm:$0xff]   ;;  %v9957_v5 = vld [vmem:[%s13133_s20 + $0x684] ss:$100 sps:$4 sm:$0xff]  }
0x153f   :  { %6379 = vmatprep.subr.bf16.mxu0 %v9900_v8  ;;  %6420 = vmatprep.subr.bf16.mxu1 %v9903_v9  ;;  %v9952_v8 = vld [vmem:[%s13133_s20 + $0x678] ss:$100 sps:$4 sm:$0xff]   ;;  %v9955_v9 = vld [vmem:[%s13133_s20 + $0x680] ss:$100 sps:$4 sm:$0xff]  }
0x1542   :  { %6380 = vmatpush1.bf16.msra.mxu0 %v9898_v30  ;;  %6421 = vmatpush1.bf16.msra.mxu1 %v9901_v12  ;;  %v9960_v30 = vld [vmem:[%s13133_s20 + $0xc04] ss:$100 sps:$4 sm:$0xff]   ;;  %v9963_v12 = vld [vmem:[%s13133_s20 + $0xc0c] ss:$100 sps:$4 sm:$0xff]  }
0x1543   :  { %6381 = vmatprep.subr.bf16.mxu0 %v9906_v14  ;;  %6422 = vmatprep.subr.bf16.mxu1 %v9909_v15  ;;  %v9958_v14 = vld [vmem:[%s13133_s20 + $0xc00] ss:$100 sps:$4 sm:$0xff]   ;;  %v9961_v15 = vld [vmem:[%s13133_s20 + $0xc08] ss:$100 sps:$4 sm:$0xff]  }
0x1546   :  { %6382 = vmatpush1.bf16.msra.mxu0 %v9904_v16  ;;  %6423 = vmatpush1.bf16.msra.mxu1 %v9907_v17  ;;  %v9966_v16 = vld [vmem:[%s13133_s20 + $0xb3c] ss:$100 sps:$4 sm:$0xff]   ;;  %v9969_v17 = vld [vmem:[%s13133_s20 + $0xb44] ss:$100 sps:$4 sm:$0xff]  }
0x1547   :  { %6449 = vmatprep.subr.bf16.mxu0 %v9912_v18  ;;  %6490 = vmatprep.subr.bf16.mxu1 %v9915_v19 }
0x1549   :  { %v11972_v24 = vpop.f32.mrf.mxu0  ;;  %v11974_v25 = vpop.f32.mrf.mxu1  ;;  %6400 = vmatmul.mubr.bf16.vlgmr.msra.gmra.mxu0 %v11640_v7  ;;  %6441 = vmatmul.mubr.bf16.vlgmr.msra.gmra.mxu1 %v11640_v7 }
0x154a   :  { %6450 = vmatpush1.bf16.msra.mxu0 %v9910_v20  ;;  %6491 = vmatpush1.bf16.msra.mxu1 %v9913_v21  ;;  %v9964_v20 = vld [vmem:[%s13133_s20 + $0xb38] ss:$100 sps:$4 sm:$0xff]   ;;  %v9967_v21 = vld [vmem:[%s13133_s20 + $0xb40] ss:$100 sps:$4 sm:$0xff]  }
0x154b   :  { %v11984_v28 = vpop.f32.mrf.mxu0  ;;  %v11986_v31 = vpop.f32.mrf.mxu1  ;;  %6451 = vmatprep.subr.bf16.mxu0 %v9918_v22  ;;  %6492 = vmatprep.subr.bf16.mxu1 %v9921_v23 }
0x154c   :  { %6481 = vmatprep.mubr.bf16.mxu0 %v10170_v37  ;;  %6522 = vmatprep.mubr.bf16.mxu1 %v10170_v37 }
0x154d   :  { %v4474_v35 = vpop.f32.mrf.mxu0  ;;  %v4515_v63 = vpop.f32.mrf.mxu1 }
0x154e   :  { %6452 = vmatpush1.bf16.msra.mxu0 %v9916_v26  ;;  %6493 = vmatpush1.bf16.msra.mxu1 %v9919_v27  ;;  %v9972_v26 = vld [vmem:[%s13133_s20 + $0xa74] ss:$100 sps:$4 sm:$0xff]   ;;  %v9975_v27 = vld [vmem:[%s13133_s20 + $0xa7c] ss:$100 sps:$4 sm:$0xff]  }
0x154f   :  { %v4475_v0 = vpop.f32.mrf.mxu0  ;;  %v4516_v45 = vpop.f32.mrf.mxu1  ;;  %6453 = vmatprep.subr.bf16.mxu0 %v9924_v33  ;;  %6494 = vmatprep.subr.bf16.mxu1 %v9927_v32  ;;  %v9970_v35 = vld [vmem:[%s13133_s20 + $0xa70] ss:$100 sps:$4 sm:$0xff]   ;;  %v9973_v63 = vld [vmem:[%s13133_s20 + $0xa78] ss:$100 sps:$4 sm:$0xff]  }
0x1550   :  { %v9978_v0 = vld [vmem:[%s13133_s20 + $0x9ac] ss:$100 sps:$4 sm:$0xff]   ;;  %v9981_v45 = vld [vmem:[%s13133_s20 + $0x9b4] ss:$100 sps:$4 sm:$0xff]  }
0x1552   :  { %6454 = vmatpush1.bf16.msra.mxu0 %v9922_v41  ;;  %6495 = vmatpush1.bf16.msra.mxu1 %v9925_v42 }
0x1553   :  { %6455 = vmatprep.subr.bf16.mxu0 %v9930_v59  ;;  %6496 = vmatprep.subr.bf16.mxu1 %v9933_v46  ;;  %v9976_v59 = vld [vmem:[%s13133_s20 + $0x9a8] ss:$100 sps:$4 sm:$0xff]   ;;  %v9979_v46 = vld [vmem:[%s13133_s20 + $0x9b0] ss:$100 sps:$4 sm:$0xff]  }
0x1556   :  { %6456 = vmatpush1.bf16.msra.mxu0 %v9928_v47  ;;  %6497 = vmatpush1.bf16.msra.mxu1 %v9931_v48  ;;  %v9984_v47 = vld [vmem:[%s13133_s20 + $0x8e4] ss:$100 sps:$4 sm:$0xff]   ;;  %v9987_v48 = vld [vmem:[%s13133_s20 + $0x8ec] ss:$100 sps:$4 sm:$0xff]  }
0x1557   :  { %6457 = vmatprep.subr.bf16.mxu0 %v9936_v49  ;;  %6498 = vmatprep.subr.bf16.mxu1 %v9939_v50  ;;  %v9982_v49 = vld [vmem:[%s13133_s20 + $0x8e0] ss:$100 sps:$4 sm:$0xff]   ;;  %v9985_v50 = vld [vmem:[%s13133_s20 + $0x8e8] ss:$100 sps:$4 sm:$0xff]  }
0x155a   :  { %6458 = vmatpush1.bf16.msra.mxu0 %v9934_v53  ;;  %6499 = vmatpush1.bf16.msra.mxu1 %v9937_v54  ;;  %v9990_v53 = vld [vmem:[%s13133_s20 + $0x81c] ss:$100 sps:$4 sm:$0xff]   ;;  %v9993_v54 = vld [vmem:[%s13133_s20 + $0x824] ss:$100 sps:$4 sm:$0xff]  }
0x155b   :  { %6459 = vmatprep.subr.bf16.mxu0 %v9942_v57  ;;  %6500 = vmatprep.subr.bf16.mxu1 %v9945_v58  ;;  %v9988_v57 = vld [vmem:[%s13133_s20 + $0x818] ss:$100 sps:$4 sm:$0xff]   ;;  %v9991_v58 = vld [vmem:[%s13133_s20 + $0x820] ss:$100 sps:$4 sm:$0xff]  }
0x155e   :  { %6460 = vmatpush1.bf16.msra.mxu0 %v9940_v60  ;;  %6501 = vmatpush1.bf16.msra.mxu1 %v9943_v61  ;;  %v9996_v60 = vld [vmem:[%s13133_s20 + $0x754] ss:$100 sps:$4 sm:$0xff]   ;;  %v9999_v61 = vld [vmem:[%s13133_s20 + $0x75c] ss:$100 sps:$4 sm:$0xff]  }
0x155f   :  { %6461 = vmatprep.subr.bf16.mxu0 %v9948_v62  ;;  %6502 = vmatprep.subr.bf16.mxu1 %v9951_v1  ;;  %v9994_v62 = vld [vmem:[%s13133_s20 + $0x750] ss:$100 sps:$4 sm:$0xff]   ;;  %v9997_v1 = vld [vmem:[%s13133_s20 + $0x758] ss:$100 sps:$4 sm:$0xff]  }
0x1562   :  { %6462 = vmatpush1.bf16.msra.mxu0 %v9946_v3  ;;  %6503 = vmatpush1.bf16.msra.mxu1 %v9949_v4  ;;  %v10002_v3 = vld [vmem:[%s13133_s20 + $0x68c] ss:$100 sps:$4 sm:$0xff]   ;;  %v10005_v4 = vld [vmem:[%s13133_s20 + $0x694] ss:$100 sps:$4 sm:$0xff]  }
0x1563   :  { %6463 = vmatprep.subr.bf16.mxu0 %v9954_v36  ;;  %6504 = vmatprep.subr.bf16.mxu1 %v9957_v5  ;;  %v10000_v36 = vld [vmem:[%s13133_s20 + $0x688] ss:$100 sps:$4 sm:$0xff]   ;;  %v10003_v5 = vld [vmem:[%s13133_s20 + $0x690] ss:$100 sps:$4 sm:$0xff]  }
0x1566   :  { %6464 = vmatpush1.bf16.msra.mxu0 %v9952_v8  ;;  %6505 = vmatpush1.bf16.msra.mxu1 %v9955_v9  ;;  %v10008_v8 = vld [vmem:[%s13133_s20 + $0xc14] ss:$100 sps:$4 sm:$0xff]  }
0x1567   :  { %6531 = vmatprep.subr.bf16.mxu0 %v9960_v30  ;;  %6572 = vmatprep.subr.bf16.mxu1 %v9963_v12  ;;  %v10006_v9 = vld [vmem:[%s13133_s20 + $0xc10] ss:$100 sps:$4 sm:$0xff]   ;;  %v10009_v30 = vld [vmem:[%s13133_s20 + $0xc18] ss:$100 sps:$4 sm:$0xff]  }
0x1568   :  { %v10012_v12 = vld [vmem:[%s13133_s20 + $0xb4c] ss:$100 sps:$4 sm:$0xff]  }
0x1569   :  { %v12080_v18 = vpop.f32.mrf.mxu0  ;;  %v12082_v19 = vpop.f32.mrf.mxu1  ;;  %6482 = vmatmul.mubr.bf16.vlgmr.msra.gmra.mxu0 %v11640_v7  ;;  %6523 = vmatmul.mubr.bf16.vlgmr.msra.gmra.mxu1 %v11640_v7 }
0x156a   :  { %6532 = vmatpush1.bf16.msra.mxu0 %v9958_v14  ;;  %6573 = vmatpush1.bf16.msra.mxu1 %v9961_v15 }
0x156b   :  { %v12092_v22 = vpop.f32.mrf.mxu0  ;;  %v12094_v23 = vpop.f32.mrf.mxu1  ;;  %6533 = vmatprep.subr.bf16.mxu0 %v9966_v16  ;;  %6574 = vmatprep.subr.bf16.mxu1 %v9969_v17  ;;  %v10010_v16 = vld [vmem:[%s13133_s20 + $0xb48] ss:$100 sps:$4 sm:$0xff]   ;;  %v10013_v17 = vld [vmem:[%s13133_s20 + $0xb50] ss:$100 sps:$4 sm:$0xff]  }
0x156c   :  { %6563 = vmatprep.mubr.bf16.mxu0 %v10170_v37  ;;  %6604 = vmatprep.mubr.bf16.mxu1 %v10170_v37 }
0x156d   :  { %v4556_v33 = vpop.f32.mrf.mxu0  ;;  %v4597_v32 = vpop.f32.mrf.mxu1 }
0x156e   :  { %6534 = vmatpush1.bf16.msra.mxu0 %v9964_v20  ;;  %6575 = vmatpush1.bf16.msra.mxu1 %v9967_v21  ;;  %v10014_v32 = vld [vmem:[%s13133_s20 + $0xa80] ss:$100 sps:$4 sm:$0xff]  }
0x156f   :  { %v4557_v41 = vpop.f32.mrf.mxu0  ;;  %v4598_v42 = vpop.f32.mrf.mxu1  ;;  %6535 = vmatprep.subr.bf16.mxu0 %v9972_v26  ;;  %6576 = vmatprep.subr.bf16.mxu1 %v9975_v27  ;;  %v10016_v26 = vld [vmem:[%s13133_s20 + $0xa84] ss:$100 sps:$4 sm:$0xff]  }
0x1570   :  { %v10018_v42 = vld [vmem:[%s13133_s20 + $0x9b8] ss:$100 sps:$4 sm:$0xff]  }
0x1572   :  { %6536 = vmatpush1.bf16.msra.mxu0 %v9970_v35  ;;  %6577 = vmatpush1.bf16.msra.mxu1 %v9973_v63  ;;  %v10017_v35 = vld [vmem:[%s13133_s20 + $0xa88] ss:$100 sps:$4 sm:$0xff]  }
0x1573   :  { %6537 = vmatprep.subr.bf16.mxu0 %v9978_v0  ;;  %6578 = vmatprep.subr.bf16.mxu1 %v9981_v45  ;;  %v10021_v0 = vld [vmem:[%s13133_s20 + $0x9c0] ss:$100 sps:$4 sm:$0xff]   ;;  %v10024_v45 = vld [vmem:[%s13133_s20 + $0x8f4] ss:$100 sps:$4 sm:$0xff]  }
0x1576   :  { %6538 = vmatpush1.bf16.msra.mxu0 %v9976_v59  ;;  %6579 = vmatpush1.bf16.msra.mxu1 %v9979_v46  ;;  %v10022_v59 = vld [vmem:[%s13133_s20 + $0x8f0] ss:$100 sps:$4 sm:$0xff]   ;;  %v10025_v46 = vld [vmem:[%s13133_s20 + $0x8f8] ss:$100 sps:$4 sm:$0xff]  }
0x1577   :  { %6539 = vmatprep.subr.bf16.mxu0 %v9984_v47  ;;  %6580 = vmatprep.subr.bf16.mxu1 %v9987_v48  ;;  %v10028_v47 = vld [vmem:[%s13133_s20 + $0x82c] ss:$100 sps:$4 sm:$0xff]   ;;  %v4685_v48 = vlaneseq }
0x157a   :  { %6540 = vmatpush1.bf16.msra.mxu0 %v9982_v49  ;;  %6581 = vmatpush1.bf16.msra.mxu1 %v9985_v50  ;;  %v10026_v49 = vld [vmem:[%s13133_s20 + $0x828] ss:$100 sps:$4 sm:$0xff]   ;;  %v10029_v50 = vld [vmem:[%s13133_s20 + $0x830] ss:$100 sps:$4 sm:$0xff]  }
0x157b   :  { %6541 = vmatprep.subr.bf16.mxu0 %v9990_v53  ;;  %6582 = vmatprep.subr.bf16.mxu1 %v9993_v54  ;;  %v10032_v53 = vld [vmem:[%s13133_s20 + $0x764] ss:$100 sps:$4 sm:$0xff]   ;;  %v12244_v54 = vshrl.u32 %v4685_v48, 7 }
0x157e   :  { %6542 = vmatpush1.bf16.msra.mxu0 %v9988_v57  ;;  %6583 = vmatpush1.bf16.msra.mxu1 %v9991_v58  ;;  %v10030_v57 = vld [vmem:[%s13133_s20 + $0x760] ss:$100 sps:$4 sm:$0xff]   ;;  %v10033_v58 = vld [vmem:[%s13133_s20 + $0x768] ss:$100 sps:$4 sm:$0xff]  }
0x157f   :  { %6543 = vmatprep.subr.bf16.mxu0 %v9996_v60  ;;  %6584 = vmatprep.subr.bf16.mxu1 %v9999_v61  ;;  %v10036_v60 = vld [vmem:[%s13133_s20 + $0x69c] ss:$100 sps:$4 sm:$0xff]   ;;  %v12257_v61 = vsub.s32 0, %v12244_v54 }
0x1582   :  { %6544 = vmatpush1.bf16.msra.mxu0 %v9994_v62  ;;  %6585 = vmatpush1.bf16.msra.mxu1 %v9997_v1  ;;  %v12262_v62 = vld [vmem:[%s13134_s21] sm:$0xff]  ;;  %v12265_v1 = vsub.s32 1, %v12244_v54 }
0x1583   :  { %6545 = vmatprep.subr.bf16.mxu0 %v10002_v3  ;;  %6586 = vmatprep.subr.bf16.mxu1 %v10005_v4  ;;  %v10034_v3 = vld [vmem:[%s13133_s20 + $0x698] ss:$100 sps:$4 sm:$0xff]   ;;  %v10037_v4 = vld [vmem:[%s13133_s20 + $0x6a0] ss:$100 sps:$4 sm:$0xff]  }
0x1586   :  { %6546 = vmatpush1.bf16.msra.mxu0 %v10000_v36  ;;  %6587 = vmatpush1.bf16.msra.mxu1 %v10003_v5  ;;  %v4688_v36 = vrot.slane %v12262_v62, %v12257_v61  ;;  %v8104_v5 = vld [vmem:[%s13128_s15] ss:$0 sm:$0xff] }
0x1587   :  { %6613 = vmatprep.subr.bf16.mxu0 %v10008_v8  ;;  %9278 = vmatprep.subr.bf16.mxu1 %v10168_v6  ;;  %v4692_v8 = vrot.slane %v12262_v62, %v12265_v1 }
0x1589   :  { %v12183_v14 = vpop.f32.mrf.mxu0  ;;  %v12185_v15 = vpop.f32.mrf.mxu1  ;;  %6564 = vmatmul.mubr.bf16.vlgmr.msra.gmra.mxu0 %v11640_v7  ;;  %6605 = vmatmul.mubr.bf16.vlgmr.msra.gmra.mxu1 %v11640_v7 }
0x158a   :  { %6614 = vmatpush1.bf16.msra.mxu0 %v10006_v9  ;;  %9279 = vmatpush3.bf16.msra.mxu1 %v10009_v30  ;;  %v2932_v9 = vadd.f32 %v8104_v5, %v11550_v39  ;;  %v4810_v30 = vadd.f32 %v4688_v36, %v11552_v40 }
0x158b   :  { %v12195_v20 = vpop.f32.mrf.mxu0  ;;  %v9256_v21 = vpop.f32.mrf.mxu1  ;;  %6615 = vmatprep.subr.bf16.mxu0 %v10012_v12  ;;  %9280 = vmatprep.subr.bf16.mxu1 %v10168_v6 }
0x158c   :  { %6645 = vmatprep.mubr.bf16.mxu0 %v10170_v37  ;;  %9294 = vmatprep.mubr.msk.bf16.mxu1 %vm10169_vm1, %v10168_v6  ;;  %v10020_v37 = vld [vmem:[%s13133_s20 + $0x9bc] ss:$100 sps:$4 sm:$0xff]  }
0x158d   :  { %v4638_v27 = vpop.f32.mrf.mxu0  ;;  %v4678_v33 = vpop.f32.mrf.mxu1 }
0x158e   :  { %6616 = vmatpush1.bf16.msra.mxu0 %v10010_v16  ;;  %9281 = vmatpush3.bf16.msra.mxu1 %v10013_v17  ;;  %v4811_v17 = vadd.f32 %v4692_v8, %v11560_v43 }
0x158f   :  { %v4639_v63 = vpop.f32.mrf.mxu0  ;;  %v9257_v41 = vpop.f32.mrf.mxu1  ;;  %6617 = vmatprep.subr.bf16.mxu0 %v10016_v26  ;;  %9282 = vmatprep.subr.bf16.mxu1 %v10168_v6 }
0x1590   :  { %v12302_v63 = vsub.s32 2, %v12244_v54  ;;  %v12305_v41 = vsub.s32 4, %v12244_v54 }
0x1592   :  { %6618 = vmatpush1.bf16.msra.mxu0 %v10014_v32  ;;  %9283 = vmatpush3.bf16.msra.mxu1 %v10017_v35 }
0x1593   :  { %6619 = vmatprep.subr.bf16.mxu0 %v10020_v37  ;;  %9284 = vmatprep.subr.bf16.mxu1 %v10168_v6  ;;  %v12308_v37 = vsub.s32 3, %v12244_v54 }
0x1596   :  { %6620 = vmatpush1.bf16.msra.mxu0 %v10018_v42  ;;  %9285 = vmatpush3.bf16.msra.mxu1 %v10021_v0  ;;  %v12311_v42 = vsub.s32 5, %v12244_v54  ;;  %v4696_v0 = vrot.slane %v12262_v62, %v12302_v63 }
0x1597   :  { %6621 = vmatprep.subr.bf16.mxu0 %v10024_v45  ;;  %9286 = vmatprep.subr.bf16.mxu1 %v10168_v6  ;;  %v4704_v45 = vrot.slane %v12262_v62, %v12305_v41 }
0x1599   :  { %v4814_v48 = vadd.f32 %v4704_v45, %v11650_v11 }
0x159a   :  { %6622 = vmatpush1.bf16.msra.mxu0 %v10022_v59  ;;  %9287 = vmatpush3.bf16.msra.mxu1 %v10025_v46  ;;  %v4700_v59 = vrot.slane %v12262_v62, %v12308_v37  ;;  %v4708_v46 = vrot.slane %v12262_v62, %v12311_v42 }
0x159b   :  { %6623 = vmatprep.subr.bf16.mxu0 %v10028_v47  ;;  %9288 = vmatprep.subr.bf16.mxu1 %v10168_v6  ;;  %v4812_v47 = vadd.f32 %v4696_v0, %v11648_v10 }
0x159e   :  { %6624 = vmatpush1.bf16.msra.mxu0 %v10026_v49  ;;  %9289 = vmatpush3.bf16.msra.mxu1 %v10029_v50 }
0x159f   :  { %6625 = vmatprep.subr.bf16.mxu0 %v10032_v53  ;;  %9290 = vmatprep.subr.bf16.mxu1 %v10168_v6  ;;  %v4813_v53 = vadd.f32 %v4700_v59, %v11660_v29  ;;  %v2813_v29 = vld [vmem:[%s13134_s21 + $0x8] sm:$0xff] }
0x15a2   :  { %6626 = vmatpush1.bf16.msra.mxu0 %v10030_v57  ;;  %9291 = vmatpush3.bf16.msra.mxu1 %v10033_v58  ;;  %v4815_v57 = vadd.f32 %v4708_v46, %v11662_v13  ;;  %v12340_v13 = vsub.s32 7, %v12244_v54 }
0x15a3   :  { %6627 = vmatprep.subr.bf16.mxu0 %v10036_v60  ;;  %9292 = vmatprep.subr.bf16.mxu1 %v10168_v6 }
0x15a6   :  { %6628 = vmatpush1.bf16.msra.mxu0 %v10034_v3  ;;  %9293 = vmatpush3.bf16.msra.mxu1 %v10037_v4 }
0x15a7   :  { %9298 = vmatprep.subr.bf16.mxu0 %v10168_v6  ;;  %9318 = vmatprep.subr.bf16.mxu1 %v10168_v6 }
0x15a9   :  { %v4938_v12 = vpop.f32.mrf.mxu0  ;;  %v6196_v16 = vpop.f32.mrf.mxu1  ;;  %6646 = vmatmul.mubr.bf16.vlgmr.msra.gmra.mxu0 %v11640_v7  ;;  %9295 = vmatmul.mubr.bf16.vlgmr.msra.gmra.mxu1 %v11640_v7 }
0x15aa   :  { %v12288_v21 = vadd.f32 %v4938_v12, %v2932_v9  ;;  %v12290_v26 = vadd.f32 %v6196_v16, %v4810_v30  ;;  %9314 = vmatprep.mubr.msk.bf16.mxu0 %vm10169_vm1, %v10168_v6  ;;  %9334 = vmatprep.mubr.msk.bf16.mxu1 %vm10169_vm1, %v10168_v6  ;;  %v12334_v30 = vsub.s32 6, %v12244_v54  ;;  %v4720_v16 = vrot.slane %v2813_v29, %v12257_v61 }
0x15ab   :  { %v9276_v39 = vpop.f32.mrf.mxu0  ;;  %v6198_v40 = vpop.f32.mrf.mxu1 }
0x15ac   :  { %6719 = vst [vmem:[#allocation2] sm:$0x3] %v12288_v21  ;;  %v12297_v27 = vadd.f32 %v6198_v40, %v4811_v17  ;;  %v6722_v7 = vsel %vm357_vm2, %v12288_v21, 0.0  ;;  %v4712_v12 = vrot.slane %v12262_v62, %v12334_v30  ;;  %v4716_v17 = vrot.slane %v12262_v62, %v12340_v13 }
0x15ad   :  { %6723 = vadd.xlane.f32.xlu1 %v6722_v7  ;;  %v4941_v43 = vpop.f32.mrf.mxu0  ;;  %v6200_v33 = vpop.f32.mrf.mxu1  ;;  %v4724_v39 = vrot.slane %v2813_v29, %v12265_v1  ;;  %v4818_v7 = vadd.f32 %v4720_v16, %v11758_v52 }
0x15ae   :  { %v4816_v40 = vadd.f32 %v4712_v12, %v11756_v51 }
0x15af   :  { %v9277_v32 = vpop.f32.mrf.mxu0  ;;  %v6201_v35 = vpop.f32.mrf.mxu1 }
0x15b0   :  { %v4817_v32 = vadd.f32 %v4716_v17, %v11768_v55  ;;  %v4819_v35 = vadd.f32 %v4724_v39, %v11770_v56  ;;  %v4736_v55 = vrot.slane %v2813_v29, %v12305_v41  ;;  %v4732_v56 = vrot.slane %v2813_v29, %v12308_v37 }
0x15c9   :  { %v6237_v49 = vpop.f32.mrf.mxu0  ;;  %v6278_v50 = vpop.f32.mrf.mxu1 }
0x15ca   :  { %v12325_v58 = vadd.f32 %v6237_v49, %v4812_v47  ;;  %v12327_v60 = vadd.f32 %v6278_v50, %v4814_v48  ;;  %v4728_v50 = vrot.slane %v2813_v29, %v12302_v63 }
0x15cb   :  { %v6239_v3 = vpop.f32.mrf.mxu0  ;;  %v6280_v4 = vpop.f32.mrf.mxu1 }
0x15cc   :  { %v12329_v36 = vadd.f32 %v6239_v3, %v4813_v53  ;;  %v12331_v5 = vadd.f32 %v6280_v4, %v4815_v57  ;;  %v4740_v53 = vrot.slane %v2813_v29, %v12311_v42  ;;  %v4820_v57 = vadd.f32 %v4728_v50, %v11864_v38 }
0x15cd   :  { %v6241_v8 = vpop.f32.mrf.mxu0  ;;  %v6282_v10 = vpop.f32.mrf.mxu1  ;;  %v4822_v3 = vadd.f32 %v4736_v55, %v11866_v2 }
0x15ce   :  { %v4821_v10 = vadd.f32 %v4732_v56, %v11876_v34  ;;  %v12379_v34 = vld [vmem:[%s13134_s21 + $0x10] sm:$0xff] }
0x15cf   :  { %v6242_v9 = vpop.f32.mrf.mxu0  ;;  %v6283_v11 = vpop.f32.mrf.mxu1 }
0x15d0   :  { %v4823_v9 = vadd.f32 %v4740_v53, %v11878_v44  ;;  %v4744_v44 = vrot.slane %v2813_v29, %v12334_v30 }
0x15e9   :  { %v6319_v43 = vpop.f32.mrf.mxu0  ;;  %v6360_v33 = vpop.f32.mrf.mxu1 }
0x15ea   :  { %v12352_v0 = vadd.f32 %v6319_v43, %v4816_v40  ;;  %v12354_v45 = vadd.f32 %v6360_v33, %v4818_v7  ;;  %v4752_v33 = vrot.slane %v12379_v34, %v12257_v61 }
0x15eb   :  { %v6321_v59 = vpop.f32.mrf.mxu0  ;;  %v6362_v46 = vpop.f32.mrf.mxu1 }
0x15ec   :  { %v12356_v47 = vadd.f32 %v6321_v59, %v4817_v32  ;;  %v12358_v62 = vadd.f32 %v6362_v46, %v4819_v35  ;;  %v4748_v32 = vrot.slane %v2813_v29, %v12340_v13  ;;  %v4756_v35 = vrot.slane %v12379_v34, %v12265_v1 }
0x15ed   :  { %v6323_v48 = vpop.f32.mrf.mxu0  ;;  %v6364_v51 = vpop.f32.mrf.mxu1  ;;  %v4824_v59 = vadd.f32 %v4744_v44, %v11972_v24  ;;  %v4826_v46 = vadd.f32 %v4752_v33, %v11974_v25 }
0x15ef   :  { %v6324_v49 = vpop.f32.mrf.mxu0  ;;  %v6365_v52 = vpop.f32.mrf.mxu1 }
0x15f0   :  { %v4825_v49 = vadd.f32 %v4748_v32, %v11984_v28  ;;  %v4827_v52 = vadd.f32 %v4756_v35, %v11986_v31 }
0x1609   :  { %v6401_v4 = vpop.f32.mrf.mxu0  ;;  %v6442_v8 = vpop.f32.mrf.mxu1 }
0x160a   :  { %v12368_v11 = vadd.f32 %v6401_v4, %v4820_v57  ;;  %v12370_v12 = vadd.f32 %v6442_v8, %v4822_v3 }
0x160b   :  { %v6403_v16 = vpop.f32.mrf.mxu0  ;;  %v6444_v17 = vpop.f32.mrf.mxu1 }
0x160c   :  { %v12372_v39 = vadd.f32 %v6403_v16, %v4821_v10  ;;  %v12374_v40 = vadd.f32 %v6444_v17, %v4823_v9  ;;  %v4760_v16 = vrot.slane %v12379_v34, %v12302_v63  ;;  %v4768_v17 = vrot.slane %v12379_v34, %v12305_v41 }
0x160d   :  { %v6405_v7 = vpop.f32.mrf.mxu0  ;;  %v6446_v38 = vpop.f32.mrf.mxu1 }
0x160e   :  { %v4764_v7 = vrot.slane %v12379_v34, %v12308_v37  ;;  %v4772_v38 = vrot.slane %v12379_v34, %v12311_v42 }
0x160f   :  { %v6406_v43 = vpop.f32.mrf.mxu0  ;;  %v6447_v2 = vpop.f32.mrf.mxu1 }
0x1610   :  { %v4830_v43 = vadd.f32 %v4768_v17, %v12082_v19  ;;  %v4829_v33 = vadd.f32 %v4764_v7, %v12092_v22  ;;  %v4831_v32 = vadd.f32 %v4772_v38, %v12094_v23  ;;  %v10038_v22 = vld [vmem:[%s13131_s18 + $0x38] sm:$0xff]   ;;  %v10039_v23 = vld [vmem:[%s13131_s18 + $0x30] sm:$0xff]  }
0x1611   :  { %9299 = vmatpush3.bf16.msra.mxu0 %v10038_v22  ;;  %v8739_v22 = vld [vmem:[%s13130_s17] ss:$0 sm:$0xff] }
0x1612   :  { %9300 = vmatprep.subr.bf16.mxu0 %v10168_v6 }
0x1615   :  { %9301 = vmatpush3.bf16.msra.mxu0 %v10039_v23 }
0x1616   :  { %9302 = vmatprep.subr.bf16.mxu0 %v10168_v6 }
0x1629   :  { %v6483_v48 = vpop.f32.mrf.mxu0  ;;  %v6524_v51 = vpop.f32.mrf.mxu1 }
0x162a   :  { %v12391_v50 = vadd.f32 %v6483_v48, %v4824_v59  ;;  %v12393_v55 = vadd.f32 %v6524_v51, %v4826_v46 }
0x162b   :  { %v6485_v56 = vpop.f32.mrf.mxu0  ;;  %v6526_v53 = vpop.f32.mrf.mxu1 }
0x162c   :  { %v12395_v29 = vadd.f32 %v6485_v56, %v4825_v49  ;;  %v12397_v57 = vadd.f32 %v6526_v53, %v4827_v52  ;;  %v10040_v53 = vld [vmem:[%s13131_s18 + $0x28] sm:$0xff]  }
0x162d   :  { %v6487_v3 = vpop.f32.mrf.mxu0  ;;  %v6528_v24 = vpop.f32.mrf.mxu1  ;;  %9303 = vmatpush3.bf16.msra.mxu0 %v10040_v53 }
0x162e   :  { %v4776_v3 = vrot.slane %v12379_v34, %v12334_v30  ;;  %v8305_v24 = vld [vmem:[%s13134_s21 + $0x18] ss:$0 sm:$0xff]  ;;  %9304 = vmatprep.subr.bf16.mxu0 %v10168_v6 }
0x162f   :  { %v6488_v4 = vpop.f32.mrf.mxu0  ;;  %v6529_v25 = vpop.f32.mrf.mxu1 }
0x1630   :  { %v4780_v4 = vrot.slane %v12379_v34, %v12340_v13  ;;  %v10041_v25 = vld [vmem:[%s13131_s18 + $0x20] sm:$0xff]  }
0x1631   :  { %9305 = vmatpush3.bf16.msra.mxu0 %v10041_v25 }
0x1632   :  { %9306 = vmatprep.subr.bf16.mxu0 %v10168_v6 }
0x1636   :  { %v6724_v8 = vpop.xlane.xlu1 %6723 }
0x1637   :  { %v6725_v10 = vmul.f32 0.0078125, %v6724_v8  ;;  %v4832_v8 = vadd.f32 %v4776_v3, %v12183_v14 }
0x1639   :  { %v12400_v28 = vsub.f32 %v12288_v21, %v6725_v10  ;;  %v4828_v21 = vadd.f32 %v4760_v16, %v12080_v18  ;;  %v4834_v10 = vadd.f32 %v8305_v24, %v12185_v15  ;;  %v4833_v16 = vadd.f32 %v4780_v4, %v12195_v20  ;;  %v10043_v20 = vld [vmem:[%s13131_s18 + $0x10] sm:$0xff]  }
0x163b   :  { %v6727_v31 = vmul.f32 %v12400_v28, %v12400_v28 }
0x163d   :  { %v6728_v9 = vsel %vm357_vm2, %v6727_v31, 0.0 }
0x163e   :  { %6729 = vadd.xlane.f32.xlu0 %v6728_v9 }
0x1649   :  { %v6565_v2 = vpop.f32.mrf.mxu0  ;;  %v6606_v44 = vpop.f32.mrf.mxu1 }
0x164a   :  { %v12417_v35 = vadd.f32 %v6565_v2, %v4828_v21  ;;  %v12419_v59 = vadd.f32 %v6606_v44, %v4830_v43  ;;  %v10042_v21 = vld [vmem:[%s13131_s18 + $0x18] sm:$0xff]  }
0x164b   :  { %v6567_v46 = vpop.f32.mrf.mxu0  ;;  %v6608_v48 = vpop.f32.mrf.mxu1  ;;  %9307 = vmatpush3.bf16.msra.mxu0 %v10042_v21 }
0x164c   :  { %v12421_v51 = vadd.f32 %v6567_v46, %v4829_v33  ;;  %v12423_v49 = vadd.f32 %v6608_v48, %v4831_v32  ;;  %9308 = vmatprep.subr.bf16.mxu0 %v10168_v6  ;;  %v10044_v33 = vld [vmem:[%s13131_s18 + $0x8] sm:$0xff]   ;;  %v10045_v32 = vld [vmem:[%s13131_s18] sm:$0xff]  }
0x164d   :  { %v6569_v52 = vpop.f32.mrf.mxu0  ;;  %v6610_v18 = vpop.f32.mrf.mxu1 }
0x164f   :  { %v6570_v56 = vpop.f32.mrf.mxu0  ;;  %v6611_v19 = vpop.f32.mrf.mxu1  ;;  %9309 = vmatpush3.bf16.msra.mxu0 %v10043_v20 }
0x1650   :  { %9310 = vmatprep.subr.bf16.mxu0 %v10168_v6  ;;  %v8738_v56 = vld [vmem:[%s13129_s16] ss:$0 sm:$0xff] }
0x1653   :  { %9311 = vmatpush3.bf16.msra.mxu0 %v10044_v33 }
0x1654   :  { %9312 = vmatprep.subr.bf16.mxu0 %v10168_v6 }
0x1657   :  { %9313 = vmatpush3.bf16.msra.mxu0 %v10045_v32 }
0x1658   :  { %9338 = vmatprep.subr.bf16.mxu0 %v10168_v6 }
0x1669   :  { %v6647_v31 = vpop.f32.mrf.mxu0  ;;  %v6688_v9 = vpop.f32.mrf.mxu1 }
0x166a   :  { %v12450_v17 = vadd.f32 %v6647_v31, %v4832_v8  ;;  %v12452_v7 = vadd.f32 %v6688_v9, %v4834_v10 }
0x166b   :  { %v6649_v34 = vpop.f32.mrf.mxu0  ;;  %v9296_v38 = vpop.f32.mrf.mxu1 }
0x166c   :  { %v12457_v14 = vadd.f32 %v6649_v34, %v4833_v16 }
0x166d   :  { %v6651_v15 = vpop.f32.mrf.mxu0  ;;  %v6691_v43 = vpop.f32.mrf.mxu1 }
0x166f   :  { %v6652_v2 = vpop.f32.mrf.mxu0  ;;  %v9297_v44 = vpop.f32.mrf.mxu1 }
0x16c7   :  { %v6730_v46 = vpop.xlane.xlu0 %6729 }
0x16c8   :  { %v6731_v48 = vmul.f32 0.0078125, %v6730_v46 }
0x16ca   :  { %v6732_v52 = vadd.f32 1e-05, %v6731_v48 }
0x16cc   :  { %10110 = vrsqrt.f32 %v6732_v52  ;;  %v10046_v52 = vld [vmem:[%s13131_s18 + $0x78] sm:$0xff]  }
0x16cd   :  { %9319 = vmatpush3.bf16.msra.mxu1 %v10046_v52  ;;  %v7182_v52 = vsel %vm357_vm2, %v12325_v58, 0.0 }
0x16ce   :  { %9320 = vmatprep.subr.bf16.mxu1 %v10168_v6 }
0x16d9   :  { %v10111_v18 = vpop.eup %10110 }
0x16da   :  { %v6734_v19 = vmul.f32 %v10111_v18, %v12400_v28  ;;  %v8740_v28 = vld [vmem:[%s13132_s19] ss:$0 sm:$0xff]  ;;  %v10047_v18 = vld [vmem:[%s13131_s18 + $0x70] sm:$0xff]  }
0x16db   :  { %9321 = vmatpush3.bf16.msra.mxu1 %v10047_v18 }
0x16dc   :  { %v6741_v23 = vmul.f32 %v8738_v56, %v6734_v19  ;;  %v10048_v56 = vld [vmem:[%s13131_s18 + $0x68] sm:$0xff]   ;;  %9322 = vmatprep.subr.bf16.mxu1 %v10168_v6  ;;  %v10049_v19 = vld [vmem:[%s13131_s18 + $0x60] sm:$0xff]  }
0x16de   :  { %v6748_v53 = vadd.f32 %v8739_v22, %v6741_v23  ;;  %v10050_v22 = vld [vmem:[%s13131_s18 + $0x58] sm:$0xff]   ;;  %v10051_v23 = vld [vmem:[%s13131_s18 + $0x50] sm:$0xff]  }
0x16df   :  { %9323 = vmatpush3.bf16.msra.mxu1 %v10048_v56 }
0x16e0   :  { %v6750_v3 = vmul.f32 0.044715, %v6748_v53  ;;  %v6749_v31 = vmul.f32 0.5, %v6748_v53  ;;  %9324 = vmatprep.subr.bf16.mxu1 %v10168_v6 }
0x16e2   :  { %v6751_v24 = vmul.f32 %v6750_v3, %v6748_v53  ;;  %v10053_v3 = vld [vmem:[%s13131_s18 + $0x40] sm:$0xff]  }
0x16e3   :  { %9325 = vmatpush3.bf16.msra.mxu1 %v10049_v19  ;;  %v7184_v19 = vsel %vm357_vm2, %v12329_v36, 0.0 }
0x16e4   :  { %v6752_v4 = vmul.f32 %v6751_v24, %v6748_v53  ;;  %9326 = vmatprep.subr.bf16.mxu1 %v10168_v6 }
0x16e6   :  { %v6753_v25 = vadd.f32 %v6752_v4, %v6748_v53  ;;  %v10052_v53 = vld [vmem:[%s13131_s18 + $0x48] sm:$0xff]  }
0x16e7   :  { %9327 = vmatpush3.bf16.msra.mxu1 %v10050_v22 }
0x16e8   :  { %v6754_v8 = vmul.f32 0.7978846, %v6753_v25  ;;  %9328 = vmatprep.subr.bf16.mxu1 %v10168_v6 }
0x16ea   :  { %10112 = vtanh.f32 %v6754_v8 }
0x16eb   :  { %9329 = vmatpush3.bf16.msra.mxu1 %v10051_v23  ;;  %v7186_v23 = vsel %vm357_vm2, %v12327_v60, 0.0 }
0x16ec   :  { %9330 = vmatprep.subr.bf16.mxu1 %v10168_v6 }
0x16ef   :  { %9331 = vmatpush3.bf16.msra.mxu1 %v10052_v53 }
0x16f0   :  { %9332 = vmatprep.subr.bf16.mxu1 %v10168_v6 }
0x16f3   :  { %9333 = vmatpush3.bf16.msra.mxu1 %v10053_v3  ;;  %v7188_v3 = vsel %vm357_vm2, %v12331_v5, 0.0 }
0x16f7   :  { %v10113_v10 = vpop.eup %10112 }
0x16f8   :  { %v6756_v9 = vadd.f32 1.0, %v10113_v10  ;;  %v8751_v10 = vld [vmem:[%s13129_s16 + $0x1] ss:$0 sm:$0xff] }
0x16fa   :  { %v6757_v16 = vmul.f32 %v6756_v9, %v6749_v31  ;;  %v8752_v9 = vld [vmem:[%s13130_s17 + $0x1] ss:$0 sm:$0xff] }
0x16fc   :  { %v6758_v34 = vpack.c.bf16 %v6757_v16, %v6757_v16 }
0x16fe   :  { %9315 = vmatmul.mubr.bf16.vlgmr.msra.gmra.mxu0 %v6758_v34 }
0x16ff   :  { %9354 = vmatprep.mubr.msk.bf16.mxu0 %vm10169_vm1, %v10168_v6 }
0x17be   :  { %v6864_v38 = vpop.f32.mrf.mxu0 }
0x17bf   :  { %v6865_v21 = vadd.f32 %v8740_v28, %v6864_v38 }
0x17c0   :  { %v9316_v15 = vpop.f32.mrf.mxu0 }
0x17c1   :  { %v6874_v43 = vsel %vm357_vm2, %v6865_v21, 0.0 }
0x17c2   :  { %6875 = vadd.xlane.f32.xlu0 %v6874_v43  ;;  %v6867_v2 = vpop.f32.mrf.mxu0 }
0x17c4   :  { %v9317_v44 = vpop.f32.mrf.mxu0 }
0x184b   :  { %v6876_v20 = vpop.xlane.xlu0 %6875 }
0x184c   :  { %v6877_v33 = vmul.f32 0.0078125, %v6876_v20 }
0x184e   :  { %v6878_v32 = vsub.f32 %v6865_v21, %v6877_v33 }
0x1850   :  { %v6879_v46 = vmul.f32 %v6878_v32, %v6878_v32 }
0x1852   :  { %v6880_v48 = vsel %vm357_vm2, %v6879_v46, 0.0 }
0x1853   :  { %6881 = vadd.xlane.f32.xlu1 %v6880_v48  ;;  %v7179_v48 = vsel %vm357_vm2, %v12290_v26, 0.0 }
0x18dc   :  { %v6882_v24 = vpop.xlane.xlu1 %6881 }
0x18dd   :  { %v6883_v4 = vmul.f32 0.0078125, %v6882_v24  ;;  %v7190_v24 = vsel %vm357_vm2, %v12352_v0, 0.0 }
0x18df   :  { %v6884_v25 = vadd.f32 1e-05, %v6883_v4 }
0x18e1   :  { %10114 = vrsqrt.f32 %v6884_v25 }
0x18ee   :  { %v10115_v8 = vpop.eup %10114 }
0x18ef   :  { %v6886_v31 = vmul.f32 %v10115_v8, %v6878_v32  ;;  %v7180_v32 = vsel %vm357_vm2, %v12297_v27, 0.0  ;;  %v7192_v8 = vsel %vm357_vm2, %v12356_v47, 0.0 }
0x18f0   :  { %v7181_v18 = vadd.f32 %v7180_v32, %v7179_v48  ;;  %v7208_v32 = vsel %vm357_vm2, %v12395_v29, 0.0 }
0x18f1   :  { %v6893_v16 = vmul.f32 %v8751_v10, %v6886_v31  ;;  %v7194_v31 = vsel %vm357_vm2, %v12354_v45, 0.0 }
0x18f2   :  { %v7183_v56 = vadd.f32 %v7182_v52, %v7181_v18  ;;  %v7210_v52 = vsel %vm357_vm2, %v12393_v55, 0.0 }
0x18f3   :  { %v6900_v34 = vadd.f32 %v8752_v9, %v6893_v16  ;;  %v7196_v16 = vsel %vm357_vm2, %v12358_v62, 0.0 }
0x18f4   :  { %v7185_v22 = vadd.f32 %v7184_v19, %v7183_v56  ;;  %v7212_v56 = vsel %vm357_vm2, %v12397_v57, 0.0  ;;  %v7214_v19 = vsel %vm357_vm2, %v12417_v35, 0.0 }
0x18f5   :  { %v6902_v28 = vmul.f32 0.044715, %v6900_v34  ;;  %v6901_v44 = vmul.f32 0.5, %v6900_v34 }
0x18f6   :  { %v7187_v53 = vadd.f32 %v7186_v23, %v7185_v22 }
0x18f7   :  { %v6903_v38 = vmul.f32 %v6902_v28, %v6900_v34 }
0x18f8   :  { %v7189_v4 = vadd.f32 %v7188_v3, %v7187_v53  ;;  %v7216_v53 = vsel %vm357_vm2, %v12421_v51, 0.0 }
0x18f9   :  { %v6904_v21 = vmul.f32 %v6903_v38, %v6900_v34 }
0x18fa   :  { %v7191_v25 = vadd.f32 %v7190_v24, %v7189_v4  ;;  %v7218_v24 = vsel %vm357_vm2, %v12419_v59, 0.0 }
0x18fb   :  { %v6905_v15 = vadd.f32 %v6904_v21, %v6900_v34  ;;  %v7198_v34 = vsel %vm357_vm2, %v12368_v11, 0.0  ;;  %v7200_v21 = vsel %vm357_vm2, %v12372_v39, 0.0 }
0x18fc   :  { %v7193_v10 = vadd.f32 %v7192_v8, %v7191_v25  ;;  %v7220_v25 = vsel %vm357_vm2, %v12423_v49, 0.0  ;;  %v7222_v8 = vsel %vm357_vm2, %v12450_v17, 0.0 }
0x18fd   :  { %v6906_v43 = vmul.f32 0.7978846, %v6905_v15 }
0x18fe   :  { %v7195_v9 = vadd.f32 %v7194_v31, %v7193_v10 }
0x18ff   :  { %10116 = vtanh.f32 %v6906_v43  ;;  %v7202_v43 = vsel %vm357_vm2, %v12370_v12, 0.0 }
0x1900   :  { %v7197_v28 = vadd.f32 %v7196_v16, %v7195_v9  ;;  %v8770_v9 = vld [vmem:[%s13132_s19 + $0x1] ss:$0 sm:$0xff]  ;;  %v7224_v16 = vsel %vm357_vm2, %v12457_v14, 0.0 }
0x1902   :  { %v7199_v38 = vadd.f32 %v7198_v34, %v7197_v28 }
0x1904   :  { %v7201_v15 = vadd.f32 %v7200_v21, %v7199_v38 }
0x190c   :  { %v10117_v2 = vpop.eup %10116 }
0x190d   :  { %v6908_v20 = vadd.f32 1.0, %v10117_v2  ;;  %v7203_v2 = vadd.f32 %v7202_v43, %v7201_v15 }
0x190f   :  { %v6909_v33 = vmul.f32 %v6908_v20, %v6901_v44  ;;  %v7204_v44 = vsel %vm357_vm2, %v12374_v40, 0.0  ;;  %v7206_v20 = vsel %vm357_vm2, %v12391_v50, 0.0 }
0x1911   :  { %v6910_v46 = vpack.c.bf16 %v6909_v33, %v6909_v33  ;;  %v7205_v33 = vadd.f32 %v7204_v44, %v7203_v2  ;;  %v7227_v2 = vsel %vm7226_vm5, %v12452_v7, 0.0 }
0x1913   :  { %9335 = vmatmul.mubr.bf16.vlgmr.msra.gmra.mxu1 %v6910_v46  ;;  %v7207_v46 = vadd.f32 %v7206_v20, %v7205_v33 }
0x1915   :  { %v7209_v48 = vadd.f32 %v7208_v32, %v7207_v46 }
0x1917   :  { %v7211_v18 = vadd.f32 %v7210_v52, %v7209_v48 }
0x1919   :  { %v7213_v22 = vadd.f32 %v7212_v56, %v7211_v18 }
0x191b   :  { %v7215_v23 = vadd.f32 %v7214_v19, %v7213_v22 }
0x191d   :  { %v7217_v3 = vadd.f32 %v7216_v53, %v7215_v23 }
0x191f   :  { %v7219_v4 = vadd.f32 %v7218_v24, %v7217_v3 }
0x1921   :  { %v7221_v10 = vadd.f32 %v7220_v25, %v7219_v4 }
0x1923   :  { %v7223_v31 = vadd.f32 %v7222_v8, %v7221_v10 }
0x1925   :  { %v7225_v21 = vadd.f32 %v7224_v16, %v7223_v31 }
0x1927   :  { %v7228_v20 = vadd.f32 %v7227_v2, %v7225_v21 }
0x19d3   :  { %v7018_v34 = vpop.f32.mrf.mxu1 }
0x19d4   :  { %v7019_v28 = vadd.f32 %v8770_v9, %v7018_v34 }
0x19d5   :  { %v9336_v38 = vpop.f32.mrf.mxu1 }
0x19d6   :  { %v7028_v15 = vsel %vm357_vm2, %v7019_v28, 0.0 }
0x19d7   :  { %7029 = vadd.xlane.f32.xlu0 %v7028_v15  ;;  %v7021_v43 = vpop.f32.mrf.mxu1 }
0x19d9   :  { %v9337_v44 = vpop.f32.mrf.mxu1 }
0x19db   :  { %7229 = vadd.xlane.f32.xlu0 %v7228_v20 }
0x1a60   :  { %v7030_v33 = vpop.xlane.xlu0 %7029 }
0x1a61   :  { %v7031_v46 = vmul.f32 0.0078125, %v7030_v33 }
0x1a63   :  { %v12578_v32 = vsub.f32 %v7019_v28, %v7031_v46 }
0x1a64   :  { %v7230_v48 = vpop.xlane.xlu0 %7229 }
0x1a65   :  { %v7033_v52 = vmul.f32 %v12578_v32, %v12578_v32  ;;  %v12582_v18 = vmul.f32 0.00031887754, %v7230_v48 }
0x1a67   :  { %v7034_v56 = vsel %vm357_vm2, %v7033_v52, 0.0  ;;  %v12587_v19 = vsub.f32 %v12290_v26, %v12582_v18  ;;  %v12591_v22 = vsub.f32 %v12297_v27, %v12582_v18  ;;  %v12595_v23 = vsub.f32 %v12325_v58, %v12582_v18 }
0x1a68   :  { %7035 = vadd.xlane.f32.xlu1 %v7034_v56  ;;  %v12601_v3 = vsub.f32 %v12329_v36, %v12582_v18  ;;  %v12607_v26 = vsub.f32 %v12327_v60, %v12582_v18  ;;  %v12614_v4 = vsub.f32 %v12331_v5, %v12582_v18  ;;  %v12621_v10 = vsub.f32 %v12352_v0, %v12582_v18 }
0x1a69   :  { %v7258_v53 = vmul.f32 %v12587_v19, %v12587_v19  ;;  %v7259_v24 = vmul.f32 %v12591_v22, %v12591_v22  ;;  %v7260_v27 = vmul.f32 %v12595_v23, %v12595_v23  ;;  %v12628_v5 = vsub.f32 %v12356_v47, %v12582_v18 }
0x1a6a   :  { %v7261_v36 = vmul.f32 %v12601_v3, %v12601_v3  ;;  %v7262_v60 = vmul.f32 %v12607_v26, %v12607_v26  ;;  %v7263_v16 = vmul.f32 %v12614_v4, %v12614_v4  ;;  %v12635_v0 = vsub.f32 %v12354_v45, %v12582_v18 }
0x1a6b   :  { %v7283_v58 = vsel %vm357_vm2, %v7258_v53, 0.0  ;;  %v7284_v25 = vsel %vm357_vm2, %v7259_v24, 0.0  ;;  %v7286_v31 = vsel %vm357_vm2, %v7260_v27, 0.0  ;;  %v7264_v38 = vmul.f32 %v12621_v10, %v12621_v10 }
0x1a6c   :  { %v7285_v8 = vadd.f32 %v7284_v25, %v7283_v58  ;;  %v7288_v34 = vsel %vm357_vm2, %v7261_v36, 0.0  ;;  %v7290_v21 = vsel %vm357_vm2, %v7262_v60, 0.0  ;;  %v12642_v47 = vsub.f32 %v12358_v62, %v12582_v18 }
0x1a6d   :  { %v7265_v43 = vmul.f32 %v12628_v5, %v12628_v5  ;;  %v7292_v2 = vsel %vm357_vm2, %v7263_v16, 0.0  ;;  %v12649_v45 = vsub.f32 %v12368_v11, %v12582_v18  ;;  %v7266_v20 = vmul.f32 %v12635_v0, %v12635_v0 }
0x1a6e   :  { %v7287_v9 = vadd.f32 %v7286_v31, %v7285_v8  ;;  %v7294_v33 = vsel %vm357_vm2, %v7264_v38, 0.0  ;;  %v12656_v62 = vsub.f32 %v12372_v39, %v12582_v18  ;;  %v7267_v48 = vmul.f32 %v12642_v47, %v12642_v47 }
0x1a6f   :  { %v7296_v52 = vsel %vm357_vm2, %v7265_v43, 0.0  ;;  %v12663_v11 = vsub.f32 %v12370_v12, %v12582_v18  ;;  %v7268_v53 = vmul.f32 %v12649_v45, %v12649_v45  ;;  %v7298_v24 = vsel %vm357_vm2, %v7266_v20, 0.0 }
0x1a70   :  { %v7289_v28 = vadd.f32 %v7288_v34, %v7287_v9  ;;  %v12670_v39 = vsub.f32 %v12374_v40, %v12582_v18  ;;  %v7269_v58 = vmul.f32 %v12656_v62, %v12656_v62  ;;  %v7300_v36 = vsel %vm357_vm2, %v7267_v48, 0.0 }
0x1a71   :  { %v12677_v12 = vsub.f32 %v12391_v50, %v12582_v18  ;;  %v7270_v8 = vmul.f32 %v12663_v11, %v12663_v11  ;;  %v7302_v60 = vsel %vm357_vm2, %v7268_v53, 0.0  ;;  %v12684_v40 = vsub.f32 %v12395_v29, %v12582_v18  ;;  %v10054_v50 = vld [vmem:[%s13131_s18 + $0xb8] sm:$0xff]  }
0x1a72   :  { %v7291_v15 = vadd.f32 %v7290_v21, %v7289_v28  ;;  %v7271_v9 = vmul.f32 %v12670_v39, %v12670_v39  ;;  %v7304_v16 = vsel %vm357_vm2, %v7269_v58, 0.0  ;;  %v12694_v28 = vsub.f32 %v12393_v55, %v12582_v18  ;;  %9339 = vmatpush3.bf16.msra.mxu0 %v10054_v50  ;;  %v10055_v21 = vld [vmem:[%s13131_s18 + $0xb0] sm:$0xff]  }
0x1a73   :  { %v7272_v38 = vmul.f32 %v12677_v12, %v12677_v12  ;;  %v7306_v29 = vsel %vm357_vm2, %v7270_v8, 0.0  ;;  %9340 = vmatprep.subr.bf16.mxu0 %v10168_v6  ;;  %v12705_v43 = vsub.f32 %v12397_v57, %v12582_v18  ;;  %v7273_v55 = vmul.f32 %v12684_v40, %v12684_v40  ;;  %v10056_v57 = vld [vmem:[%s13131_s18 + $0xa8] sm:$0xff]  }
0x1a74   :  { %v7293_v44 = vadd.f32 %v7292_v2, %v7291_v15  ;;  %v7308_v2 = vsel %vm357_vm2, %v7271_v9, 0.0  ;;  %v12712_v20 = vsub.f32 %v12417_v35, %v12582_v18 }
0x1a75   :  { %v7275_v35 = vmul.f32 %v12705_v43, %v12705_v43 }
0x1a76   :  { %v7295_v46 = vadd.f32 %v7294_v33, %v7293_v44  ;;  %v7274_v33 = vmul.f32 %v12694_v28, %v12694_v28  ;;  %9341 = vmatpush3.bf16.msra.mxu0 %v10055_v21  ;;  %v12766_v21 = vsub.f32 %v12452_v7, %v12582_v18 }
0x1a77   :  { %9342 = vmatprep.subr.bf16.mxu0 %v10168_v6  ;;  %v7316_v8 = vsel %vm357_vm2, %v7275_v35, 0.0 }
0x1a78   :  { %v7297_v56 = vadd.f32 %v7296_v52, %v7295_v46  ;;  %v7310_v46 = vsel %vm357_vm2, %v7272_v38, 0.0  ;;  %v12723_v52 = vsub.f32 %v12421_v51, %v12582_v18  ;;  %v7314_v58 = vsel %vm357_vm2, %v7274_v33, 0.0  ;;  %v10057_v51 = vld [vmem:[%s13131_s18 + $0xa0] sm:$0xff]  }
0x1a7a   :  { %v7299_v27 = vadd.f32 %v7298_v24, %v7297_v56  ;;  %v7312_v56 = vsel %vm357_vm2, %v7273_v55, 0.0  ;;  %v12730_v24 = vsub.f32 %v12419_v59, %v12582_v18  ;;  %9343 = vmatpush3.bf16.msra.mxu0 %v10056_v57  ;;  %v7277_v59 = vmul.f32 %v12723_v52, %v12723_v52  ;;  %v10060_v57 = vld [vmem:[%s13131_s18 + $0x88] sm:$0xff]  }
0x1a7b   :  { %9344 = vmatprep.subr.bf16.mxu0 %v10168_v6 }
0x1a7c   :  { %v7301_v25 = vadd.f32 %v7300_v36, %v7299_v27  ;;  %v7276_v27 = vmul.f32 %v12712_v20, %v12712_v20  ;;  %v7278_v9 = vmul.f32 %v12730_v24, %v12730_v24  ;;  %v7320_v38 = vsel %vm357_vm2, %v7277_v59, 0.0 }
0x1a7e   :  { %v7303_v31 = vadd.f32 %v7302_v60, %v7301_v25  ;;  %v12741_v25 = vsub.f32 %v12423_v49, %v12582_v18  ;;  %9345 = vmatpush3.bf16.msra.mxu0 %v10057_v51  ;;  %v10058_v49 = vld [vmem:[%s13131_s18 + $0x98] sm:$0xff]   ;;  %v7322_v55 = vsel %vm357_vm2, %v7278_v9, 0.0 }
0x1a7f   :  { %9346 = vmatprep.subr.bf16.mxu0 %v10168_v6 }
0x1a80   :  { %v7305_v34 = vadd.f32 %v7304_v16, %v7303_v31  ;;  %v12748_v31 = vsub.f32 %v12450_v17, %v12582_v18  ;;  %v7318_v16 = vsel %vm357_vm2, %v7276_v27, 0.0  ;;  %v7279_v17 = vmul.f32 %v12741_v25, %v12741_v25  ;;  %v10061_v27 = vld [vmem:[%s13131_s18 + $0x80] sm:$0xff]  }
0x1a82   :  { %v7307_v15 = vadd.f32 %v7306_v29, %v7305_v34  ;;  %v12759_v34 = vsub.f32 %v12457_v14, %v12582_v18  ;;  %9347 = vmatpush3.bf16.msra.mxu0 %v10058_v49  ;;  %v10059_v14 = vld [vmem:[%s13131_s18 + $0x90] sm:$0xff]   ;;  %v7324_v33 = vsel %vm357_vm2, %v7279_v17, 0.0  ;;  %v7282_v18 = vmul.f32 %v12766_v21, %v12766_v21 }
0x1a83   :  { %9348 = vmatprep.subr.bf16.mxu0 %v10168_v6 }
0x1a84   :  { %v7309_v44 = vadd.f32 %v7308_v2, %v7307_v15  ;;  %v7280_v15 = vmul.f32 %v12748_v31, %v12748_v31 }
0x1a86   :  { %v7311_v48 = vadd.f32 %v7310_v46, %v7309_v44  ;;  %v7281_v44 = vmul.f32 %v12759_v34, %v12759_v34  ;;  %v7326_v46 = vsel %vm357_vm2, %v7280_v15, 0.0  ;;  %9349 = vmatpush3.bf16.msra.mxu0 %v10059_v14 }
0x1a87   :  { %9350 = vmatprep.subr.bf16.mxu0 %v10168_v6 }
0x1a88   :  { %v7313_v53 = vadd.f32 %v7312_v56, %v7311_v48  ;;  %v7328_v35 = vsel %vm357_vm2, %v7281_v44, 0.0 }
0x1a8a   :  { %v7315_v36 = vadd.f32 %v7314_v58, %v7313_v53  ;;  %v7330_v53 = vsel %vm7226_vm5, %v7282_v18, 0.0  ;;  %9351 = vmatpush3.bf16.msra.mxu0 %v10060_v57  ;;  %v12801_v18 = vld [vmem:[%s13135_s22] sm:$0xff]  ;;  %v12811_v57 = vld [vmem:[%s13135_s22 + $0x10] sm:$0xff] }
0x1a8b   :  { %9352 = vmatprep.subr.bf16.mxu0 %v10168_v6 }
0x1a8c   :  { %v7317_v60 = vadd.f32 %v7316_v8, %v7315_v36 }
0x1a8e   :  { %v7319_v50 = vadd.f32 %v7318_v16, %v7317_v60  ;;  %9353 = vmatpush3.bf16.msra.mxu0 %v10061_v27  ;;  %v8781_v60 = vld [vmem:[%s13129_s16 + $0x2] ss:$0 sm:$0xff]  ;;  %v7373_v27 = vrot.slane %v12801_v18, %v12257_v61 }
0x1a8f   :  { %v8782_v16 = vld [vmem:[%s13130_s17 + $0x2] ss:$0 sm:$0xff]  ;;  %s10172_s17 = smov [#allocation2]  }
0x1a90   :  { %v7321_v29 = vadd.f32 %v7320_v38, %v7319_v50  ;;  %s7832_s0 = sshll.u32 %s10172_s17, 4  ;;  %s7833_s0 = int_to_ptr.vmem [resolvable:$true] %s7832_s0 }
0x1a91   :  { %s10124_s5 = scalar_lea.vmem %s7833_s0, 32  ;;  %p10129_p1 = scmp.lt.s32.totalorder %s7833_s0, %s7833_s0 }
0x1a92   :  { %v7323_v2 = vadd.f32 %v7322_v55, %v7321_v29  ;;  %p10125_p0 = scmp.ne.s32.totalorder %s7833_s0, %s10124_s5  ;;  %p10130_p2 = scmp.lt.s32.totalorder %s10124_s5, %s10124_s5 }
0x1a94   :  { %v7325_v7 = vadd.f32 %v7324_v33, %v7323_v2  ;;  %p10131_p3 = por %p10130_p2, %p10129_p1 }
0x1a96   :  { %v7327_v48 = vadd.f32 %v7326_v46, %v7325_v7  ;;  %v12806_v46 = vld [vmem:[%s13135_s22 + $0x8] sm:$0xff]  ;;  %p10132_p4 = pnand %p10131_p3, %p10125_p0 }
0x1a98   :  { %v7329_v56 = vadd.f32 %v7328_v35, %v7327_v48  ;;  %v12816_v48 = vld [vmem:[%s13178_s8] sm:$0xff] }
0x1a9a   :  { %v7331_v58 = vadd.f32 %v7330_v53, %v7329_v56  ;;  %v12821_v56 = vld [vmem:[%s13178_s8 + $0x8] sm:$0xff]  ;;  %v12826_v53 = vld [vmem:[%s13178_s8 + $0x10] sm:$0xff] }
0x1a9c   :  { %7332 = vadd.xlane.f32.xlu1 %v7331_v58 }
0x1af1   :  { %v7036_v51 = vpop.xlane.xlu1 %7035 }
0x1af2   :  { %v7037_v36 = vmul.f32 0.0078125, %v7036_v51  ;;  %v7559_v51 = vrot.slane %v12816_v48, %v12340_v13 }
0x1af4   :  { %v7038_v59 = vadd.f32 1e-05, %v7037_v36 }
0x1af6   :  { %10118 = vrsqrt.f32 %v7038_v59  ;;  %v7401_v59 = vrot.slane %v12801_v18, %v12340_v13 }
0x1b03   :  { %v10119_v8 = vpop.eup %10118 }
0x1b04   :  { %v7040_v9 = vmul.f32 %v10119_v8, %v12578_v32 }
0x1b06   :  { %v7047_v49 = vmul.f32 %v8781_v60, %v7040_v9 }
0x1b08   :  { %v7054_v50 = vadd.f32 %v8782_v16, %v7047_v49 }
0x1b0a   :  { %v7056_v6 = vmul.f32 0.044715, %v7054_v50  ;;  %v7055_v14 = vmul.f32 0.5, %v7054_v50 }
0x1b0c   :  { %v7057_v17 = vmul.f32 %v7056_v6, %v7054_v50  ;;  %v7397_v6 = vrot.slane %v12801_v18, %v12334_v30 }
0x1b0e   :  { %v7058_v38 = vmul.f32 %v7057_v17, %v7054_v50 }
0x1b10   :  { %v7059_v29 = vadd.f32 %v7058_v38, %v7054_v50 }
0x1b12   :  { %v7060_v15 = vmul.f32 0.7978846, %v7059_v29  ;;  %v7465_v29 = vrot.slane %v12811_v57, %v12340_v13 }
0x1b14   :  { %10120 = vtanh.f32 %v7060_v15  ;;  %v7433_v15 = vrot.slane %v12806_v46, %v12340_v13 }
0x1b21   :  { %v10121_v55 = vpop.eup %10120 }
0x1b22   :  { %v7062_v2 = vadd.f32 1.0, %v10121_v55  ;;  %v7461_v55 = vrot.slane %v12811_v57, %v12334_v30 }
0x1b24   :  { %v7063_v44 = vmul.f32 %v7062_v2, %v7055_v14  ;;  %v10171_v2 = vmov 1983009808   ;;  %v7393_v14 = vrot.slane %v12801_v18, %v12311_v42 }
0x1b25   :  { %v7333_v7 = vpop.xlane.xlu1 %7332 }
0x1b26   :  { %v7064_v33 = vpack.c.bf16 %v7063_v44, %v7063_v44  ;;  %v7334_v32 = vmul.f32 0.00031887754, %v7333_v7  ;;  %v7706_v44 = vunpack.c.l.s4 %v10171_v2  ;;  %v7385_v2 = vrot.slane %v12801_v18, %v12308_v37 }
0x1b28   :  { %9355 = vmatmul.mubr.bf16.vlgmr.msra.gmra.mxu0 %v7064_v33  ;;  %v7335_v35 = vadd.f32 1e-05, %v7334_v32  ;;  %v7389_v33 = vrot.slane %v12801_v18, %v12305_v41  ;;  %v7707_v49 = vunpack.c.0.s8 %v7706_v44  ;;  %v7429_v32 = vrot.slane %v12806_v46, %v12334_v30 }
0x1b2a   :  { %10122 = vrsqrt.f32 %v7335_v35  ;;  %v7425_v35 = vrot.slane %v12806_v46, %v12311_v42  ;;  %v12925_v50 = vsub.s32 %v7707_v49, %v12244_v54 }
0x1b2c   :  { %13179 = vst [vmem:[#allocation8_spill] sm:$0xff] %v12925_v50 }
0x1b37   :  { %v10123_v16 = vpop.eup %10122 }
0x1b38   :  { %v7337_v7 = vmul.f32 %v10123_v16, %v12587_v19  ;;  %v7338_v8 = vmul.f32 %v10123_v16, %v12591_v22  ;;  %v7339_v38 = vmul.f32 %v10123_v16, %v12595_v23  ;;  %v7340_v9 = vmul.f32 %v10123_v16, %v12601_v3 }
0x1b39   :  { %v7341_v58 = vmul.f32 %v10123_v16, %v12607_v26  ;;  %v7342_v17 = vmul.f32 %v10123_v16, %v12614_v4  ;;  %v7343_v44 = vmul.f32 %v10123_v16, %v12621_v10  ;;  %v7344_v60 = vmul.f32 %v10123_v16, %v12628_v5 }
0x1b3a   :  { %v7345_v36 = vmul.f32 %v10123_v16, %v12635_v0  ;;  %v7346_v54 = vmul.f32 %v10123_v16, %v12642_v47  ;;  %v7347_v19 = vmul.f32 %v10123_v16, %v12649_v45  ;;  %v7348_v22 = vmul.f32 %v10123_v16, %v12656_v62 }
0x1b3b   :  { %v7349_v23 = vmul.f32 %v10123_v16, %v12663_v11  ;;  %v7350_v3 = vmul.f32 %v10123_v16, %v12670_v39  ;;  %v7351_v26 = vmul.f32 %v10123_v16, %v12677_v12  ;;  %v7352_v4 = vmul.f32 %v10123_v16, %v12684_v40 }
0x1b3c   :  { %v7353_v10 = vmul.f32 %v10123_v16, %v12694_v28  ;;  %v7354_v5 = vmul.f32 %v10123_v16, %v12705_v43  ;;  %v7355_v0 = vmul.f32 %v10123_v16, %v12712_v20  ;;  %v7356_v47 = vmul.f32 %v10123_v16, %v12723_v52 }
0x1b3d   :  { %v7357_v45 = vmul.f32 %v10123_v16, %v12730_v24  ;;  %v7358_v62 = vmul.f32 %v10123_v16, %v12741_v25  ;;  %v7359_v11 = vmul.f32 %v10123_v16, %v12748_v31  ;;  %v7360_v39 = vmul.f32 %v10123_v16, %v12759_v34 }
0x1b3e   :  { %v7361_v12 = vmul.f32 %v10123_v16, %v12766_v21  ;;  %v7495_v40 = vmul.f32 %v7373_v27, %v7337_v7  ;;  %v13180_v28 = vrot.slane %v12801_v18, %v12265_v1  ;;  %v13181_v20 = vrot.slane %v12801_v18, %v12302_v63  ;;  %v8809_v18 = vld [vmem:[%s13135_s22 + $0x18] ss:$0 sm:$0xff] }
0x1b3f   :  { %v7498_v24 = vmul.f32 %v7385_v2, %v7340_v9  ;;  %v7499_v25 = vmul.f32 %v7389_v33, %v7341_v58  ;;  %v7500_v49 = vmul.f32 %v7393_v14, %v7342_v17  ;;  %v7501_v31 = vmul.f32 %v7397_v6, %v7343_v44 }
0x1b40   :  { %v7496_v43 = vmul.f32 %v13180_v28, %v7338_v8  ;;  %v7497_v52 = vmul.f32 %v13181_v20, %v7339_v38  ;;  %v7502_v50 = vmul.f32 %v7401_v59, %v7344_v60  ;;  %v13182_v34 = vrot.slane %v12806_v46, %v12257_v61 }
0x1b41   :  { %v13183_v27 = vrot.slane %v12806_v46, %v12265_v1  ;;  %v13184_v8 = vrot.slane %v12806_v46, %v12302_v63  ;;  %v13185_v58 = vrot.slane %v12806_v46, %v12308_v37  ;;  %v13186_v60 = vrot.slane %v12806_v46, %v12305_v41 }
0x1b42   :  { %v7503_v21 = vmul.f32 %v13182_v34, %v7345_v36  ;;  %v7508_v9 = vmul.f32 %v7425_v35, %v7350_v3  ;;  %v7509_v6 = vmul.f32 %v7429_v32, %v7351_v26  ;;  %v7510_v17 = vmul.f32 %v7433_v15, %v7352_v4 }
0x1b43   :  { %v7504_v16 = vmul.f32 %v13183_v27, %v7346_v54  ;;  %v7505_v7 = vmul.f32 %v13184_v8, %v7347_v19  ;;  %v7506_v59 = vmul.f32 %v13185_v58, %v7348_v22  ;;  %v7507_v36 = vmul.f32 %v13186_v60, %v7349_v23 }
0x1b44   :  { %v13187_v38 = vrot.slane %v12811_v57, %v12257_v61  ;;  %v13188_v33 = vrot.slane %v12811_v57, %v12265_v1  ;;  %v13189_v44 = vrot.slane %v12811_v57, %v12302_v63  ;;  %v13190_v19 = vrot.slane %v12811_v57, %v12308_v37 }
0x1b45   :  { %v13191_v32 = vrot.slane %v12811_v57, %v12305_v41  ;;  %v13192_v35 = vrot.slane %v12811_v57, %v12311_v42  ;;  %v7517_v23 = vmul.f32 %v7461_v55, %v7359_v11  ;;  %v7518_v3 = vmul.f32 %v7465_v29, %v7360_v39 }
0x1b46   :  { %v7511_v14 = vmul.f32 %v13187_v38, %v7353_v10  ;;  %v7512_v2 = vmul.f32 %v13188_v33, %v7354_v5  ;;  %v7513_v54 = vmul.f32 %v13189_v44, %v7355_v0  ;;  %v7514_v46 = vmul.f32 %v13190_v19, %v7356_v47 }
0x1b47   :  { %v7515_v15 = vmul.f32 %v13191_v32, %v7357_v45  ;;  %v7516_v22 = vmul.f32 %v13192_v35, %v7358_v62  ;;  %v7519_v26 = vmul.f32 %v8809_v18, %v7361_v12  ;;  %v13193_v4 = vrot.slane %v12816_v48, %v12257_v61 }
0x1b48   :  { %v13194_v5 = vrot.slane %v12816_v48, %v12265_v1  ;;  %v13195_v47 = vrot.slane %v12816_v48, %v12302_v63  ;;  %v13196_v45 = vrot.slane %v12816_v48, %v12308_v37  ;;  %v13197_v29 = vrot.slane %v12816_v48, %v12305_v41 }
0x1b49   :  { %v7653_v10 = vadd.f32 %v13193_v4, %v7495_v40  ;;  %v13198_v62 = vrot.slane %v12816_v48, %v12311_v42  ;;  %v13199_v39 = vrot.slane %v12816_v48, %v12334_v30  ;;  %v7660_v40 = vadd.f32 %v7559_v51, %v7502_v50 }
0x1b4a   :  { %v7654_v0 = vadd.f32 %v13194_v5, %v7496_v43  ;;  %v7655_v28 = vadd.f32 %v13195_v47, %v7497_v52  ;;  %v7656_v57 = vadd.f32 %v13196_v45, %v7498_v24  ;;  %v7657_v55 = vadd.f32 %v13197_v29, %v7499_v25  ;;  %v8810_v25 = vld [vmem:[%s13178_s8 + $0x18] ss:$0 sm:$0xff] }
0x1b4b   :  { %v7658_v11 = vadd.f32 %v13198_v62, %v7500_v49  ;;  %v7659_v12 = vadd.f32 %v13199_v39, %v7501_v31  ;;  %v13200_v43 = vrot.slane %v12821_v56, %v12257_v61  ;;  %v13201_v52 = vrot.slane %v12821_v56, %v12265_v1 }
0x1b4c   :  { %v13202_v49 = vrot.slane %v12821_v56, %v12302_v63  ;;  %v13203_v48 = vrot.slane %v12821_v56, %v12308_v37  ;;  %v13204_v50 = vrot.slane %v12821_v56, %v12305_v41  ;;  %v13207_v18 = vrot.slane %v12821_v56, %v12340_v13 }
0x1b4d   :  { %v7661_v20 = vadd.f32 %v13200_v43, %v7503_v21  ;;  %v7662_v24 = vadd.f32 %v13201_v52, %v7504_v16  ;;  %v13205_v21 = vrot.slane %v12821_v56, %v12311_v42  ;;  %v13206_v16 = vrot.slane %v12821_v56, %v12334_v30 }
0x1b4e   :  { %v7663_v34 = vadd.f32 %v13202_v49, %v7505_v7  ;;  %v7664_v51 = vadd.f32 %v13203_v48, %v7506_v59  ;;  %v7665_v31 = vadd.f32 %v13204_v50, %v7507_v36  ;;  %v7668_v7 = vadd.f32 %v13207_v18, %v7510_v17 }
0x1b4f   :  { %v7666_v27 = vadd.f32 %v13205_v21, %v7508_v9  ;;  %v7667_v8 = vadd.f32 %v13206_v16, %v7509_v6  ;;  %v13208_v58 = vrot.slane %v12826_v53, %v12257_v61  ;;  %v13209_v60 = vrot.slane %v12826_v53, %v12265_v1 }
0x1b50   :  { %v13210_v38 = vrot.slane %v12826_v53, %v12302_v63  ;;  %v13211_v33 = vrot.slane %v12826_v53, %v12308_v37  ;;  %v13212_v56 = vrot.slane %v12826_v53, %v12305_v41  ;;  %v13213_v61 = vrot.slane %v12826_v53, %v12311_v42  ;;  %v13216_v41 = vld [vmem:[#allocation8_spill] sm:$0xff] }
0x1b51   :  { %v7669_v59 = vadd.f32 %v13208_v58, %v7511_v14  ;;  %v7670_v36 = vadd.f32 %v13209_v60, %v7512_v2  ;;  %v13214_v1 = vrot.slane %v12826_v53, %v12334_v30  ;;  %v13215_v63 = vrot.slane %v12826_v53, %v12340_v13 }
0x1b52   :  { %v7671_v9 = vadd.f32 %v13210_v38, %v7513_v54  ;;  %v7672_v6 = vadd.f32 %v13211_v33, %v7514_v46  ;;  %v7673_v17 = vadd.f32 %v13212_v56, %v7515_v15  ;;  %v7674_v14 = vadd.f32 %v13213_v61, %v7516_v22 }
0x1b53   :  { %v7675_v2 = vadd.f32 %v13214_v1, %v7517_v23  ;;  %v7676_v44 = vadd.f32 %v13215_v63, %v7518_v3  ;;  %v7677_v54 = vadd.f32 %v8810_v25, %v7519_v26  ;;  %v7703_v19 = vcombine.low %v7653_v10, %v7654_v0 }
0x1b54   :  { %v7704_v37 = vcombine.low %v7655_v28, %v7656_v57  ;;  %v7720_v46 = vcombine.low %v7657_v55, %v7658_v11  ;;  %v7721_v32 = vcombine.low %v7659_v12, %v7660_v40  ;;  %v7737_v35 = vcombine.low %v7661_v20, %v7662_v24 }
0x1b55   :  { %v7711_v15 = vrot.slane %v7703_v19, %v13216_v41  ;;  %v7738_v4 = vcombine.low %v7663_v34, %v7664_v51  ;;  %v7754_v5 = vcombine.low %v7665_v31, %v7666_v27  ;;  %v7755_v42 = vcombine.low %v7667_v8, %v7668_v7 }
0x1b56   :  { %v7718_v22 = vrot.slane %v7704_v37, %v13216_v41  ;;  %v7728_v30 = vrot.slane %v7720_v46, %v13216_v41  ;;  %v7735_v23 = vrot.slane %v7721_v32, %v13216_v41  ;;  %v7745_v13 = vrot.slane %v7737_v35, %v13216_v41 }
0x1b57   :  { %v7752_v53 = vrot.slane %v7738_v4, %v13216_v41  ;;  %v7762_v3 = vrot.slane %v7754_v5, %v13216_v41  ;;  %v7769_v26 = vrot.slane %v7755_v42, %v13216_v41  ;;  %v7771_v10 = vcombine.low %v7669_v59, %v7670_v36 }
0x1b58   :  { %v7719_v0 = vcombine.low %v7711_v15, %v7718_v22  ;;  %v7736_v47 = vcombine.low %v7728_v30, %v7735_v23  ;;  %v7772_v28 = vcombine.low %v7671_v9, %v7672_v6  ;;  %v7788_v45 = vcombine.low %v7673_v17, %v7674_v14 }
0x1b59   :  { %v7753_v57 = vcombine.low %v7745_v13, %v7752_v53  ;;  %v7770_v29 = vcombine.low %v7762_v3, %v7769_v26  ;;  %v7779_v55 = vrot.slane %v7771_v10, %v13216_v41  ;;  %v7789_v62 = vcombine.low %v7675_v2, %v7676_v44 }
0x1b5a   :  { %v7786_v11 = vrot.slane %v7772_v28, %v13216_v41  ;;  %v7796_v39 = vrot.slane %v7788_v45, %v13216_v41  ;;  %v7811_v12 = vrot.slane %v7677_v54, %v13216_v41  ;;  %7819 = vst [vmem:[%s13217_s13] sm:$0xff] %v7719_v0  ;;  %7820 = vst [vmem:[%s13217_s13 + $0x8] sm:$0xff] %v7736_v47 }
0x1b5b   :  { %v7803_v40 = vrot.slane %v7789_v62, %v13216_v41  ;;  %7821 = vst [vmem:[%s13217_s13 + $0x10] sm:$0xff] %v7753_v57  ;;  %7822 = vst [vmem:[%s13217_s13 + $0x18] sm:$0xff] %v7770_v29 }
0x1b5c   :  { %v7787_v43 = vcombine.low %v7779_v55, %v7786_v11  ;;  %7825 = vst.msk [vmem:[%s13217_s13 + $0x30] sm:$0x3] %vm7226_vm5, %v7811_v12 }
0x1b5d   :  { %v7804_v20 = vcombine.low %v7796_v39, %v7803_v40 }
0x1b5e   :  { %7823 = vst [vmem:[%s13217_s13 + $0x20] sm:$0xff] %v7787_v43 }
0x1b5f   :  { %7824 = vst [vmem:[%s13217_s13 + $0x28] sm:$0xff] %v7804_v20 }
0x1b60   :  { %10135 = shalt.err (!%p10132_p4)
}
0x1b61   :  { %s13218_s28 = sld [smem:[#allocation21_spill]]  ;;  %v8800_v52 = vld [vmem:[%s13132_s19 + $0x2] ss:$0 sm:$0xff]  ;;  %s10173_s25 = smov [#allocation4]  }
0x1b62   :  { %s7842_s15 = sshll.u32 %s10173_s25, 4  ;;  %s7843_s15 = int_to_ptr.vmem [resolvable:$true] %s7842_s15 }
0x1b63   :  { %s10144_s20 = scalar_lea.vmem %s7843_s15, 32  ;;  %p10149_p6 = scmp.lt.s32.totalorder %s7843_s15, %s7843_s15 }
0x1b64   :  { %p10145_p5 = scmp.ne.s32.totalorder %s7843_s15, %s10144_s20  ;;  %p10150_p7 = scmp.lt.s32.totalorder %s10144_s20, %s10144_s20 }
0x1b66   :  { %p10151_p8 = por %p10150_p7, %p10149_p6 }
0x1b67   :  { %7835 = dma.vmem_to_hbm [thread:$0]  %s7833_s0, 32, %s13218_s28, [#allocation3]  }
0x1b68   :  { %p10152_p9 = pnand %p10151_p8, %p10145_p5 }
0x1be8   :  { %v7172_v24 = vpop.f32.mrf.mxu0 }
0x1be9   :  { %v7173_v25 = vadd.f32 %v8800_v52, %v7172_v24 }
0x1bea   :  { %v9356_v49 = vpop.f32.mrf.mxu0 }
0x1beb   :  { %7178 = vst [vmem:[#allocation4] sm:$0x3] %v7173_v25 }
0x1bec   :  { %v7175_v34 = vpop.f32.mrf.mxu0 }
0x1bed   :  { %10155 = shalt.err (!%p10152_p9)
}
0x1bee   :  { %s13219_s22 = sld [smem:[#allocation22_spill]]  ;;  %v9357_v48 = vpop.f32.mrf.mxu0 }
0x1bf4   :  { %7845 = dma.vmem_to_hbm [thread:$0]  %s7843_s15, 32, %s13219_s22, [#allocation5]  }
0x1bf5   :  { %10164 = dma.done.wait [#allocation3], 32  }
0x1bf6   :  { %10165 = vsyncadd [#allocation3], 4294967264 }
0x1bf7   :  { %10166 = dma.done.wait [#allocation5], 32  }
0x1bf8   :  { %10167 = vsyncadd [#allocation5], 4294967264 }
0x1bf9   :  { %7856 = vsyncpa [#allocation3], 1 }
0x1bfa   :  { %7857 = vsyncpa [#allocation5], 1 }

</bundles_post_ra>
